<compile_context>
chip_gen: v5e
topology: v5e:2x2
jax: 0.10.0
libtpu: 0.0.40
codegen_flags: <defaults>
</compile_context>

<pallas_src>
import functools

import jax
import jax.numpy as jnp
from jax.experimental import pallas as pl
from jax.experimental.pallas import tpu as pltpu

EPS = 1e-5
_VMEM = pl.BlockSpec(memory_space=pltpu.MemorySpace.VMEM)
_CPARAMS = pltpu.CompilerParams(vmem_limit_bytes=32 * 1024 * 1024)


# --------------------------------------------------------------------------
# In-kernel helpers
# --------------------------------------------------------------------------
def _bn_rows(y, gamma, beta, m):
    """Training-mode BatchNorm over the M rows of y (per-channel batch stats).

    One-pass sum / sum-of-squares in f32, biased variance (PyTorch's
    normalization), lax.rsqrt.
    TODO(synk): switch to shifted two-pass / partial-sum accumulation when M
    grows beyond toy sizes (precision + tiling).
    """
    inv_m = 1.0 / float(m)
    s1 = jnp.sum(y, axis=0, keepdims=True)
    s2 = jnp.sum(y * y, axis=0, keepdims=True)
    mean = s1 * inv_m
    var = jnp.maximum(s2 * inv_m - mean * mean, 0.0)
    return (y - mean) * jax.lax.rsqrt(var + EPS) * gamma + beta


def _fill_pad(pad_ref, x, n, h, w, c):
    """Write x into the interior of the (n, h+2, w+2, c) scratch and zero ONLY
    the 1-pixel border (not the whole scratch)."""
    zr = jnp.zeros((n, 1, w + 2, c), pad_ref.dtype)
    pad_ref[:, 0:1, :, :] = zr                       # top padding row
    pad_ref[:, h + 1:h + 2, :, :] = zr               # bottom padding row
    zc = jnp.zeros((n, h, 1, c), pad_ref.dtype)
    pad_ref[:, 1:h + 1, 0:1, :] = zc                 # left padding col
    pad_ref[:, 1:h + 1, w + 1:w + 2, :] = zc         # right padding col
    pad_ref[:, 1:h + 1, 1:w + 1, :] = x.astype(pad_ref.dtype)


def _deinterleave_cols(cpad_ref, xpad_ref, wo):
    """One-time even/odd column reorg of the padded input for stride-2 convs.

    cpad[:, :, 0:wo+1, :]          = even padded columns (0, 2, ...)
    cpad[:, :, wo+1:2*(wo+1), :]   = odd  padded columns (1, 3, ...)
    Only these 2 reads are sublane-strided; every stride-2 tap / shortcut read
    afterwards is contiguous along the sublane (W) axis.
    """
    cpad_ref[:, :, 0:wo + 1, :] = (
        xpad_ref[:, :, pl.ds(0, wo + 1, 2), :].astype(cpad_ref.dtype))
    cpad_ref[:, :, wo + 1:2 * (wo + 1), :] = (
        xpad_ref[:, :, pl.ds(1, wo + 1, 2), :].astype(cpad_ref.dtype))


# --------------------------------------------------------------------------
# Kernels
# --------------------------------------------------------------------------
def _stem_kernel(x_ref, w_ref, g_ref, b_ref, o_ref, xpad_ref):
    """Fused stem: conv1 (3x3, 1->64, s=1, p=1) + BN(batch stats) + ReLU.

    Cin == 1, so the 9 taps are VPU broadcast-FMAs (a K=9 MXU matmul would be
    degenerate); the im2col/matmul path is reserved for the real convs.
    conv1's bias is dropped: training-mode BN cancels any per-channel bias.
    """
    n, h, w, _ = x_ref.shape
    cout = w_ref.shape[1]
    m = n * h * w
    _fill_pad(xpad_ref, x_ref[...], n, h, w, 1)
    w_all = w_ref[...].astype(jnp.float32)           # (9, 64)
    acc = jnp.zeros((m, cout), jnp.float32)
    for i in range(3):                               # static 3x3 taps
        for j in range(3):
            t = i * 3 + j
            patch = xpad_ref[:, i:i + h, j:j + w, :].reshape(m, 1)
            acc = acc + patch * w_all[t:t + 1, :]
    y = jnp.maximum(_bn_rows(acc, g_ref[...], b_ref[...], m), 0.0)
    o_ref[...] = y.reshape(n, h, w, cout).astype(o_ref.dtype)


def _block_kernel(*refs, stride, has_sc):
    """One fused BasicBlock, all intermediates in VMEM:

        conv1(3x3, stride)+BN1+ReLU -> conv2(3x3, 1)+BN2
          -> [1x1 conv + BN shortcut] -> residual add -> ReLU

    Each 3x3 conv is an in-VMEM im2col: the 9 tap patches are stored into a
    (M, 9*Cin) bf16 slab scratch and a single MXU matmul against the
    (9*Cin, Cout) bf16 weight computes the whole conv with f32 accumulation.
    """
    n_in = 10 if has_sc else 7
    (x_ref, w1_ref, g1_ref, b1_ref, w2_ref, g2_ref, b2_ref) = refs[:7]
    if has_sc:
        wsc_ref, gsc_ref, bsc_ref = refs[7:10]
    o_ref = refs[n_in]
    if stride == 1:
        xpad_ref, ypad_ref, slab1_ref, slab2_ref = refs[n_in + 1:]
    else:
        xpad_ref, cpad_ref, ypad_ref, slab1_ref, slab2_ref = refs[n_in + 1:]

    n, hi, wi, cin = x_ref.shape
    cout = w1_ref.shape[1]
    ho, wo = hi // stride, wi // stride
    m = n * ho * wo

    # ---- conv1: border-only pad + im2col slab + one matmul + BN1 + ReLU ---
    _fill_pad(xpad_ref, x_ref[...], n, hi, wi, cin)
    if stride == 1:
        for i in range(3):
            for j in range(3):
                t = i * 3 + j
                patch = xpad_ref[:, i:i + ho, j:j + wo, :]
                slab1_ref[:, t * cin:(t + 1) * cin] = (
                    patch.reshape(m, cin).astype(jnp.bfloat16))
    else:
        _deinterleave_cols(cpad_ref, xpad_ref, wo)
        for i in range(3):
            for j in range(3):
                t = i * 3 + j
                c0 = (j % 2) * (wo + 1) + j // 2      # contiguous W slice start
                patch = cpad_ref[:, pl.ds(i, ho, 2), c0:c0 + wo, :]
                slab1_ref[:, t * cin:(t + 1) * cin] = (
                    patch.reshape(m, cin).astype(jnp.bfloat16))

    y = jnp.dot(slab1_ref[...], w1_ref[...], preferred_element_type=jnp.float32)
    y = jnp.maximum(_bn_rows(y, g1_ref[...], b1_ref[...], m), 0.0)

    # ---- conv2 (3x3, stride 1): pad + im2col slab + one matmul + BN2 ------
    _fill_pad(ypad_ref, y.reshape(n, ho, wo, cout), n, ho, wo, cout)
    for i in range(3):
        for j in range(3):
            t = i * 3 + j
            patch = ypad_ref[:, i:i + ho, j:j + wo, :]
            slab2_ref[:, t * cout:(t + 1) * cout] = (
                patch.reshape(m, cout).astype(jnp.bfloat16))
    y2 = jnp.dot(slab2_ref[...], w2_ref[...], preferred_element_type=jnp.float32)
    y2 = _bn_rows(y2, g2_ref[...], b2_ref[...], m)

    # ---- shortcut ----------------------------------------------------------
    if has_sc:
        if stride == 1:
            xs = xpad_ref[:, 1:hi + 1, 1:wi + 1, :]
        else:
            # x[::2, ::2] == padded[1::2, 1::2] -> odd-parity cols, rows 1::2.
            xs = cpad_ref[:, pl.ds(1, ho, 2), wo + 1:2 * wo + 1, :]
        xs = xs.reshape(m, cin).astype(jnp.bfloat16)
        sc = jnp.dot(xs, wsc_ref[...], preferred_element_type=jnp.float32)
        sc = _bn_rows(sc, gsc_ref[...], bsc_ref[...], m)
    else:
        # identity shortcut (cin == cout, stride == 1): reuse padded interior.
        sc = xpad_ref[:, 1:hi + 1, 1:wi + 1, :].reshape(m, cin)

    o_ref[...] = (jnp.maximum(y2 + sc, 0.0)
                  .reshape(n, ho, wo, cout).astype(o_ref.dtype))


def _linear_kernel(x_ref, w_ref, b_ref, o_ref):
    o_ref[...] = (jnp.dot(x_ref[...], w_ref[...],
                          preferred_element_type=jnp.float32) + b_ref[...])


# --------------------------------------------------------------------------
# Wrappers (pallas_call plumbing)
# --------------------------------------------------------------------------
def stem(x, p):
    n, h, w, _ = x.shape
    return pl.pallas_call(
        _stem_kernel,
        out_shape=jax.ShapeDtypeStruct((n, h, w, 64), jnp.bfloat16),
        in_specs=[_VMEM] * 4,
        out_specs=_VMEM,
        scratch_shapes=[pltpu.VMEM((n, h + 2, w + 2, 1), jnp.float32)],
        compiler_params=_CPARAMS,
    )(x, p["conv1_w"], p["bn1_g"], p["bn1_b"])


def basic_block(x, bp):
    n, hi, wi, cin = x.shape
    s = bp["stride"]
    cout = bp["bn1_g"].shape[1]
    ho, wo = hi // s, wi // s
    m = n * ho * wo
    has_sc = "sc_w" in bp

    args = [x, bp["conv1_w"], bp["bn1_g"], bp["bn1_b"],
            bp["conv2_w"], bp["bn2_g"], bp["bn2_b"]]
    if has_sc:
        args += [bp["sc_w"], bp["sc_g"], bp["sc_b"]]

    scratch = [pltpu.VMEM((n, hi + 2, wi + 2, cin), jnp.float32)]   # padded x
    if s != 1:
        # even/odd column de-interleaved padded input (stride-2 reorg)
        scratch.append(pltpu.VMEM((n, hi + 2, 2 * (wo + 1), cin), jnp.float32))
    scratch += [
        pltpu.VMEM((n, ho + 2, wo + 2, cout), jnp.float32),          # padded conv1 out
        pltpu.VMEM((m, 9 * cin), jnp.bfloat16),                      # im2col slab conv1
        pltpu.VMEM((m, 9 * cout), jnp.bfloat16),                     # im2col slab conv2
    ]

    return pl.pallas_call(
        functools.partial(_block_kernel, stride=s, has_sc=has_sc),
        out_shape=jax.ShapeDtypeStruct((n, ho, wo, cout), jnp.bfloat16),
        in_specs=[_VMEM] * len(args),
        out_specs=_VMEM,
        scratch_shapes=scratch,
        compiler_params=_CPARAMS,
    )(*args)


def linear(x, w, b):
    n = x.shape[0]
    c = w.shape[1]
    return pl.pallas_call(
        _linear_kernel,
        out_shape=jax.ShapeDtypeStruct((n, c), jnp.float32),
        in_specs=[_VMEM] * 3,
        out_specs=_VMEM,
        compiler_params=_CPARAMS,
    )(x, w, b)


# --------------------------------------------------------------------------
# Parameters + forward glue
# --------------------------------------------------------------------------
def _conv_w(key, kh, kw, cin, cout):
    """HWIO conv weight, pre-reshaped to the im2col layout (kh*kw*cin, cout)."""
    std = (2.0 / (kh * kw * cin)) ** 0.5
    w = std * jax.random.normal(key, (kh, kw, cin, cout), jnp.float32)
    return w.reshape(kh * kw * cin, cout).astype(jnp.bfloat16)


def init_params(key, num_blocks=(1, 1, 1, 1), num_classes=1, in_spatial=16):
    keys = iter(jax.random.split(key, 128))
    p = {
        # conv1 bias omitted: training-mode BN right after makes it a no-op.
        "conv1_w": _conv_w(next(keys), 3, 3, 1, 64),
        "bn1_g": jnp.ones((1, 64), jnp.float32),
        "bn1_b": jnp.zeros((1, 64), jnp.float32),
    }
    in_ch, spatial = 64, in_spatial
    layers = []
    for out_ch, nb, stride0 in zip((64, 128, 256, 512), num_blocks, (1, 2, 2, 2)):
        blocks = []
        for s in [stride0] + [1] * (nb - 1):
            bp = {
                "stride": s,
                "conv1_w": _conv_w(next(keys), 3, 3, in_ch, out_ch),
                "bn1_g": jnp.ones((1, out_ch), jnp.float32),
                "bn1_b": jnp.zeros((1, out_ch), jnp.float32),
                "conv2_w": _conv_w(next(keys), 3, 3, out_ch, out_ch),
                "bn2_g": jnp.ones((1, out_ch), jnp.float32),
                "bn2_b": jnp.zeros((1, out_ch), jnp.float32),
            }
            if s != 1 or in_ch != out_ch:
                std = (2.0 / in_ch) ** 0.5
                bp["sc_w"] = (std * jax.random.normal(
                    next(keys), (in_ch, out_ch), jnp.float32)).astype(jnp.bfloat16)
                bp["sc_g"] = jnp.ones((1, out_ch), jnp.float32)
                bp["sc_b"] = jnp.zeros((1, out_ch), jnp.float32)
            blocks.append(bp)
            in_ch = out_ch
            spatial //= s
        layers.append(blocks)
    p["layers"] = layers

    flat = 512 * spatial * spatial
    p["lin_w"] = ((1.0 / flat ** 0.5) * jax.random.normal(
        next(keys), (flat, num_classes), jnp.float32)).astype(jnp.bfloat16)
    p["lin_b"] = jnp.zeros((1, num_classes), jnp.float32)
    return p


def resnet_forward(params, x_nchw):
    # PyTorch NCHW -> NHWC for the kernels (channels on the lane dim).
    x = jnp.transpose(x_nchw, (0, 2, 3, 1)).astype(jnp.float32)

    out = stem(x, params)                 # bf16 activations between blocks
    for layer in params["layers"]:
        for bp in layer:
            out = basic_block(out, bp)

    n = out.shape[0]
    # match torch `out.view(N, -1)` on NCHW: flatten in (C, H, W) order.
    flat = jnp.transpose(out, (0, 3, 1, 2)).reshape(n, -1)
    return linear(flat, params["lin_w"], params["lin_b"])


# --------------------------------------------------------------------------
if __name__ == "__main__":
    key = jax.random.PRNGKey(0)
    kx, kp = jax.random.split(key)

    # deterministic small input: (N=2, C=1, H=16, W=16), NCHW as in PyTorch.
    x = jax.random.normal(kx, (2, 1, 16, 16), jnp.float32)
    params = init_params(kp, num_blocks=(1, 1, 1, 1), num_classes=1, in_spatial=16)

    y = jax.block_until_ready(resnet_forward(params, x))
    assert y.shape == (2, 1) and y.dtype == jnp.float32
    assert bool(jnp.all(jnp.isfinite(y)))
    print("KERNEL_OK")
</pallas_src>

<mosaic_0001>
module attributes {stable_mosaic.version = 11 : i64} {
  func.func @_stem_kernel(%arg0: memref<2x16x16x1xf32, #tpu.memory_space<vmem>>, %arg1: memref<9x64xbf16, #tpu.memory_space<vmem>>, %arg2: memref<1x64xf32, #tpu.memory_space<vmem>>, %arg3: memref<1x64xf32, #tpu.memory_space<vmem>>, %arg4: memref<2x16x16x64xbf16, #tpu.memory_space<vmem>>, %arg5: memref<2x18x18x1xf32, #tpu.memory_space<vmem>>) attributes {dimension_semantics = [], scalar_prefetch = 0 : i64, scratch_operands = 1 : i64, tpu.core_type = #tpu.core_type<tc>} {
    %c0 = arith.constant 0 : index
    %c0_0 = arith.constant 0 : index
    %c0_1 = arith.constant 0 : index
    %c0_2 = arith.constant 0 : index
    %0 = vector.load %arg0[%c0, %c0_0, %c0_1, %c0_2] : memref<2x16x16x1xf32, #tpu.memory_space<vmem>>, vector<2x16x16x1xf32>
    %cst = arith.constant 0.000000e+00 : f32
    %1 = vector.broadcast %cst : f32 to vector<2x1x18x1xf32>
    %c0_3 = arith.constant 0 : index
    %c0_4 = arith.constant 0 : index
    %c0_5 = arith.constant 0 : index
    %c0_6 = arith.constant 0 : index
    %2 = vector.load %arg5[%c0_3, %c0_4, %c0_5, %c0_6] : memref<2x18x18x1xf32, #tpu.memory_space<vmem>>, vector<2x1x18x1xf32>
    tpu.vector_store %arg5[%c0_3, %c0_4, %c0_5, %c0_6], %1 {strides = array<i32>} : memref<2x18x18x1xf32, #tpu.memory_space<vmem>>, vector<2x1x18x1xf32>,
    %c0_7 = arith.constant 0 : index
    %c17 = arith.constant 17 : index
    %c0_8 = arith.constant 0 : index
    %c0_9 = arith.constant 0 : index
    %3 = vector.load %arg5[%c0_7, %c17, %c0_8, %c0_9] : memref<2x18x18x1xf32, #tpu.memory_space<vmem>>, vector<2x1x18x1xf32>
    tpu.vector_store %arg5[%c0_7, %c17, %c0_8, %c0_9], %1 {strides = array<i32>} : memref<2x18x18x1xf32, #tpu.memory_space<vmem>>, vector<2x1x18x1xf32>,
    %cst_10 = arith.constant 0.000000e+00 : f32
    %4 = vector.broadcast %cst_10 : f32 to vector<2x16x1x1xf32>
    %c0_11 = arith.constant 0 : index
    %c1 = arith.constant 1 : index
    %c0_12 = arith.constant 0 : index
    %c0_13 = arith.constant 0 : index
    %5 = vector.load %arg5[%c0_11, %c1, %c0_12, %c0_13] : memref<2x18x18x1xf32, #tpu.memory_space<vmem>>, vector<2x16x1x1xf32>
    tpu.vector_store %arg5[%c0_11, %c1, %c0_12, %c0_13], %4 {strides = array<i32>} : memref<2x18x18x1xf32, #tpu.memory_space<vmem>>, vector<2x16x1x1xf32>,
    %c0_14 = arith.constant 0 : index
    %c1_15 = arith.constant 1 : index
    %c17_16 = arith.constant 17 : index
    %c0_17 = arith.constant 0 : index
    %6 = vector.load %arg5[%c0_14, %c1_15, %c17_16, %c0_17] : memref<2x18x18x1xf32, #tpu.memory_space<vmem>>, vector<2x16x1x1xf32>
    tpu.vector_store %arg5[%c0_14, %c1_15, %c17_16, %c0_17], %4 {strides = array<i32>} : memref<2x18x18x1xf32, #tpu.memory_space<vmem>>, vector<2x16x1x1xf32>,
    %c0_18 = arith.constant 0 : index
    %c1_19 = arith.constant 1 : index
    %c1_20 = arith.constant 1 : index
    %c0_21 = arith.constant 0 : index
    %7 = vector.load %arg5[%c0_18, %c1_19, %c1_20, %c0_21] : memref<2x18x18x1xf32, #tpu.memory_space<vmem>>, vector<2x16x16x1xf32>
    tpu.vector_store %arg5[%c0_18, %c1_19, %c1_20, %c0_21], %0 {strides = array<i32>} : memref<2x18x18x1xf32, #tpu.memory_space<vmem>>, vector<2x16x16x1xf32>,
    %c0_22 = arith.constant 0 : index
    %c0_23 = arith.constant 0 : index
    %8 = vector.load %arg1[%c0_22, %c0_23] : memref<9x64xbf16, #tpu.memory_space<vmem>>, vector<9x64xbf16>
    %9 = arith.extf %8 : vector<9x64xbf16> to vector<9x64xf32>
    %cst_24 = arith.constant 0.000000e+00 : f32
    %10 = vector.broadcast %cst_24 : f32 to vector<512x64xf32>
    %c0_25 = arith.constant 0 : index
    %c0_26 = arith.constant 0 : index
    %c0_27 = arith.constant 0 : index
    %c0_28 = arith.constant 0 : index
    %11 = vector.load %arg5[%c0_25, %c0_26, %c0_27, %c0_28] : memref<2x18x18x1xf32, #tpu.memory_space<vmem>>, vector<2x16x16x1xf32>
    %12 = vector.shape_cast %11 : vector<2x16x16x1xf32> to vector<512x1xf32>
    %13 = vector.extract_strided_slice %9 {offsets = [0, 0], sizes = [1, 64], strides = [1, 1]} : vector<9x64xf32> to vector<1x64xf32>
    %14 = vector.broadcast %12 : vector<512x1xf32> to vector<512x64xf32>
    %15 = vector.broadcast %13 : vector<1x64xf32> to vector<512x64xf32>
    %16 = arith.mulf %14, %15 : vector<512x64xf32>
    %17 = arith.addf %10, %16 : vector<512x64xf32>
    %c0_29 = arith.constant 0 : index
    %c0_30 = arith.constant 0 : index
    %c1_31 = arith.constant 1 : index
    %c0_32 = arith.constant 0 : index
    %18 = vector.load %arg5[%c0_29, %c0_30, %c1_31, %c0_32] : memref<2x18x18x1xf32, #tpu.memory_space<vmem>>, vector<2x16x16x1xf32>
    %19 = vector.shape_cast %18 : vector<2x16x16x1xf32> to vector<512x1xf32>
    %20 = vector.extract_strided_slice %9 {offsets = [1, 0], sizes = [1, 64], strides = [1, 1]} : vector<9x64xf32> to vector<1x64xf32>
    %21 = vector.broadcast %19 : vector<512x1xf32> to vector<512x64xf32>
    %22 = vector.broadcast %20 : vector<1x64xf32> to vector<512x64xf32>
    %23 = arith.mulf %21, %22 : vector<512x64xf32>
    %24 = arith.addf %17, %23 : vector<512x64xf32>
    %c0_33 = arith.constant 0 : index
    %c0_34 = arith.constant 0 : index
    %c2 = arith.constant 2 : index
    %c0_35 = arith.constant 0 : index
    %25 = vector.load %arg5[%c0_33, %c0_34, %c2, %c0_35] : memref<2x18x18x1xf32, #tpu.memory_space<vmem>>, vector<2x16x16x1xf32>
    %26 = vector.shape_cast %25 : vector<2x16x16x1xf32> to vector<512x1xf32>
    %27 = vector.extract_strided_slice %9 {offsets = [2, 0], sizes = [1, 64], strides = [1, 1]} : vector<9x64xf32> to vector<1x64xf32>
    %28 = vector.broadcast %26 : vector<512x1xf32> to vector<512x64xf32>
    %29 = vector.broadcast %27 : vector<1x64xf32> to vector<512x64xf32>
    %30 = arith.mulf %28, %29 : vector<512x64xf32>
    %31 = arith.addf %24, %30 : vector<512x64xf32>
    %c0_36 = arith.constant 0 : index
    %c1_37 = arith.constant 1 : index
    %c0_38 = arith.constant 0 : index
    %c0_39 = arith.constant 0 : index
    %32 = vector.load %arg5[%c0_36, %c1_37, %c0_38, %c0_39] : memref<2x18x18x1xf32, #tpu.memory_space<vmem>>, vector<2x16x16x1xf32>
    %33 = vector.shape_cast %32 : vector<2x16x16x1xf32> to vector<512x1xf32>
    %34 = vector.extract_strided_slice %9 {offsets = [3, 0], sizes = [1, 64], strides = [1, 1]} : vector<9x64xf32> to vector<1x64xf32>
    %35 = vector.broadcast %33 : vector<512x1xf32> to vector<512x64xf32>
    %36 = vector.broadcast %34 : vector<1x64xf32> to vector<512x64xf32>
    %37 = arith.mulf %35, %36 : vector<512x64xf32>
    %38 = arith.addf %31, %37 : vector<512x64xf32>
    %c0_40 = arith.constant 0 : index
    %c1_41 = arith.constant 1 : index
    %c1_42 = arith.constant 1 : index
    %c0_43 = arith.constant 0 : index
    %39 = vector.load %arg5[%c0_40, %c1_41, %c1_42, %c0_43] : memref<2x18x18x1xf32, #tpu.memory_space<vmem>>, vector<2x16x16x1xf32>
    %40 = vector.shape_cast %39 : vector<2x16x16x1xf32> to vector<512x1xf32>
    %41 = vector.extract_strided_slice %9 {offsets = [4, 0], sizes = [1, 64], strides = [1, 1]} : vector<9x64xf32> to vector<1x64xf32>
    %42 = vector.broadcast %40 : vector<512x1xf32> to vector<512x64xf32>
    %43 = vector.broadcast %41 : vector<1x64xf32> to vector<512x64xf32>
    %44 = arith.mulf %42, %43 : vector<512x64xf32>
    %45 = arith.addf %38, %44 : vector<512x64xf32>
    %c0_44 = arith.constant 0 : index
    %c1_45 = arith.constant 1 : index
    %c2_46 = arith.constant 2 : index
    %c0_47 = arith.constant 0 : index
    %46 = vector.load %arg5[%c0_44, %c1_45, %c2_46, %c0_47] : memref<2x18x18x1xf32, #tpu.memory_space<vmem>>, vector<2x16x16x1xf32>
    %47 = vector.shape_cast %46 : vector<2x16x16x1xf32> to vector<512x1xf32>
    %48 = vector.extract_strided_slice %9 {offsets = [5, 0], sizes = [1, 64], strides = [1, 1]} : vector<9x64xf32> to vector<1x64xf32>
    %49 = vector.broadcast %47 : vector<512x1xf32> to vector<512x64xf32>
    %50 = vector.broadcast %48 : vector<1x64xf32> to vector<512x64xf32>
    %51 = arith.mulf %49, %50 : vector<512x64xf32>
    %52 = arith.addf %45, %51 : vector<512x64xf32>
    %c0_48 = arith.constant 0 : index
    %c2_49 = arith.constant 2 : index
    %c0_50 = arith.constant 0 : index
    %c0_51 = arith.constant 0 : index
    %53 = vector.load %arg5[%c0_48, %c2_49, %c0_50, %c0_51] : memref<2x18x18x1xf32, #tpu.memory_space<vmem>>, vector<2x16x16x1xf32>
    %54 = vector.shape_cast %53 : vector<2x16x16x1xf32> to vector<512x1xf32>
    %55 = vector.extract_strided_slice %9 {offsets = [6, 0], sizes = [1, 64], strides = [1, 1]} : vector<9x64xf32> to vector<1x64xf32>
    %56 = vector.broadcast %54 : vector<512x1xf32> to vector<512x64xf32>
    %57 = vector.broadcast %55 : vector<1x64xf32> to vector<512x64xf32>
    %58 = arith.mulf %56, %57 : vector<512x64xf32>
    %59 = arith.addf %52, %58 : vector<512x64xf32>
    %c0_52 = arith.constant 0 : index
    %c2_53 = arith.constant 2 : index
    %c1_54 = arith.constant 1 : index
    %c0_55 = arith.constant 0 : index
    %60 = vector.load %arg5[%c0_52, %c2_53, %c1_54, %c0_55] : memref<2x18x18x1xf32, #tpu.memory_space<vmem>>, vector<2x16x16x1xf32>
    %61 = vector.shape_cast %60 : vector<2x16x16x1xf32> to vector<512x1xf32>
    %62 = vector.extract_strided_slice %9 {offsets = [7, 0], sizes = [1, 64], strides = [1, 1]} : vector<9x64xf32> to vector<1x64xf32>
    %63 = vector.broadcast %61 : vector<512x1xf32> to vector<512x64xf32>
    %64 = vector.broadcast %62 : vector<1x64xf32> to vector<512x64xf32>
    %65 = arith.mulf %63, %64 : vector<512x64xf32>
    %66 = arith.addf %59, %65 : vector<512x64xf32>
    %c0_56 = arith.constant 0 : index
    %c2_57 = arith.constant 2 : index
    %c2_58 = arith.constant 2 : index
    %c0_59 = arith.constant 0 : index
    %67 = vector.load %arg5[%c0_56, %c2_57, %c2_58, %c0_59] : memref<2x18x18x1xf32, #tpu.memory_space<vmem>>, vector<2x16x16x1xf32>
    %68 = vector.shape_cast %67 : vector<2x16x16x1xf32> to vector<512x1xf32>
    %69 = vector.extract_strided_slice %9 {offsets = [8, 0], sizes = [1, 64], strides = [1, 1]} : vector<9x64xf32> to vector<1x64xf32>
    %70 = vector.broadcast %68 : vector<512x1xf32> to vector<512x64xf32>
    %71 = vector.broadcast %69 : vector<1x64xf32> to vector<512x64xf32>
    %72 = arith.mulf %70, %71 : vector<512x64xf32>
    %73 = arith.addf %66, %72 : vector<512x64xf32>
    %c0_60 = arith.constant 0 : index
    %c0_61 = arith.constant 0 : index
    %74 = vector.load %arg2[%c0_60, %c0_61] : memref<1x64xf32, #tpu.memory_space<vmem>>, vector<1x64xf32>
    %c0_62 = arith.constant 0 : index
    %c0_63 = arith.constant 0 : index
    %75 = vector.load %arg3[%c0_62, %c0_63] : memref<1x64xf32, #tpu.memory_space<vmem>>, vector<1x64xf32>
    %cst_64 = arith.constant dense<0.000000e+00> : vector<64xf32>
    %76 = vector.multi_reduction <add>, %73, %cst_64 [0] : vector<512x64xf32> to vector<64xf32>
    %77 = vector.shape_cast %76 : vector<64xf32> to vector<1x64xf32>
    %78 = arith.mulf %73, %73 : vector<512x64xf32>
    %cst_65 = arith.constant dense<0.000000e+00> : vector<64xf32>
    %79 = vector.multi_reduction <add>, %78, %cst_65 [0] : vector<512x64xf32> to vector<64xf32>
    %80 = vector.shape_cast %79 : vector<64xf32> to vector<1x64xf32>
    %cst_66 = arith.constant 0.001953125 : f32
    %81 = vector.broadcast %cst_66 : f32 to vector<1x64xf32>
    %82 = arith.mulf %77, %81 : vector<1x64xf32>
    %cst_67 = arith.constant 0.001953125 : f32
    %83 = vector.broadcast %cst_67 : f32 to vector<1x64xf32>
    %84 = arith.mulf %80, %83 : vector<1x64xf32>
    %85 = arith.mulf %82, %82 : vector<1x64xf32>
    %86 = arith.subf %84, %85 : vector<1x64xf32>
    %cst_68 = arith.constant 0.000000e+00 : f32
    %87 = vector.broadcast %cst_68 : f32 to vector<1x64xf32>
    %88 = arith.maximumf %86, %87 : vector<1x64xf32>
    %89 = vector.broadcast %82 : vector<1x64xf32> to vector<512x64xf32>
    %90 = arith.subf %73, %89 : vector<512x64xf32>
    %cst_69 = arith.constant 9.99999974E-6 : f32
    %91 = vector.broadcast %cst_69 : f32 to vector<1x64xf32>
    %92 = arith.addf %88, %91 : vector<1x64xf32>
    %93 = math.rsqrt %92 : vector<1x64xf32>
    %94 = vector.broadcast %93 : vector<1x64xf32> to vector<512x64xf32>
    %95 = arith.mulf %90, %94 : vector<512x64xf32>
    %96 = vector.broadcast %74 : vector<1x64xf32> to vector<512x64xf32>
    %97 = arith.mulf %95, %96 : vector<512x64xf32>
    %98 = vector.broadcast %75 : vector<1x64xf32> to vector<512x64xf32>
    %99 = arith.addf %97, %98 : vector<512x64xf32>
    %cst_70 = arith.constant 0.000000e+00 : f32
    %100 = vector.broadcast %cst_70 : f32 to vector<512x64xf32>
    %101 = arith.maximumf %99, %100 : vector<512x64xf32>
    %102 = vector.shape_cast %101 : vector<512x64xf32> to vector<2x16x16x64xf32>
    %103 = arith.truncf %102 : vector<2x16x16x64xf32> to vector<2x16x16x64xbf16>
    %c0_71 = arith.constant 0 : index
    %c0_72 = arith.constant 0 : index
    %c0_73 = arith.constant 0 : index
    %c0_74 = arith.constant 0 : index
    %104 = vector.load %arg4[%c0_71, %c0_72, %c0_73, %c0_74] : memref<2x16x16x64xbf16, #tpu.memory_space<vmem>>, vector<2x16x16x64xbf16>
    tpu.vector_store %arg4[%c0_71, %c0_72, %c0_73, %c0_74], %103 {strides = array<i32>} : memref<2x16x16x64xbf16, #tpu.memory_space<vmem>>, vector<2x16x16x64xbf16>,
    return
  }
}

</mosaic_0001>

<bundles_post_ra>
// kernel: tpu_custom_call.1
= control target key start
LH: loop header
LB: loop body
LE: loop exit
PB: predicated region body
PF: predicated region fallthrough
CT: control target
= control target key end

     0   :  { %vm82_vm0 = vcmask 7168   ;;  %v5709_v0 = vmov 0   ;;  %v5710_v1 = vmov 0.0   ;;  %s10659_s0 = inlined_call_operand.vmem [shape: f32[2,16,16,1], index: 0, kind: input, shape index: {}]   ;;  %s10660_s1 = inlined_call_operand.vmem [shape: bf16[9,64], index: 1, kind: input, shape index: {}]   ;;  %s10661_s2 = inlined_call_operand.vmem [shape: f32[1,64], index: 2, kind: input, shape index: {}]   ;;  %s10662_s3 = inlined_call_operand.vmem [shape: f32[1,64], index: 3, kind: input, shape index: {}]   ;;  %s10663_s4 = inlined_call_operand.hbm [shape: bf16[2,16,16,64], index: 4, kind: output, shape index: {}]  }
   0x1   :  { %5678 = vset.pattern.permute.xlu2 %v5709_v0  ;;  %5677 = vset.pattern.permute.xlu1 %v5709_v0  ;;  %83 = vst.msk [vmem:[#allocation2] sm:$0xff] %vm82_vm0, %v5710_v1 }
   0x2   :  { %5676 = vset.pattern.permute.xlu0 %v5709_v0  ;;  %84 = vst.msk [vmem:[#allocation2 + $0x8] sm:$0xff] %vm82_vm0, %v5710_v1 }
   0x3   :  { %9 = vsyncpa [#allocation4], 0  ;;  %87 = vst.msk [vmem:[#allocation2 + $0x1b0] sm:$0xff] %vm82_vm0, %v5710_v1  ;;  %vm98_vm1 = vcmask 0   ;;  %v20_v2 = vld [vmem:[%s10659_s0 + $0x10] sm:$0xff]  ;;  %v18_v6 = vld [vmem:[%s10659_s0] sm:$0xff] }
   0x4   :  { %88 = vst.msk [vmem:[#allocation2 + $0x1b8] sm:$0xff] %vm82_vm0, %v5710_v1  ;;  %v21_v7 = vld [vmem:[%s10659_s0 + $0x18] sm:$0xff]  ;;  %v19_v8 = vld [vmem:[%s10659_s0 + $0x8] sm:$0xff]  ;;  %v22_v9 = vld [vmem:[%s10659_s0 + $0x20] sm:$0xff]  ;;  %vm85_vm2 = vcmask 1024   ;;  %vm4851_vm3 = vcmask 523264  }
   0x5   :  { %91 = vst.msk [vmem:[#allocation2 + $0x198] sm:$0xff] %vm82_vm0, %v5710_v1  ;;  %v24_v10 = vld [vmem:[%s10659_s0 + $0x30] sm:$0xff]  ;;  %v23_v11 = vld [vmem:[%s10659_s0 + $0x28] sm:$0xff]  ;;  %v25_v12 = vld [vmem:[%s10659_s0 + $0x38] sm:$0xff]  ;;  %vm5588_vm7 = vcmask 519168   ;;  %s5659_s21 = sshll.u32 %s10663_s4, 4  ;;  %s5660_s21 = int_to_ptr.hbm [resolvable:$true] %s5659_s21 }
   0x6   :  { %92 = vst.msk [vmem:[#allocation2 + $0x1a0] sm:$0xff] %vm82_vm0, %v5710_v1  ;;  %v26_v13 = vld [vmem:[%s10659_s0 + $0x40] sm:$0xff]  ;;  %v27_v14 = vld [vmem:[%s10659_s0 + $0x48] sm:$0xff]  ;;  %v28_v15 = vld [vmem:[%s10659_s0 + $0x50] sm:$0xff]  ;;  %s5712_s22 = smov 64   ;;  %s5713_s23 = smov 4  }
   0x7   :  { %94 = vst.msk [vmem:[#allocation2 + $0x348] sm:$0xff] %vm82_vm0, %v5710_v1  ;;  %v30_v17 = vld [vmem:[%s10659_s0 + $0x60] sm:$0xff]  ;;  %v29_v19 = vld [vmem:[%s10659_s0 + $0x58] sm:$0xff]  ;;  %v31_v20 = vld [vmem:[%s10659_s0 + $0x68] sm:$0xff] }
   0x8   :  { %v231_v3 = vld [vmem:[#allocation2] sm:$0xff]  ;;  %95 = vst.msk [vmem:[#allocation2 + $0x350] sm:$0xff] %vm82_vm0, %v5710_v1  ;;  %v32_v22 = vld [vmem:[%s10659_s0 + $0x70] sm:$0xff]  ;;  %v33_v23 = vld [vmem:[%s10659_s0 + $0x78] sm:$0xff] }
   0x9   :  { %297 = vperm.xlu0 %5676, %v231_v3   ;;  %100 = vst.msk [vmem:[#allocation2 + $0x30] sm:$0x1] %vm98_vm1, %v5710_v1  ;;  %v232_v5 = vld [vmem:[#allocation2 + $0x8] sm:$0xff]  ;;  %v34_v26 = vld [vmem:[%s10659_s0 + $0x80] sm:$0xff]  ;;  %v36_v27 = vld [vmem:[%s10659_s0 + $0x90] sm:$0xff] }
   0xa   :  { %165 = vst.msk [vmem:[#allocation2 + $0x31] sm:$0xff] %vm82_vm0, %v20_v2  ;;  %v35_v29 = vld [vmem:[%s10659_s0 + $0x88] sm:$0xff]  ;;  %v37_v32 = vld [vmem:[%s10659_s0 + $0x98] sm:$0xff]  ;;  %v38_v33 = vld [vmem:[%s10659_s0 + $0xa0] sm:$0xff] }
   0xb   :  { %99 = vst.msk [vmem:[#allocation2 + $0x18] sm:$0x1] %vm98_vm1, %v5710_v1  ;;  %v39_v35 = vld [vmem:[%s10659_s0 + $0xa8] sm:$0xff]  ;;  %v40_v38 = vld [vmem:[%s10659_s0 + $0xb0] sm:$0xff]  ;;  %v42_v39 = vld [vmem:[%s10659_s0 + $0xc0] sm:$0xff] }
   0xc   :  { %101 = vst.msk [vmem:[#allocation2 + $0x48] sm:$0x1] %vm98_vm1, %v5710_v1  ;;  %v41_v41 = vld [vmem:[%s10659_s0 + $0xb8] sm:$0xff]  ;;  %v43_v44 = vld [vmem:[%s10659_s0 + $0xc8] sm:$0xff]  ;;  %v44_v45 = vld [vmem:[%s10659_s0 + $0xd0] sm:$0xff] }
   0xd   :  { %102 = vst.msk [vmem:[#allocation2 + $0x60] sm:$0x1] %vm98_vm1, %v5710_v1  ;;  %v45_v47 = vld [vmem:[%s10659_s0 + $0xd8] sm:$0xff]  ;;  %v46_v50 = vld [vmem:[%s10659_s0 + $0xe0] sm:$0xff]  ;;  %v47_v51 = vld [vmem:[%s10659_s0 + $0xe8] sm:$0xff] }
   0xe   :  { %103 = vst.msk [vmem:[#allocation2 + $0x78] sm:$0x1] %vm98_vm1, %v5710_v1  ;;  %v50_v55 = vld [vmem:[%s10659_s0 + $0x100] sm:$0xff]  ;;  %v51_v56 = vld [vmem:[%s10659_s0 + $0x108] sm:$0xff]  ;;  %v52_v60 = vld [vmem:[%s10659_s0 + $0x110] sm:$0xff] }
   0xf   :  { %104 = vst.msk [vmem:[#allocation2 + $0x90] sm:$0x1] %vm98_vm1, %v5710_v1  ;;  %v54_v61 = vld [vmem:[%s10659_s0 + $0x120] sm:$0xff]  ;;  %v53_v63 = vld [vmem:[%s10659_s0 + $0x118] sm:$0xff]  ;;  %v55_v3 = vld [vmem:[%s10659_s0 + $0x128] sm:$0xff] }
  0x10   :  { %105 = vst.msk [vmem:[#allocation2 + $0xa8] sm:$0x1] %vm98_vm1, %v5710_v1 }
  0x11   :  { %v235_v4 = vld [vmem:[#allocation2 + $0x30] sm:$0xff]  ;;  %106 = vst.msk [vmem:[#allocation2 + $0xc0] sm:$0x1] %vm98_vm1, %v5710_v1  ;;  %302 = vperm.xlu0 %5676, %v232_v5  }
  0x12   :  { %317 = vperm.xlu2 %5678, %v235_v4   ;;  %107 = vst.msk [vmem:[#allocation2 + $0xd8] sm:$0x1] %vm98_vm1, %v5710_v1  ;;  %v56_v4 = vld [vmem:[%s10659_s0 + $0x130] sm:$0xff] }
  0x13   :  { %108 = vst.msk [vmem:[#allocation2 + $0xf0] sm:$0x1] %vm98_vm1, %v5710_v1 }
  0x14   :  { %109 = vst.msk [vmem:[#allocation2 + $0x108] sm:$0x1] %vm98_vm1, %v5710_v1 }
  0x15   :  { %110 = vst.msk [vmem:[#allocation2 + $0x120] sm:$0x1] %vm98_vm1, %v5710_v1 }
  0x16   :  { %111 = vst.msk [vmem:[#allocation2 + $0x138] sm:$0x1] %vm98_vm1, %v5710_v1 }
  0x17   :  { %112 = vst.msk [vmem:[#allocation2 + $0x150] sm:$0x1] %vm98_vm1, %v5710_v1 }
  0x18   :  { %113 = vst.msk [vmem:[#allocation2 + $0x168] sm:$0x1] %vm98_vm1, %v5710_v1 }
  0x19   :  { %114 = vst.msk [vmem:[#allocation2 + $0x180] sm:$0x1] %vm98_vm1, %v5710_v1 }
  0x1a   :  { %115 = vst.msk [vmem:[#allocation2 + $0x1c8] sm:$0x1] %vm98_vm1, %v5710_v1 }
  0x1b   :  { %116 = vst.msk [vmem:[#allocation2 + $0x1e0] sm:$0x1] %vm98_vm1, %v5710_v1 }
  0x1c   :  { %117 = vst.msk [vmem:[#allocation2 + $0x1f8] sm:$0x1] %vm98_vm1, %v5710_v1 }
  0x1d   :  { %118 = vst.msk [vmem:[#allocation2 + $0x210] sm:$0x1] %vm98_vm1, %v5710_v1 }
  0x1e   :  { %119 = vst.msk [vmem:[#allocation2 + $0x228] sm:$0x1] %vm98_vm1, %v5710_v1 }
  0x1f   :  { %120 = vst.msk [vmem:[#allocation2 + $0x240] sm:$0x1] %vm98_vm1, %v5710_v1 }
  0x20   :  { %121 = vst.msk [vmem:[#allocation2 + $0x258] sm:$0x1] %vm98_vm1, %v5710_v1 }
  0x21   :  { %122 = vst.msk [vmem:[#allocation2 + $0x270] sm:$0x1] %vm98_vm1, %v5710_v1 }
  0x22   :  { %123 = vst.msk [vmem:[#allocation2 + $0x288] sm:$0x1] %vm98_vm1, %v5710_v1 }
  0x23   :  { %124 = vst.msk [vmem:[#allocation2 + $0x2a0] sm:$0x1] %vm98_vm1, %v5710_v1 }
  0x24   :  { %125 = vst.msk [vmem:[#allocation2 + $0x2b8] sm:$0x1] %vm98_vm1, %v5710_v1 }
  0x25   :  { %126 = vst.msk [vmem:[#allocation2 + $0x2d0] sm:$0x1] %vm98_vm1, %v5710_v1 }
  0x26   :  { %127 = vst.msk [vmem:[#allocation2 + $0x2e8] sm:$0x1] %vm98_vm1, %v5710_v1 }
  0x27   :  { %128 = vst.msk [vmem:[#allocation2 + $0x300] sm:$0x1] %vm98_vm1, %v5710_v1 }
  0x28   :  { %129 = vst.msk [vmem:[#allocation2 + $0x318] sm:$0x1] %vm98_vm1, %v5710_v1 }
  0x29   :  { %130 = vst.msk [vmem:[#allocation2 + $0x330] sm:$0x1] %vm98_vm1, %v5710_v1 }
  0x2a   :  { %131 = vst.msk [vmem:[#allocation2 + $0x29] sm:$0x1] %vm98_vm1, %v5710_v1 }
  0x2b   :  { %132 = vst.msk [vmem:[#allocation2 + $0x41] sm:$0x1] %vm98_vm1, %v5710_v1 }
  0x2c   :  { %133 = vst.msk [vmem:[#allocation2 + $0x59] sm:$0x1] %vm98_vm1, %v5710_v1 }
  0x2d   :  { %134 = vst.msk [vmem:[#allocation2 + $0x71] sm:$0x1] %vm98_vm1, %v5710_v1 }
  0x2e   :  { %135 = vst.msk [vmem:[#allocation2 + $0x89] sm:$0x1] %vm98_vm1, %v5710_v1 }
  0x2f   :  { %136 = vst.msk [vmem:[#allocation2 + $0xa1] sm:$0x1] %vm98_vm1, %v5710_v1 }
  0x30   :  { %137 = vst.msk [vmem:[#allocation2 + $0xb9] sm:$0x1] %vm98_vm1, %v5710_v1 }
  0x31   :  { %138 = vst.msk [vmem:[#allocation2 + $0xd1] sm:$0x1] %vm98_vm1, %v5710_v1 }
  0x32   :  { %139 = vst.msk [vmem:[#allocation2 + $0xe9] sm:$0x1] %vm98_vm1, %v5710_v1 }
  0x33   :  { %140 = vst.msk [vmem:[#allocation2 + $0x101] sm:$0x1] %vm98_vm1, %v5710_v1 }
  0x34   :  { %141 = vst.msk [vmem:[#allocation2 + $0x119] sm:$0x1] %vm98_vm1, %v5710_v1 }
  0x35   :  { %142 = vst.msk [vmem:[#allocation2 + $0x131] sm:$0x1] %vm98_vm1, %v5710_v1 }
  0x36   :  { %143 = vst.msk [vmem:[#allocation2 + $0x149] sm:$0x1] %vm98_vm1, %v5710_v1 }
  0x37   :  { %144 = vst.msk [vmem:[#allocation2 + $0x161] sm:$0x1] %vm98_vm1, %v5710_v1 }
  0x38   :  { %145 = vst.msk [vmem:[#allocation2 + $0x179] sm:$0x1] %vm98_vm1, %v5710_v1 }
  0x39   :  { %146 = vst.msk [vmem:[#allocation2 + $0x191] sm:$0x1] %vm98_vm1, %v5710_v1 }
  0x3a   :  { %147 = vst.msk [vmem:[#allocation2 + $0x1d9] sm:$0x1] %vm98_vm1, %v5710_v1 }
  0x3b   :  { %148 = vst.msk [vmem:[#allocation2 + $0x1f1] sm:$0x1] %vm98_vm1, %v5710_v1 }
  0x3c   :  { %149 = vst.msk [vmem:[#allocation2 + $0x209] sm:$0x1] %vm98_vm1, %v5710_v1 }
  0x3d   :  { %150 = vst.msk [vmem:[#allocation2 + $0x221] sm:$0x1] %vm98_vm1, %v5710_v1 }
  0x3e   :  { %151 = vst.msk [vmem:[#allocation2 + $0x239] sm:$0x1] %vm98_vm1, %v5710_v1 }
  0x3f   :  { %152 = vst.msk [vmem:[#allocation2 + $0x251] sm:$0x1] %vm98_vm1, %v5710_v1 }
  0x40   :  { %153 = vst.msk [vmem:[#allocation2 + $0x269] sm:$0x1] %vm98_vm1, %v5710_v1 }
  0x41   :  { %154 = vst.msk [vmem:[#allocation2 + $0x281] sm:$0x1] %vm98_vm1, %v5710_v1 }
  0x42   :  { %155 = vst.msk [vmem:[#allocation2 + $0x299] sm:$0x1] %vm98_vm1, %v5710_v1 }
  0x43   :  { %156 = vst.msk [vmem:[#allocation2 + $0x2b1] sm:$0x1] %vm98_vm1, %v5710_v1 }
  0x44   :  { %157 = vst.msk [vmem:[#allocation2 + $0x2c9] sm:$0x1] %vm98_vm1, %v5710_v1 }
  0x45   :  { %158 = vst.msk [vmem:[#allocation2 + $0x2e1] sm:$0x1] %vm98_vm1, %v5710_v1 }
  0x46   :  { %159 = vst.msk [vmem:[#allocation2 + $0x2f9] sm:$0x1] %vm98_vm1, %v5710_v1 }
  0x47   :  { %160 = vst.msk [vmem:[#allocation2 + $0x311] sm:$0x1] %vm98_vm1, %v5710_v1 }
  0x48   :  { %161 = vst.msk [vmem:[#allocation2 + $0x329] sm:$0x1] %vm98_vm1, %v5710_v1 }
  0x49   :  { %162 = vst.msk [vmem:[#allocation2 + $0x341] sm:$0x1] %vm98_vm1, %v5710_v1 }
  0x4a   :  { %163 = vst.msk [vmem:[#allocation2 + $0x19] sm:$0xff] %vm82_vm0, %v18_v6  ;;  %v57_v6 = vld [vmem:[%s10659_s0 + $0x138] sm:$0xff] }
  0x4b   :  { %166 = vst.msk [vmem:[#allocation2 + $0x39] sm:$0xff] %vm82_vm0, %v21_v7 }
  0x4c   :  { %164 = vst.msk [vmem:[#allocation2 + $0x21] sm:$0xff] %vm82_vm0, %v19_v8  ;;  %v263_v8 = vld [vmem:[#allocation2 + $0x1b0] sm:$0xff] }
  0x4d   :  { %167 = vst.msk [vmem:[#allocation2 + $0x49] sm:$0xff] %vm82_vm0, %v22_v9  ;;  %v58_v9 = vld [vmem:[%s10659_s0 + $0x140] sm:$0xff] }
  0x4e   :  { %169 = vst.msk [vmem:[#allocation2 + $0x61] sm:$0xff] %vm82_vm0, %v24_v10  ;;  %v60_v10 = vld [vmem:[%s10659_s0 + $0x150] sm:$0xff] }
  0x4f   :  { %168 = vst.msk [vmem:[#allocation2 + $0x51] sm:$0xff] %vm82_vm0, %v23_v11  ;;  %v264_v11 = vld [vmem:[#allocation2 + $0x1b8] sm:$0xff] }
  0x50   :  { %170 = vst.msk [vmem:[#allocation2 + $0x69] sm:$0xff] %vm82_vm0, %v25_v12  ;;  %v59_v12 = vld [vmem:[%s10659_s0 + $0x148] sm:$0xff] }
  0x51   :  { %v233_v16 = vld [vmem:[#allocation2 + $0x18] sm:$0xff]  ;;  %171 = vst.msk [vmem:[#allocation2 + $0x79] sm:$0xff] %vm82_vm0, %v26_v13 }
  0x52   :  { %307 = vperm.xlu1 %5677, %v233_v16   ;;  %v236_v18 = vld [vmem:[#allocation2 + $0x38] sm:$0xff]  ;;  %172 = vst.msk [vmem:[#allocation2 + $0x81] sm:$0xff] %vm82_vm0, %v27_v14  ;;  %v62_v16 = vld [vmem:[%s10659_s0 + $0x160] sm:$0xff] }
  0x53   :  { %322 = vperm.xlu2 %5678, %v236_v18   ;;  %173 = vst.msk [vmem:[#allocation2 + $0x91] sm:$0xff] %vm82_vm0, %v28_v15  ;;  %v234_v24 = vld [vmem:[#allocation2 + $0x20] sm:$0xff]  ;;  %v61_v15 = vld [vmem:[%s10659_s0 + $0x158] sm:$0xff]  ;;  %v63_v18 = vld [vmem:[%s10659_s0 + $0x168] sm:$0xff] }
  0x54   :  { %v237_v21 = vld [vmem:[#allocation2 + $0x48] sm:$0xff]  ;;  %175 = vst.msk [vmem:[#allocation2 + $0xa9] sm:$0xff] %vm82_vm0, %v30_v17 }
  0x55   :  { %327 = vperm.xlu0 %5676, %v237_v21   ;;  %174 = vst.msk [vmem:[#allocation2 + $0x99] sm:$0xff] %vm82_vm0, %v29_v19  ;;  %v239_v25 = vld [vmem:[#allocation2 + $0x60] sm:$0xff] }
  0x56   :  { %176 = vst.msk [vmem:[#allocation2 + $0xb1] sm:$0xff] %vm82_vm0, %v31_v20  ;;  %v238_v30 = vld [vmem:[#allocation2 + $0x50] sm:$0xff] }
  0x57   :  { %177 = vst.msk [vmem:[#allocation2 + $0xc1] sm:$0xff] %vm82_vm0, %v32_v22  ;;  %v240_v28 = vld [vmem:[#allocation2 + $0x68] sm:$0xff]  ;;  %v64_v22 = vld [vmem:[%s10659_s0 + $0x170] sm:$0xff] }
  0x58   :  { %178 = vst.msk [vmem:[#allocation2 + $0xc9] sm:$0xff] %vm82_vm0, %v33_v23  ;;  %v241_v36 = vld [vmem:[#allocation2 + $0x78] sm:$0xff]  ;;  %v66_v23 = vld [vmem:[%s10659_s0 + $0x180] sm:$0xff] }
  0x59   :  { %179 = vst.msk [vmem:[#allocation2 + $0xd9] sm:$0xff] %vm82_vm0, %v34_v26  ;;  %v242_v31 = vld [vmem:[#allocation2 + $0x80] sm:$0xff] }
  0x5a   :  { %312 = vperm.xlu1 %5677, %v234_v24   ;;  %181 = vst.msk [vmem:[#allocation2 + $0xf1] sm:$0xff] %vm82_vm0, %v36_v27  ;;  %v243_v34 = vld [vmem:[#allocation2 + $0x90] sm:$0xff] }
  0x5b   :  { %337 = vperm.xlu2 %5678, %v239_v25   ;;  %180 = vst.msk [vmem:[#allocation2 + $0xe1] sm:$0xff] %vm82_vm0, %v35_v29  ;;  %v245_v37 = vld [vmem:[#allocation2 + $0xa8] sm:$0xff]  ;;  %v65_v25 = vld [vmem:[%s10659_s0 + $0x178] sm:$0xff] }
  0x5c   :  { %182 = vst.msk [vmem:[#allocation2 + $0xf9] sm:$0xff] %vm82_vm0, %v37_v32  ;;  %v244_v42 = vld [vmem:[#allocation2 + $0x98] sm:$0xff]  ;;  %v67_v29 = vld [vmem:[%s10659_s0 + $0x188] sm:$0xff] }
  0x5d   :  { %342 = vperm.xlu0 %5676, %v240_v28   ;;  %183 = vst.msk [vmem:[#allocation2 + $0x109] sm:$0xff] %vm82_vm0, %v38_v33  ;;  %v246_v40 = vld [vmem:[#allocation2 + $0xb0] sm:$0xff]  ;;  %v69_v32 = vld [vmem:[%s10659_s0 + $0x198] sm:$0xff] }
  0x5e   :  { %184 = vst.msk [vmem:[#allocation2 + $0x111] sm:$0xff] %vm82_vm0, %v39_v35  ;;  %v247_v48 = vld [vmem:[#allocation2 + $0xc0] sm:$0xff] }
  0x5f   :  { %185 = vst.msk [vmem:[#allocation2 + $0x121] sm:$0xff] %vm82_vm0, %v40_v38  ;;  %v248_v43 = vld [vmem:[#allocation2 + $0xc8] sm:$0xff]  ;;  %v72_v38 = vld [vmem:[%s10659_s0 + $0x1b0] sm:$0xff] }
  0x60   :  { %187 = vst.msk [vmem:[#allocation2 + $0x139] sm:$0xff] %vm82_vm0, %v42_v39  ;;  %v249_v46 = vld [vmem:[#allocation2 + $0xd8] sm:$0xff] }
  0x61   :  { %186 = vst.msk [vmem:[#allocation2 + $0x129] sm:$0xff] %vm82_vm0, %v41_v41  ;;  %v251_v49 = vld [vmem:[#allocation2 + $0xf0] sm:$0xff] }
  0x62   :  { %332 = vperm.xlu1 %5677, %v238_v30   ;;  %188 = vst.msk [vmem:[#allocation2 + $0x141] sm:$0xff] %vm82_vm0, %v43_v44  ;;  %v250_v53 = vld [vmem:[#allocation2 + $0xe0] sm:$0xff]  ;;  %v68_v30 = vld [vmem:[%s10659_s0 + $0x190] sm:$0xff] }
  0x63   :  { %352 = vperm.xlu2 %5678, %v242_v31   ;;  %189 = vst.msk [vmem:[#allocation2 + $0x151] sm:$0xff] %vm82_vm0, %v44_v45  ;;  %v252_v52 = vld [vmem:[#allocation2 + $0xf8] sm:$0xff] }
  0x64   :  { %190 = vst.msk [vmem:[#allocation2 + $0x159] sm:$0xff] %vm82_vm0, %v45_v47  ;;  %v253_v58 = vld [vmem:[#allocation2 + $0x108] sm:$0xff]  ;;  %v73_v45 = vld [vmem:[%s10659_s0 + $0x1b8] sm:$0xff] }
  0x65   :  { %357 = vperm.xlu0 %5676, %v243_v34   ;;  %191 = vst.msk [vmem:[#allocation2 + $0x169] sm:$0xff] %vm82_vm0, %v46_v50  ;;  %v254_v54 = vld [vmem:[#allocation2 + $0x110] sm:$0xff] }
  0x66   :  { %192 = vst.msk [vmem:[#allocation2 + $0x171] sm:$0xff] %vm82_vm0, %v47_v51  ;;  %v255_v57 = vld [vmem:[#allocation2 + $0x120] sm:$0xff] }
  0x67   :  { %195 = vst.msk [vmem:[#allocation2 + $0x1c9] sm:$0xff] %vm82_vm0, %v50_v55  ;;  %v257_v59 = vld [vmem:[#allocation2 + $0x138] sm:$0xff]  ;;  %v78_v55 = vld [vmem:[%s10659_s0 + $0x1e0] sm:$0xff] }
  0x68   :  { %196 = vst.msk [vmem:[#allocation2 + $0x1d1] sm:$0xff] %vm82_vm0, %v51_v56  ;;  %v256_v0 = vld [vmem:[#allocation2 + $0x128] sm:$0xff] }
  0x69   :  { %v258_v62 = vld [vmem:[#allocation2 + $0x140] sm:$0xff]  ;;  %197 = vst.msk [vmem:[#allocation2 + $0x1e1] sm:$0xff] %vm82_vm0, %v52_v60 }
  0x6a   :  { %347 = vperm.xlu1 %5677, %v241_v36   ;;  %199 = vst.msk [vmem:[#allocation2 + $0x1f9] sm:$0xff] %vm82_vm0, %v54_v61  ;;  %v259_v7 = vld [vmem:[#allocation2 + $0x150] sm:$0xff] }
  0x6b   :  { %367 = vperm.xlu2 %5678, %v245_v37   ;;  %198 = vst.msk [vmem:[#allocation2 + $0x1e9] sm:$0xff] %vm82_vm0, %v53_v63  ;;  %v260_v2 = vld [vmem:[#allocation2 + $0x158] sm:$0xff]  ;;  %v70_v37 = vld [vmem:[%s10659_s0 + $0x1a0] sm:$0xff]  ;;  %v79_v63 = vld [vmem:[%s10659_s0 + $0x1e8] sm:$0xff] }
  0x6c   :  { %v261_v5 = vld [vmem:[#allocation2 + $0x168] sm:$0xff]  ;;  %200 = vst.msk [vmem:[#allocation2 + $0x201] sm:$0xff] %vm82_vm0, %v55_v3  ;;  %v6057_v19 = vpop.permute.xlu2 %317 }
  0x6d   :  { %372 = vperm.xlu0 %5676, %v246_v40   ;;  %201 = vst.msk [vmem:[#allocation2 + $0x211] sm:$0xff] %vm82_vm0, %v56_v4  ;;  %v262_v13 = vld [vmem:[#allocation2 + $0x170] sm:$0xff]  ;;  %v71_v40 = vld [vmem:[%s10659_s0 + $0x1a8] sm:$0xff] }
  0x6e   :  { %202 = vst.msk [vmem:[#allocation2 + $0x219] sm:$0xff] %vm82_vm0, %v57_v6  ;;  %v265_v20 = vld [vmem:[#allocation2 + $0x1c8] sm:$0xff] }
  0x6f   :  { %203 = vst.msk [vmem:[#allocation2 + $0x229] sm:$0xff] %vm82_vm0, %v58_v9  ;;  %v266_v14 = vld [vmem:[#allocation2 + $0x1d0] sm:$0xff] }
  0x70   :  { %205 = vst.msk [vmem:[#allocation2 + $0x241] sm:$0xff] %vm82_vm0, %v60_v10  ;;  %v267_v17 = vld [vmem:[#allocation2 + $0x1e0] sm:$0xff] }
  0x71   :  { %204 = vst.msk [vmem:[#allocation2 + $0x231] sm:$0xff] %vm82_vm0, %v59_v12  ;;  %v269_v21 = vld [vmem:[#allocation2 + $0x1f8] sm:$0xff] }
  0x72   :  { %362 = vperm.xlu1 %5677, %v244_v42   ;;  %206 = vst.msk [vmem:[#allocation2 + $0x249] sm:$0xff] %vm82_vm0, %v61_v15  ;;  %v268_v27 = vld [vmem:[#allocation2 + $0x1e8] sm:$0xff] }
  0x73   :  { %382 = vperm.xlu2 %5678, %v248_v43   ;;  %207 = vst.msk [vmem:[#allocation2 + $0x259] sm:$0xff] %vm82_vm0, %v62_v16  ;;  %v270_v24 = vld [vmem:[#allocation2 + $0x200] sm:$0xff] }
  0x74   :  { %208 = vst.msk [vmem:[#allocation2 + $0x261] sm:$0xff] %vm82_vm0, %v63_v18  ;;  %v271_v35 = vld [vmem:[#allocation2 + $0x210] sm:$0xff] }
  0x75   :  { %387 = vperm.xlu0 %5676, %v249_v46   ;;  %209 = vst.msk [vmem:[#allocation2 + $0x271] sm:$0xff] %vm82_vm0, %v64_v22  ;;  %v272_v28 = vld [vmem:[#allocation2 + $0x218] sm:$0xff]  ;;  %v74_v46 = vld [vmem:[%s10659_s0 + $0x1c0] sm:$0xff] }
  0x76   :  { %211 = vst.msk [vmem:[#allocation2 + $0x289] sm:$0xff] %vm82_vm0, %v66_v23  ;;  %v273_v31 = vld [vmem:[#allocation2 + $0x228] sm:$0xff] }
  0x77   :  { %210 = vst.msk [vmem:[#allocation2 + $0x279] sm:$0xff] %vm82_vm0, %v65_v25  ;;  %v275_v36 = vld [vmem:[#allocation2 + $0x240] sm:$0xff] }
  0x78   :  { %212 = vst.msk [vmem:[#allocation2 + $0x291] sm:$0xff] %vm82_vm0, %v67_v29  ;;  %v274_v43 = vld [vmem:[#allocation2 + $0x230] sm:$0xff]  ;;  %v746_v25 = vld [vmem:[#allocation2 + $0x19] sm:$0xff]  ;;  %v744_v29 = vld [vmem:[#allocation2 + $0x1] sm:$0xff] }
  0x79   :  { %213 = vst.msk [vmem:[#allocation2 + $0x2a1] sm:$0xff] %vm82_vm0, %v68_v30  ;;  %v276_v39 = vld [vmem:[#allocation2 + $0x248] sm:$0xff] }
  0x7a   :  { %377 = vperm.xlu1 %5677, %v247_v48   ;;  %214 = vst.msk [vmem:[#allocation2 + $0x2a9] sm:$0xff] %vm82_vm0, %v69_v32  ;;  %v75_v48 = vld [vmem:[%s10659_s0 + $0x1c8] sm:$0xff]  ;;  %v277_v51 = vld [vmem:[#allocation2 + $0x258] sm:$0xff] }
  0x7b   :  { %397 = vperm.xlu2 %5678, %v251_v49   ;;  %v6085_v33 = vpop.permute.xlu0 %297  ;;  %215 = vst.msk [vmem:[#allocation2 + $0x2b9] sm:$0xff] %vm82_vm0, %v70_v37  ;;  %v278_v44 = vld [vmem:[#allocation2 + $0x260] sm:$0xff] }
  0x7c   :  { %217 = vst.msk [vmem:[#allocation2 + $0x2d1] sm:$0xff] %vm82_vm0, %v72_v38  ;;  %v279_v47 = vld [vmem:[#allocation2 + $0x270] sm:$0xff]  ;;  %v749_v32 = vld [vmem:[#allocation2 + $0x39] sm:$0xff]  ;;  %v747_v37 = vld [vmem:[#allocation2 + $0x21] sm:$0xff] }
  0x7d   :  { %402 = vperm.xlu0 %5676, %v252_v52   ;;  %216 = vst.msk [vmem:[#allocation2 + $0x2c1] sm:$0xff] %vm82_vm0, %v71_v40  ;;  %v752_v40 = vld [vmem:[#allocation2 + $0x61] sm:$0xff] }
  0x7e   :  { %218 = vst.msk [vmem:[#allocation2 + $0x2d9] sm:$0xff] %vm82_vm0, %v73_v45  ;;  %v280_v60 = vld [vmem:[#allocation2 + $0x278] sm:$0xff]  ;;  %v750_v45 = vld [vmem:[#allocation2 + $0x49] sm:$0xff] }
  0x7f   :  { %219 = vst.msk [vmem:[#allocation2 + $0x2e9] sm:$0xff] %vm82_vm0, %v74_v46  ;;  %v282_v56 = vld [vmem:[#allocation2 + $0x290] sm:$0xff] }
  0x80   :  { %220 = vst.msk [vmem:[#allocation2 + $0x2f1] sm:$0xff] %vm82_vm0, %v75_v48  ;;  %v283_v4 = vld [vmem:[#allocation2 + $0x2a0] sm:$0xff] }
  0x81   :  { %223 = vst.msk [vmem:[#allocation2 + $0x319] sm:$0xff] %vm82_vm0, %v78_v55  ;;  %v755_v48 = vld [vmem:[#allocation2 + $0x81] sm:$0xff] }
  0x82   :  { %392 = vperm.xlu1 %5677, %v250_v53   ;;  %v281_v53 = vld [vmem:[#allocation2 + $0x288] sm:$0xff]  ;;  %224 = vst.msk [vmem:[#allocation2 + $0x321] sm:$0xff] %vm82_vm0, %v79_v63  ;;  %v756_v63 = vld [vmem:[#allocation2 + $0x91] sm:$0xff] }
  0x83   :  { %412 = vperm.xlu2 %5678, %v254_v54   ;;  %v6105_v42 = vpop.permute.xlu0 %302  ;;  %v76_v54 = vld [vmem:[%s10659_s0 + $0x1d0] sm:$0xff]  ;;  %86 = vst.msk [vmem:[#allocation2 + $0x10] sm:$0x3] %vm85_vm2, %v5710_v1 }
  0x84   :  { %221 = vst.msk [vmem:[#allocation2 + $0x301] sm:$0xff] %vm82_vm0, %v76_v54  ;;  %v287_v6 = vld [vmem:[#allocation2 + $0x2d0] sm:$0xff]  ;;  %v286_v10 = vld [vmem:[#allocation2 + $0x2c0] sm:$0xff] }
  0x85   :  { %417 = vperm.xlu0 %5676, %v255_v57   ;;  %v77_v57 = vld [vmem:[%s10659_s0 + $0x1d8] sm:$0xff]  ;;  %89 = vst.msk [vmem:[#allocation2 + $0x1c0] sm:$0x3] %vm85_vm2, %v5710_v1  ;;  %v753_v54 = vld [vmem:[#allocation2 + $0x69] sm:$0xff] }
  0x86   :  { %222 = vst.msk [vmem:[#allocation2 + $0x309] sm:$0xff] %vm82_vm0, %v77_v57  ;;  %v289_v15 = vld [vmem:[#allocation2 + $0x2e8] sm:$0xff] }
  0x87   :  { %93 = vst.msk [vmem:[#allocation2 + $0x1a8] sm:$0x3] %vm85_vm2, %v5710_v1  ;;  %v290_v12 = vld [vmem:[#allocation2 + $0x2f0] sm:$0xff] }
  0x88   :  { %96 = vst.msk [vmem:[#allocation2 + $0x358] sm:$0x3] %vm85_vm2, %v5710_v1  ;;  %v758_v57 = vld [vmem:[#allocation2 + $0xa9] sm:$0xff] }
  0x89   :  { %v294_v18 = vld [vmem:[#allocation2 + $0x320] sm:$0xff] }
  0x8a   :  { %407 = vperm.xlu1 %5677, %v253_v58  }
  0x8b   :  { %427 = vperm.xlu2 %5678, %v257_v59  }
  0x8d   :  { %432 = vperm.xlu0 %5676, %v258_v62   ;;  %v284_v62 = vld [vmem:[#allocation2 + $0x2a8] sm:$0xff] }
  0x8e   :  { %v292_v22 = vld [vmem:[#allocation2 + $0x308] sm:$0xff] }
  0x92   :  { %422 = vperm.xlu1 %5677, %v256_v0   ;;  %v285_v0 = vld [vmem:[#allocation2 + $0x2b8] sm:$0xff] }
  0x93   :  { %442 = vperm.xlu2 %5678, %v260_v2  }
  0x95   :  { %447 = vperm.xlu0 %5676, %v261_v5  }
  0x9a   :  { %437 = vperm.xlu1 %5677, %v259_v7   ;;  %v288_v7 = vld [vmem:[#allocation2 + $0x2d8] sm:$0xff] }
  0x9b   :  { %457 = vperm.xlu2 %5678, %v263_v8  }
  0x9d   :  { %462 = vperm.xlu0 %5676, %v264_v11  }
  0xa2   :  { %452 = vperm.xlu1 %5677, %v262_v13   ;;  %v291_v13 = vld [vmem:[#allocation2 + $0x300] sm:$0xff] }
  0xa3   :  { %472 = vperm.xlu2 %5678, %v266_v14  }
  0xa5   :  { %477 = vperm.xlu0 %5676, %v267_v17   ;;  %v293_v17 = vld [vmem:[#allocation2 + $0x318] sm:$0xff] }
  0xaa   :  { %467 = vperm.xlu1 %5677, %v265_v20  }
  0xab   :  { %487 = vperm.xlu2 %5678, %v269_v21  }
  0xad   :  { %v6073_v26 = vpop.permute.xlu2 %322  ;;  %492 = vperm.xlu0 %5676, %v270_v24   ;;  %v745_v24 = vld [vmem:[#allocation2 + $0x9] sm:$0xff] }
  0xb2   :  { %482 = vperm.xlu1 %5677, %v268_v27  }
  0xb3   :  { %502 = vperm.xlu2 %5678, %v272_v28  }
  0xb5   :  { %v6089_v34 = vpop.permute.xlu2 %337  ;;  %507 = vperm.xlu0 %5676, %v273_v31   ;;  %v748_v31 = vld [vmem:[#allocation2 + $0x31] sm:$0xff] }
  0xba   :  { %497 = vperm.xlu1 %5677, %v271_v35  }
  0xbb   :  { %517 = vperm.xlu2 %5678, %v275_v36  }
  0xbd   :  { %v6103_v41 = vpop.permute.xlu2 %352  ;;  %522 = vperm.xlu0 %5676, %v276_v39   ;;  %v751_v39 = vld [vmem:[#allocation2 + $0x51] sm:$0xff] }
  0xc2   :  { %512 = vperm.xlu1 %5677, %v274_v43  }
  0xc3   :  { %532 = vperm.xlu2 %5678, %v278_v44  }
  0xc4   :  { %v6118_v49 = vpop.permute.xlu1 %307 }
  0xc5   :  { %v6121_v50 = vpop.permute.xlu2 %367  ;;  %537 = vperm.xlu0 %5676, %v279_v47   ;;  %v754_v47 = vld [vmem:[#allocation2 + $0x79] sm:$0xff] }
  0xc7   :  { %v6123_v52 = vpop.permute.xlu0 %327 }
  0xca   :  { %527 = vperm.xlu1 %5677, %v277_v51  }
  0xcb   :  { %547 = vperm.xlu2 %5678, %v281_v53  }
  0xcc   :  { %v6136_v58 = vpop.permute.xlu1 %312 }
  0xcd   :  { %v6139_v59 = vpop.permute.xlu2 %382  ;;  %552 = vperm.xlu0 %5676, %v282_v56   ;;  %v757_v56 = vld [vmem:[#allocation2 + $0x99] sm:$0xff] }
  0xcf   :  { %v6141_v61 = vpop.permute.xlu0 %342 }
  0xd2   :  { %542 = vperm.xlu1 %5677, %v280_v60  }
  0xd3   :  { %562 = vperm.xlu2 %5678, %v284_v62  }
  0xd4   :  { %v6148_v2 = vpop.permute.xlu1 %332 }
  0xd5   :  { %v6151_v3 = vpop.permute.xlu2 %397  ;;  %567 = vperm.xlu0 %5676, %v285_v0  }
  0xd7   :  { %v6155_v5 = vpop.permute.xlu0 %357 }
  0xda   :  { %557 = vperm.xlu1 %5677, %v283_v4   ;;  %v760_v4 = vld [vmem:[#allocation2 + $0xc1] sm:$0xff] }
  0xdb   :  { %577 = vperm.xlu2 %5678, %v287_v6   ;;  %v761_v6 = vld [vmem:[#allocation2 + $0xc9] sm:$0xff] }
  0xdc   :  { %v6157_v8 = vpop.permute.xlu1 %347 }
  0xdd   :  { %v6159_v9 = vpop.permute.xlu2 %412  ;;  %582 = vperm.xlu0 %5676, %v288_v7  }
  0xdf   :  { %v6161_v11 = vpop.permute.xlu0 %372 }
  0xe2   :  { %572 = vperm.xlu1 %5677, %v286_v10  }
  0xe3   :  { %592 = vperm.xlu2 %5678, %v290_v12   ;;  %v759_v12 = vld [vmem:[#allocation2 + $0xb1] sm:$0xff] }
  0xe4   :  { %v6163_v1 = vpop.permute.xlu1 %362 }
  0xe5   :  { %v6165_v14 = vpop.permute.xlu2 %427  ;;  %597 = vperm.xlu0 %5676, %v291_v13  }
  0xe7   :  { %v6167_v16 = vpop.permute.xlu0 %387 }
  0xea   :  { %587 = vperm.xlu1 %5677, %v289_v15   ;;  %v763_v15 = vld [vmem:[#allocation2 + $0xe1] sm:$0xff] }
  0xeb   :  { %607 = vperm.xlu2 %5678, %v293_v17   ;;  %v764_v17 = vld [vmem:[#allocation2 + $0xf1] sm:$0xff] }
  0xec   :  { %v6169_v20 = vpop.permute.xlu1 %377 }
  0xed   :  { %v6171_v21 = vpop.permute.xlu2 %442  ;;  %612 = vperm.xlu0 %5676, %v294_v18  }
  0xef   :  { %v6173_v23 = vpop.permute.xlu0 %402 }
  0xf2   :  { %602 = vperm.xlu1 %5677, %v292_v22  }
  0xf3   :  { %815 = vperm.xlu2 %5678, %v745_v24   ;;  %v762_v24 = vld [vmem:[#allocation2 + $0xd9] sm:$0xff] }
  0xf4   :  { %v6175_v27 = vpop.permute.xlu1 %392 }
  0xf5   :  { %v6177_v28 = vpop.permute.xlu2 %457  ;;  %820 = vperm.xlu0 %5676, %v746_v25  }
  0xf7   :  { %v6179_v30 = vpop.permute.xlu0 %417 }
  0xfa   :  { %810 = vperm.xlu1 %5677, %v744_v29   ;;  %v766_v29 = vld [vmem:[#allocation2 + $0x109] sm:$0xff] }
  0xfb   :  { %830 = vperm.xlu2 %5678, %v748_v31   ;;  %v767_v31 = vld [vmem:[#allocation2 + $0x111] sm:$0xff] }
  0xfc   :  { %v6181_v35 = vpop.permute.xlu1 %407 }
  0xfd   :  { %v6183_v36 = vpop.permute.xlu2 %472  ;;  %835 = vperm.xlu0 %5676, %v749_v32  }
  0xff   :  { %v6185_v38 = vpop.permute.xlu0 %432 }
 0x102   :  { %825 = vperm.xlu1 %5677, %v747_v37  }
 0x103   :  { %845 = vperm.xlu2 %5678, %v751_v39   ;;  %v765_v39 = vld [vmem:[#allocation2 + $0xf9] sm:$0xff] }
 0x104   :  { %v6187_v43 = vpop.permute.xlu1 %422 }
 0x105   :  { %v6189_v44 = vpop.permute.xlu2 %487  ;;  %850 = vperm.xlu0 %5676, %v752_v40  }
 0x107   :  { %v6191_v46 = vpop.permute.xlu0 %447 }
 0x10a   :  { %840 = vperm.xlu1 %5677, %v750_v45   ;;  %v769_v45 = vld [vmem:[#allocation2 + $0x129] sm:$0xff] }
 0x10b   :  { %860 = vperm.xlu2 %5678, %v754_v47   ;;  %v770_v47 = vld [vmem:[#allocation2 + $0x139] sm:$0xff] }
 0x10c   :  { %v6193_v51 = vpop.permute.xlu1 %437 }
 0x10d   :  { %v6195_v53 = vpop.permute.xlu2 %502  ;;  %865 = vperm.xlu0 %5676, %v755_v48  }
 0x10f   :  { %v6197_v55 = vpop.permute.xlu0 %462 }
 0x112   :  { %855 = vperm.xlu1 %5677, %v753_v54  }
 0x113   :  { %875 = vperm.xlu2 %5678, %v757_v56   ;;  %v768_v56 = vld [vmem:[#allocation2 + $0x121] sm:$0xff] }
 0x114   :  { %v6199_v60 = vpop.permute.xlu1 %452 }
 0x115   :  { %v6201_v62 = vpop.permute.xlu2 %517  ;;  %880 = vperm.xlu0 %5676, %v758_v57  }
 0x117   :  { %v6203_v0 = vpop.permute.xlu0 %477 }
 0x11a   :  { %870 = vperm.xlu1 %5677, %v756_v63   ;;  %v772_v63 = vld [vmem:[#allocation2 + $0x151] sm:$0xff] }
 0x11b   :  { %890 = vperm.xlu2 %5678, %v760_v4   ;;  %v773_v4 = vld [vmem:[#allocation2 + $0x159] sm:$0xff] }
 0x11c   :  { %v6205_v7 = vpop.permute.xlu1 %467 }
 0x11d   :  { %v6207_v10 = vpop.permute.xlu2 %532  ;;  %895 = vperm.xlu0 %5676, %v761_v6  }
 0x11f   :  { %v6209_v13 = vpop.permute.xlu0 %492 }
 0x122   :  { %885 = vperm.xlu1 %5677, %v759_v12  }
 0x123   :  { %905 = vperm.xlu2 %5678, %v763_v15   ;;  %v771_v15 = vld [vmem:[#allocation2 + $0x141] sm:$0xff] }
 0x124   :  { %v6211_v18 = vpop.permute.xlu1 %482 }
 0x125   :  { %v6213_v22 = vpop.permute.xlu2 %547  ;;  %910 = vperm.xlu0 %5676, %v764_v17  }
 0x127   :  { %v6215_v25 = vpop.permute.xlu0 %507 }
 0x12a   :  { %900 = vperm.xlu1 %5677, %v762_v24   ;;  %v775_v24 = vld [vmem:[#allocation2 + $0x171] sm:$0xff] }
 0x12b   :  { %920 = vperm.xlu2 %5678, %v766_v29   ;;  %v776_v29 = vld [vmem:[#allocation2 + $0x1b1] sm:$0xff] }
 0x12c   :  { %v6217_v32 = vpop.permute.xlu1 %497 }
 0x12d   :  { %v6219_v37 = vpop.permute.xlu2 %562  ;;  %925 = vperm.xlu0 %5676, %v767_v31  }
 0x12f   :  { %v6221_v40 = vpop.permute.xlu0 %522 }
 0x132   :  { %915 = vperm.xlu1 %5677, %v765_v39  }
 0x133   :  { %935 = vperm.xlu2 %5678, %v769_v45   ;;  %v774_v45 = vld [vmem:[#allocation2 + $0x169] sm:$0xff] }
 0x134   :  { %v6223_v48 = vpop.permute.xlu1 %512 }
 0x135   :  { %v6225_v54 = vpop.permute.xlu2 %577  ;;  %940 = vperm.xlu0 %5676, %v770_v47  }
 0x137   :  { %v6227_v57 = vpop.permute.xlu0 %537 }
 0x138   :  { %10724 = vst [vmem:[#allocation6_spill] sm:$0xff] %v6227_v57 }
 0x13a   :  { %930 = vperm.xlu1 %5677, %v768_v56   ;;  %v778_v56 = vld [vmem:[#allocation2 + $0x1c9] sm:$0xff] }
 0x13b   :  { %950 = vperm.xlu2 %5678, %v772_v63   ;;  %v779_v63 = vld [vmem:[#allocation2 + $0x1d1] sm:$0xff] }
 0x13c   :  { %v6229_v6 = vpop.permute.xlu1 %527 }
 0x13d   :  { %v6231_v12 = vpop.permute.xlu2 %592  ;;  %955 = vperm.xlu0 %5676, %v773_v4  }
 0x13e   :  { %10725 = vst [vmem:[#allocation7_spill] sm:$0xff] %v6231_v12 }
 0x13f   :  { %v6233_v17 = vpop.permute.xlu0 %552 }
 0x140   :  { %10726 = vst [vmem:[#allocation8_spill] sm:$0xff] %v6233_v17 }
 0x142   :  { %945 = vperm.xlu1 %5677, %v771_v15   ;;  %v777_v15 = vld [vmem:[#allocation2 + $0x1b9] sm:$0xff] }
 0x143   :  { %965 = vperm.xlu2 %5678, %v775_v24   ;;  %v781_v24 = vld [vmem:[#allocation2 + $0x1e9] sm:$0xff] }
 0x144   :  { %v6235_v31 = vpop.permute.xlu1 %542 }
 0x145   :  { %10727 = vst [vmem:[#allocation9_spill] sm:$0xff] %v6235_v31  ;;  %v6237_v39 = vpop.permute.xlu2 %607  ;;  %970 = vperm.xlu0 %5676, %v776_v29   ;;  %v782_v31 = vld [vmem:[#allocation2 + $0x1f9] sm:$0xff] }
 0x146   :  { %10728 = vst [vmem:[#allocation10_spill] sm:$0xff] %v6237_v39 }
 0x147   :  { %v6239_v47 = vpop.permute.xlu0 %567 }
 0x148   :  { %10729 = vst [vmem:[#allocation11_spill] sm:$0xff] %v6239_v47 }
 0x14a   :  { %960 = vperm.xlu1 %5677, %v774_v45   ;;  %v780_v45 = vld [vmem:[#allocation2 + $0x1e1] sm:$0xff] }
 0x14b   :  { %980 = vperm.xlu2 %5678, %v778_v56   ;;  %v784_v56 = vld [vmem:[#allocation2 + $0x211] sm:$0xff] }
 0x14c   :  { %v6241_v4 = vpop.permute.xlu1 %557 }
 0x14d   :  { %10730 = vst [vmem:[#allocation12_spill] sm:$0xff] %v6241_v4  ;;  %v6243_v12 = vpop.permute.xlu2 %815  ;;  %985 = vperm.xlu0 %5676, %v779_v63   ;;  %v785_v4 = vld [vmem:[#allocation2 + $0x219] sm:$0xff] }
 0x14f   :  { %v6245_v17 = vpop.permute.xlu0 %582 }
 0x150   :  { %10731 = vst [vmem:[#allocation13_spill] sm:$0xff] %v6245_v17 }
 0x152   :  { %975 = vperm.xlu1 %5677, %v777_v15   ;;  %v783_v15 = vld [vmem:[#allocation2 + $0x201] sm:$0xff] }
 0x153   :  { %995 = vperm.xlu2 %5678, %v781_v24   ;;  %v787_v24 = vld [vmem:[#allocation2 + $0x231] sm:$0xff] }
 0x154   :  { %v6247_v29 = vpop.permute.xlu1 %572 }
 0x155   :  { %10732 = vst [vmem:[#allocation14_spill] sm:$0xff] %v6247_v29  ;;  %v6249_v39 = vpop.permute.xlu2 %830  ;;  %1000 = vperm.xlu0 %5676, %v782_v31   ;;  %v788_v29 = vld [vmem:[#allocation2 + $0x241] sm:$0xff] }
 0x156   :  { %10733 = vst [vmem:[#allocation15_spill] sm:$0xff] %v6249_v39 }
 0x157   :  { %v6251_v47 = vpop.permute.xlu0 %597 }
 0x158   :  { %10734 = vst [vmem:[#allocation16_spill] sm:$0xff] %v6251_v47 }
 0x15a   :  { %990 = vperm.xlu1 %5677, %v780_v45   ;;  %v786_v45 = vld [vmem:[#allocation2 + $0x229] sm:$0xff] }
 0x15b   :  { %1010 = vperm.xlu2 %5678, %v784_v56   ;;  %v790_v56 = vld [vmem:[#allocation2 + $0x259] sm:$0xff] }
 0x15c   :  { %v6253_v63 = vpop.permute.xlu1 %587 }
 0x15d   :  { %10735 = vst [vmem:[#allocation17_spill] sm:$0xff] %v6253_v63  ;;  %v6255_v57 = vpop.permute.xlu2 %845  ;;  %1015 = vperm.xlu0 %5676, %v785_v4   ;;  %v791_v63 = vld [vmem:[#allocation2 + $0x261] sm:$0xff] }
 0x15e   :  { %10736 = vst [vmem:[#allocation18_spill] sm:$0xff] %v6255_v57 }
 0x15f   :  { %v6257_v17 = vpop.permute.xlu0 %612 }
 0x160   :  { %10737 = vst [vmem:[#allocation19_spill] sm:$0xff] %v6257_v17 }
 0x162   :  { %1005 = vperm.xlu1 %5677, %v783_v15   ;;  %v789_v15 = vld [vmem:[#allocation2 + $0x249] sm:$0xff] }
 0x163   :  { %1025 = vperm.xlu2 %5678, %v787_v24   ;;  %v793_v24 = vld [vmem:[#allocation2 + $0x279] sm:$0xff] }
 0x164   :  { %v6259_v31 = vpop.permute.xlu1 %602 }
 0x165   :  { %10738 = vst [vmem:[#allocation20_spill] sm:$0xff] %v6259_v31  ;;  %v6261_v39 = vpop.permute.xlu2 %860  ;;  %1030 = vperm.xlu0 %5676, %v788_v29   ;;  %v794_v31 = vld [vmem:[#allocation2 + $0x289] sm:$0xff] }
 0x166   :  { %10739 = vst [vmem:[#allocation21_spill] sm:$0xff] %v6261_v39 }
 0x167   :  { %v6263_v47 = vpop.permute.xlu0 %820 }
 0x168   :  { %10740 = vst [vmem:[#allocation22_spill] sm:$0xff] %v6263_v47 }
 0x16a   :  { %1020 = vperm.xlu1 %5677, %v786_v45   ;;  %v792_v45 = vld [vmem:[#allocation2 + $0x271] sm:$0xff] }
 0x16b   :  { %1040 = vperm.xlu2 %5678, %v790_v56   ;;  %v796_v56 = vld [vmem:[#allocation2 + $0x2a1] sm:$0xff] }
 0x16c   :  { %v6265_v4 = vpop.permute.xlu1 %810 }
 0x16d   :  { %10741 = vst [vmem:[#allocation23_spill] sm:$0xff] %v6265_v4  ;;  %v6267_v57 = vpop.permute.xlu2 %875  ;;  %1045 = vperm.xlu0 %5676, %v791_v63   ;;  %v797_v4 = vld [vmem:[#allocation2 + $0x2a9] sm:$0xff] }
 0x16e   :  { %10742 = vst [vmem:[#allocation24_spill] sm:$0xff] %v6267_v57 }
 0x16f   :  { %v6269_v17 = vpop.permute.xlu0 %835 }
 0x170   :  { %10743 = vst [vmem:[#allocation25_spill] sm:$0xff] %v6269_v17 }
 0x172   :  { %1035 = vperm.xlu1 %5677, %v789_v15   ;;  %v795_v15 = vld [vmem:[#allocation2 + $0x291] sm:$0xff] }
 0x173   :  { %1055 = vperm.xlu2 %5678, %v793_v24   ;;  %v799_v24 = vld [vmem:[#allocation2 + $0x2c1] sm:$0xff] }
 0x174   :  { %v6271_v29 = vpop.permute.xlu1 %825 }
 0x175   :  { %10744 = vst [vmem:[#allocation26_spill] sm:$0xff] %v6271_v29  ;;  %v6273_v39 = vpop.permute.xlu2 %890  ;;  %1060 = vperm.xlu0 %5676, %v794_v31   ;;  %v800_v29 = vld [vmem:[#allocation2 + $0x2d1] sm:$0xff] }
 0x176   :  { %10745 = vst [vmem:[#allocation27_spill] sm:$0xff] %v6273_v39 }
 0x177   :  { %v6275_v47 = vpop.permute.xlu0 %850 }
 0x178   :  { %10746 = vst [vmem:[#allocation28_spill] sm:$0xff] %v6275_v47 }
 0x17a   :  { %1050 = vperm.xlu1 %5677, %v792_v45   ;;  %v798_v45 = vld [vmem:[#allocation2 + $0x2b9] sm:$0xff] }
 0x17b   :  { %1070 = vperm.xlu2 %5678, %v796_v56   ;;  %v802_v56 = vld [vmem:[#allocation2 + $0x2e9] sm:$0xff] }
 0x17c   :  { %v6277_v63 = vpop.permute.xlu1 %840 }
 0x17d   :  { %10747 = vst [vmem:[#allocation29_spill] sm:$0xff] %v6277_v63  ;;  %v6279_v57 = vpop.permute.xlu2 %905  ;;  %1075 = vperm.xlu0 %5676, %v797_v4   ;;  %v803_v63 = vld [vmem:[#allocation2 + $0x2f1] sm:$0xff] }
 0x17e   :  { %10748 = vst [vmem:[#allocation30_spill] sm:$0xff] %v6279_v57 }
 0x17f   :  { %v6281_v17 = vpop.permute.xlu0 %865 }
 0x180   :  { %10749 = vst [vmem:[#allocation31_spill] sm:$0xff] %v6281_v17 }
 0x182   :  { %1065 = vperm.xlu1 %5677, %v795_v15   ;;  %v801_v15 = vld [vmem:[#allocation2 + $0x2d9] sm:$0xff] }
 0x183   :  { %1085 = vperm.xlu2 %5678, %v799_v24   ;;  %v805_v24 = vld [vmem:[#allocation2 + $0x309] sm:$0xff] }
 0x184   :  { %v6283_v31 = vpop.permute.xlu1 %855 }
 0x185   :  { %10750 = vst [vmem:[#allocation32_spill] sm:$0xff] %v6283_v31  ;;  %v6285_v39 = vpop.permute.xlu2 %920  ;;  %1090 = vperm.xlu0 %5676, %v800_v29   ;;  %v806_v31 = vld [vmem:[#allocation2 + $0x319] sm:$0xff] }
 0x186   :  { %10751 = vst [vmem:[#allocation33_spill] sm:$0xff] %v6285_v39 }
 0x187   :  { %v6287_v47 = vpop.permute.xlu0 %880 }
 0x188   :  { %10752 = vst [vmem:[#allocation34_spill] sm:$0xff] %v6287_v47 }
 0x18a   :  { %1080 = vperm.xlu1 %5677, %v798_v45   ;;  %v804_v45 = vld [vmem:[#allocation2 + $0x301] sm:$0xff] }
 0x18b   :  { %1100 = vperm.xlu2 %5678, %v802_v56   ;;  %v1257_v56 = vld [vmem:[#allocation2 + $0x2] sm:$0xff] }
 0x18c   :  { %v6289_v4 = vpop.permute.xlu1 %870 }
 0x18d   :  { %10753 = vst [vmem:[#allocation35_spill] sm:$0xff] %v6289_v4  ;;  %v6291_v57 = vpop.permute.xlu2 %935  ;;  %1105 = vperm.xlu0 %5676, %v803_v63   ;;  %v1258_v4 = vld [vmem:[#allocation2 + $0xa] sm:$0xff] }
 0x18e   :  { %10754 = vst [vmem:[#allocation36_spill] sm:$0xff] %v6291_v57 }
 0x18f   :  { %v6293_v17 = vpop.permute.xlu0 %895 }
 0x190   :  { %10755 = vst [vmem:[#allocation37_spill] sm:$0xff] %v6293_v17 }
 0x192   :  { %1095 = vperm.xlu1 %5677, %v801_v15   ;;  %v807_v15 = vld [vmem:[#allocation2 + $0x321] sm:$0xff] }
 0x193   :  { %1115 = vperm.xlu2 %5678, %v805_v24   ;;  %v1260_v24 = vld [vmem:[#allocation2 + $0x22] sm:$0xff] }
 0x194   :  { %v6295_v29 = vpop.permute.xlu1 %885 }
 0x195   :  { %10756 = vst [vmem:[#allocation38_spill] sm:$0xff] %v6295_v29  ;;  %v6297_v39 = vpop.permute.xlu2 %950  ;;  %1120 = vperm.xlu0 %5676, %v806_v31   ;;  %v1261_v29 = vld [vmem:[#allocation2 + $0x32] sm:$0xff] }
 0x196   :  { %10757 = vst [vmem:[#allocation39_spill] sm:$0xff] %v6297_v39 }
 0x197   :  { %v6299_v47 = vpop.permute.xlu0 %910 }
 0x198   :  { %10758 = vst [vmem:[#allocation40_spill] sm:$0xff] %v6299_v47 }
 0x19a   :  { %1110 = vperm.xlu1 %5677, %v804_v45   ;;  %v1259_v45 = vld [vmem:[#allocation2 + $0x1a] sm:$0xff] }
 0x19b   :  { %1323 = vperm.xlu2 %5678, %v1257_v56   ;;  %v1263_v56 = vld [vmem:[#allocation2 + $0x4a] sm:$0xff] }
 0x19c   :  { %v6301_v63 = vpop.permute.xlu1 %900 }
 0x19d   :  { %10759 = vst [vmem:[#allocation41_spill] sm:$0xff] %v6301_v63  ;;  %v6303_v57 = vpop.permute.xlu2 %965  ;;  %1328 = vperm.xlu0 %5676, %v1258_v4   ;;  %v1264_v63 = vld [vmem:[#allocation2 + $0x52] sm:$0xff] }
 0x19e   :  { %10760 = vst [vmem:[#allocation42_spill] sm:$0xff] %v6303_v57 }
 0x19f   :  { %v6305_v17 = vpop.permute.xlu0 %925 }
 0x1a0   :  { %10761 = vst [vmem:[#allocation43_spill] sm:$0xff] %v6305_v17 }
 0x1a2   :  { %1125 = vperm.xlu1 %5677, %v807_v15   ;;  %v1262_v15 = vld [vmem:[#allocation2 + $0x3a] sm:$0xff] }
 0x1a3   :  { %1338 = vperm.xlu2 %5678, %v1260_v24   ;;  %v1266_v24 = vld [vmem:[#allocation2 + $0x6a] sm:$0xff] }
 0x1a4   :  { %v6307_v31 = vpop.permute.xlu1 %915 }
 0x1a5   :  { %10762 = vst [vmem:[#allocation44_spill] sm:$0xff] %v6307_v31  ;;  %v6309_v39 = vpop.permute.xlu2 %980  ;;  %1343 = vperm.xlu0 %5676, %v1261_v29   ;;  %v1267_v31 = vld [vmem:[#allocation2 + $0x7a] sm:$0xff] }
 0x1a6   :  { %10763 = vst [vmem:[#allocation45_spill] sm:$0xff] %v6309_v39 }
 0x1a7   :  { %v6311_v47 = vpop.permute.xlu0 %940 }
 0x1a8   :  { %10764 = vst [vmem:[#allocation46_spill] sm:$0xff] %v6311_v47 }
 0x1aa   :  { %1333 = vperm.xlu1 %5677, %v1259_v45   ;;  %v1265_v45 = vld [vmem:[#allocation2 + $0x62] sm:$0xff] }
 0x1ab   :  { %1353 = vperm.xlu2 %5678, %v1263_v56   ;;  %v1269_v56 = vld [vmem:[#allocation2 + $0x92] sm:$0xff] }
 0x1ac   :  { %v6313_v4 = vpop.permute.xlu1 %930 }
 0x1ad   :  { %10765 = vst [vmem:[#allocation47_spill] sm:$0xff] %v6313_v4  ;;  %v6315_v57 = vpop.permute.xlu2 %995  ;;  %1358 = vperm.xlu0 %5676, %v1264_v63   ;;  %v1270_v4 = vld [vmem:[#allocation2 + $0x9a] sm:$0xff] }
 0x1ae   :  { %10766 = vst [vmem:[#allocation48_spill] sm:$0xff] %v6315_v57 }
 0x1af   :  { %v6317_v17 = vpop.permute.xlu0 %955 }
 0x1b0   :  { %10767 = vst [vmem:[#allocation49_spill] sm:$0xff] %v6317_v17 }
 0x1b2   :  { %1348 = vperm.xlu1 %5677, %v1262_v15   ;;  %v1268_v15 = vld [vmem:[#allocation2 + $0x82] sm:$0xff] }
 0x1b3   :  { %1368 = vperm.xlu2 %5678, %v1266_v24   ;;  %v1272_v24 = vld [vmem:[#allocation2 + $0xb2] sm:$0xff] }
 0x1b4   :  { %v6319_v29 = vpop.permute.xlu1 %945 }
 0x1b5   :  { %10768 = vst [vmem:[#allocation50_spill] sm:$0xff] %v6319_v29  ;;  %v6321_v39 = vpop.permute.xlu2 %1010  ;;  %1373 = vperm.xlu0 %5676, %v1267_v31   ;;  %v1273_v29 = vld [vmem:[#allocation2 + $0xc2] sm:$0xff] }
 0x1b6   :  { %10769 = vst [vmem:[#allocation51_spill] sm:$0xff] %v6321_v39 }
 0x1b7   :  { %v6323_v47 = vpop.permute.xlu0 %970 }
 0x1b8   :  { %10770 = vst [vmem:[#allocation52_spill] sm:$0xff] %v6323_v47 }
 0x1ba   :  { %1363 = vperm.xlu1 %5677, %v1265_v45   ;;  %v1271_v45 = vld [vmem:[#allocation2 + $0xaa] sm:$0xff] }
 0x1bb   :  { %1383 = vperm.xlu2 %5678, %v1269_v56   ;;  %v1275_v56 = vld [vmem:[#allocation2 + $0xda] sm:$0xff] }
 0x1bc   :  { %v6325_v63 = vpop.permute.xlu1 %960 }
 0x1bd   :  { %10771 = vst [vmem:[#allocation53_spill] sm:$0xff] %v6325_v63  ;;  %v6327_v57 = vpop.permute.xlu2 %1025  ;;  %1388 = vperm.xlu0 %5676, %v1270_v4   ;;  %v1276_v63 = vld [vmem:[#allocation2 + $0xe2] sm:$0xff] }
 0x1be   :  { %10772 = vst [vmem:[#allocation54_spill] sm:$0xff] %v6327_v57 }
 0x1bf   :  { %v6329_v17 = vpop.permute.xlu0 %985 }
 0x1c0   :  { %10773 = vst [vmem:[#allocation55_spill] sm:$0xff] %v6329_v17 }
 0x1c2   :  { %1378 = vperm.xlu1 %5677, %v1268_v15   ;;  %v1274_v15 = vld [vmem:[#allocation2 + $0xca] sm:$0xff] }
 0x1c3   :  { %1398 = vperm.xlu2 %5678, %v1272_v24   ;;  %v1278_v24 = vld [vmem:[#allocation2 + $0xfa] sm:$0xff] }
 0x1c4   :  { %v6331_v31 = vpop.permute.xlu1 %975 }
 0x1c5   :  { %10774 = vst [vmem:[#allocation56_spill] sm:$0xff] %v6331_v31  ;;  %v6333_v39 = vpop.permute.xlu2 %1040  ;;  %1403 = vperm.xlu0 %5676, %v1273_v29   ;;  %v1279_v31 = vld [vmem:[#allocation2 + $0x10a] sm:$0xff] }
 0x1c6   :  { %10775 = vst [vmem:[#allocation57_spill] sm:$0xff] %v6333_v39 }
 0x1c7   :  { %v6335_v47 = vpop.permute.xlu0 %1000 }
 0x1c8   :  { %10776 = vst [vmem:[#allocation58_spill] sm:$0xff] %v6335_v47 }
 0x1ca   :  { %1393 = vperm.xlu1 %5677, %v1271_v45   ;;  %v1277_v45 = vld [vmem:[#allocation2 + $0xf2] sm:$0xff] }
 0x1cb   :  { %1413 = vperm.xlu2 %5678, %v1275_v56   ;;  %v1281_v56 = vld [vmem:[#allocation2 + $0x122] sm:$0xff] }
 0x1cc   :  { %v6337_v4 = vpop.permute.xlu1 %990 }
 0x1cd   :  { %10777 = vst [vmem:[#allocation59_spill] sm:$0xff] %v6337_v4  ;;  %v6339_v57 = vpop.permute.xlu2 %1055  ;;  %1418 = vperm.xlu0 %5676, %v1276_v63   ;;  %v1282_v4 = vld [vmem:[#allocation2 + $0x12a] sm:$0xff] }
 0x1ce   :  { %10778 = vst [vmem:[#allocation60_spill] sm:$0xff] %v6339_v57 }
 0x1cf   :  { %v6341_v17 = vpop.permute.xlu0 %1015 }
 0x1d0   :  { %10779 = vst [vmem:[#allocation61_spill] sm:$0xff] %v6341_v17 }
 0x1d2   :  { %1408 = vperm.xlu1 %5677, %v1274_v15   ;;  %v1280_v15 = vld [vmem:[#allocation2 + $0x112] sm:$0xff] }
 0x1d3   :  { %1428 = vperm.xlu2 %5678, %v1278_v24   ;;  %v1284_v24 = vld [vmem:[#allocation2 + $0x142] sm:$0xff] }
 0x1d4   :  { %v6343_v29 = vpop.permute.xlu1 %1005 }
 0x1d5   :  { %10780 = vst [vmem:[#allocation62_spill] sm:$0xff] %v6343_v29  ;;  %v6345_v39 = vpop.permute.xlu2 %1070  ;;  %1433 = vperm.xlu0 %5676, %v1279_v31   ;;  %v1285_v29 = vld [vmem:[#allocation2 + $0x152] sm:$0xff] }
 0x1d6   :  { %10781 = vst [vmem:[#allocation63_spill] sm:$0xff] %v6345_v39 }
 0x1d7   :  { %v6347_v47 = vpop.permute.xlu0 %1030 }
 0x1d8   :  { %10782 = vst [vmem:[#allocation64_spill] sm:$0xff] %v6347_v47 }
 0x1da   :  { %1423 = vperm.xlu1 %5677, %v1277_v45   ;;  %v1283_v45 = vld [vmem:[#allocation2 + $0x13a] sm:$0xff] }
 0x1db   :  { %1443 = vperm.xlu2 %5678, %v1281_v56   ;;  %v1287_v56 = vld [vmem:[#allocation2 + $0x16a] sm:$0xff] }
 0x1dc   :  { %v6349_v63 = vpop.permute.xlu1 %1020 }
 0x1dd   :  { %10783 = vst [vmem:[#allocation65_spill] sm:$0xff] %v6349_v63  ;;  %v6351_v57 = vpop.permute.xlu2 %1085  ;;  %1448 = vperm.xlu0 %5676, %v1282_v4   ;;  %v1288_v63 = vld [vmem:[#allocation2 + $0x172] sm:$0xff] }
 0x1de   :  { %10784 = vst [vmem:[#allocation66_spill] sm:$0xff] %v6351_v57 }
 0x1df   :  { %v6353_v17 = vpop.permute.xlu0 %1045 }
 0x1e0   :  { %10785 = vst [vmem:[#allocation67_spill] sm:$0xff] %v6353_v17 }
 0x1e2   :  { %1438 = vperm.xlu1 %5677, %v1280_v15   ;;  %v1286_v15 = vld [vmem:[#allocation2 + $0x15a] sm:$0xff] }
 0x1e3   :  { %1458 = vperm.xlu2 %5678, %v1284_v24   ;;  %v1290_v24 = vld [vmem:[#allocation2 + $0x1ba] sm:$0xff] }
 0x1e4   :  { %v6355_v31 = vpop.permute.xlu1 %1035 }
 0x1e5   :  { %10786 = vst [vmem:[#allocation68_spill] sm:$0xff] %v6355_v31  ;;  %v6357_v39 = vpop.permute.xlu2 %1100  ;;  %1463 = vperm.xlu0 %5676, %v1285_v29   ;;  %v1291_v31 = vld [vmem:[#allocation2 + $0x1ca] sm:$0xff] }
 0x1e6   :  { %10787 = vst [vmem:[#allocation69_spill] sm:$0xff] %v6357_v39 }
 0x1e7   :  { %v6359_v47 = vpop.permute.xlu0 %1060 }
 0x1e8   :  { %10788 = vst [vmem:[#allocation70_spill] sm:$0xff] %v6359_v47 }
 0x1ea   :  { %1453 = vperm.xlu1 %5677, %v1283_v45   ;;  %v1289_v45 = vld [vmem:[#allocation2 + $0x1b2] sm:$0xff] }
 0x1eb   :  { %1473 = vperm.xlu2 %5678, %v1287_v56   ;;  %v1293_v56 = vld [vmem:[#allocation2 + $0x1e2] sm:$0xff] }
 0x1ec   :  { %v6361_v4 = vpop.permute.xlu1 %1050 }
 0x1ed   :  { %10789 = vst [vmem:[#allocation71_spill] sm:$0xff] %v6361_v4  ;;  %v6363_v57 = vpop.permute.xlu2 %1115  ;;  %1478 = vperm.xlu0 %5676, %v1288_v63   ;;  %v1294_v4 = vld [vmem:[#allocation2 + $0x1ea] sm:$0xff] }
 0x1ee   :  { %10790 = vst [vmem:[#allocation72_spill] sm:$0xff] %v6363_v57 }
 0x1ef   :  { %v6365_v17 = vpop.permute.xlu0 %1075 }
 0x1f0   :  { %10791 = vst [vmem:[#allocation73_spill] sm:$0xff] %v6365_v17 }
 0x1f2   :  { %1468 = vperm.xlu1 %5677, %v1286_v15   ;;  %v1292_v15 = vld [vmem:[#allocation2 + $0x1d2] sm:$0xff] }
 0x1f3   :  { %1488 = vperm.xlu2 %5678, %v1290_v24   ;;  %v1296_v24 = vld [vmem:[#allocation2 + $0x202] sm:$0xff] }
 0x1f4   :  { %v6367_v29 = vpop.permute.xlu1 %1065 }
 0x1f5   :  { %10792 = vst [vmem:[#allocation74_spill] sm:$0xff] %v6367_v29  ;;  %v6369_v39 = vpop.permute.xlu2 %1323  ;;  %1493 = vperm.xlu0 %5676, %v1291_v31   ;;  %v1297_v29 = vld [vmem:[#allocation2 + $0x212] sm:$0xff] }
 0x1f6   :  { %10793 = vst [vmem:[#allocation75_spill] sm:$0xff] %v6369_v39 }
 0x1f7   :  { %v6371_v47 = vpop.permute.xlu0 %1090 }
 0x1f8   :  { %10794 = vst [vmem:[#allocation76_spill] sm:$0xff] %v6371_v47 }
 0x1fa   :  { %1483 = vperm.xlu1 %5677, %v1289_v45   ;;  %v1295_v45 = vld [vmem:[#allocation2 + $0x1fa] sm:$0xff] }
 0x1fb   :  { %1503 = vperm.xlu2 %5678, %v1293_v56   ;;  %v1299_v56 = vld [vmem:[#allocation2 + $0x22a] sm:$0xff] }
 0x1fc   :  { %v6373_v63 = vpop.permute.xlu1 %1080 }
 0x1fd   :  { %10795 = vst [vmem:[#allocation77_spill] sm:$0xff] %v6373_v63  ;;  %v6375_v57 = vpop.permute.xlu2 %1338  ;;  %1508 = vperm.xlu0 %5676, %v1294_v4   ;;  %v1300_v63 = vld [vmem:[#allocation2 + $0x232] sm:$0xff] }
 0x1fe   :  { %10796 = vst [vmem:[#allocation78_spill] sm:$0xff] %v6375_v57 }
 0x1ff   :  { %v6377_v17 = vpop.permute.xlu0 %1105 }
 0x200   :  { %10797 = vst [vmem:[#allocation79_spill] sm:$0xff] %v6377_v17 }
 0x202   :  { %1498 = vperm.xlu1 %5677, %v1292_v15   ;;  %v1298_v15 = vld [vmem:[#allocation2 + $0x21a] sm:$0xff] }
 0x203   :  { %1518 = vperm.xlu2 %5678, %v1296_v24   ;;  %v1302_v24 = vld [vmem:[#allocation2 + $0x24a] sm:$0xff] }
 0x204   :  { %v6379_v31 = vpop.permute.xlu1 %1095 }
 0x205   :  { %10798 = vst [vmem:[#allocation80_spill] sm:$0xff] %v6379_v31  ;;  %v6381_v39 = vpop.permute.xlu2 %1353  ;;  %1523 = vperm.xlu0 %5676, %v1297_v29   ;;  %v1303_v31 = vld [vmem:[#allocation2 + $0x25a] sm:$0xff] }
 0x206   :  { %10799 = vst [vmem:[#allocation81_spill] sm:$0xff] %v6381_v39 }
 0x207   :  { %v6383_v47 = vpop.permute.xlu0 %1120 }
 0x208   :  { %10800 = vst [vmem:[#allocation82_spill] sm:$0xff] %v6383_v47 }
 0x20a   :  { %1513 = vperm.xlu1 %5677, %v1295_v45   ;;  %v1301_v45 = vld [vmem:[#allocation2 + $0x242] sm:$0xff] }
 0x20b   :  { %1533 = vperm.xlu2 %5678, %v1299_v56   ;;  %v1305_v56 = vld [vmem:[#allocation2 + $0x272] sm:$0xff] }
 0x20c   :  { %v6385_v4 = vpop.permute.xlu1 %1110 }
 0x20d   :  { %10801 = vst [vmem:[#allocation83_spill] sm:$0xff] %v6385_v4  ;;  %v6387_v57 = vpop.permute.xlu2 %1368  ;;  %1538 = vperm.xlu0 %5676, %v1300_v63   ;;  %v1306_v4 = vld [vmem:[#allocation2 + $0x27a] sm:$0xff] }
 0x20e   :  { %10802 = vst [vmem:[#allocation84_spill] sm:$0xff] %v6387_v57 }
 0x20f   :  { %v6389_v17 = vpop.permute.xlu0 %1328 }
 0x210   :  { %10803 = vst [vmem:[#allocation85_spill] sm:$0xff] %v6389_v17 }
 0x212   :  { %1528 = vperm.xlu1 %5677, %v1298_v15   ;;  %v1304_v15 = vld [vmem:[#allocation2 + $0x262] sm:$0xff] }
 0x213   :  { %1548 = vperm.xlu2 %5678, %v1302_v24   ;;  %v1308_v24 = vld [vmem:[#allocation2 + $0x292] sm:$0xff] }
 0x214   :  { %v6391_v29 = vpop.permute.xlu1 %1125 }
 0x215   :  { %10804 = vst [vmem:[#allocation86_spill] sm:$0xff] %v6391_v29  ;;  %v6393_v39 = vpop.permute.xlu2 %1383  ;;  %1553 = vperm.xlu0 %5676, %v1303_v31   ;;  %v1309_v29 = vld [vmem:[#allocation2 + $0x2a2] sm:$0xff] }
 0x216   :  { %10805 = vst [vmem:[#allocation87_spill] sm:$0xff] %v6393_v39 }
 0x217   :  { %v6395_v47 = vpop.permute.xlu0 %1343 }
 0x218   :  { %10806 = vst [vmem:[#allocation88_spill] sm:$0xff] %v6395_v47 }
 0x21a   :  { %1543 = vperm.xlu1 %5677, %v1301_v45   ;;  %v1307_v45 = vld [vmem:[#allocation2 + $0x28a] sm:$0xff] }
 0x21b   :  { %1563 = vperm.xlu2 %5678, %v1305_v56   ;;  %v1311_v56 = vld [vmem:[#allocation2 + $0x2ba] sm:$0xff] }
 0x21c   :  { %v6397_v63 = vpop.permute.xlu1 %1333 }
 0x21d   :  { %10807 = vst [vmem:[#allocation89_spill] sm:$0xff] %v6397_v63  ;;  %v6399_v57 = vpop.permute.xlu2 %1398  ;;  %1568 = vperm.xlu0 %5676, %v1306_v4   ;;  %v1312_v63 = vld [vmem:[#allocation2 + $0x2c2] sm:$0xff] }
 0x21e   :  { %10808 = vst [vmem:[#allocation90_spill] sm:$0xff] %v6399_v57 }
 0x21f   :  { %v6401_v17 = vpop.permute.xlu0 %1358 }
 0x220   :  { %10809 = vst [vmem:[#allocation91_spill] sm:$0xff] %v6401_v17 }
 0x222   :  { %1558 = vperm.xlu1 %5677, %v1304_v15   ;;  %v1310_v15 = vld [vmem:[#allocation2 + $0x2aa] sm:$0xff] }
 0x223   :  { %1578 = vperm.xlu2 %5678, %v1308_v24   ;;  %v1314_v24 = vld [vmem:[#allocation2 + $0x2da] sm:$0xff] }
 0x224   :  { %v6403_v31 = vpop.permute.xlu1 %1348 }
 0x225   :  { %10810 = vst [vmem:[#allocation92_spill] sm:$0xff] %v6403_v31  ;;  %v6405_v39 = vpop.permute.xlu2 %1413  ;;  %1583 = vperm.xlu0 %5676, %v1309_v29   ;;  %v1315_v31 = vld [vmem:[#allocation2 + $0x2ea] sm:$0xff] }
 0x226   :  { %10811 = vst [vmem:[#allocation93_spill] sm:$0xff] %v6405_v39 }
 0x227   :  { %v6407_v47 = vpop.permute.xlu0 %1373 }
 0x228   :  { %10812 = vst [vmem:[#allocation94_spill] sm:$0xff] %v6407_v47 }
 0x22a   :  { %1573 = vperm.xlu1 %5677, %v1307_v45   ;;  %v1313_v45 = vld [vmem:[#allocation2 + $0x2d2] sm:$0xff] }
 0x22b   :  { %1593 = vperm.xlu2 %5678, %v1311_v56   ;;  %v1317_v56 = vld [vmem:[#allocation2 + $0x302] sm:$0xff] }
 0x22c   :  { %v6409_v4 = vpop.permute.xlu1 %1363 }
 0x22d   :  { %10813 = vst [vmem:[#allocation95_spill] sm:$0xff] %v6409_v4  ;;  %v6411_v57 = vpop.permute.xlu2 %1428  ;;  %1598 = vperm.xlu0 %5676, %v1312_v63   ;;  %v1318_v4 = vld [vmem:[#allocation2 + $0x30a] sm:$0xff] }
 0x22e   :  { %10814 = vst [vmem:[#allocation96_spill] sm:$0xff] %v6411_v57 }
 0x22f   :  { %v6413_v17 = vpop.permute.xlu0 %1388 }
 0x230   :  { %10815 = vst [vmem:[#allocation97_spill] sm:$0xff] %v6413_v17 }
 0x232   :  { %1588 = vperm.xlu1 %5677, %v1310_v15   ;;  %v1316_v15 = vld [vmem:[#allocation2 + $0x2f2] sm:$0xff] }
 0x233   :  { %1608 = vperm.xlu2 %5678, %v1314_v24   ;;  %v1320_v24 = vld [vmem:[#allocation2 + $0x322] sm:$0xff] }
 0x234   :  { %v6415_v29 = vpop.permute.xlu1 %1378 }
 0x235   :  { %10816 = vst [vmem:[#allocation98_spill] sm:$0xff] %v6415_v29  ;;  %v6417_v39 = vpop.permute.xlu2 %1443  ;;  %1613 = vperm.xlu0 %5676, %v1315_v31   ;;  %v1770_v29 = vld [vmem:[#allocation2 + $0x18] sm:$0xff] }
 0x236   :  { %10817 = vst [vmem:[#allocation99_spill] sm:$0xff] %v6417_v39 }
 0x237   :  { %v6419_v47 = vpop.permute.xlu0 %1403 }
 0x238   :  { %10818 = vst [vmem:[#allocation100_spill] sm:$0xff] %v6419_v47 }
 0x23a   :  { %1603 = vperm.xlu1 %5677, %v1313_v45   ;;  %v1319_v45 = vld [vmem:[#allocation2 + $0x31a] sm:$0xff] }
 0x23b   :  { %1623 = vperm.xlu2 %5678, %v1317_v56   ;;  %v1772_v56 = vld [vmem:[#allocation2 + $0x30] sm:$0xff] }
 0x23c   :  { %v6421_v63 = vpop.permute.xlu1 %1393 }
 0x23d   :  { %10819 = vst [vmem:[#allocation101_spill] sm:$0xff] %v6421_v63  ;;  %v6423_v57 = vpop.permute.xlu2 %1458  ;;  %1628 = vperm.xlu0 %5676, %v1318_v4   ;;  %v1773_v63 = vld [vmem:[#allocation2 + $0x38] sm:$0xff] }
 0x23e   :  { %10820 = vst [vmem:[#allocation102_spill] sm:$0xff] %v6423_v57 }
 0x23f   :  { %v6425_v17 = vpop.permute.xlu0 %1418 }
 0x240   :  { %10821 = vst [vmem:[#allocation103_spill] sm:$0xff] %v6425_v17 }
 0x242   :  { %1618 = vperm.xlu1 %5677, %v1316_v15   ;;  %v1771_v15 = vld [vmem:[#allocation2 + $0x20] sm:$0xff] }
 0x243   :  { %1638 = vperm.xlu2 %5678, %v1320_v24   ;;  %v1775_v24 = vld [vmem:[#allocation2 + $0x50] sm:$0xff] }
 0x244   :  { %v6427_v31 = vpop.permute.xlu1 %1408 }
 0x245   :  { %10822 = vst [vmem:[#allocation104_spill] sm:$0xff] %v6427_v31  ;;  %v6429_v39 = vpop.permute.xlu2 %1473  ;;  %1836 = vperm.xlu0 %5676, %v1770_v29   ;;  %v1776_v31 = vld [vmem:[#allocation2 + $0x60] sm:$0xff] }
 0x246   :  { %10823 = vst [vmem:[#allocation105_spill] sm:$0xff] %v6429_v39 }
 0x247   :  { %v6431_v47 = vpop.permute.xlu0 %1433 }
 0x248   :  { %10824 = vst [vmem:[#allocation106_spill] sm:$0xff] %v6431_v47 }
 0x24a   :  { %1633 = vperm.xlu1 %5677, %v1319_v45   ;;  %v1774_v45 = vld [vmem:[#allocation2 + $0x48] sm:$0xff] }
 0x24b   :  { %1846 = vperm.xlu2 %5678, %v1772_v56   ;;  %v1778_v56 = vld [vmem:[#allocation2 + $0x78] sm:$0xff] }
 0x24c   :  { %v6433_v4 = vpop.permute.xlu1 %1423 }
 0x24d   :  { %10825 = vst [vmem:[#allocation107_spill] sm:$0xff] %v6433_v4  ;;  %v6435_v57 = vpop.permute.xlu2 %1488  ;;  %1851 = vperm.xlu0 %5676, %v1773_v63   ;;  %v1779_v4 = vld [vmem:[#allocation2 + $0x80] sm:$0xff] }
 0x24e   :  { %10826 = vst [vmem:[#allocation108_spill] sm:$0xff] %v6435_v57 }
 0x24f   :  { %v6437_v17 = vpop.permute.xlu0 %1448 }
 0x250   :  { %10827 = vst [vmem:[#allocation109_spill] sm:$0xff] %v6437_v17 }
 0x252   :  { %1841 = vperm.xlu1 %5677, %v1771_v15   ;;  %v1777_v15 = vld [vmem:[#allocation2 + $0x68] sm:$0xff] }
 0x253   :  { %1861 = vperm.xlu2 %5678, %v1775_v24   ;;  %v1781_v24 = vld [vmem:[#allocation2 + $0x98] sm:$0xff] }
 0x254   :  { %v6439_v29 = vpop.permute.xlu1 %1438 }
 0x255   :  { %10828 = vst [vmem:[#allocation110_spill] sm:$0xff] %v6439_v29  ;;  %v6441_v39 = vpop.permute.xlu2 %1503  ;;  %1866 = vperm.xlu0 %5676, %v1776_v31   ;;  %v1782_v29 = vld [vmem:[#allocation2 + $0xa8] sm:$0xff] }
 0x256   :  { %10829 = vst [vmem:[#allocation111_spill] sm:$0xff] %v6441_v39 }
 0x257   :  { %v6443_v47 = vpop.permute.xlu0 %1463 }
 0x258   :  { %10830 = vst [vmem:[#allocation112_spill] sm:$0xff] %v6443_v47 }
 0x25a   :  { %1856 = vperm.xlu1 %5677, %v1774_v45   ;;  %v1780_v45 = vld [vmem:[#allocation2 + $0x90] sm:$0xff] }
 0x25b   :  { %1876 = vperm.xlu2 %5678, %v1778_v56   ;;  %v1784_v56 = vld [vmem:[#allocation2 + $0xc0] sm:$0xff] }
 0x25c   :  { %v6445_v63 = vpop.permute.xlu1 %1453 }
 0x25d   :  { %10831 = vst [vmem:[#allocation113_spill] sm:$0xff] %v6445_v63  ;;  %v6447_v57 = vpop.permute.xlu2 %1518  ;;  %1881 = vperm.xlu0 %5676, %v1779_v4   ;;  %v1785_v63 = vld [vmem:[#allocation2 + $0xc8] sm:$0xff] }
 0x25e   :  { %10832 = vst [vmem:[#allocation114_spill] sm:$0xff] %v6447_v57 }
 0x25f   :  { %v6449_v17 = vpop.permute.xlu0 %1478 }
 0x260   :  { %10833 = vst [vmem:[#allocation115_spill] sm:$0xff] %v6449_v17 }
 0x262   :  { %1871 = vperm.xlu1 %5677, %v1777_v15   ;;  %v1783_v15 = vld [vmem:[#allocation2 + $0xb0] sm:$0xff] }
 0x263   :  { %1891 = vperm.xlu2 %5678, %v1781_v24   ;;  %v1787_v24 = vld [vmem:[#allocation2 + $0xe0] sm:$0xff] }
 0x264   :  { %v6451_v31 = vpop.permute.xlu1 %1468 }
 0x265   :  { %10834 = vst [vmem:[#allocation116_spill] sm:$0xff] %v6451_v31  ;;  %v6453_v39 = vpop.permute.xlu2 %1533  ;;  %1896 = vperm.xlu0 %5676, %v1782_v29   ;;  %v1788_v31 = vld [vmem:[#allocation2 + $0xf0] sm:$0xff] }
 0x266   :  { %10835 = vst [vmem:[#allocation117_spill] sm:$0xff] %v6453_v39 }
 0x267   :  { %v6455_v47 = vpop.permute.xlu0 %1493 }
 0x268   :  { %10836 = vst [vmem:[#allocation118_spill] sm:$0xff] %v6455_v47 }
 0x26a   :  { %1886 = vperm.xlu1 %5677, %v1780_v45   ;;  %v1786_v45 = vld [vmem:[#allocation2 + $0xd8] sm:$0xff] }
 0x26b   :  { %1906 = vperm.xlu2 %5678, %v1784_v56   ;;  %v1790_v56 = vld [vmem:[#allocation2 + $0x108] sm:$0xff] }
 0x26c   :  { %v6457_v4 = vpop.permute.xlu1 %1483 }
 0x26d   :  { %10837 = vst [vmem:[#allocation119_spill] sm:$0xff] %v6457_v4  ;;  %v6459_v57 = vpop.permute.xlu2 %1548  ;;  %1911 = vperm.xlu0 %5676, %v1785_v63   ;;  %v48_v63 = vld [vmem:[%s10659_s0 + $0xf0] sm:$0xff] }
 0x26e   :  { %10838 = vst [vmem:[#allocation120_spill] sm:$0xff] %v6459_v57  ;;  %v1794_v57 = vld [vmem:[#allocation2 + $0x138] sm:$0xff] }
 0x26f   :  { %v6461_v17 = vpop.permute.xlu0 %1508  ;;  %193 = vst.msk [vmem:[#allocation2 + $0x181] sm:$0xff] %vm82_vm0, %v48_v63 }
 0x270   :  { %10839 = vst [vmem:[#allocation121_spill] sm:$0xff] %v6461_v17  ;;  %v49_v17 = vld [vmem:[%s10659_s0 + $0xf8] sm:$0xff] }
 0x271   :  { %194 = vst.msk [vmem:[#allocation2 + $0x189] sm:$0xff] %vm82_vm0, %v49_v17  ;;  %v1796_v17 = vld [vmem:[#allocation2 + $0x150] sm:$0xff] }
 0x272   :  { %1901 = vperm.xlu1 %5677, %v1783_v15   ;;  %v1791_v15 = vld [vmem:[#allocation2 + $0x110] sm:$0xff] }
 0x273   :  { %1921 = vperm.xlu2 %5678, %v1787_v24  }
 0x274   :  { %v6463_v29 = vpop.permute.xlu1 %1498 }
 0x275   :  { %10840 = vst [vmem:[#allocation122_spill] sm:$0xff] %v6463_v29  ;;  %v6465_v39 = vpop.permute.xlu2 %1563  ;;  %1926 = vperm.xlu0 %5676, %v1788_v31   ;;  %v1793_v29 = vld [vmem:[#allocation2 + $0x128] sm:$0xff] }
 0x276   :  { %10841 = vst [vmem:[#allocation123_spill] sm:$0xff] %v6465_v39 }
 0x277   :  { %v6467_v47 = vpop.permute.xlu0 %1523 }
 0x278   :  { %10842 = vst [vmem:[#allocation124_spill] sm:$0xff] %v6467_v47  ;;  %v1789_v47 = vld [vmem:[#allocation2 + $0xf8] sm:$0xff] }
 0x27a   :  { %1916 = vperm.xlu1 %5677, %v1786_v45  }
 0x27b   :  { %1936 = vperm.xlu2 %5678, %v1790_v56   ;;  %v1792_v56 = vld [vmem:[#allocation2 + $0x120] sm:$0xff] }
 0x27c   :  { %v6477_v31 = vpop.permute.xlu1 %1513 }
 0x27d   :  { %10843 = vst [vmem:[#allocation125_spill] sm:$0xff] %v6477_v31  ;;  %v6479_v24 = vpop.permute.xlu2 %1578  ;;  %1941 = vperm.xlu0 %5676, %v1791_v15   ;;  %v1797_v31 = vld [vmem:[#allocation2 + $0x158] sm:$0xff] }
 0x27e   :  { %10844 = vst [vmem:[#allocation126_spill] sm:$0xff] %v6479_v24 }
 0x27f   :  { %v6481_v39 = vpop.permute.xlu0 %1538 }
 0x280   :  { %10845 = vst [vmem:[#allocation127_spill] sm:$0xff] %v6481_v39 }
 0x282   :  { %1931 = vperm.xlu1 %5677, %v1789_v47   ;;  %v1795_v47 = vld [vmem:[#allocation2 + $0x140] sm:$0xff] }
 0x283   :  { %1951 = vperm.xlu2 %5678, %v1793_v29   ;;  %v1799_v29 = vld [vmem:[#allocation2 + $0x170] sm:$0xff] }
 0x284   :  { %v6483_v4 = vpop.permute.xlu1 %1528 }
 0x285   :  { %10846 = vst [vmem:[#allocation128_spill] sm:$0xff] %v6483_v4  ;;  %v6485_v45 = vpop.permute.xlu2 %1593  ;;  %1956 = vperm.xlu0 %5676, %v1794_v57   ;;  %v1800_v4 = vld [vmem:[#allocation2 + $0x180] sm:$0xff] }
 0x286   :  { %10847 = vst [vmem:[#allocation129_spill] sm:$0xff] %v6485_v45 }
 0x287   :  { %v6487_v63 = vpop.permute.xlu0 %1553 }
 0x288   :  { %10848 = vst [vmem:[#allocation130_spill] sm:$0xff] %v6487_v63 }
 0x28a   :  { %1946 = vperm.xlu1 %5677, %v1792_v56   ;;  %v1798_v56 = vld [vmem:[#allocation2 + $0x168] sm:$0xff] }
 0x28b   :  { %1966 = vperm.xlu2 %5678, %v1796_v17   ;;  %v1802_v17 = vld [vmem:[#allocation2 + $0x1c8] sm:$0xff] }
 0x28c   :  { %v6489_v15 = vpop.permute.xlu1 %1543 }
 0x28d   :  { %10849 = vst [vmem:[#allocation131_spill] sm:$0xff] %v6489_v15  ;;  %v6491_v24 = vpop.permute.xlu2 %1608  ;;  %1971 = vperm.xlu0 %5676, %v1797_v31   ;;  %v1803_v15 = vld [vmem:[#allocation2 + $0x1d0] sm:$0xff] }
 0x28e   :  { %10850 = vst [vmem:[#allocation132_spill] sm:$0xff] %v6491_v24 }
 0x28f   :  { %v6493_v39 = vpop.permute.xlu0 %1568 }
 0x290   :  { %10851 = vst [vmem:[#allocation133_spill] sm:$0xff] %v6493_v39 }
 0x292   :  { %1961 = vperm.xlu1 %5677, %v1795_v47   ;;  %v1801_v47 = vld [vmem:[#allocation2 + $0x188] sm:$0xff] }
 0x293   :  { %1981 = vperm.xlu2 %5678, %v1799_v29   ;;  %v1805_v29 = vld [vmem:[#allocation2 + $0x1e8] sm:$0xff] }
 0x294   :  { %v6495_v57 = vpop.permute.xlu1 %1558 }
 0x295   :  { %10852 = vst [vmem:[#allocation134_spill] sm:$0xff] %v6495_v57  ;;  %v6497_v45 = vpop.permute.xlu2 %1623  ;;  %1986 = vperm.xlu0 %5676, %v1800_v4   ;;  %v1806_v57 = vld [vmem:[#allocation2 + $0x1f8] sm:$0xff] }
 0x296   :  { %10853 = vst [vmem:[#allocation135_spill] sm:$0xff] %v6497_v45 }
 0x297   :  { %v6499_v63 = vpop.permute.xlu0 %1583 }
 0x298   :  { %10854 = vst [vmem:[#allocation136_spill] sm:$0xff] %v6499_v63 }
 0x29a   :  { %1976 = vperm.xlu1 %5677, %v1798_v56   ;;  %v1804_v56 = vld [vmem:[#allocation2 + $0x1e0] sm:$0xff] }
 0x29b   :  { %1996 = vperm.xlu2 %5678, %v1802_v17   ;;  %v1808_v17 = vld [vmem:[#allocation2 + $0x210] sm:$0xff] }
 0x29c   :  { %v6501_v31 = vpop.permute.xlu1 %1573 }
 0x29d   :  { %10855 = vst [vmem:[#allocation137_spill] sm:$0xff] %v6501_v31  ;;  %v6503_v24 = vpop.permute.xlu2 %1638  ;;  %2001 = vperm.xlu0 %5676, %v1803_v15   ;;  %v1809_v31 = vld [vmem:[#allocation2 + $0x218] sm:$0xff] }
 0x29e   :  { %10856 = vst [vmem:[#allocation138_spill] sm:$0xff] %v6503_v24 }
 0x29f   :  { %v6505_v39 = vpop.permute.xlu0 %1598 }
 0x2a0   :  { %10857 = vst [vmem:[#allocation139_spill] sm:$0xff] %v6505_v39 }
 0x2a2   :  { %1991 = vperm.xlu1 %5677, %v1801_v47   ;;  %v1807_v47 = vld [vmem:[#allocation2 + $0x200] sm:$0xff] }
 0x2a3   :  { %2011 = vperm.xlu2 %5678, %v1805_v29   ;;  %v1811_v29 = vld [vmem:[#allocation2 + $0x230] sm:$0xff] }
 0x2a4   :  { %v6507_v4 = vpop.permute.xlu1 %1588 }
 0x2a5   :  { %10858 = vst [vmem:[#allocation140_spill] sm:$0xff] %v6507_v4  ;;  %v6509_v45 = vpop.permute.xlu2 %1846  ;;  %2016 = vperm.xlu0 %5676, %v1806_v57   ;;  %v1812_v4 = vld [vmem:[#allocation2 + $0x240] sm:$0xff] }
 0x2a6   :  { %10859 = vst [vmem:[#allocation141_spill] sm:$0xff] %v6509_v45 }
 0x2a7   :  { %v6511_v63 = vpop.permute.xlu0 %1613 }
 0x2a8   :  { %10860 = vst [vmem:[#allocation142_spill] sm:$0xff] %v6511_v63 }
 0x2aa   :  { %2006 = vperm.xlu1 %5677, %v1804_v56   ;;  %v1810_v56 = vld [vmem:[#allocation2 + $0x228] sm:$0xff] }
 0x2ab   :  { %2026 = vperm.xlu2 %5678, %v1808_v17   ;;  %v1814_v17 = vld [vmem:[#allocation2 + $0x258] sm:$0xff] }
 0x2ac   :  { %v6513_v15 = vpop.permute.xlu1 %1603 }
 0x2ad   :  { %10861 = vst [vmem:[#allocation143_spill] sm:$0xff] %v6513_v15  ;;  %v6515_v24 = vpop.permute.xlu2 %1861  ;;  %2031 = vperm.xlu0 %5676, %v1809_v31   ;;  %v1815_v15 = vld [vmem:[#allocation2 + $0x260] sm:$0xff] }
 0x2ae   :  { %10862 = vst [vmem:[#allocation144_spill] sm:$0xff] %v6515_v24 }
 0x2af   :  { %v6517_v39 = vpop.permute.xlu0 %1628 }
 0x2b0   :  { %10863 = vst [vmem:[#allocation145_spill] sm:$0xff] %v6517_v39 }
 0x2b2   :  { %2021 = vperm.xlu1 %5677, %v1807_v47   ;;  %v1813_v47 = vld [vmem:[#allocation2 + $0x248] sm:$0xff] }
 0x2b3   :  { %2041 = vperm.xlu2 %5678, %v1811_v29   ;;  %v1817_v29 = vld [vmem:[#allocation2 + $0x278] sm:$0xff] }
 0x2b4   :  { %v6519_v57 = vpop.permute.xlu1 %1618 }
 0x2b5   :  { %10864 = vst [vmem:[#allocation146_spill] sm:$0xff] %v6519_v57  ;;  %v6521_v45 = vpop.permute.xlu2 %1876  ;;  %2046 = vperm.xlu0 %5676, %v1812_v4   ;;  %v1818_v57 = vld [vmem:[#allocation2 + $0x288] sm:$0xff] }
 0x2b6   :  { %10865 = vst [vmem:[#allocation147_spill] sm:$0xff] %v6521_v45 }
 0x2b7   :  { %v6523_v63 = vpop.permute.xlu0 %1836 }
 0x2b8   :  { %10866 = vst [vmem:[#allocation148_spill] sm:$0xff] %v6523_v63 }
 0x2ba   :  { %2036 = vperm.xlu1 %5677, %v1810_v56   ;;  %v1816_v56 = vld [vmem:[#allocation2 + $0x270] sm:$0xff] }
 0x2bb   :  { %2056 = vperm.xlu2 %5678, %v1814_v17   ;;  %v1820_v17 = vld [vmem:[#allocation2 + $0x2a0] sm:$0xff] }
 0x2bc   :  { %v6525_v31 = vpop.permute.xlu1 %1633 }
 0x2bd   :  { %10867 = vst [vmem:[#allocation149_spill] sm:$0xff] %v6525_v31  ;;  %v6527_v24 = vpop.permute.xlu2 %1891  ;;  %2061 = vperm.xlu0 %5676, %v1815_v15   ;;  %v80_v15 = vld [vmem:[%s10659_s0 + $0x1f0] sm:$0xff] }
 0x2be   :  { %10868 = vst [vmem:[#allocation150_spill] sm:$0xff] %v6527_v24  ;;  %v1821_v24 = vld [vmem:[#allocation2 + $0x2a8] sm:$0xff] }
 0x2bf   :  { %v6529_v39 = vpop.permute.xlu0 %1851  ;;  %225 = vst.msk [vmem:[#allocation2 + $0x331] sm:$0xff] %vm82_vm0, %v80_v15  ;;  %v1822_v15 = vld [vmem:[#allocation2 + $0x2b8] sm:$0xff] }
 0x2c0   :  { %10869 = vst [vmem:[#allocation151_spill] sm:$0xff] %v6529_v39  ;;  %v1819_v39 = vld [vmem:[#allocation2 + $0x290] sm:$0xff] }
 0x2c2   :  { %2051 = vperm.xlu1 %5677, %v1813_v47  }
 0x2c3   :  { %2071 = vperm.xlu2 %5678, %v1817_v29  }
 0x2c4   :  { %v6531_v4 = vpop.permute.xlu1 %1841 }
 0x2c5   :  { %10870 = vst [vmem:[#allocation152_spill] sm:$0xff] %v6531_v4  ;;  %v6533_v45 = vpop.permute.xlu2 %1906  ;;  %2076 = vperm.xlu0 %5676, %v1818_v57   ;;  %v1824_v4 = vld [vmem:[#allocation2 + $0x2d0] sm:$0xff] }
 0x2c6   :  { %10871 = vst [vmem:[#allocation153_spill] sm:$0xff] %v6533_v45  ;;  %v1823_v45 = vld [vmem:[#allocation2 + $0x2c0] sm:$0xff] }
 0x2c7   :  { %v6535_v63 = vpop.permute.xlu0 %1866 }
 0x2c8   :  { %10872 = vst [vmem:[#allocation154_spill] sm:$0xff] %v6535_v63  ;;  %v81_v63 = vld [vmem:[%s10659_s0 + $0x1f8] sm:$0xff] }
 0x2c9   :  { %226 = vst.msk [vmem:[#allocation2 + $0x339] sm:$0xff] %vm82_vm0, %v81_v63 }
 0x2ca   :  { %2066 = vperm.xlu1 %5677, %v1816_v56  }
 0x2cb   :  { %2086 = vperm.xlu2 %5678, %v1820_v17  }
 0x2cc   :  { %v6541_v47 = vpop.permute.xlu1 %1856 }
 0x2cd   :  { %10873 = vst [vmem:[#allocation155_spill] sm:$0xff] %v6541_v47  ;;  %v6543_v29 = vpop.permute.xlu2 %1921  ;;  %2091 = vperm.xlu0 %5676, %v1821_v24  }
 0x2ce   :  { %10874 = vst [vmem:[#allocation156_spill] sm:$0xff] %v6543_v29  ;;  %v1826_v29 = vld [vmem:[#allocation2 + $0x2e8] sm:$0xff] }
 0x2cf   :  { %v6545_v57 = vpop.permute.xlu0 %1881 }
 0x2d0   :  { %10875 = vst [vmem:[#allocation157_spill] sm:$0xff] %v6545_v57  ;;  %v1827_v57 = vld [vmem:[#allocation2 + $0x2f0] sm:$0xff] }
 0x2d2   :  { %2081 = vperm.xlu1 %5677, %v1819_v39   ;;  %v1825_v39 = vld [vmem:[#allocation2 + $0x2d8] sm:$0xff] }
 0x2d3   :  { %2101 = vperm.xlu2 %5678, %v1823_v45   ;;  %v1829_v45 = vld [vmem:[#allocation2 + $0x308] sm:$0xff] }
 0x2d4   :  { %v6551_v56 = vpop.permute.xlu1 %1871 }
 0x2d5   :  { %10876 = vst [vmem:[#allocation158_spill] sm:$0xff] %v6551_v56  ;;  %v6553_v17 = vpop.permute.xlu2 %1936  ;;  %2106 = vperm.xlu0 %5676, %v1824_v4   ;;  %v1830_v56 = vld [vmem:[#allocation2 + $0x318] sm:$0xff] }
 0x2d6   :  { %10877 = vst [vmem:[#allocation159_spill] sm:$0xff] %v6553_v17 }
 0x2d7   :  { %v6555_v24 = vpop.permute.xlu0 %1896 }
 0x2d8   :  { %10878 = vst [vmem:[#allocation160_spill] sm:$0xff] %v6555_v24 }
 0x2da   :  { %2096 = vperm.xlu1 %5677, %v1822_v15   ;;  %v1828_v15 = vld [vmem:[#allocation2 + $0x300] sm:$0xff] }
 0x2db   :  { %2116 = vperm.xlu2 %5678, %v1826_v29   ;;  %v1832_v29 = vld [vmem:[#allocation2 + $0x330] sm:$0xff] }
 0x2dc   :  { %v6557_v47 = vpop.permute.xlu1 %1886 }
 0x2dd   :  { %10879 = vst [vmem:[#allocation161_spill] sm:$0xff] %v6557_v47  ;;  %v6559_v31 = vpop.permute.xlu2 %1951  ;;  %2121 = vperm.xlu0 %5676, %v1827_v57   ;;  %v1833_v47 = vld [vmem:[#allocation2 + $0x338] sm:$0xff] }
 0x2de   :  { %10880 = vst [vmem:[#allocation162_spill] sm:$0xff] %v6559_v31 }
 0x2df   :  { %v6561_v63 = vpop.permute.xlu0 %1911 }
 0x2e0   :  { %10881 = vst [vmem:[#allocation163_spill] sm:$0xff] %v6561_v63 }
 0x2e2   :  { %2111 = vperm.xlu1 %5677, %v1825_v39   ;;  %v1831_v39 = vld [vmem:[#allocation2 + $0x320] sm:$0xff] }
 0x2e3   :  { %2131 = vperm.xlu2 %5678, %v1829_v45   ;;  %v2284_v45 = vld [vmem:[#allocation2 + $0x21] sm:$0xff] }
 0x2e4   :  { %v6563_v4 = vpop.permute.xlu1 %1901 }
 0x2e5   :  { %10882 = vst [vmem:[#allocation164_spill] sm:$0xff] %v6563_v4  ;;  %v6565_v17 = vpop.permute.xlu2 %1966  ;;  %2136 = vperm.xlu0 %5676, %v1830_v56   ;;  %v2285_v4 = vld [vmem:[#allocation2 + $0x31] sm:$0xff] }
 0x2e6   :  { %10883 = vst [vmem:[#allocation165_spill] sm:$0xff] %v6565_v17 }
 0x2e7   :  { %v6567_v24 = vpop.permute.xlu0 %1926 }
 0x2e8   :  { %10884 = vst [vmem:[#allocation166_spill] sm:$0xff] %v6567_v24 }
 0x2ea   :  { %2126 = vperm.xlu1 %5677, %v1828_v15   ;;  %v2283_v15 = vld [vmem:[#allocation2 + $0x19] sm:$0xff] }
 0x2eb   :  { %2146 = vperm.xlu2 %5678, %v1832_v29   ;;  %v2287_v29 = vld [vmem:[#allocation2 + $0x49] sm:$0xff] }
 0x2ec   :  { %v6569_v57 = vpop.permute.xlu1 %1916 }
 0x2ed   :  { %10885 = vst [vmem:[#allocation167_spill] sm:$0xff] %v6569_v57  ;;  %v6571_v31 = vpop.permute.xlu2 %1981  ;;  %2151 = vperm.xlu0 %5676, %v1833_v47   ;;  %v2288_v57 = vld [vmem:[#allocation2 + $0x51] sm:$0xff] }
 0x2ee   :  { %10886 = vst [vmem:[#allocation168_spill] sm:$0xff] %v6571_v31 }
 0x2ef   :  { %v6573_v63 = vpop.permute.xlu0 %1941 }
 0x2f0   :  { %10887 = vst [vmem:[#allocation169_spill] sm:$0xff] %v6573_v63 }
 0x2f2   :  { %2141 = vperm.xlu1 %5677, %v1831_v39   ;;  %v2286_v39 = vld [vmem:[#allocation2 + $0x39] sm:$0xff] }
 0x2f3   :  { %2354 = vperm.xlu2 %5678, %v2284_v45   ;;  %v2290_v45 = vld [vmem:[#allocation2 + $0x69] sm:$0xff] }
 0x2f4   :  { %v6575_v56 = vpop.permute.xlu1 %1931 }
 0x2f5   :  { %10888 = vst [vmem:[#allocation170_spill] sm:$0xff] %v6575_v56  ;;  %v6577_v17 = vpop.permute.xlu2 %1996  ;;  %2359 = vperm.xlu0 %5676, %v2285_v4   ;;  %v2291_v56 = vld [vmem:[#allocation2 + $0x79] sm:$0xff] }
 0x2f6   :  { %10889 = vst [vmem:[#allocation171_spill] sm:$0xff] %v6577_v17 }
 0x2f7   :  { %v6579_v24 = vpop.permute.xlu0 %1956 }
 0x2f8   :  { %10890 = vst [vmem:[#allocation172_spill] sm:$0xff] %v6579_v24 }
 0x2fa   :  { %2349 = vperm.xlu1 %5677, %v2283_v15   ;;  %v2289_v15 = vld [vmem:[#allocation2 + $0x61] sm:$0xff] }
 0x2fb   :  { %2369 = vperm.xlu2 %5678, %v2287_v29   ;;  %v2293_v29 = vld [vmem:[#allocation2 + $0x91] sm:$0xff] }
 0x2fc   :  { %v6581_v47 = vpop.permute.xlu1 %1946 }
 0x2fd   :  { %10891 = vst [vmem:[#allocation173_spill] sm:$0xff] %v6581_v47  ;;  %v6583_v31 = vpop.permute.xlu2 %2011  ;;  %2374 = vperm.xlu0 %5676, %v2288_v57   ;;  %v2294_v47 = vld [vmem:[#allocation2 + $0x99] sm:$0xff] }
 0x2fe   :  { %10892 = vst [vmem:[#allocation174_spill] sm:$0xff] %v6583_v31 }
 0x2ff   :  { %v6585_v63 = vpop.permute.xlu0 %1971 }
 0x300   :  { %10893 = vst [vmem:[#allocation175_spill] sm:$0xff] %v6585_v63 }
 0x302   :  { %2364 = vperm.xlu1 %5677, %v2286_v39   ;;  %v2292_v39 = vld [vmem:[#allocation2 + $0x81] sm:$0xff] }
 0x303   :  { %2384 = vperm.xlu2 %5678, %v2290_v45   ;;  %v2296_v45 = vld [vmem:[#allocation2 + $0xb1] sm:$0xff] }
 0x304   :  { %v6587_v4 = vpop.permute.xlu1 %1961 }
 0x305   :  { %10894 = vst [vmem:[#allocation176_spill] sm:$0xff] %v6587_v4  ;;  %v6589_v17 = vpop.permute.xlu2 %2026  ;;  %2389 = vperm.xlu0 %5676, %v2291_v56   ;;  %v2297_v4 = vld [vmem:[#allocation2 + $0xc1] sm:$0xff] }
 0x306   :  { %10895 = vst [vmem:[#allocation177_spill] sm:$0xff] %v6589_v17 }
 0x307   :  { %v6591_v24 = vpop.permute.xlu0 %1986 }
 0x308   :  { %10896 = vst [vmem:[#allocation178_spill] sm:$0xff] %v6591_v24 }
 0x30a   :  { %2379 = vperm.xlu1 %5677, %v2289_v15   ;;  %v2295_v15 = vld [vmem:[#allocation2 + $0xa9] sm:$0xff] }
 0x30b   :  { %2399 = vperm.xlu2 %5678, %v2293_v29   ;;  %v2299_v29 = vld [vmem:[#allocation2 + $0xd9] sm:$0xff] }
 0x30c   :  { %v6593_v57 = vpop.permute.xlu1 %1976 }
 0x30d   :  { %10897 = vst [vmem:[#allocation179_spill] sm:$0xff] %v6593_v57  ;;  %v6595_v31 = vpop.permute.xlu2 %2041  ;;  %2404 = vperm.xlu0 %5676, %v2294_v47   ;;  %v2300_v57 = vld [vmem:[#allocation2 + $0xe1] sm:$0xff] }
 0x30e   :  { %10898 = vst [vmem:[#allocation180_spill] sm:$0xff] %v6595_v31 }
 0x30f   :  { %v6597_v63 = vpop.permute.xlu0 %2001 }
 0x310   :  { %10899 = vst [vmem:[#allocation181_spill] sm:$0xff] %v6597_v63 }
 0x312   :  { %2394 = vperm.xlu1 %5677, %v2292_v39   ;;  %v2298_v39 = vld [vmem:[#allocation2 + $0xc9] sm:$0xff] }
 0x313   :  { %2414 = vperm.xlu2 %5678, %v2296_v45   ;;  %v2302_v45 = vld [vmem:[#allocation2 + $0xf9] sm:$0xff] }
 0x314   :  { %v6599_v56 = vpop.permute.xlu1 %1991 }
 0x315   :  { %10900 = vst [vmem:[#allocation182_spill] sm:$0xff] %v6599_v56  ;;  %v6601_v17 = vpop.permute.xlu2 %2056  ;;  %2419 = vperm.xlu0 %5676, %v2297_v4   ;;  %v2303_v56 = vld [vmem:[#allocation2 + $0x109] sm:$0xff] }
 0x316   :  { %10901 = vst [vmem:[#allocation183_spill] sm:$0xff] %v6601_v17 }
 0x317   :  { %v6603_v24 = vpop.permute.xlu0 %2016 }
 0x318   :  { %10902 = vst [vmem:[#allocation184_spill] sm:$0xff] %v6603_v24 }
 0x31a   :  { %2409 = vperm.xlu1 %5677, %v2295_v15   ;;  %v2301_v15 = vld [vmem:[#allocation2 + $0xf1] sm:$0xff] }
 0x31b   :  { %2429 = vperm.xlu2 %5678, %v2299_v29   ;;  %v2305_v29 = vld [vmem:[#allocation2 + $0x121] sm:$0xff] }
 0x31c   :  { %v6605_v47 = vpop.permute.xlu1 %2006 }
 0x31d   :  { %10903 = vst [vmem:[#allocation185_spill] sm:$0xff] %v6605_v47  ;;  %v6607_v31 = vpop.permute.xlu2 %2071  ;;  %2434 = vperm.xlu0 %5676, %v2300_v57   ;;  %v2306_v47 = vld [vmem:[#allocation2 + $0x129] sm:$0xff] }
 0x31e   :  { %10904 = vst [vmem:[#allocation186_spill] sm:$0xff] %v6607_v31 }
 0x31f   :  { %v6609_v63 = vpop.permute.xlu0 %2031 }
 0x320   :  { %10905 = vst [vmem:[#allocation187_spill] sm:$0xff] %v6609_v63 }
 0x322   :  { %2424 = vperm.xlu1 %5677, %v2298_v39   ;;  %v2304_v39 = vld [vmem:[#allocation2 + $0x111] sm:$0xff] }
 0x323   :  { %2444 = vperm.xlu2 %5678, %v2302_v45   ;;  %v2308_v45 = vld [vmem:[#allocation2 + $0x141] sm:$0xff] }
 0x324   :  { %v6611_v4 = vpop.permute.xlu1 %2021 }
 0x325   :  { %10906 = vst [vmem:[#allocation188_spill] sm:$0xff] %v6611_v4  ;;  %v6613_v17 = vpop.permute.xlu2 %2086  ;;  %2449 = vperm.xlu0 %5676, %v2303_v56   ;;  %v2309_v4 = vld [vmem:[#allocation2 + $0x151] sm:$0xff] }
 0x326   :  { %10907 = vst [vmem:[#allocation189_spill] sm:$0xff] %v6613_v17 }
 0x327   :  { %v6615_v24 = vpop.permute.xlu0 %2046 }
 0x328   :  { %10908 = vst [vmem:[#allocation190_spill] sm:$0xff] %v6615_v24 }
 0x32a   :  { %2439 = vperm.xlu1 %5677, %v2301_v15   ;;  %v2307_v15 = vld [vmem:[#allocation2 + $0x139] sm:$0xff] }
 0x32b   :  { %2459 = vperm.xlu2 %5678, %v2305_v29   ;;  %v2311_v29 = vld [vmem:[#allocation2 + $0x169] sm:$0xff] }
 0x32c   :  { %v6617_v57 = vpop.permute.xlu1 %2036 }
 0x32d   :  { %10909 = vst [vmem:[#allocation191_spill] sm:$0xff] %v6617_v57  ;;  %v6619_v31 = vpop.permute.xlu2 %2101  ;;  %2464 = vperm.xlu0 %5676, %v2306_v47   ;;  %v2312_v57 = vld [vmem:[#allocation2 + $0x171] sm:$0xff] }
 0x32e   :  { %10910 = vst [vmem:[#allocation192_spill] sm:$0xff] %v6619_v31 }
 0x32f   :  { %v6621_v63 = vpop.permute.xlu0 %2061 }
 0x330   :  { %10911 = vst [vmem:[#allocation193_spill] sm:$0xff] %v6621_v63 }
 0x332   :  { %2454 = vperm.xlu1 %5677, %v2304_v39   ;;  %v2310_v39 = vld [vmem:[#allocation2 + $0x159] sm:$0xff] }
 0x333   :  { %2474 = vperm.xlu2 %5678, %v2308_v45   ;;  %v2314_v45 = vld [vmem:[#allocation2 + $0x189] sm:$0xff] }
 0x334   :  { %v6623_v56 = vpop.permute.xlu1 %2051 }
 0x335   :  { %10912 = vst [vmem:[#allocation194_spill] sm:$0xff] %v6623_v56  ;;  %v6625_v17 = vpop.permute.xlu2 %2116  ;;  %2479 = vperm.xlu0 %5676, %v2309_v4   ;;  %v2315_v56 = vld [vmem:[#allocation2 + $0x1c9] sm:$0xff] }
 0x336   :  { %10913 = vst [vmem:[#allocation195_spill] sm:$0xff] %v6625_v17 }
 0x337   :  { %v6627_v24 = vpop.permute.xlu0 %2076 }
 0x338   :  { %10914 = vst [vmem:[#allocation196_spill] sm:$0xff] %v6627_v24 }
 0x33a   :  { %2469 = vperm.xlu1 %5677, %v2307_v15   ;;  %v2313_v15 = vld [vmem:[#allocation2 + $0x181] sm:$0xff] }
 0x33b   :  { %2489 = vperm.xlu2 %5678, %v2311_v29   ;;  %v2317_v29 = vld [vmem:[#allocation2 + $0x1e1] sm:$0xff] }
 0x33c   :  { %v6629_v47 = vpop.permute.xlu1 %2066 }
 0x33d   :  { %10915 = vst [vmem:[#allocation197_spill] sm:$0xff] %v6629_v47  ;;  %v6631_v31 = vpop.permute.xlu2 %2131  ;;  %2494 = vperm.xlu0 %5676, %v2312_v57   ;;  %v2318_v47 = vld [vmem:[#allocation2 + $0x1e9] sm:$0xff] }
 0x33e   :  { %10916 = vst [vmem:[#allocation198_spill] sm:$0xff] %v6631_v31 }
 0x33f   :  { %v6633_v63 = vpop.permute.xlu0 %2091 }
 0x340   :  { %10917 = vst [vmem:[#allocation199_spill] sm:$0xff] %v6633_v63 }
 0x342   :  { %2484 = vperm.xlu1 %5677, %v2310_v39   ;;  %v2316_v39 = vld [vmem:[#allocation2 + $0x1d1] sm:$0xff] }
 0x343   :  { %2504 = vperm.xlu2 %5678, %v2314_v45   ;;  %v2320_v45 = vld [vmem:[#allocation2 + $0x201] sm:$0xff] }
 0x344   :  { %v6635_v4 = vpop.permute.xlu1 %2081 }
 0x345   :  { %10918 = vst [vmem:[#allocation200_spill] sm:$0xff] %v6635_v4  ;;  %v6637_v17 = vpop.permute.xlu2 %2146  ;;  %2509 = vperm.xlu0 %5676, %v2315_v56   ;;  %v2321_v4 = vld [vmem:[#allocation2 + $0x211] sm:$0xff] }
 0x346   :  { %10919 = vst [vmem:[#allocation201_spill] sm:$0xff] %v6637_v17 }
 0x347   :  { %v6639_v24 = vpop.permute.xlu0 %2106 }
 0x348   :  { %10920 = vst [vmem:[#allocation202_spill] sm:$0xff] %v6639_v24 }
 0x34a   :  { %2499 = vperm.xlu1 %5677, %v2313_v15   ;;  %v2319_v15 = vld [vmem:[#allocation2 + $0x1f9] sm:$0xff] }
 0x34b   :  { %2519 = vperm.xlu2 %5678, %v2317_v29   ;;  %v2323_v29 = vld [vmem:[#allocation2 + $0x229] sm:$0xff] }
 0x34c   :  { %v6641_v57 = vpop.permute.xlu1 %2096 }
 0x34d   :  { %10921 = vst [vmem:[#allocation203_spill] sm:$0xff] %v6641_v57  ;;  %v6643_v31 = vpop.permute.xlu2 %2354  ;;  %2524 = vperm.xlu0 %5676, %v2318_v47   ;;  %v2324_v57 = vld [vmem:[#allocation2 + $0x231] sm:$0xff] }
 0x34e   :  { %10922 = vst [vmem:[#allocation204_spill] sm:$0xff] %v6643_v31 }
 0x34f   :  { %v6645_v63 = vpop.permute.xlu0 %2121 }
 0x350   :  { %10923 = vst [vmem:[#allocation205_spill] sm:$0xff] %v6645_v63 }
 0x352   :  { %2514 = vperm.xlu1 %5677, %v2316_v39   ;;  %v2322_v39 = vld [vmem:[#allocation2 + $0x219] sm:$0xff] }
 0x353   :  { %2534 = vperm.xlu2 %5678, %v2320_v45   ;;  %v2326_v45 = vld [vmem:[#allocation2 + $0x249] sm:$0xff] }
 0x354   :  { %v6647_v56 = vpop.permute.xlu1 %2111 }
 0x355   :  { %10924 = vst [vmem:[#allocation206_spill] sm:$0xff] %v6647_v56  ;;  %v6649_v17 = vpop.permute.xlu2 %2369  ;;  %2539 = vperm.xlu0 %5676, %v2321_v4   ;;  %v2327_v56 = vld [vmem:[#allocation2 + $0x259] sm:$0xff] }
 0x356   :  { %10925 = vst [vmem:[#allocation207_spill] sm:$0xff] %v6649_v17 }
 0x357   :  { %v6651_v24 = vpop.permute.xlu0 %2136 }
 0x358   :  { %10926 = vst [vmem:[#allocation208_spill] sm:$0xff] %v6651_v24 }
 0x35a   :  { %2529 = vperm.xlu1 %5677, %v2319_v15   ;;  %v2325_v15 = vld [vmem:[#allocation2 + $0x241] sm:$0xff] }
 0x35b   :  { %2549 = vperm.xlu2 %5678, %v2323_v29   ;;  %v2329_v29 = vld [vmem:[#allocation2 + $0x271] sm:$0xff] }
 0x35c   :  { %v6653_v47 = vpop.permute.xlu1 %2126 }
 0x35d   :  { %10927 = vst [vmem:[#allocation209_spill] sm:$0xff] %v6653_v47  ;;  %v6655_v31 = vpop.permute.xlu2 %2384  ;;  %2554 = vperm.xlu0 %5676, %v2324_v57   ;;  %v2330_v47 = vld [vmem:[#allocation2 + $0x279] sm:$0xff] }
 0x35e   :  { %10928 = vst [vmem:[#allocation210_spill] sm:$0xff] %v6655_v31 }
 0x35f   :  { %v6657_v63 = vpop.permute.xlu0 %2151 }
 0x360   :  { %10929 = vst [vmem:[#allocation211_spill] sm:$0xff] %v6657_v63 }
 0x362   :  { %2544 = vperm.xlu1 %5677, %v2322_v39   ;;  %v2328_v39 = vld [vmem:[#allocation2 + $0x261] sm:$0xff] }
 0x363   :  { %2564 = vperm.xlu2 %5678, %v2326_v45   ;;  %v2332_v45 = vld [vmem:[#allocation2 + $0x291] sm:$0xff] }
 0x364   :  { %v6659_v4 = vpop.permute.xlu1 %2141 }
 0x365   :  { %10930 = vst [vmem:[#allocation212_spill] sm:$0xff] %v6659_v4  ;;  %v6661_v17 = vpop.permute.xlu2 %2399  ;;  %2569 = vperm.xlu0 %5676, %v2327_v56   ;;  %v2333_v4 = vld [vmem:[#allocation2 + $0x2a1] sm:$0xff] }
 0x366   :  { %10931 = vst [vmem:[#allocation213_spill] sm:$0xff] %v6661_v17 }
 0x367   :  { %v6663_v24 = vpop.permute.xlu0 %2359 }
 0x368   :  { %10932 = vst [vmem:[#allocation214_spill] sm:$0xff] %v6663_v24 }
 0x36a   :  { %2559 = vperm.xlu1 %5677, %v2325_v15   ;;  %v2331_v15 = vld [vmem:[#allocation2 + $0x289] sm:$0xff] }
 0x36b   :  { %2579 = vperm.xlu2 %5678, %v2329_v29   ;;  %v2335_v29 = vld [vmem:[#allocation2 + $0x2b9] sm:$0xff] }
 0x36c   :  { %v6665_v57 = vpop.permute.xlu1 %2349 }
 0x36d   :  { %10933 = vst [vmem:[#allocation215_spill] sm:$0xff] %v6665_v57  ;;  %v6667_v31 = vpop.permute.xlu2 %2414  ;;  %2584 = vperm.xlu0 %5676, %v2330_v47   ;;  %v2336_v57 = vld [vmem:[#allocation2 + $0x2c1] sm:$0xff] }
 0x36e   :  { %10934 = vst [vmem:[#allocation216_spill] sm:$0xff] %v6667_v31 }
 0x36f   :  { %v6669_v63 = vpop.permute.xlu0 %2374 }
 0x370   :  { %10935 = vst [vmem:[#allocation217_spill] sm:$0xff] %v6669_v63 }
 0x372   :  { %2574 = vperm.xlu1 %5677, %v2328_v39   ;;  %v2334_v39 = vld [vmem:[#allocation2 + $0x2a9] sm:$0xff] }
 0x373   :  { %2594 = vperm.xlu2 %5678, %v2332_v45   ;;  %v2338_v45 = vld [vmem:[#allocation2 + $0x2d9] sm:$0xff] }
 0x374   :  { %v6671_v56 = vpop.permute.xlu1 %2364 }
 0x375   :  { %10936 = vst [vmem:[#allocation218_spill] sm:$0xff] %v6671_v56  ;;  %v6673_v17 = vpop.permute.xlu2 %2429  ;;  %2599 = vperm.xlu0 %5676, %v2333_v4   ;;  %v2339_v56 = vld [vmem:[#allocation2 + $0x2e9] sm:$0xff] }
 0x376   :  { %10937 = vst [vmem:[#allocation219_spill] sm:$0xff] %v6673_v17 }
 0x377   :  { %v6675_v24 = vpop.permute.xlu0 %2389 }
 0x378   :  { %10938 = vst [vmem:[#allocation220_spill] sm:$0xff] %v6675_v24 }
 0x37a   :  { %2589 = vperm.xlu1 %5677, %v2331_v15   ;;  %v2337_v15 = vld [vmem:[#allocation2 + $0x2d1] sm:$0xff] }
 0x37b   :  { %2609 = vperm.xlu2 %5678, %v2335_v29   ;;  %v2341_v29 = vld [vmem:[#allocation2 + $0x301] sm:$0xff] }
 0x37c   :  { %v6677_v47 = vpop.permute.xlu1 %2379 }
 0x37d   :  { %10939 = vst [vmem:[#allocation221_spill] sm:$0xff] %v6677_v47  ;;  %v6679_v31 = vpop.permute.xlu2 %2444  ;;  %2614 = vperm.xlu0 %5676, %v2336_v57   ;;  %v2342_v47 = vld [vmem:[#allocation2 + $0x309] sm:$0xff] }
 0x37e   :  { %10940 = vst [vmem:[#allocation222_spill] sm:$0xff] %v6679_v31 }
 0x37f   :  { %v6681_v63 = vpop.permute.xlu0 %2404 }
 0x380   :  { %10941 = vst [vmem:[#allocation223_spill] sm:$0xff] %v6681_v63 }
 0x382   :  { %2604 = vperm.xlu1 %5677, %v2334_v39   ;;  %v2340_v39 = vld [vmem:[#allocation2 + $0x2f1] sm:$0xff] }
 0x383   :  { %2624 = vperm.xlu2 %5678, %v2338_v45   ;;  %v2344_v45 = vld [vmem:[#allocation2 + $0x321] sm:$0xff] }
 0x384   :  { %v6683_v4 = vpop.permute.xlu1 %2394 }
 0x385   :  { %10942 = vst [vmem:[#allocation224_spill] sm:$0xff] %v6683_v4  ;;  %v6685_v17 = vpop.permute.xlu2 %2459  ;;  %2629 = vperm.xlu0 %5676, %v2339_v56   ;;  %v2345_v4 = vld [vmem:[#allocation2 + $0x331] sm:$0xff] }
 0x386   :  { %10943 = vst [vmem:[#allocation225_spill] sm:$0xff] %v6685_v17 }
 0x387   :  { %v6687_v24 = vpop.permute.xlu0 %2419 }
 0x388   :  { %10944 = vst [vmem:[#allocation226_spill] sm:$0xff] %v6687_v24 }
 0x38a   :  { %2619 = vperm.xlu1 %5677, %v2337_v15   ;;  %v2343_v15 = vld [vmem:[#allocation2 + $0x319] sm:$0xff] }
 0x38b   :  { %2639 = vperm.xlu2 %5678, %v2341_v29   ;;  %v2796_v29 = vld [vmem:[#allocation2 + $0x1a] sm:$0xff] }
 0x38c   :  { %v6689_v57 = vpop.permute.xlu1 %2409 }
 0x38d   :  { %10945 = vst [vmem:[#allocation227_spill] sm:$0xff] %v6689_v57  ;;  %v6691_v31 = vpop.permute.xlu2 %2474  ;;  %2644 = vperm.xlu0 %5676, %v2342_v47   ;;  %v2797_v57 = vld [vmem:[#allocation2 + $0x22] sm:$0xff] }
 0x38e   :  { %10946 = vst [vmem:[#allocation228_spill] sm:$0xff] %v6691_v31 }
 0x38f   :  { %v6693_v63 = vpop.permute.xlu0 %2434 }
 0x390   :  { %10947 = vst [vmem:[#allocation229_spill] sm:$0xff] %v6693_v63 }
 0x392   :  { %2634 = vperm.xlu1 %5677, %v2340_v39   ;;  %v2346_v39 = vld [vmem:[#allocation2 + $0x339] sm:$0xff] }
 0x393   :  { %2654 = vperm.xlu2 %5678, %v2344_v45   ;;  %v2799_v45 = vld [vmem:[#allocation2 + $0x3a] sm:$0xff] }
 0x394   :  { %v6695_v56 = vpop.permute.xlu1 %2424 }
 0x395   :  { %10948 = vst [vmem:[#allocation230_spill] sm:$0xff] %v6695_v56  ;;  %v6697_v17 = vpop.permute.xlu2 %2489  ;;  %2659 = vperm.xlu0 %5676, %v2345_v4   ;;  %v2800_v56 = vld [vmem:[#allocation2 + $0x4a] sm:$0xff] }
 0x396   :  { %10949 = vst [vmem:[#allocation231_spill] sm:$0xff] %v6697_v17 }
 0x397   :  { %v6699_v24 = vpop.permute.xlu0 %2449 }
 0x398   :  { %10950 = vst [vmem:[#allocation232_spill] sm:$0xff] %v6699_v24 }
 0x39a   :  { %2649 = vperm.xlu1 %5677, %v2343_v15   ;;  %v2798_v15 = vld [vmem:[#allocation2 + $0x32] sm:$0xff] }
 0x39b   :  { %2862 = vperm.xlu2 %5678, %v2796_v29   ;;  %v2802_v29 = vld [vmem:[#allocation2 + $0x62] sm:$0xff] }
 0x39c   :  { %v6701_v47 = vpop.permute.xlu1 %2439 }
 0x39d   :  { %10951 = vst [vmem:[#allocation233_spill] sm:$0xff] %v6701_v47  ;;  %v6703_v31 = vpop.permute.xlu2 %2504  ;;  %2867 = vperm.xlu0 %5676, %v2797_v57   ;;  %v2803_v47 = vld [vmem:[#allocation2 + $0x6a] sm:$0xff] }
 0x39e   :  { %10952 = vst [vmem:[#allocation234_spill] sm:$0xff] %v6703_v31 }
 0x39f   :  { %v6705_v63 = vpop.permute.xlu0 %2464 }
 0x3a0   :  { %10953 = vst [vmem:[#allocation235_spill] sm:$0xff] %v6705_v63 }
 0x3a2   :  { %2664 = vperm.xlu1 %5677, %v2346_v39   ;;  %v2801_v39 = vld [vmem:[#allocation2 + $0x52] sm:$0xff] }
 0x3a3   :  { %2877 = vperm.xlu2 %5678, %v2799_v45   ;;  %v2805_v45 = vld [vmem:[#allocation2 + $0x82] sm:$0xff] }
 0x3a4   :  { %v6707_v4 = vpop.permute.xlu1 %2454 }
 0x3a5   :  { %10954 = vst [vmem:[#allocation236_spill] sm:$0xff] %v6707_v4  ;;  %v6709_v17 = vpop.permute.xlu2 %2519  ;;  %2882 = vperm.xlu0 %5676, %v2800_v56   ;;  %v2806_v4 = vld [vmem:[#allocation2 + $0x92] sm:$0xff] }
 0x3a6   :  { %10955 = vst [vmem:[#allocation237_spill] sm:$0xff] %v6709_v17 }
 0x3a7   :  { %v6711_v24 = vpop.permute.xlu0 %2479 }
 0x3a8   :  { %10956 = vst [vmem:[#allocation238_spill] sm:$0xff] %v6711_v24 }
 0x3aa   :  { %2872 = vperm.xlu1 %5677, %v2798_v15   ;;  %v2804_v15 = vld [vmem:[#allocation2 + $0x7a] sm:$0xff] }
 0x3ab   :  { %2892 = vperm.xlu2 %5678, %v2802_v29   ;;  %v2808_v29 = vld [vmem:[#allocation2 + $0xaa] sm:$0xff] }
 0x3ac   :  { %v6713_v57 = vpop.permute.xlu1 %2469 }
 0x3ad   :  { %10957 = vst [vmem:[#allocation239_spill] sm:$0xff] %v6713_v57  ;;  %v6715_v31 = vpop.permute.xlu2 %2534  ;;  %2897 = vperm.xlu0 %5676, %v2803_v47   ;;  %v2809_v57 = vld [vmem:[#allocation2 + $0xb2] sm:$0xff] }
 0x3ae   :  { %10958 = vst [vmem:[#allocation240_spill] sm:$0xff] %v6715_v31 }
 0x3af   :  { %v6717_v63 = vpop.permute.xlu0 %2494 }
 0x3b0   :  { %10959 = vst [vmem:[#allocation241_spill] sm:$0xff] %v6717_v63 }
 0x3b2   :  { %2887 = vperm.xlu1 %5677, %v2801_v39   ;;  %v2807_v39 = vld [vmem:[#allocation2 + $0x9a] sm:$0xff] }
 0x3b3   :  { %2907 = vperm.xlu2 %5678, %v2805_v45   ;;  %v2811_v45 = vld [vmem:[#allocation2 + $0xca] sm:$0xff] }
 0x3b4   :  { %v6719_v56 = vpop.permute.xlu1 %2484 }
 0x3b5   :  { %10960 = vst [vmem:[#allocation242_spill] sm:$0xff] %v6719_v56  ;;  %v6721_v17 = vpop.permute.xlu2 %2549  ;;  %2912 = vperm.xlu0 %5676, %v2806_v4   ;;  %v2812_v56 = vld [vmem:[#allocation2 + $0xda] sm:$0xff] }
 0x3b6   :  { %10961 = vst [vmem:[#allocation243_spill] sm:$0xff] %v6721_v17 }
 0x3b7   :  { %v6723_v24 = vpop.permute.xlu0 %2509 }
 0x3b8   :  { %10962 = vst [vmem:[#allocation244_spill] sm:$0xff] %v6723_v24 }
 0x3ba   :  { %2902 = vperm.xlu1 %5677, %v2804_v15   ;;  %v2810_v15 = vld [vmem:[#allocation2 + $0xc2] sm:$0xff] }
 0x3bb   :  { %2922 = vperm.xlu2 %5678, %v2808_v29   ;;  %v2814_v29 = vld [vmem:[#allocation2 + $0xf2] sm:$0xff] }
 0x3bc   :  { %v6725_v47 = vpop.permute.xlu1 %2499 }
 0x3bd   :  { %10963 = vst [vmem:[#allocation245_spill] sm:$0xff] %v6725_v47  ;;  %v6727_v31 = vpop.permute.xlu2 %2564  ;;  %2927 = vperm.xlu0 %5676, %v2809_v57   ;;  %v2815_v47 = vld [vmem:[#allocation2 + $0xfa] sm:$0xff] }
 0x3be   :  { %10964 = vst [vmem:[#allocation246_spill] sm:$0xff] %v6727_v31 }
 0x3bf   :  { %v6729_v63 = vpop.permute.xlu0 %2524 }
 0x3c0   :  { %10965 = vst [vmem:[#allocation247_spill] sm:$0xff] %v6729_v63 }
 0x3c2   :  { %2917 = vperm.xlu1 %5677, %v2807_v39   ;;  %v2813_v39 = vld [vmem:[#allocation2 + $0xe2] sm:$0xff] }
 0x3c3   :  { %2937 = vperm.xlu2 %5678, %v2811_v45   ;;  %v2817_v45 = vld [vmem:[#allocation2 + $0x112] sm:$0xff] }
 0x3c4   :  { %v6731_v4 = vpop.permute.xlu1 %2514 }
 0x3c5   :  { %10966 = vst [vmem:[#allocation248_spill] sm:$0xff] %v6731_v4  ;;  %v6733_v17 = vpop.permute.xlu2 %2579  ;;  %2942 = vperm.xlu0 %5676, %v2812_v56   ;;  %v2818_v4 = vld [vmem:[#allocation2 + $0x122] sm:$0xff] }
 0x3c6   :  { %10967 = vst [vmem:[#allocation249_spill] sm:$0xff] %v6733_v17 }
 0x3c7   :  { %v6735_v24 = vpop.permute.xlu0 %2539 }
 0x3c8   :  { %10968 = vst [vmem:[#allocation250_spill] sm:$0xff] %v6735_v24 }
 0x3ca   :  { %2932 = vperm.xlu1 %5677, %v2810_v15   ;;  %v2816_v15 = vld [vmem:[#allocation2 + $0x10a] sm:$0xff] }
 0x3cb   :  { %2952 = vperm.xlu2 %5678, %v2814_v29   ;;  %v2820_v29 = vld [vmem:[#allocation2 + $0x13a] sm:$0xff] }
 0x3cc   :  { %v6737_v57 = vpop.permute.xlu1 %2529 }
 0x3cd   :  { %10969 = vst [vmem:[#allocation251_spill] sm:$0xff] %v6737_v57  ;;  %v6739_v31 = vpop.permute.xlu2 %2594  ;;  %2957 = vperm.xlu0 %5676, %v2815_v47   ;;  %v2821_v57 = vld [vmem:[#allocation2 + $0x142] sm:$0xff] }
 0x3ce   :  { %10970 = vst [vmem:[#allocation252_spill] sm:$0xff] %v6739_v31 }
 0x3cf   :  { %v6741_v63 = vpop.permute.xlu0 %2554 }
 0x3d0   :  { %10971 = vst [vmem:[#allocation253_spill] sm:$0xff] %v6741_v63 }
 0x3d2   :  { %2947 = vperm.xlu1 %5677, %v2813_v39   ;;  %v2819_v39 = vld [vmem:[#allocation2 + $0x12a] sm:$0xff] }
 0x3d3   :  { %2967 = vperm.xlu2 %5678, %v2817_v45   ;;  %v2823_v45 = vld [vmem:[#allocation2 + $0x15a] sm:$0xff] }
 0x3d4   :  { %v6743_v56 = vpop.permute.xlu1 %2544 }
 0x3d5   :  { %10972 = vst [vmem:[#allocation254_spill] sm:$0xff] %v6743_v56  ;;  %v6745_v17 = vpop.permute.xlu2 %2609  ;;  %2972 = vperm.xlu0 %5676, %v2818_v4   ;;  %v2824_v56 = vld [vmem:[#allocation2 + $0x16a] sm:$0xff] }
 0x3d6   :  { %10973 = vst [vmem:[#allocation255_spill] sm:$0xff] %v6745_v17 }
 0x3d7   :  { %v6747_v24 = vpop.permute.xlu0 %2569 }
 0x3d8   :  { %10974 = vst [vmem:[#allocation256_spill] sm:$0xff] %v6747_v24 }
 0x3da   :  { %2962 = vperm.xlu1 %5677, %v2816_v15   ;;  %v2822_v15 = vld [vmem:[#allocation2 + $0x152] sm:$0xff] }
 0x3db   :  { %2982 = vperm.xlu2 %5678, %v2820_v29   ;;  %v2826_v29 = vld [vmem:[#allocation2 + $0x182] sm:$0xff] }
 0x3dc   :  { %v6749_v47 = vpop.permute.xlu1 %2559 }
 0x3dd   :  { %10975 = vst [vmem:[#allocation257_spill] sm:$0xff] %v6749_v47  ;;  %v6751_v31 = vpop.permute.xlu2 %2624  ;;  %2987 = vperm.xlu0 %5676, %v2821_v57   ;;  %v2827_v47 = vld [vmem:[#allocation2 + $0x18a] sm:$0xff] }
 0x3de   :  { %10976 = vst [vmem:[#allocation258_spill] sm:$0xff] %v6751_v31 }
 0x3df   :  { %v6753_v63 = vpop.permute.xlu0 %2584 }
 0x3e0   :  { %10977 = vst [vmem:[#allocation259_spill] sm:$0xff] %v6753_v63 }
 0x3e2   :  { %2977 = vperm.xlu1 %5677, %v2819_v39   ;;  %v2825_v39 = vld [vmem:[#allocation2 + $0x172] sm:$0xff] }
 0x3e3   :  { %2997 = vperm.xlu2 %5678, %v2823_v45   ;;  %v2829_v45 = vld [vmem:[#allocation2 + $0x1d2] sm:$0xff] }
 0x3e4   :  { %v6755_v4 = vpop.permute.xlu1 %2574 }
 0x3e5   :  { %10978 = vst [vmem:[#allocation260_spill] sm:$0xff] %v6755_v4  ;;  %v6757_v17 = vpop.permute.xlu2 %2639  ;;  %3002 = vperm.xlu0 %5676, %v2824_v56   ;;  %v2830_v4 = vld [vmem:[#allocation2 + $0x1e2] sm:$0xff] }
 0x3e6   :  { %10979 = vst [vmem:[#allocation261_spill] sm:$0xff] %v6757_v17 }
 0x3e7   :  { %v6759_v24 = vpop.permute.xlu0 %2599 }
 0x3e8   :  { %10980 = vst [vmem:[#allocation262_spill] sm:$0xff] %v6759_v24 }
 0x3ea   :  { %2992 = vperm.xlu1 %5677, %v2822_v15   ;;  %v2828_v15 = vld [vmem:[#allocation2 + $0x1ca] sm:$0xff] }
 0x3eb   :  { %3012 = vperm.xlu2 %5678, %v2826_v29   ;;  %v2832_v29 = vld [vmem:[#allocation2 + $0x1fa] sm:$0xff] }
 0x3ec   :  { %v6761_v57 = vpop.permute.xlu1 %2589 }
 0x3ed   :  { %10981 = vst [vmem:[#allocation263_spill] sm:$0xff] %v6761_v57  ;;  %v6763_v31 = vpop.permute.xlu2 %2654  ;;  %3017 = vperm.xlu0 %5676, %v2827_v47   ;;  %v2833_v57 = vld [vmem:[#allocation2 + $0x202] sm:$0xff] }
 0x3ee   :  { %10982 = vst [vmem:[#allocation264_spill] sm:$0xff] %v6763_v31 }
 0x3ef   :  { %v6765_v63 = vpop.permute.xlu0 %2614 }
 0x3f0   :  { %10983 = vst [vmem:[#allocation265_spill] sm:$0xff] %v6765_v63 }
 0x3f2   :  { %3007 = vperm.xlu1 %5677, %v2825_v39   ;;  %v2831_v39 = vld [vmem:[#allocation2 + $0x1ea] sm:$0xff] }
 0x3f3   :  { %3027 = vperm.xlu2 %5678, %v2829_v45   ;;  %v2835_v45 = vld [vmem:[#allocation2 + $0x21a] sm:$0xff] }
 0x3f4   :  { %v6767_v56 = vpop.permute.xlu1 %2604 }
 0x3f5   :  { %10984 = vst [vmem:[#allocation266_spill] sm:$0xff] %v6767_v56  ;;  %v6769_v17 = vpop.permute.xlu2 %2862  ;;  %3032 = vperm.xlu0 %5676, %v2830_v4   ;;  %v2836_v56 = vld [vmem:[#allocation2 + $0x22a] sm:$0xff] }
 0x3f6   :  { %10985 = vst [vmem:[#allocation267_spill] sm:$0xff] %v6769_v17 }
 0x3f7   :  { %v6771_v24 = vpop.permute.xlu0 %2629 }
 0x3f8   :  { %10986 = vst [vmem:[#allocation268_spill] sm:$0xff] %v6771_v24 }
 0x3fa   :  { %3022 = vperm.xlu1 %5677, %v2828_v15   ;;  %v2834_v15 = vld [vmem:[#allocation2 + $0x212] sm:$0xff] }
 0x3fb   :  { %3042 = vperm.xlu2 %5678, %v2832_v29   ;;  %v2838_v29 = vld [vmem:[#allocation2 + $0x242] sm:$0xff] }
 0x3fc   :  { %v6773_v47 = vpop.permute.xlu1 %2619 }
 0x3fd   :  { %10987 = vst [vmem:[#allocation269_spill] sm:$0xff] %v6773_v47  ;;  %v6775_v31 = vpop.permute.xlu2 %2877  ;;  %3047 = vperm.xlu0 %5676, %v2833_v57   ;;  %v2839_v47 = vld [vmem:[#allocation2 + $0x24a] sm:$0xff] }
 0x3fe   :  { %10988 = vst [vmem:[#allocation270_spill] sm:$0xff] %v6775_v31 }
 0x3ff   :  { %v6777_v63 = vpop.permute.xlu0 %2644 }
 0x400   :  { %10989 = vst [vmem:[#allocation271_spill] sm:$0xff] %v6777_v63 }
 0x402   :  { %3037 = vperm.xlu1 %5677, %v2831_v39   ;;  %v2837_v39 = vld [vmem:[#allocation2 + $0x232] sm:$0xff] }
 0x403   :  { %3057 = vperm.xlu2 %5678, %v2835_v45   ;;  %v2841_v45 = vld [vmem:[#allocation2 + $0x262] sm:$0xff] }
 0x404   :  { %v6779_v4 = vpop.permute.xlu1 %2634 }
 0x405   :  { %10990 = vst [vmem:[#allocation272_spill] sm:$0xff] %v6779_v4  ;;  %v6781_v17 = vpop.permute.xlu2 %2892  ;;  %3062 = vperm.xlu0 %5676, %v2836_v56   ;;  %v2842_v4 = vld [vmem:[#allocation2 + $0x272] sm:$0xff] }
 0x406   :  { %10991 = vst [vmem:[#allocation273_spill] sm:$0xff] %v6781_v17 }
 0x407   :  { %v6783_v24 = vpop.permute.xlu0 %2659 }
 0x408   :  { %10992 = vst [vmem:[#allocation274_spill] sm:$0xff] %v6783_v24 }
 0x40a   :  { %3052 = vperm.xlu1 %5677, %v2834_v15   ;;  %v2840_v15 = vld [vmem:[#allocation2 + $0x25a] sm:$0xff] }
 0x40b   :  { %3072 = vperm.xlu2 %5678, %v2838_v29   ;;  %v2844_v29 = vld [vmem:[#allocation2 + $0x28a] sm:$0xff] }
 0x40c   :  { %v6785_v57 = vpop.permute.xlu1 %2649 }
 0x40d   :  { %10993 = vst [vmem:[#allocation275_spill] sm:$0xff] %v6785_v57  ;;  %v6787_v31 = vpop.permute.xlu2 %2907  ;;  %3077 = vperm.xlu0 %5676, %v2839_v47   ;;  %v2845_v57 = vld [vmem:[#allocation2 + $0x292] sm:$0xff] }
 0x40e   :  { %10994 = vst [vmem:[#allocation276_spill] sm:$0xff] %v6787_v31 }
 0x40f   :  { %v6789_v63 = vpop.permute.xlu0 %2867 }
 0x410   :  { %10995 = vst [vmem:[#allocation277_spill] sm:$0xff] %v6789_v63 }
 0x412   :  { %3067 = vperm.xlu1 %5677, %v2837_v39   ;;  %v2843_v39 = vld [vmem:[#allocation2 + $0x27a] sm:$0xff] }
 0x413   :  { %3087 = vperm.xlu2 %5678, %v2841_v45   ;;  %v2847_v45 = vld [vmem:[#allocation2 + $0x2aa] sm:$0xff] }
 0x414   :  { %v6791_v56 = vpop.permute.xlu1 %2664 }
 0x415   :  { %10996 = vst [vmem:[#allocation278_spill] sm:$0xff] %v6791_v56  ;;  %v6793_v17 = vpop.permute.xlu2 %2922  ;;  %3092 = vperm.xlu0 %5676, %v2842_v4   ;;  %v2848_v56 = vld [vmem:[#allocation2 + $0x2ba] sm:$0xff] }
 0x416   :  { %10997 = vst [vmem:[#allocation279_spill] sm:$0xff] %v6793_v17 }
 0x417   :  { %v6795_v24 = vpop.permute.xlu0 %2882 }
 0x418   :  { %10998 = vst [vmem:[#allocation280_spill] sm:$0xff] %v6795_v24 }
 0x41a   :  { %3082 = vperm.xlu1 %5677, %v2840_v15   ;;  %v2846_v15 = vld [vmem:[#allocation2 + $0x2a2] sm:$0xff] }
 0x41b   :  { %3102 = vperm.xlu2 %5678, %v2844_v29   ;;  %v2850_v29 = vld [vmem:[#allocation2 + $0x2d2] sm:$0xff] }
 0x41c   :  { %v6797_v47 = vpop.permute.xlu1 %2872 }
 0x41d   :  { %10999 = vst [vmem:[#allocation281_spill] sm:$0xff] %v6797_v47  ;;  %v6799_v31 = vpop.permute.xlu2 %2937  ;;  %3107 = vperm.xlu0 %5676, %v2845_v57   ;;  %v2851_v47 = vld [vmem:[#allocation2 + $0x2da] sm:$0xff] }
 0x41e   :  { %11000 = vst [vmem:[#allocation282_spill] sm:$0xff] %v6799_v31 }
 0x41f   :  { %v6801_v63 = vpop.permute.xlu0 %2897 }
 0x420   :  { %11001 = vst [vmem:[#allocation283_spill] sm:$0xff] %v6801_v63 }
 0x422   :  { %3097 = vperm.xlu1 %5677, %v2843_v39   ;;  %v2849_v39 = vld [vmem:[#allocation2 + $0x2c2] sm:$0xff] }
 0x423   :  { %3117 = vperm.xlu2 %5678, %v2847_v45   ;;  %v2853_v45 = vld [vmem:[#allocation2 + $0x2f2] sm:$0xff] }
 0x424   :  { %v6803_v4 = vpop.permute.xlu1 %2887 }
 0x425   :  { %11002 = vst [vmem:[#allocation284_spill] sm:$0xff] %v6803_v4  ;;  %v6805_v17 = vpop.permute.xlu2 %2952  ;;  %3122 = vperm.xlu0 %5676, %v2848_v56   ;;  %v2854_v4 = vld [vmem:[#allocation2 + $0x302] sm:$0xff] }
 0x426   :  { %11003 = vst [vmem:[#allocation285_spill] sm:$0xff] %v6805_v17 }
 0x427   :  { %v6807_v24 = vpop.permute.xlu0 %2912 }
 0x428   :  { %11004 = vst [vmem:[#allocation286_spill] sm:$0xff] %v6807_v24 }
 0x42a   :  { %3112 = vperm.xlu1 %5677, %v2846_v15   ;;  %v2852_v15 = vld [vmem:[#allocation2 + $0x2ea] sm:$0xff] }
 0x42b   :  { %3132 = vperm.xlu2 %5678, %v2850_v29   ;;  %v2856_v29 = vld [vmem:[#allocation2 + $0x31a] sm:$0xff] }
 0x42c   :  { %v6809_v57 = vpop.permute.xlu1 %2902 }
 0x42d   :  { %11005 = vst [vmem:[#allocation287_spill] sm:$0xff] %v6809_v57  ;;  %v6811_v31 = vpop.permute.xlu2 %2967  ;;  %3137 = vperm.xlu0 %5676, %v2851_v47   ;;  %v2857_v57 = vld [vmem:[#allocation2 + $0x322] sm:$0xff] }
 0x42e   :  { %11006 = vst [vmem:[#allocation288_spill] sm:$0xff] %v6811_v31 }
 0x42f   :  { %v6813_v63 = vpop.permute.xlu0 %2927 }
 0x430   :  { %11007 = vst [vmem:[#allocation289_spill] sm:$0xff] %v6813_v63 }
 0x432   :  { %3127 = vperm.xlu1 %5677, %v2849_v39   ;;  %v2855_v39 = vld [vmem:[#allocation2 + $0x30a] sm:$0xff] }
 0x433   :  { %3147 = vperm.xlu2 %5678, %v2853_v45   ;;  %v2859_v45 = vld [vmem:[#allocation2 + $0x33a] sm:$0xff] }
 0x434   :  { %v6815_v56 = vpop.permute.xlu1 %2917 }
 0x435   :  { %11008 = vst [vmem:[#allocation290_spill] sm:$0xff] %v6815_v56  ;;  %v6817_v17 = vpop.permute.xlu2 %2982  ;;  %3152 = vperm.xlu0 %5676, %v2854_v4   ;;  %v3310_v56 = vld [vmem:[#allocation2 + $0x30] sm:$0xff] }
 0x436   :  { %11009 = vst [vmem:[#allocation291_spill] sm:$0xff] %v6817_v17 }
 0x437   :  { %v6819_v24 = vpop.permute.xlu0 %2942 }
 0x438   :  { %11010 = vst [vmem:[#allocation292_spill] sm:$0xff] %v6819_v24 }
 0x43a   :  { %3142 = vperm.xlu1 %5677, %v2852_v15   ;;  %v2858_v15 = vld [vmem:[#allocation2 + $0x332] sm:$0xff] }
 0x43b   :  { %3162 = vperm.xlu2 %5678, %v2856_v29   ;;  %v3312_v29 = vld [vmem:[#allocation2 + $0x48] sm:$0xff] }
 0x43c   :  { %v6821_v47 = vpop.permute.xlu1 %2932 }
 0x43d   :  { %11011 = vst [vmem:[#allocation293_spill] sm:$0xff] %v6821_v47  ;;  %v6823_v31 = vpop.permute.xlu2 %2997  ;;  %3167 = vperm.xlu0 %5676, %v2857_v57   ;;  %v3313_v47 = vld [vmem:[#allocation2 + $0x50] sm:$0xff] }
 0x43e   :  { %11012 = vst [vmem:[#allocation294_spill] sm:$0xff] %v6823_v31 }
 0x43f   :  { %v6825_v63 = vpop.permute.xlu0 %2957 }
 0x440   :  { %11013 = vst [vmem:[#allocation295_spill] sm:$0xff] %v6825_v63 }
 0x442   :  { %3157 = vperm.xlu1 %5677, %v2855_v39   ;;  %v3311_v39 = vld [vmem:[#allocation2 + $0x38] sm:$0xff] }
 0x443   :  { %3177 = vperm.xlu2 %5678, %v2859_v45   ;;  %v3315_v45 = vld [vmem:[#allocation2 + $0x68] sm:$0xff] }
 0x444   :  { %v6827_v4 = vpop.permute.xlu1 %2947 }
 0x445   :  { %11014 = vst [vmem:[#allocation296_spill] sm:$0xff] %v6827_v4  ;;  %v6829_v17 = vpop.permute.xlu2 %3012  ;;  %3376 = vperm.xlu0 %5676, %v3310_v56   ;;  %v3316_v4 = vld [vmem:[#allocation2 + $0x78] sm:$0xff] }
 0x446   :  { %11015 = vst [vmem:[#allocation297_spill] sm:$0xff] %v6829_v17 }
 0x447   :  { %v6831_v24 = vpop.permute.xlu0 %2972 }
 0x448   :  { %11016 = vst [vmem:[#allocation298_spill] sm:$0xff] %v6831_v24 }
 0x44a   :  { %3172 = vperm.xlu1 %5677, %v2858_v15   ;;  %v3314_v15 = vld [vmem:[#allocation2 + $0x60] sm:$0xff] }
 0x44b   :  { %3386 = vperm.xlu2 %5678, %v3312_v29   ;;  %v3318_v29 = vld [vmem:[#allocation2 + $0x90] sm:$0xff] }
 0x44c   :  { %v6833_v57 = vpop.permute.xlu1 %2962 }
 0x44d   :  { %11017 = vst [vmem:[#allocation299_spill] sm:$0xff] %v6833_v57  ;;  %v6835_v31 = vpop.permute.xlu2 %3027  ;;  %3391 = vperm.xlu0 %5676, %v3313_v47   ;;  %v3319_v57 = vld [vmem:[#allocation2 + $0x98] sm:$0xff] }
 0x44e   :  { %11018 = vst [vmem:[#allocation300_spill] sm:$0xff] %v6835_v31 }
 0x44f   :  { %v6837_v63 = vpop.permute.xlu0 %2987 }
 0x450   :  { %11019 = vst [vmem:[#allocation301_spill] sm:$0xff] %v6837_v63 }
 0x452   :  { %3381 = vperm.xlu1 %5677, %v3311_v39   ;;  %v3317_v39 = vld [vmem:[#allocation2 + $0x80] sm:$0xff] }
 0x453   :  { %3401 = vperm.xlu2 %5678, %v3315_v45   ;;  %v3321_v45 = vld [vmem:[#allocation2 + $0xb0] sm:$0xff] }
 0x454   :  { %v6839_v56 = vpop.permute.xlu1 %2977 }
 0x455   :  { %11020 = vst [vmem:[#allocation302_spill] sm:$0xff] %v6839_v56  ;;  %v6841_v17 = vpop.permute.xlu2 %3042  ;;  %3406 = vperm.xlu0 %5676, %v3316_v4   ;;  %v3322_v56 = vld [vmem:[#allocation2 + $0xc0] sm:$0xff] }
 0x456   :  { %11021 = vst [vmem:[#allocation303_spill] sm:$0xff] %v6841_v17 }
 0x457   :  { %v6843_v24 = vpop.permute.xlu0 %3002 }
 0x458   :  { %11022 = vst [vmem:[#allocation304_spill] sm:$0xff] %v6843_v24 }
 0x45a   :  { %3396 = vperm.xlu1 %5677, %v3314_v15   ;;  %v3320_v15 = vld [vmem:[#allocation2 + $0xa8] sm:$0xff] }
 0x45b   :  { %3416 = vperm.xlu2 %5678, %v3318_v29   ;;  %v3324_v29 = vld [vmem:[#allocation2 + $0xd8] sm:$0xff] }
 0x45c   :  { %v6845_v47 = vpop.permute.xlu1 %2992 }
 0x45d   :  { %11023 = vst [vmem:[#allocation305_spill] sm:$0xff] %v6845_v47  ;;  %v6847_v31 = vpop.permute.xlu2 %3057  ;;  %3421 = vperm.xlu0 %5676, %v3319_v57   ;;  %v3325_v47 = vld [vmem:[#allocation2 + $0xe0] sm:$0xff] }
 0x45e   :  { %11024 = vst [vmem:[#allocation306_spill] sm:$0xff] %v6847_v31 }
 0x45f   :  { %v6849_v63 = vpop.permute.xlu0 %3017 }
 0x460   :  { %11025 = vst [vmem:[#allocation307_spill] sm:$0xff] %v6849_v63 }
 0x462   :  { %3411 = vperm.xlu1 %5677, %v3317_v39   ;;  %v3323_v39 = vld [vmem:[#allocation2 + $0xc8] sm:$0xff] }
 0x463   :  { %3431 = vperm.xlu2 %5678, %v3321_v45   ;;  %v3327_v45 = vld [vmem:[#allocation2 + $0xf8] sm:$0xff] }
 0x464   :  { %v6851_v4 = vpop.permute.xlu1 %3007 }
 0x465   :  { %11026 = vst [vmem:[#allocation308_spill] sm:$0xff] %v6851_v4  ;;  %v6853_v17 = vpop.permute.xlu2 %3072  ;;  %3436 = vperm.xlu0 %5676, %v3322_v56   ;;  %v3328_v4 = vld [vmem:[#allocation2 + $0x108] sm:$0xff] }
 0x466   :  { %11027 = vst [vmem:[#allocation309_spill] sm:$0xff] %v6853_v17 }
 0x467   :  { %v6855_v24 = vpop.permute.xlu0 %3032 }
 0x468   :  { %11028 = vst [vmem:[#allocation310_spill] sm:$0xff] %v6855_v24 }
 0x46a   :  { %3426 = vperm.xlu1 %5677, %v3320_v15   ;;  %v3326_v15 = vld [vmem:[#allocation2 + $0xf0] sm:$0xff] }
 0x46b   :  { %3446 = vperm.xlu2 %5678, %v3324_v29   ;;  %v3330_v29 = vld [vmem:[#allocation2 + $0x120] sm:$0xff] }
 0x46c   :  { %v6857_v57 = vpop.permute.xlu1 %3022 }
 0x46d   :  { %11029 = vst [vmem:[#allocation311_spill] sm:$0xff] %v6857_v57  ;;  %v6859_v31 = vpop.permute.xlu2 %3087  ;;  %3451 = vperm.xlu0 %5676, %v3325_v47   ;;  %v3331_v57 = vld [vmem:[#allocation2 + $0x128] sm:$0xff] }
 0x46e   :  { %11030 = vst [vmem:[#allocation312_spill] sm:$0xff] %v6859_v31 }
 0x46f   :  { %v6861_v63 = vpop.permute.xlu0 %3047 }
 0x470   :  { %11031 = vst [vmem:[#allocation313_spill] sm:$0xff] %v6861_v63 }
 0x472   :  { %3441 = vperm.xlu1 %5677, %v3323_v39   ;;  %v3329_v39 = vld [vmem:[#allocation2 + $0x110] sm:$0xff] }
 0x473   :  { %3461 = vperm.xlu2 %5678, %v3327_v45   ;;  %v3333_v45 = vld [vmem:[#allocation2 + $0x140] sm:$0xff] }
 0x474   :  { %v6863_v56 = vpop.permute.xlu1 %3037 }
 0x475   :  { %11032 = vst [vmem:[#allocation314_spill] sm:$0xff] %v6863_v56  ;;  %v6865_v17 = vpop.permute.xlu2 %3102  ;;  %3466 = vperm.xlu0 %5676, %v3328_v4   ;;  %v3334_v56 = vld [vmem:[#allocation2 + $0x150] sm:$0xff] }
 0x476   :  { %11033 = vst [vmem:[#allocation315_spill] sm:$0xff] %v6865_v17 }
 0x477   :  { %v6867_v24 = vpop.permute.xlu0 %3062 }
 0x478   :  { %11034 = vst [vmem:[#allocation316_spill] sm:$0xff] %v6867_v24 }
 0x47a   :  { %3456 = vperm.xlu1 %5677, %v3326_v15   ;;  %v3332_v15 = vld [vmem:[#allocation2 + $0x138] sm:$0xff] }
 0x47b   :  { %3476 = vperm.xlu2 %5678, %v3330_v29   ;;  %v3336_v29 = vld [vmem:[#allocation2 + $0x168] sm:$0xff] }
 0x47c   :  { %v6869_v47 = vpop.permute.xlu1 %3052 }
 0x47d   :  { %11035 = vst [vmem:[#allocation317_spill] sm:$0xff] %v6869_v47  ;;  %v6871_v31 = vpop.permute.xlu2 %3117  ;;  %3481 = vperm.xlu0 %5676, %v3331_v57   ;;  %v3337_v47 = vld [vmem:[#allocation2 + $0x170] sm:$0xff] }
 0x47e   :  { %11036 = vst [vmem:[#allocation318_spill] sm:$0xff] %v6871_v31 }
 0x47f   :  { %v6873_v63 = vpop.permute.xlu0 %3077 }
 0x480   :  { %11037 = vst [vmem:[#allocation319_spill] sm:$0xff] %v6873_v63 }
 0x482   :  { %3471 = vperm.xlu1 %5677, %v3329_v39   ;;  %v3335_v39 = vld [vmem:[#allocation2 + $0x158] sm:$0xff] }
 0x483   :  { %3491 = vperm.xlu2 %5678, %v3333_v45   ;;  %v3339_v45 = vld [vmem:[#allocation2 + $0x188] sm:$0xff] }
 0x484   :  { %v6875_v4 = vpop.permute.xlu1 %3067 }
 0x485   :  { %11038 = vst [vmem:[#allocation320_spill] sm:$0xff] %v6875_v4  ;;  %v6877_v17 = vpop.permute.xlu2 %3132  ;;  %3496 = vperm.xlu0 %5676, %v3334_v56   ;;  %v3340_v4 = vld [vmem:[#allocation2 + $0x198] sm:$0xff] }
 0x486   :  { %11039 = vst [vmem:[#allocation321_spill] sm:$0xff] %v6877_v17 }
 0x487   :  { %v6879_v24 = vpop.permute.xlu0 %3092 }
 0x488   :  { %11040 = vst [vmem:[#allocation322_spill] sm:$0xff] %v6879_v24 }
 0x48a   :  { %3486 = vperm.xlu1 %5677, %v3332_v15   ;;  %v3338_v15 = vld [vmem:[#allocation2 + $0x180] sm:$0xff] }
 0x48b   :  { %3506 = vperm.xlu2 %5678, %v3336_v29   ;;  %v3342_v29 = vld [vmem:[#allocation2 + $0x1e0] sm:$0xff] }
 0x48c   :  { %v6881_v57 = vpop.permute.xlu1 %3082 }
 0x48d   :  { %11041 = vst [vmem:[#allocation323_spill] sm:$0xff] %v6881_v57  ;;  %v6883_v31 = vpop.permute.xlu2 %3147  ;;  %3511 = vperm.xlu0 %5676, %v3337_v47   ;;  %v3343_v57 = vld [vmem:[#allocation2 + $0x1e8] sm:$0xff] }
 0x48e   :  { %11042 = vst [vmem:[#allocation324_spill] sm:$0xff] %v6883_v31 }
 0x48f   :  { %v6885_v63 = vpop.permute.xlu0 %3107 }
 0x490   :  { %11043 = vst [vmem:[#allocation325_spill] sm:$0xff] %v6885_v63 }
 0x492   :  { %3501 = vperm.xlu1 %5677, %v3335_v39   ;;  %v3341_v39 = vld [vmem:[#allocation2 + $0x1a0] sm:$0xff] }
 0x493   :  { %3521 = vperm.xlu2 %5678, %v3339_v45   ;;  %v3345_v45 = vld [vmem:[#allocation2 + $0x200] sm:$0xff] }
 0x494   :  { %v6887_v56 = vpop.permute.xlu1 %3097 }
 0x495   :  { %11044 = vst [vmem:[#allocation326_spill] sm:$0xff] %v6887_v56  ;;  %v6889_v17 = vpop.permute.xlu2 %3162  ;;  %3526 = vperm.xlu0 %5676, %v3340_v4   ;;  %v3346_v56 = vld [vmem:[#allocation2 + $0x210] sm:$0xff] }
 0x496   :  { %11045 = vst [vmem:[#allocation327_spill] sm:$0xff] %v6889_v17 }
 0x497   :  { %v6891_v24 = vpop.permute.xlu0 %3122 }
 0x498   :  { %11046 = vst [vmem:[#allocation328_spill] sm:$0xff] %v6891_v24 }
 0x49a   :  { %3516 = vperm.xlu1 %5677, %v3338_v15   ;;  %v3344_v15 = vld [vmem:[#allocation2 + $0x1f8] sm:$0xff] }
 0x49b   :  { %3536 = vperm.xlu2 %5678, %v3342_v29   ;;  %v3348_v29 = vld [vmem:[#allocation2 + $0x228] sm:$0xff] }
 0x49c   :  { %v6893_v47 = vpop.permute.xlu1 %3112 }
 0x49d   :  { %11047 = vst [vmem:[#allocation329_spill] sm:$0xff] %v6893_v47  ;;  %v6895_v31 = vpop.permute.xlu2 %3177  ;;  %3541 = vperm.xlu0 %5676, %v3343_v57   ;;  %v3349_v47 = vld [vmem:[#allocation2 + $0x230] sm:$0xff] }
 0x49e   :  { %11048 = vst [vmem:[#allocation330_spill] sm:$0xff] %v6895_v31 }
 0x49f   :  { %v6897_v63 = vpop.permute.xlu0 %3137 }
 0x4a0   :  { %11049 = vst [vmem:[#allocation331_spill] sm:$0xff] %v6897_v63 }
 0x4a2   :  { %3531 = vperm.xlu1 %5677, %v3341_v39   ;;  %v3347_v39 = vld [vmem:[#allocation2 + $0x218] sm:$0xff] }
 0x4a3   :  { %3551 = vperm.xlu2 %5678, %v3345_v45   ;;  %v3351_v45 = vld [vmem:[#allocation2 + $0x248] sm:$0xff] }
 0x4a4   :  { %v6899_v4 = vpop.permute.xlu1 %3127 }
 0x4a5   :  { %11050 = vst [vmem:[#allocation332_spill] sm:$0xff] %v6899_v4  ;;  %v6901_v17 = vpop.permute.xlu2 %3386  ;;  %3556 = vperm.xlu0 %5676, %v3346_v56   ;;  %v3352_v4 = vld [vmem:[#allocation2 + $0x258] sm:$0xff] }
 0x4a6   :  { %11051 = vst [vmem:[#allocation333_spill] sm:$0xff] %v6901_v17 }
 0x4a7   :  { %v6903_v24 = vpop.permute.xlu0 %3152 }
 0x4a8   :  { %11052 = vst [vmem:[#allocation334_spill] sm:$0xff] %v6903_v24 }
 0x4aa   :  { %3546 = vperm.xlu1 %5677, %v3344_v15   ;;  %v3350_v15 = vld [vmem:[#allocation2 + $0x240] sm:$0xff] }
 0x4ab   :  { %3566 = vperm.xlu2 %5678, %v3348_v29   ;;  %v3354_v29 = vld [vmem:[#allocation2 + $0x270] sm:$0xff] }
 0x4ac   :  { %v6905_v57 = vpop.permute.xlu1 %3142 }
 0x4ad   :  { %11053 = vst [vmem:[#allocation335_spill] sm:$0xff] %v6905_v57  ;;  %v6907_v31 = vpop.permute.xlu2 %3401  ;;  %3571 = vperm.xlu0 %5676, %v3349_v47   ;;  %v3355_v57 = vld [vmem:[#allocation2 + $0x278] sm:$0xff] }
 0x4ae   :  { %11054 = vst [vmem:[#allocation336_spill] sm:$0xff] %v6907_v31 }
 0x4af   :  { %v6909_v63 = vpop.permute.xlu0 %3167 }
 0x4b0   :  { %11055 = vst [vmem:[#allocation337_spill] sm:$0xff] %v6909_v63 }
 0x4b2   :  { %3561 = vperm.xlu1 %5677, %v3347_v39   ;;  %v3353_v39 = vld [vmem:[#allocation2 + $0x260] sm:$0xff] }
 0x4b3   :  { %3581 = vperm.xlu2 %5678, %v3351_v45   ;;  %v3357_v45 = vld [vmem:[#allocation2 + $0x290] sm:$0xff] }
 0x4b4   :  { %v6911_v56 = vpop.permute.xlu1 %3157 }
 0x4b5   :  { %11056 = vst [vmem:[#allocation338_spill] sm:$0xff] %v6911_v56  ;;  %v6913_v17 = vpop.permute.xlu2 %3416  ;;  %3586 = vperm.xlu0 %5676, %v3352_v4   ;;  %v3358_v56 = vld [vmem:[#allocation2 + $0x2a0] sm:$0xff] }
 0x4b6   :  { %11057 = vst [vmem:[#allocation339_spill] sm:$0xff] %v6913_v17 }
 0x4b7   :  { %v6915_v24 = vpop.permute.xlu0 %3376 }
 0x4b8   :  { %11058 = vst [vmem:[#allocation340_spill] sm:$0xff] %v6915_v24 }
 0x4ba   :  { %3576 = vperm.xlu1 %5677, %v3350_v15   ;;  %v3356_v15 = vld [vmem:[#allocation2 + $0x288] sm:$0xff] }
 0x4bb   :  { %3596 = vperm.xlu2 %5678, %v3354_v29   ;;  %v3360_v29 = vld [vmem:[#allocation2 + $0x2b8] sm:$0xff] }
 0x4bc   :  { %v6917_v47 = vpop.permute.xlu1 %3172 }
 0x4bd   :  { %11059 = vst [vmem:[#allocation341_spill] sm:$0xff] %v6917_v47  ;;  %v6919_v31 = vpop.permute.xlu2 %3431  ;;  %3601 = vperm.xlu0 %5676, %v3355_v57   ;;  %v3361_v47 = vld [vmem:[#allocation2 + $0x2c0] sm:$0xff] }
 0x4be   :  { %11060 = vst [vmem:[#allocation342_spill] sm:$0xff] %v6919_v31 }
 0x4bf   :  { %v6921_v63 = vpop.permute.xlu0 %3391 }
 0x4c0   :  { %11061 = vst [vmem:[#allocation343_spill] sm:$0xff] %v6921_v63 }
 0x4c2   :  { %3591 = vperm.xlu1 %5677, %v3353_v39   ;;  %v3359_v39 = vld [vmem:[#allocation2 + $0x2a8] sm:$0xff] }
 0x4c3   :  { %3611 = vperm.xlu2 %5678, %v3357_v45   ;;  %v3363_v45 = vld [vmem:[#allocation2 + $0x2d8] sm:$0xff] }
 0x4c4   :  { %v6923_v4 = vpop.permute.xlu1 %3381 }
 0x4c5   :  { %11062 = vst [vmem:[#allocation344_spill] sm:$0xff] %v6923_v4  ;;  %v6925_v17 = vpop.permute.xlu2 %3446  ;;  %3616 = vperm.xlu0 %5676, %v3358_v56   ;;  %v3364_v4 = vld [vmem:[#allocation2 + $0x2e8] sm:$0xff] }
 0x4c6   :  { %11063 = vst [vmem:[#allocation345_spill] sm:$0xff] %v6925_v17 }
 0x4c7   :  { %v6927_v24 = vpop.permute.xlu0 %3406 }
 0x4c8   :  { %11064 = vst [vmem:[#allocation346_spill] sm:$0xff] %v6927_v24 }
 0x4ca   :  { %3606 = vperm.xlu1 %5677, %v3356_v15   ;;  %v3362_v15 = vld [vmem:[#allocation2 + $0x2d0] sm:$0xff] }
 0x4cb   :  { %3626 = vperm.xlu2 %5678, %v3360_v29   ;;  %v3366_v29 = vld [vmem:[#allocation2 + $0x300] sm:$0xff] }
 0x4cc   :  { %v6929_v57 = vpop.permute.xlu1 %3396 }
 0x4cd   :  { %11065 = vst [vmem:[#allocation347_spill] sm:$0xff] %v6929_v57  ;;  %v6931_v31 = vpop.permute.xlu2 %3461  ;;  %3631 = vperm.xlu0 %5676, %v3361_v47   ;;  %v3367_v57 = vld [vmem:[#allocation2 + $0x308] sm:$0xff] }
 0x4ce   :  { %11066 = vst [vmem:[#allocation348_spill] sm:$0xff] %v6931_v31 }
 0x4cf   :  { %v6933_v63 = vpop.permute.xlu0 %3421 }
 0x4d0   :  { %11067 = vst [vmem:[#allocation349_spill] sm:$0xff] %v6933_v63 }
 0x4d2   :  { %3621 = vperm.xlu1 %5677, %v3359_v39   ;;  %v3365_v39 = vld [vmem:[#allocation2 + $0x2f0] sm:$0xff] }
 0x4d3   :  { %3641 = vperm.xlu2 %5678, %v3363_v45   ;;  %v3369_v45 = vld [vmem:[#allocation2 + $0x320] sm:$0xff] }
 0x4d4   :  { %v6935_v56 = vpop.permute.xlu1 %3411 }
 0x4d5   :  { %11068 = vst [vmem:[#allocation350_spill] sm:$0xff] %v6935_v56  ;;  %v6937_v17 = vpop.permute.xlu2 %3476  ;;  %3646 = vperm.xlu0 %5676, %v3364_v4   ;;  %v3370_v56 = vld [vmem:[#allocation2 + $0x330] sm:$0xff] }
 0x4d6   :  { %11069 = vst [vmem:[#allocation351_spill] sm:$0xff] %v6937_v17 }
 0x4d7   :  { %v6939_v24 = vpop.permute.xlu0 %3436 }
 0x4d8   :  { %11070 = vst [vmem:[#allocation352_spill] sm:$0xff] %v6939_v24 }
 0x4da   :  { %3636 = vperm.xlu1 %5677, %v3362_v15   ;;  %v3368_v15 = vld [vmem:[#allocation2 + $0x318] sm:$0xff] }
 0x4db   :  { %3656 = vperm.xlu2 %5678, %v3366_v29   ;;  %v3372_v29 = vld [vmem:[#allocation2 + $0x348] sm:$0xff] }
 0x4dc   :  { %v6941_v47 = vpop.permute.xlu1 %3426 }
 0x4dd   :  { %11071 = vst [vmem:[#allocation353_spill] sm:$0xff] %v6941_v47  ;;  %v6943_v31 = vpop.permute.xlu2 %3491  ;;  %3661 = vperm.xlu0 %5676, %v3367_v57   ;;  %v3373_v47 = vld [vmem:[#allocation2 + $0x350] sm:$0xff] }
 0x4de   :  { %11072 = vst [vmem:[#allocation354_spill] sm:$0xff] %v6943_v31 }
 0x4df   :  { %v6945_v63 = vpop.permute.xlu0 %3451 }
 0x4e0   :  { %11073 = vst [vmem:[#allocation355_spill] sm:$0xff] %v6945_v63 }
 0x4e2   :  { %3651 = vperm.xlu1 %5677, %v3365_v39   ;;  %v3371_v39 = vld [vmem:[#allocation2 + $0x338] sm:$0xff] }
 0x4e3   :  { %3671 = vperm.xlu2 %5678, %v3369_v45   ;;  %v3824_v45 = vld [vmem:[#allocation2 + $0x39] sm:$0xff] }
 0x4e4   :  { %v6947_v4 = vpop.permute.xlu1 %3441 }
 0x4e5   :  { %11074 = vst [vmem:[#allocation356_spill] sm:$0xff] %v6947_v4  ;;  %v6949_v17 = vpop.permute.xlu2 %3506  ;;  %3676 = vperm.xlu0 %5676, %v3370_v56   ;;  %v3825_v4 = vld [vmem:[#allocation2 + $0x49] sm:$0xff] }
 0x4e6   :  { %11075 = vst [vmem:[#allocation357_spill] sm:$0xff] %v6949_v17 }
 0x4e7   :  { %v6951_v24 = vpop.permute.xlu0 %3466 }
 0x4e8   :  { %11076 = vst [vmem:[#allocation358_spill] sm:$0xff] %v6951_v24 }
 0x4ea   :  { %3666 = vperm.xlu1 %5677, %v3368_v15   ;;  %v3823_v15 = vld [vmem:[#allocation2 + $0x31] sm:$0xff] }
 0x4eb   :  { %3686 = vperm.xlu2 %5678, %v3372_v29   ;;  %v3827_v29 = vld [vmem:[#allocation2 + $0x61] sm:$0xff] }
 0x4ec   :  { %v6953_v57 = vpop.permute.xlu1 %3456 }
 0x4ed   :  { %11077 = vst [vmem:[#allocation359_spill] sm:$0xff] %v6953_v57  ;;  %v6955_v31 = vpop.permute.xlu2 %3521  ;;  %3691 = vperm.xlu0 %5676, %v3373_v47   ;;  %v3828_v57 = vld [vmem:[#allocation2 + $0x69] sm:$0xff] }
 0x4ee   :  { %11078 = vst [vmem:[#allocation360_spill] sm:$0xff] %v6955_v31 }
 0x4ef   :  { %v6957_v63 = vpop.permute.xlu0 %3481 }
 0x4f0   :  { %11079 = vst [vmem:[#allocation361_spill] sm:$0xff] %v6957_v63 }
 0x4f2   :  { %3681 = vperm.xlu1 %5677, %v3371_v39   ;;  %v3826_v39 = vld [vmem:[#allocation2 + $0x51] sm:$0xff] }
 0x4f3   :  { %3894 = vperm.xlu2 %5678, %v3824_v45   ;;  %v3830_v45 = vld [vmem:[#allocation2 + $0x81] sm:$0xff] }
 0x4f4   :  { %v6959_v56 = vpop.permute.xlu1 %3471 }
 0x4f5   :  { %11080 = vst [vmem:[#allocation362_spill] sm:$0xff] %v6959_v56  ;;  %v6961_v17 = vpop.permute.xlu2 %3536  ;;  %3899 = vperm.xlu0 %5676, %v3825_v4   ;;  %v3831_v56 = vld [vmem:[#allocation2 + $0x91] sm:$0xff] }
 0x4f6   :  { %11081 = vst [vmem:[#allocation363_spill] sm:$0xff] %v6961_v17 }
 0x4f7   :  { %v6963_v24 = vpop.permute.xlu0 %3496 }
 0x4f8   :  { %11082 = vst [vmem:[#allocation364_spill] sm:$0xff] %v6963_v24 }
 0x4fa   :  { %3889 = vperm.xlu1 %5677, %v3823_v15   ;;  %v3829_v15 = vld [vmem:[#allocation2 + $0x79] sm:$0xff] }
 0x4fb   :  { %3909 = vperm.xlu2 %5678, %v3827_v29   ;;  %v3833_v29 = vld [vmem:[#allocation2 + $0xa9] sm:$0xff] }
 0x4fc   :  { %v6965_v47 = vpop.permute.xlu1 %3486 }
 0x4fd   :  { %11083 = vst [vmem:[#allocation365_spill] sm:$0xff] %v6965_v47  ;;  %v6967_v31 = vpop.permute.xlu2 %3551  ;;  %3914 = vperm.xlu0 %5676, %v3828_v57   ;;  %v3834_v47 = vld [vmem:[#allocation2 + $0xb1] sm:$0xff] }
 0x4fe   :  { %11084 = vst [vmem:[#allocation366_spill] sm:$0xff] %v6967_v31 }
 0x4ff   :  { %v6969_v63 = vpop.permute.xlu0 %3511 }
 0x500   :  { %11085 = vst [vmem:[#allocation367_spill] sm:$0xff] %v6969_v63 }
 0x502   :  { %3904 = vperm.xlu1 %5677, %v3826_v39   ;;  %v3832_v39 = vld [vmem:[#allocation2 + $0x99] sm:$0xff] }
 0x503   :  { %3924 = vperm.xlu2 %5678, %v3830_v45   ;;  %v3836_v45 = vld [vmem:[#allocation2 + $0xc9] sm:$0xff] }
 0x504   :  { %v6971_v4 = vpop.permute.xlu1 %3501 }
 0x505   :  { %11086 = vst [vmem:[#allocation368_spill] sm:$0xff] %v6971_v4  ;;  %v6973_v17 = vpop.permute.xlu2 %3566  ;;  %3929 = vperm.xlu0 %5676, %v3831_v56   ;;  %v3837_v4 = vld [vmem:[#allocation2 + $0xd9] sm:$0xff] }
 0x506   :  { %11087 = vst [vmem:[#allocation369_spill] sm:$0xff] %v6973_v17 }
 0x507   :  { %v6975_v24 = vpop.permute.xlu0 %3526 }
 0x508   :  { %11088 = vst [vmem:[#allocation370_spill] sm:$0xff] %v6975_v24 }
 0x50a   :  { %3919 = vperm.xlu1 %5677, %v3829_v15   ;;  %v3835_v15 = vld [vmem:[#allocation2 + $0xc1] sm:$0xff] }
 0x50b   :  { %3939 = vperm.xlu2 %5678, %v3833_v29   ;;  %v3839_v29 = vld [vmem:[#allocation2 + $0xf1] sm:$0xff] }
 0x50c   :  { %v6977_v57 = vpop.permute.xlu1 %3516 }
 0x50d   :  { %11089 = vst [vmem:[#allocation371_spill] sm:$0xff] %v6977_v57  ;;  %v6979_v31 = vpop.permute.xlu2 %3581  ;;  %3944 = vperm.xlu0 %5676, %v3834_v47   ;;  %v3840_v57 = vld [vmem:[#allocation2 + $0xf9] sm:$0xff] }
 0x50e   :  { %11090 = vst [vmem:[#allocation372_spill] sm:$0xff] %v6979_v31 }
 0x50f   :  { %v6981_v63 = vpop.permute.xlu0 %3541 }
 0x510   :  { %11091 = vst [vmem:[#allocation373_spill] sm:$0xff] %v6981_v63 }
 0x512   :  { %3934 = vperm.xlu1 %5677, %v3832_v39   ;;  %v3838_v39 = vld [vmem:[#allocation2 + $0xe1] sm:$0xff] }
 0x513   :  { %3954 = vperm.xlu2 %5678, %v3836_v45   ;;  %v3842_v45 = vld [vmem:[#allocation2 + $0x111] sm:$0xff] }
 0x514   :  { %v6983_v56 = vpop.permute.xlu1 %3531 }
 0x515   :  { %11092 = vst [vmem:[#allocation374_spill] sm:$0xff] %v6983_v56  ;;  %v6985_v17 = vpop.permute.xlu2 %3596  ;;  %3959 = vperm.xlu0 %5676, %v3837_v4   ;;  %v3843_v56 = vld [vmem:[#allocation2 + $0x121] sm:$0xff] }
 0x516   :  { %11093 = vst [vmem:[#allocation375_spill] sm:$0xff] %v6985_v17 }
 0x517   :  { %v6987_v24 = vpop.permute.xlu0 %3556 }
 0x518   :  { %11094 = vst [vmem:[#allocation376_spill] sm:$0xff] %v6987_v24 }
 0x51a   :  { %3949 = vperm.xlu1 %5677, %v3835_v15   ;;  %v3841_v15 = vld [vmem:[#allocation2 + $0x109] sm:$0xff] }
 0x51b   :  { %3969 = vperm.xlu2 %5678, %v3839_v29   ;;  %v3845_v29 = vld [vmem:[#allocation2 + $0x139] sm:$0xff] }
 0x51c   :  { %v6989_v47 = vpop.permute.xlu1 %3546 }
 0x51d   :  { %11095 = vst [vmem:[#allocation377_spill] sm:$0xff] %v6989_v47  ;;  %v6991_v31 = vpop.permute.xlu2 %3611  ;;  %3974 = vperm.xlu0 %5676, %v3840_v57   ;;  %v3846_v47 = vld [vmem:[#allocation2 + $0x141] sm:$0xff] }
 0x51e   :  { %11096 = vst [vmem:[#allocation378_spill] sm:$0xff] %v6991_v31 }
 0x51f   :  { %v6993_v63 = vpop.permute.xlu0 %3571 }
 0x520   :  { %11097 = vst [vmem:[#allocation379_spill] sm:$0xff] %v6993_v63 }
 0x522   :  { %3964 = vperm.xlu1 %5677, %v3838_v39   ;;  %v3844_v39 = vld [vmem:[#allocation2 + $0x129] sm:$0xff] }
 0x523   :  { %3984 = vperm.xlu2 %5678, %v3842_v45   ;;  %v3848_v45 = vld [vmem:[#allocation2 + $0x159] sm:$0xff] }
 0x524   :  { %v6995_v4 = vpop.permute.xlu1 %3561 }
 0x525   :  { %11098 = vst [vmem:[#allocation380_spill] sm:$0xff] %v6995_v4  ;;  %v6997_v17 = vpop.permute.xlu2 %3626  ;;  %3989 = vperm.xlu0 %5676, %v3843_v56   ;;  %v3849_v4 = vld [vmem:[#allocation2 + $0x169] sm:$0xff] }
 0x526   :  { %11099 = vst [vmem:[#allocation381_spill] sm:$0xff] %v6997_v17 }
 0x527   :  { %v6999_v24 = vpop.permute.xlu0 %3586 }
 0x528   :  { %11100 = vst [vmem:[#allocation382_spill] sm:$0xff] %v6999_v24 }
 0x52a   :  { %3979 = vperm.xlu1 %5677, %v3841_v15   ;;  %v3847_v15 = vld [vmem:[#allocation2 + $0x151] sm:$0xff] }
 0x52b   :  { %3999 = vperm.xlu2 %5678, %v3845_v29   ;;  %v3851_v29 = vld [vmem:[#allocation2 + $0x181] sm:$0xff] }
 0x52c   :  { %v7001_v57 = vpop.permute.xlu1 %3576 }
 0x52d   :  { %11101 = vst [vmem:[#allocation383_spill] sm:$0xff] %v7001_v57  ;;  %v7003_v31 = vpop.permute.xlu2 %3641  ;;  %4004 = vperm.xlu0 %5676, %v3846_v47   ;;  %v3852_v57 = vld [vmem:[#allocation2 + $0x189] sm:$0xff] }
 0x52e   :  { %11102 = vst [vmem:[#allocation384_spill] sm:$0xff] %v7003_v31 }
 0x52f   :  { %v7005_v63 = vpop.permute.xlu0 %3601 }
 0x530   :  { %11103 = vst [vmem:[#allocation385_spill] sm:$0xff] %v7005_v63 }
 0x532   :  { %3994 = vperm.xlu1 %5677, %v3844_v39   ;;  %v3850_v39 = vld [vmem:[#allocation2 + $0x171] sm:$0xff] }
 0x533   :  { %4014 = vperm.xlu2 %5678, %v3848_v45   ;;  %v3854_v45 = vld [vmem:[#allocation2 + $0x1a1] sm:$0xff] }
 0x534   :  { %v7007_v56 = vpop.permute.xlu1 %3591 }
 0x535   :  { %11104 = vst [vmem:[#allocation386_spill] sm:$0xff] %v7007_v56  ;;  %v7009_v17 = vpop.permute.xlu2 %3656  ;;  %4019 = vperm.xlu0 %5676, %v3849_v4   ;;  %v227_v4 = vld [vmem:[%s10660_s1] sm:$0xf] }
 0x536   :  { %11105 = vst [vmem:[#allocation387_spill] sm:$0xff] %v7009_v17  ;;  %v3855_v56 = vld [vmem:[#allocation2 + $0x1e1] sm:$0xff] }
 0x537   :  { %v7011_v24 = vpop.permute.xlu0 %3616 }
 0x538   :  { %11106 = vst [vmem:[#allocation388_spill] sm:$0xff] %v7011_v24  ;;  %v3857_v24 = vld [vmem:[#allocation2 + $0x1f9] sm:$0xff] }
 0x53a   :  { %4009 = vperm.xlu1 %5677, %v3847_v15   ;;  %v7024_v15 = vunpack.c.l.bf16 %v227_v4 }
 0x53b   :  { %4029 = vperm.xlu2 %5678, %v3851_v29  }
 0x53c   :  { %v7013_v47 = vpop.permute.xlu1 %3606  ;;  %11111 = vst [vmem:[#allocation393_spill] sm:$0xff] %v7024_v15 }
 0x53d   :  { %11107 = vst [vmem:[#allocation389_spill] sm:$0xff] %v7013_v47  ;;  %v7015_v31 = vpop.permute.xlu2 %3671  ;;  %4034 = vperm.xlu0 %5676, %v3852_v57   ;;  %v3858_v47 = vld [vmem:[#allocation2 + $0x201] sm:$0xff] }
 0x53e   :  { %11108 = vst [vmem:[#allocation390_spill] sm:$0xff] %v7015_v31  ;;  %v3853_v31 = vld [vmem:[#allocation2 + $0x199] sm:$0xff] }
 0x53f   :  { %v7017_v63 = vpop.permute.xlu0 %3631 }
 0x540   :  { %11109 = vst [vmem:[#allocation391_spill] sm:$0xff] %v7017_v63  ;;  %v7031_v63 = vperm.slane %v7024_v15, 0 }
 0x542   :  { %4024 = vperm.xlu1 %5677, %v3850_v39   ;;  %v7041_v4 = vmul.f32 %v7031_v63, %v6073_v26  ;;  %v7063_v26 = vmul.f32 %v7031_v63, %v6118_v49  ;;  %v7083_v49 = vmul.f32 %v7031_v63, %v6141_v61  ;;  %v3860_v61 = vld [vmem:[#allocation2 + $0x219] sm:$0xff] }
 0x543   :  { %4044 = vperm.xlu2 %5678, %v3854_v45   ;;  %v7037_v45 = vmul.f32 %v7031_v63, %v6057_v19  ;;  %v7059_v19 = vmul.f32 %v7031_v63, %v6103_v41  ;;  %v7079_v41 = vmul.f32 %v7031_v63, %v6139_v59  ;;  %v7101_v59 = vmul.f32 %v7031_v63, %v6155_v5 }
 0x544   :  { %v7022_v17 = vpop.permute.xlu1 %3621  ;;  %v7121_v5 = vmul.f32 %v7031_v63, %v6169_v20  ;;  %v7141_v20 = vmul.f32 %v7031_v63, %v6177_v28  ;;  %v7161_v28 = vmul.f32 %v7031_v63, %v6185_v38  ;;  %v7182_v38 = vmul.f32 %v7031_v63, %v6195_v53 }
 0x545   :  { %11110 = vst [vmem:[#allocation392_spill] sm:$0xff] %v7022_v17  ;;  %v7026_v29 = vpop.permute.xlu2 %3686  ;;  %4049 = vperm.xlu0 %5676, %v3855_v56   ;;  %v7045_v56 = vmul.f32 %v7031_v63, %v6085_v33  ;;  %v7067_v33 = vmul.f32 %v7031_v63, %v6121_v50  ;;  %v7089_v50 = vmul.f32 %v7031_v63, %v6148_v2  ;;  %v11131_v17 = vld [vmem:[#allocation7_spill] sm:$0xff] }
 0x546   :  { %11112 = vst [vmem:[#allocation394_spill] sm:$0xff] %v7026_v29  ;;  %v7049_v29 = vmul.f32 %v7031_v63, %v6105_v42  ;;  %v7071_v42 = vmul.f32 %v7031_v63, %v6136_v58  ;;  %v7093_v58 = vmul.f32 %v7031_v63, %v6151_v3  ;;  %v7109_v2 = vmul.f32 %v7031_v63, %v6163_v1 }
 0x547   :  { %v7028_v57 = vpop.permute.xlu0 %3646  ;;  %v7113_v3 = vmul.f32 %v7031_v63, %v6161_v11  ;;  %v7129_v1 = vmul.f32 %v7031_v63, %v6171_v21  ;;  %v7133_v11 = vmul.f32 %v7031_v63, %v6173_v23  ;;  %v7149_v21 = vmul.f32 %v7031_v63, %v6179_v30  ;;  %11118 = vst [vmem:[#allocation400_spill] sm:$0xff] %v7182_v38 }
 0x548   :  { %11113 = vst [vmem:[#allocation395_spill] sm:$0xff] %v7028_v57  ;;  %v3861_v57 = vld [vmem:[#allocation2 + $0x229] sm:$0xff]  ;;  %v7153_v23 = vmul.f32 %v7031_v63, %v6183_v36  ;;  %v7170_v30 = vmul.f32 %v7031_v63, %v6189_v44  ;;  %v7174_v36 = vmul.f32 %v7031_v63, %v6193_v51  ;;  %v7192_v44 = vmul.f32 %v7031_v63, %v6197_v55 }
 0x549   :  { %v7196_v51 = vmul.f32 %v7031_v63, %v6201_v62  ;;  %v7204_v53 = vmul.f32 %v7031_v63, %v6205_v7  ;;  %v7212_v55 = vmul.f32 %v7031_v63, %v6211_v18  ;;  %v7216_v62 = vmul.f32 %v7031_v63, %v6209_v13  ;;  %v3863_v13 = vld [vmem:[#allocation2 + $0x241] sm:$0xff] }
 0x54a   :  { %4039 = vperm.xlu1 %5677, %v3853_v31   ;;  %v7226_v7 = vmul.f32 %v7031_v63, %v6217_v32  ;;  %v7244_v32 = vmul.f32 %v7031_v63, %v6221_v40 }
 0x54b   :  { %4059 = vperm.xlu2 %5678, %v3857_v24   ;;  %v7055_v24 = vmul.f32 %v7031_v63, %v6089_v34  ;;  %v7075_v34 = vmul.f32 %v7031_v63, %v6123_v52  ;;  %v7097_v52 = vmul.f32 %v7031_v63, %v6157_v8  ;;  %v7117_v8 = vmul.f32 %v7031_v63, %v6165_v14 }
 0x54c   :  { %v7033_v39 = vpop.permute.xlu1 %3636  ;;  %v7137_v14 = vmul.f32 %v7031_v63, %v6175_v27  ;;  %v7157_v27 = vmul.f32 %v7031_v63, %v6187_v43  ;;  %v7178_v43 = vmul.f32 %v7031_v63, %v6191_v46  ;;  %11120 = vst [vmem:[#allocation402_spill] sm:$0xff] %v7196_v51  ;;  %v7200_v46 = vmul.f32 %v7031_v63, %v6203_v0  ;;  %v11152_v51 = vld [vmem:[#allocation23_spill] sm:$0xff] }
 0x54d   :  { %11114 = vst [vmem:[#allocation396_spill] sm:$0xff] %v7033_v39  ;;  %v7051_v31 = vpop.permute.xlu2 %3894  ;;  %4064 = vperm.xlu0 %5676, %v3858_v47   ;;  %v3856_v47 = vld [vmem:[#allocation2 + $0x1e9] sm:$0xff]  ;;  %v7222_v0 = vmul.f32 %v7031_v63, %v6213_v22  ;;  %v7236_v39 = vmul.f32 %v7031_v63, %v6219_v37  ;;  %v7240_v22 = vmul.f32 %v7031_v63, %v6223_v48 }
 0x54e   :  { %11115 = vst [vmem:[#allocation397_spill] sm:$0xff] %v7051_v31  ;;  %v7260_v48 = vmul.f32 %v7031_v63, %v11131_v17  ;;  %v11141_v17 = vld [vmem:[#allocation15_spill] sm:$0xff] }
 0x54f   :  { %v7085_v31 = vpop.permute.xlu0 %3661  ;;  %11122 = vst [vmem:[#allocation404_spill] sm:$0xff] %v7216_v62  ;;  %v11160_v62 = vld [vmem:[#allocation16_spill] sm:$0xff] }
 0x550   :  { %11116 = vst [vmem:[#allocation398_spill] sm:$0xff] %v7085_v31  ;;  %v7105_v31 = vmul.f32 %v7031_v63, %v6159_v9  ;;  %v7125_v9 = vmul.f32 %v7031_v63, %v6167_v16  ;;  %v7145_v16 = vmul.f32 %v7031_v63, %v6181_v35  ;;  %v7164_v35 = vperm.slane %v7024_v15, 1 }
 0x551   :  { %11124 = vst [vmem:[#allocation406_spill] sm:$0xff] %v7222_v0  ;;  %v3864_v0 = vld [vmem:[#allocation2 + $0x249] sm:$0xff] }
 0x552   :  { %4054 = vperm.xlu1 %5677, %v3856_v47   ;;  %v1130_v18 = vmul.f32 %v7164_v35, %v6243_v12  ;;  %11126 = vst [vmem:[#allocation408_spill] sm:$0xff] %v7236_v39  ;;  %v7252_v12 = vmul.f32 %v7031_v63, %v6229_v6  ;;  %v11133_v39 = vld [vmem:[#allocation8_spill] sm:$0xff]  ;;  %v11137_v6 = vld [vmem:[#allocation10_spill] sm:$0xff] }
 0x553   :  { %4074 = vperm.xlu2 %5678, %v3860_v61   ;;  %11127 = vst [vmem:[#allocation409_spill] sm:$0xff] %v7244_v32  ;;  %v7264_v40 = vmul.f32 %v7031_v63, %v11133_v39  ;;  %v11142_v39 = vld [vmem:[#allocation12_spill] sm:$0xff] }
 0x554   :  { %v7166_v47 = vpop.permute.xlu1 %3651  ;;  %11132 = vst [vmem:[#allocation7_spill] sm:$0xff] %v7260_v48  ;;  %v1133_v48 = vmul.f32 %v7164_v35, %v11141_v17 }
 0x555   :  { %11117 = vst [vmem:[#allocation399_spill] sm:$0xff] %v7166_v47  ;;  %v7184_v61 = vpop.permute.xlu2 %3909  ;;  %4079 = vperm.xlu0 %5676, %v3861_v57   ;;  %v7188_v47 = vmul.f32 %v7031_v63, %v6199_v60  ;;  %v7208_v60 = vmul.f32 %v7031_v63, %v6207_v10  ;;  %v3859_v57 = vld [vmem:[#allocation2 + $0x211] sm:$0xff]  ;;  %v7230_v10 = vmul.f32 %v7031_v63, %v6215_v25 }
 0x556   :  { %11119 = vst [vmem:[#allocation401_spill] sm:$0xff] %v7184_v61  ;;  %v7248_v25 = vmul.f32 %v7031_v63, %v6225_v54  ;;  %v11135_v54 = vld [vmem:[#allocation9_spill] sm:$0xff] }
 0x557   :  { %11121 = vst [vmem:[#allocation403_spill] sm:$0xff] %v7208_v60  ;;  %v7218_v61 = vpop.permute.xlu0 %3676  ;;  %v7272_v60 = vmul.f32 %v7031_v63, %v11137_v6  ;;  %v11147_v6 = vld [vmem:[#allocation18_spill] sm:$0xff] }
 0x558   :  { %11123 = vst [vmem:[#allocation405_spill] sm:$0xff] %v7218_v61  ;;  %v11129_v61 = vld [vmem:[#allocation6_spill] sm:$0xff] }
 0x559   :  { %11125 = vst [vmem:[#allocation407_spill] sm:$0xff] %v7230_v10  ;;  %v7256_v37 = vmul.f32 %v7031_v63, %v11129_v61  ;;  %v11139_v61 = vld [vmem:[#allocation11_spill] sm:$0xff] }
 0x55a   :  { %11128 = vst [vmem:[#allocation410_spill] sm:$0xff] %v7248_v25  ;;  %4069 = vperm.xlu1 %5677, %v3859_v57   ;;  %v7268_v25 = vmul.f32 %v7031_v63, %v11135_v54  ;;  %v7282_v57 = vmul.f32 %v7031_v63, %v11142_v39  ;;  %v11145_v54 = vld [vmem:[#allocation13_spill] sm:$0xff] }
 0x55b   :  { %11130 = vst [vmem:[#allocation6_spill] sm:$0xff] %v7256_v37  ;;  %v7276_v37 = vmul.f32 %v7031_v63, %v11139_v61  ;;  %4089 = vperm.xlu2 %5678, %v3863_v13   ;;  %v7289_v32 = vmul.f32 %v7031_v63, %v11145_v54  ;;  %v11151_v13 = vld [vmem:[#allocation21_spill] sm:$0xff] }
 0x55c   :  { %11134 = vst [vmem:[#allocation8_spill] sm:$0xff] %v7264_v40  ;;  %v7285_v40 = vadd.f32 %v1130_v18, %v7049_v29  ;;  %v7293_v61 = vpop.permute.xlu1 %3666  ;;  %v1139_v39 = vmul.f32 %v7164_v35, %v11151_v13  ;;  %v1129_v29 = vmul.f32 %v7164_v35, %v11152_v51  ;;  %v11153_v18 = vld [vmem:[#allocation22_spill] sm:$0xff]  ;;  %v7316_v51 = vadd.f32 %v1133_v48, %v7037_v45  ;;  %v11166_v48 = vld [vmem:[#allocation19_spill] sm:$0xff] }
 0x55d   :  { %11136 = vst [vmem:[#allocation9_spill] sm:$0xff] %v7268_v25  ;;  %v7305_v54 = vpop.permute.xlu2 %3924  ;;  %4094 = vperm.xlu0 %5676, %v3864_v0   ;;  %v11162_v0 = vld [vmem:[#allocation29_spill] sm:$0xff] }
 0x55e   :  { %11138 = vst [vmem:[#allocation10_spill] sm:$0xff] %v7272_v60  ;;  %v1136_v60 = vmul.f32 %v7164_v35, %v11147_v6 }
 0x55f   :  { %11140 = vst [vmem:[#allocation11_spill] sm:$0xff] %v7276_v37  ;;  %v11149_v37 = vld [vmem:[#allocation14_spill] sm:$0xff]  ;;  %v7326_v38 = vpop.permute.xlu0 %3691 }
 0x560   :  { %11143 = vst [vmem:[#allocation15_spill] sm:$0xff] %v7282_v57  ;;  %v7297_v17 = vmul.f32 %v7031_v63, %v11149_v37  ;;  %v11157_v37 = vld [vmem:[#allocation27_spill] sm:$0xff]  ;;  %v11158_v57 = vld [vmem:[#allocation25_spill] sm:$0xff]  ;;  %v7333_v45 = vadd.f32 %v1136_v60, %v7089_v50 }
 0x561   :  { %11144 = vst [vmem:[#allocation12_spill] sm:$0xff] %v7285_v40  ;;  %v1131_v40 = vmul.f32 %v7164_v35, %v11153_v18  ;;  %v1134_v13 = vmul.f32 %v7164_v35, %v11158_v57  ;;  %v7320_v18 = vmul.f32 %v7031_v63, %v11160_v62  ;;  %v7337_v62 = vmul.f32 %v7031_v63, %v11166_v48  ;;  %v11167_v57 = vld [vmem:[#allocation30_spill] sm:$0xff] }
 0x562   :  { %11146 = vst [vmem:[#allocation13_spill] sm:$0xff] %v7289_v32  ;;  %v11155_v32 = vld [vmem:[#allocation24_spill] sm:$0xff] }
 0x563   :  { %11148 = vst [vmem:[#allocation18_spill] sm:$0xff] %v7293_v61  ;;  %v1142_v6 = vmul.f32 %v7164_v35, %v11155_v32  ;;  %v11156_v61 = vld [vmem:[#allocation26_spill] sm:$0xff]  ;;  %v11163_v32 = vld [vmem:[#allocation28_spill] sm:$0xff]  ;;  %v7352_v50 = vadd.f32 %v1131_v40, %v7063_v26 }
 0x564   :  { %11150 = vst [vmem:[#allocation14_spill] sm:$0xff] %v7297_v17  ;;  %v1132_v10 = vmul.f32 %v7164_v35, %v11156_v61  ;;  %v1145_v17 = vmul.f32 %v7164_v35, %v11157_v37  ;;  %v1137_v15 = vmul.f32 %v7164_v35, %v11163_v32  ;;  %v3862_v61 = vld [vmem:[#allocation2 + $0x231] sm:$0xff] }
 0x565   :  { %11154 = vst [vmem:[#allocation21_spill] sm:$0xff] %v7305_v54  ;;  %v1135_v54 = vmul.f32 %v7164_v35, %v11162_v0  ;;  %v11165_v37 = vld [vmem:[#allocation17_spill] sm:$0xff]  ;;  %v1148_v0 = vmul.f32 %v7164_v35, %v11167_v57  ;;  %v7355_v60 = vadd.f32 %v1142_v6, %v7109_v2  ;;  %4084 = vperm.xlu1 %5677, %v3862_v61   ;;  %v11171_v40 = vld [vmem:[#allocation32_spill] sm:$0xff] }
 0x566   :  { %11159 = vst [vmem:[#allocation23_spill] sm:$0xff] %v7316_v51  ;;  %v7330_v25 = vmul.f32 %v7031_v63, %v11165_v37  ;;  %v3866_v51 = vld [vmem:[#allocation2 + $0x261] sm:$0xff]  ;;  %v7349_v37 = vadd.f32 %v1129_v29, %v7045_v56  ;;  %v7358_v48 = vadd.f32 %v1132_v10, %v7071_v42  ;;  %v7361_v57 = vadd.f32 %v1145_v17, %v7121_v5  ;;  %v11181_v61 = vld [vmem:[#allocation37_spill] sm:$0xff] }
 0x567   :  { %11161 = vst [vmem:[#allocation22_spill] sm:$0xff] %v7320_v18  ;;  %v11168_v18 = vld [vmem:[#allocation20_spill] sm:$0xff]  ;;  %v7367_v56 = vadd.f32 %v1135_v54, %v7075_v34  ;;  %v7370_v26 = vadd.f32 %v1137_v15, %v7055_v24  ;;  %v1138_v2 = vmul.f32 %v7164_v35, %v11171_v40  ;;  %4104 = vperm.xlu2 %5678, %v3866_v51   ;;  %v11175_v17 = vld [vmem:[#allocation35_spill] sm:$0xff]  ;;  %v11176_v29 = vld [vmem:[#allocation34_spill] sm:$0xff]  ;;  %v7385_v24 = vpop.permute.xlu1 %3681  ;;  %v7395_v40 = vpop.permute.xlu2 %3939 }
 0x568   :  { %11164 = vst [vmem:[#allocation24_spill] sm:$0xff] %v7326_v38  ;;  %v7343_v32 = vmul.f32 %v7031_v63, %v11168_v18  ;;  %v7346_v38 = vadd.f32 %v1139_v39, %v7097_v52  ;;  %v7364_v63 = vadd.f32 %v1134_v13, %v7041_v4  ;;  %v3867_v52 = vld [vmem:[#allocation2 + $0x271] sm:$0xff]  ;;  %v11172_v39 = vld [vmem:[#allocation31_spill] sm:$0xff]  ;;  %v7377_v5 = vadd.f32 %v1148_v0, %v7137_v14  ;;  %v11179_v13 = vld [vmem:[#allocation38_spill] sm:$0xff] }
 0x569   :  { %11169 = vst [vmem:[#allocation26_spill] sm:$0xff] %v7355_v60  ;;  %v1140_v42 = vmul.f32 %v7164_v35, %v11172_v39  ;;  %v11174_v4 = vld [vmem:[#allocation33_spill] sm:$0xff]  ;;  %v1141_v34 = vmul.f32 %v7164_v35, %v11175_v17  ;;  %v1143_v15 = vmul.f32 %v7164_v35, %v11176_v29  ;;  %v11178_v54 = vld [vmem:[#allocation36_spill] sm:$0xff]  ;;  %v1144_v51 = vmul.f32 %v7164_v35, %v11179_v13  ;;  %v11180_v18 = vld [vmem:[#allocation39_spill] sm:$0xff] }
 0x56a   :  { %11170 = vst [vmem:[#allocation27_spill] sm:$0xff] %v7361_v57  ;;  %v1151_v10 = vmul.f32 %v7164_v35, %v11174_v4  ;;  %v1154_v6 = vmul.f32 %v7164_v35, %v11178_v54  ;;  %v1157_v14 = vmul.f32 %v7164_v35, %v11180_v18  ;;  %v1146_v0 = vmul.f32 %v7164_v35, %v11181_v61  ;;  %v11183_v39 = vld [vmem:[#allocation41_spill] sm:$0xff]  ;;  %v11184_v17 = vld [vmem:[#allocation42_spill] sm:$0xff] }
 0x56b   :  { %11173 = vst [vmem:[#allocation25_spill] sm:$0xff] %v7377_v5  ;;  %4109 = vperm.xlu0 %5676, %v3867_v52   ;;  %v1147_v4 = vmul.f32 %v7164_v35, %v11183_v39  ;;  %v1160_v29 = vmul.f32 %v7164_v35, %v11184_v17  ;;  %v11186_v5 = vld [vmem:[#allocation43_spill] sm:$0xff]  ;;  %v7406_v18 = vadd.f32 %v1138_v2, %v7083_v49  ;;  %v11188_v57 = vld [vmem:[#allocation45_spill] sm:$0xff]  ;;  %v7415_v17 = vpop.permute.xlu0 %3899 }
 0x56c   :  { %11177 = vst [vmem:[#allocation16_spill] sm:$0xff] %v7385_v24  ;;  %v11185_v24 = vld [vmem:[#allocation40_spill] sm:$0xff]  ;;  %v1152_v13 = vmul.f32 %v7164_v35, %v11186_v5  ;;  %v7409_v61 = vadd.f32 %v1140_v42, %v7059_v19  ;;  %v1163_v39 = vmul.f32 %v7164_v35, %v11188_v57  ;;  %v3865_v60 = vld [vmem:[#allocation2 + $0x259] sm:$0xff]  ;;  %v7421_v5 = vadd.f32 %v1141_v34, %v7101_v59  ;;  %v11192_v34 = vld [vmem:[#allocation47_spill] sm:$0xff] }
 0x56d   :  { %11182 = vst [vmem:[#allocation29_spill] sm:$0xff] %v7395_v40  ;;  %v1149_v54 = vmul.f32 %v7164_v35, %v11185_v24  ;;  %v11187_v40 = vld [vmem:[#allocation44_spill] sm:$0xff]  ;;  %v7418_v24 = vadd.f32 %v1151_v10, %v7145_v16  ;;  %v7424_v49 = vadd.f32 %v1143_v15, %v7067_v33  ;;  %v11190_v19 = vld [vmem:[#allocation46_spill] sm:$0xff]  ;;  %v7432_v57 = vadd.f32 %v1144_v51, %v7113_v3  ;;  %v11196_v51 = vld [vmem:[#allocation49_spill] sm:$0xff] }
 0x56e   :  { %v1150_v52 = vmul.f32 %v7164_v35, %v11187_v40  ;;  %11189 = vst [vmem:[#allocation28_spill] sm:$0xff] %v7415_v17  ;;  %v1155_v2 = vmul.f32 %v7164_v35, %v11190_v19  ;;  %v3869_v42 = vld [vmem:[#allocation2 + $0x289] sm:$0xff]  ;;  %v7429_v40 = vadd.f32 %v1154_v6, %v7157_v27  ;;  %v7435_v17 = vadd.f32 %v1157_v14, %v7174_v36  ;;  %v3870_v3 = vld [vmem:[#allocation2 + $0x291] sm:$0xff] }
 0x56f   :  { %v7438_v16 = vadd.f32 %v1146_v0, %v7079_v41  ;;  %v7441_v59 = vadd.f32 %v1147_v4, %v7125_v9  ;;  %v7444_v33 = vadd.f32 %v1160_v29, %v7188_v47  ;;  %v7447_v10 = vadd.f32 %v1149_v54, %v7093_v58  ;;  %4099 = vperm.xlu1 %5677, %v3865_v60   ;;  %v11193_v15 = vld [vmem:[#allocation48_spill] sm:$0xff]  ;;  %v11195_v6 = vld [vmem:[#allocation51_spill] sm:$0xff]  ;;  %v7471_v14 = vpop.permute.xlu1 %3889  ;;  %v11198_v0 = vld [vmem:[#allocation53_spill] sm:$0xff]  ;;  %v7481_v19 = vpop.permute.xlu2 %3954 }
 0x570   :  { %v7450_v27 = vadd.f32 %v1152_v13, %v7105_v31  ;;  %v7453_v36 = vadd.f32 %v1150_v52, %v7133_v11  ;;  %v7456_v41 = vadd.f32 %v1163_v39, %v7204_v53  ;;  %v1153_v9 = vmul.f32 %v7164_v35, %v11192_v34  ;;  %4119 = vperm.xlu2 %5678, %v3869_v42   ;;  %v11194_v31 = vld [vmem:[#allocation50_spill] sm:$0xff]  ;;  %v11200_v13 = vld [vmem:[#allocation52_spill] sm:$0xff]  ;;  %v11201_v52 = vld [vmem:[#allocation55_spill] sm:$0xff] }
 0x571   :  { %v1166_v47 = vmul.f32 %v7164_v35, %v11193_v15  ;;  %v7463_v58 = vadd.f32 %v1155_v2, %v7117_v8  ;;  %v1156_v60 = vmul.f32 %v7164_v35, %v11194_v31  ;;  %v1169_v11 = vmul.f32 %v7164_v35, %v11195_v6  ;;  %11197 = vst [vmem:[#allocation19_spill] sm:$0xff] %v7471_v14  ;;  %v11199_v29 = vld [vmem:[#allocation54_spill] sm:$0xff]  ;;  %v11203_v2 = vld [vmem:[#allocation56_spill] sm:$0xff]  ;;  %v11204_v34 = vld [vmem:[#allocation57_spill] sm:$0xff] }
 0x572   :  { %11191 = vst [vmem:[#allocation17_spill] sm:$0xff] %v7456_v41  ;;  %v1158_v53 = vmul.f32 %v7164_v35, %v11196_v51  ;;  %v1159_v4 = vmul.f32 %v7164_v35, %v11198_v0  ;;  %v1172_v54 = vmul.f32 %v7164_v35, %v11199_v29  ;;  %v1161_v8 = vmul.f32 %v7164_v35, %v11200_v13  ;;  %v11205_v31 = vld [vmem:[#allocation59_spill] sm:$0xff]  ;;  %v11206_v51 = vld [vmem:[#allocation58_spill] sm:$0xff] }
 0x573   :  { %v1164_v39 = vmul.f32 %v7164_v35, %v11201_v52  ;;  %11202 = vst [vmem:[#allocation30_spill] sm:$0xff] %v7481_v19  ;;  %4124 = vperm.xlu0 %5676, %v3870_v3   ;;  %v1162_v42 = vmul.f32 %v7164_v35, %v11203_v2  ;;  %v1175_v15 = vmul.f32 %v7164_v35, %v11204_v34  ;;  %v11208_v52 = vld [vmem:[#allocation60_spill] sm:$0xff]  ;;  %v11209_v19 = vld [vmem:[#allocation61_spill] sm:$0xff]  ;;  %v7501_v34 = vpop.permute.xlu0 %3914 }
 0x574   :  { %v1165_v6 = vmul.f32 %v7164_v35, %v11205_v31  ;;  %v1167_v0 = vmul.f32 %v7164_v35, %v11206_v51  ;;  %v7492_v29 = vadd.f32 %v1153_v9, %v7149_v21  ;;  %v7495_v13 = vadd.f32 %v1166_v47, %v7212_v55  ;;  %v3868_v14 = vld [vmem:[#allocation2 + $0x279] sm:$0xff]  ;;  %11210 = vst [vmem:[#allocation32_spill] sm:$0xff] %v7501_v34  ;;  %v3872_v47 = vld [vmem:[#allocation2 + $0x2a9] sm:$0xff] }
 0x575   :  { %v1178_v3 = vmul.f32 %v7164_v35, %v11208_v52  ;;  %v1170_v2 = vmul.f32 %v7164_v35, %v11209_v19  ;;  %v7504_v31 = vadd.f32 %v1156_v60, %v7161_v28  ;;  %v7507_v51 = vadd.f32 %v1169_v11, %v7226_v7  ;;  %v11212_v55 = vld [vmem:[#allocation62_spill] sm:$0xff]  ;;  %v11218_v11 = vld [vmem:[#allocation9_spill] sm:$0xff] }
 0x576   :  { %11207 = vst [vmem:[#allocation20_spill] sm:$0xff] %v7495_v13  ;;  %v7510_v21 = vadd.f32 %v1158_v53, %v7129_v1  ;;  %v1168_v9 = vmul.f32 %v7164_v35, %v11212_v55  ;;  %v7515_v52 = vadd.f32 %v1159_v4, %v7178_v43  ;;  %v7518_v19 = vadd.f32 %v1172_v54, %v7240_v22  ;;  %v3873_v22 = vld [vmem:[#allocation2 + $0x2b9] sm:$0xff]  ;;  %v11220_v53 = vld [vmem:[#allocation63_spill] sm:$0xff]  ;;  %v11221_v4 = vld [vmem:[#allocation400_spill] sm:$0xff] }
 0x577   :  { %11211 = vst [vmem:[#allocation31_spill] sm:$0xff] %v7507_v51  ;;  %v7521_v34 = vadd.f32 %v1161_v8, %v7141_v20  ;;  %v7524_v28 = vadd.f32 %v1164_v39, %v7153_v23  ;;  %v7527_v7 = vadd.f32 %v1162_v42, %v7192_v44  ;;  %v7530_v1 = vadd.f32 %v1175_v15, %v7252_v12  ;;  %v11223_v54 = vld [vmem:[#allocation393_spill] sm:$0xff]  ;;  %v11226_v39 = vld [vmem:[#allocation66_spill] sm:$0xff]  ;;  %v11227_v15 = vld [vmem:[#allocation64_spill] sm:$0xff] }
 0x578   :  { %11213 = vst [vmem:[#allocation33_spill] sm:$0xff] %v7518_v19  ;;  %v7533_v60 = vadd.f32 %v1165_v6, %v7200_v46  ;;  %v7536_v43 = vadd.f32 %v1167_v0, %v7170_v30  ;;  %4114 = vperm.xlu1 %5677, %v3868_v14   ;;  %v7539_v20 = vadd.f32 %v1178_v3, %v11218_v11  ;;  %v7547_v12 = vperm.slane %v11223_v54, 2  ;;  %v11224_v46 = vld [vmem:[#allocation404_spill] sm:$0xff]  ;;  %v11225_v30 = vld [vmem:[#allocation65_spill] sm:$0xff]  ;;  %v7558_v0 = vpop.permute.xlu1 %3904  ;;  %v11231_v11 = vld [vmem:[#allocation67_spill] sm:$0xff] }
 0x579   :  { %11214 = vst [vmem:[#allocation35_spill] sm:$0xff] %v7521_v34  ;;  %v1181_v23 = vmul.f32 %v7164_v35, %v11220_v53  ;;  %v7544_v44 = vadd.f32 %v1170_v2, %v11221_v4  ;;  %4134 = vperm.xlu2 %5678, %v3872_v47   ;;  %v7550_v8 = vadd.f32 %v1168_v9, %v11224_v46  ;;  %v11229_v3 = vld [vmem:[#allocation68_spill] sm:$0xff]  ;;  %v11230_v55 = vld [vmem:[#allocation69_spill] sm:$0xff]  ;;  %v11232_v53 = vld [vmem:[#allocation70_spill] sm:$0xff]  ;;  %v7568_v46 = vpop.permute.xlu2 %3969 }
 0x57a   :  { %11215 = vst [vmem:[#allocation34_spill] sm:$0xff] %v7524_v28  ;;  %v1171_v14 = vmul.f32 %v7164_v35, %v11225_v30  ;;  %v1184_v42 = vmul.f32 %v7164_v35, %v11226_v39  ;;  %v1173_v6 = vmul.f32 %v7164_v35, %v11227_v15  ;;  %v1174_v2 = vmul.f32 %v7164_v35, %v11229_v3  ;;  %v11234_v30 = vld [vmem:[#allocation71_spill] sm:$0xff]  ;;  %v11235_v15 = vld [vmem:[#allocation72_spill] sm:$0xff]  ;;  %v11245_v13 = vld [vmem:[#allocation14_spill] sm:$0xff] }
 0x57b   :  { %11216 = vst [vmem:[#allocation36_spill] sm:$0xff] %v7530_v1  ;;  %v1187_v47 = vmul.f32 %v7164_v35, %v11230_v55  ;;  %v1176_v9 = vmul.f32 %v7164_v35, %v11231_v11  ;;  %v1179_v4 = vmul.f32 %v7164_v35, %v11232_v53  ;;  %4139 = vperm.xlu0 %5676, %v3873_v22   ;;  %v11237_v1 = vld [vmem:[#allocation73_spill] sm:$0xff]  ;;  %v11240_v19 = vld [vmem:[#allocation75_spill] sm:$0xff]  ;;  %v11242_v54 = vld [vmem:[#allocation76_spill] sm:$0xff] }
 0x57c   :  { %11217 = vst [vmem:[#allocation38_spill] sm:$0xff] %v7536_v43  ;;  %v1177_v39 = vmul.f32 %v7164_v35, %v11234_v30  ;;  %v1182_v55 = vmul.f32 %v7164_v35, %v11237_v1  ;;  %v1642_v53 = vmul.f32 %v7547_v12, %v11240_v19  ;;  %v1185_v30 = vmul.f32 %v7164_v35, %v11242_v54  ;;  %v3871_v51 = vld [vmem:[#allocation2 + $0x2a1] sm:$0xff]  ;;  %v3875_v28 = vld [vmem:[#allocation2 + $0x2d1] sm:$0xff] }
 0x57d   :  { %11219 = vst [vmem:[#allocation39_spill] sm:$0xff] %v7539_v20  ;;  %v11236_v20 = vld [vmem:[#allocation74_spill] sm:$0xff]  ;;  %v11244_v43 = vld [vmem:[#allocation407_spill] sm:$0xff]  ;;  %v7593_v1 = vadd.f32 %v1184_v42, %v11245_v13  ;;  %v7604_v54 = vadd.f32 %v1187_v47, %v7330_v25 }
 0x57e   :  { %11222 = vst [vmem:[#allocation37_spill] sm:$0xff] %v7544_v44  ;;  %v1180_v3 = vmul.f32 %v7164_v35, %v11236_v20  ;;  %v11238_v44 = vld [vmem:[#allocation15_spill] sm:$0xff]  ;;  %v7590_v20 = vadd.f32 %v1171_v14, %v11244_v43  ;;  %v11252_v43 = vld [vmem:[#allocation406_spill] sm:$0xff]  ;;  %v7625_v47 = vadd.f32 %v1642_v53, %v7349_v37 }
 0x57f   :  { %11228 = vst [vmem:[#allocation41_spill] sm:$0xff] %v7558_v0  ;;  %v1190_v0 = vmul.f32 %v7164_v35, %v11235_v15  ;;  %v7579_v11 = vadd.f32 %v1181_v23, %v11238_v44  ;;  %v7587_v15 = vpop.permute.xlu0 %3929  ;;  %v11247_v23 = vld [vmem:[#allocation402_spill] sm:$0xff]  ;;  %v7610_v14 = vadd.f32 %v1179_v4, %v11252_v43  ;;  %v11263_v43 = vld [vmem:[#allocation79_spill] sm:$0xff] }
 0x580   :  { %11233 = vst [vmem:[#allocation42_spill] sm:$0xff] %v7568_v46  ;;  %v11241_v46 = vld [vmem:[#allocation77_spill] sm:$0xff]  ;;  %v7596_v44 = vadd.f32 %v1173_v6, %v11247_v23  ;;  %v11254_v13 = vld [vmem:[#allocation6_spill] sm:$0xff]  ;;  %4129 = vperm.xlu1 %5677, %v3871_v51  }
 0x581   :  { %11239 = vst [vmem:[#allocation40_spill] sm:$0xff] %v7579_v11  ;;  %v1183_v22 = vmul.f32 %v7164_v35, %v11241_v46  ;;  %v11248_v11 = vld [vmem:[#allocation78_spill] sm:$0xff]  ;;  %v11249_v46 = vld [vmem:[#allocation409_spill] sm:$0xff]  ;;  %v7613_v42 = vadd.f32 %v1177_v39, %v11254_v13  ;;  %v7616_v6 = vadd.f32 %v1190_v0, %v7343_v32  ;;  %v1188_v32 = vmul.f32 %v7164_v35, %v11263_v43  ;;  %v7644_v13 = vpop.permute.xlu1 %3919  ;;  %v7654_v43 = vpop.permute.xlu2 %3984 }
 0x582   :  { %11243 = vst [vmem:[#allocation43_spill] sm:$0xff] %v7587_v15  ;;  %v1645_v19 = vmul.f32 %v7547_v12, %v11248_v11  ;;  %v7601_v34 = vadd.f32 %v1174_v2, %v11249_v46  ;;  %v11251_v15 = vld [vmem:[#allocation403_spill] sm:$0xff]  ;;  %v11256_v11 = vld [vmem:[#allocation8_spill] sm:$0xff]  ;;  %v3876_v25 = vld [vmem:[#allocation2 + $0x2d9] sm:$0xff]  ;;  %4149 = vperm.xlu2 %5678, %v3875_v28  }
 0x583   :  { %11246 = vst [vmem:[#allocation44_spill] sm:$0xff] %v7593_v1  ;;  %v7607_v41 = vadd.f32 %v1176_v9, %v11251_v15  ;;  %v7619_v23 = vadd.f32 %v1180_v3, %v11256_v11  ;;  %v11257_v2 = vld [vmem:[#allocation408_spill] sm:$0xff]  ;;  %v11260_v9 = vld [vmem:[#allocation11_spill] sm:$0xff]  ;;  %v11261_v15 = vld [vmem:[#allocation410_spill] sm:$0xff]  ;;  %4154 = vperm.xlu0 %5676, %v3876_v25  }
 0x584   :  { %11250 = vst [vmem:[#allocation45_spill] sm:$0xff] %v7604_v54  ;;  %v7622_v46 = vadd.f32 %v1182_v55, %v11257_v2  ;;  %v7628_v4 = vadd.f32 %v1183_v22, %v11260_v9  ;;  %v7631_v39 = vadd.f32 %v1185_v30, %v11261_v15  ;;  %v7636_v0 = vadd.f32 %v1645_v19, %v7358_v48  ;;  %v11265_v3 = vld [vmem:[#allocation80_spill] sm:$0xff]  ;;  %v11266_v55 = vld [vmem:[#allocation81_spill] sm:$0xff]  ;;  %v11267_v53 = vld [vmem:[#allocation82_spill] sm:$0xff] }
 0x585   :  { %11253 = vst [vmem:[#allocation46_spill] sm:$0xff] %v7610_v14  ;;  %v1186_v51 = vmul.f32 %v7164_v35, %v11265_v3  ;;  %v1648_v37 = vmul.f32 %v7547_v12, %v11266_v55  ;;  %v1191_v22 = vmul.f32 %v7164_v35, %v11267_v53  ;;  %v11269_v30 = vld [vmem:[#allocation83_spill] sm:$0xff]  ;;  %v11270_v2 = vld [vmem:[#allocation84_spill] sm:$0xff]  ;;  %v11271_v9 = vld [vmem:[#allocation86_spill] sm:$0xff] }
 0x586   :  { %11255 = vst [vmem:[#allocation47_spill] sm:$0xff] %v7616_v6  ;;  %v1189_v11 = vmul.f32 %v7164_v35, %v11269_v30  ;;  %v1651_v28 = vmul.f32 %v7547_v12, %v11270_v2  ;;  %v1192_v48 = vmul.f32 %v7164_v35, %v11271_v9  ;;  %v11272_v19 = vld [vmem:[#allocation85_spill] sm:$0xff]  ;;  %v11274_v3 = vld [vmem:[#allocation87_spill] sm:$0xff]  ;;  %v11280_v9 = vld [vmem:[#allocation92_spill] sm:$0xff] }
 0x587   :  { %11258 = vst [vmem:[#allocation48_spill] sm:$0xff] %v7622_v46  ;;  %v1643_v15 = vmul.f32 %v7547_v12, %v11272_v19  ;;  %v1654_v55 = vmul.f32 %v7547_v12, %v11274_v3  ;;  %v11275_v53 = vld [vmem:[#allocation89_spill] sm:$0xff]  ;;  %v11278_v6 = vld [vmem:[#allocation7_spill] sm:$0xff]  ;;  %v1647_v19 = vmul.f32 %v7547_v12, %v11280_v9 }
 0x588   :  { %11259 = vst [vmem:[#allocation50_spill] sm:$0xff] %v7625_v47  ;;  %v11277_v47 = vld [vmem:[#allocation88_spill] sm:$0xff]  ;;  %v7665_v35 = vadd.f32 %v1188_v32, %v11278_v6  ;;  %v3874_v54 = vld [vmem:[#allocation2 + $0x2c1] sm:$0xff]  ;;  %v11284_v1 = vld [vmem:[#allocation13_spill] sm:$0xff] }
 0x589   :  { %11262 = vst [vmem:[#allocation51_spill] sm:$0xff] %v7631_v39  ;;  %v1646_v2 = vmul.f32 %v7547_v12, %v11277_v47  ;;  %v11282_v39 = vld [vmem:[#allocation91_spill] sm:$0xff]  ;;  %v7679_v47 = vadd.f32 %v1648_v37, %v7367_v56  ;;  %v11285_v6 = vld [vmem:[#allocation10_spill] sm:$0xff]  ;;  %v3878_v46 = vld [vmem:[#allocation2 + $0x2f1] sm:$0xff]  ;;  %v7699_v56 = vadd.f32 %v1654_v55, %v7421_v5  ;;  %4144 = vperm.xlu1 %5677, %v3874_v54  }
 0x58a   :  { %11264 = vst [vmem:[#allocation49_spill] sm:$0xff] %v7636_v0  ;;  %v11276_v0 = vld [vmem:[#allocation90_spill] sm:$0xff]  ;;  %v1649_v3 = vmul.f32 %v7547_v12, %v11282_v39  ;;  %v7682_v32 = vadd.f32 %v1191_v22, %v11285_v6  ;;  %v7690_v39 = vadd.f32 %v1651_v28, %v7406_v18  ;;  %4164 = vperm.xlu2 %5678, %v3878_v46   ;;  %v11296_v55 = vld [vmem:[#allocation97_spill] sm:$0xff]  ;;  %v11301_v6 = vld [vmem:[#allocation100_spill] sm:$0xff] }
 0x58b   :  { %11268 = vst [vmem:[#allocation53_spill] sm:$0xff] %v7644_v13  ;;  %v1644_v13 = vmul.f32 %v7547_v12, %v11275_v53  ;;  %v1657_v30 = vmul.f32 %v7547_v12, %v11276_v0  ;;  %v7673_v53 = vpop.permute.xlu0 %3944  ;;  %v7676_v0 = vadd.f32 %v1186_v51, %v11284_v1  ;;  %v11288_v1 = vld [vmem:[#allocation12_spill] sm:$0xff]  ;;  %v3879_v18 = vld [vmem:[#allocation2 + $0x301] sm:$0xff] }
 0x58c   :  { %11273 = vst [vmem:[#allocation54_spill] sm:$0xff] %v7654_v43  ;;  %v11281_v43 = vld [vmem:[#allocation93_spill] sm:$0xff]  ;;  %v7696_v51 = vadd.f32 %v1643_v15, %v11288_v1  ;;  %v7717_v5 = vadd.f32 %v1649_v3, %v7333_v45  ;;  %v11295_v54 = vld [vmem:[#allocation98_spill] sm:$0xff]  ;;  %v11298_v45 = vld [vmem:[#allocation99_spill] sm:$0xff]  ;;  %4169 = vperm.xlu0 %5676, %v3879_v18  }
 0x58d   :  { %11279 = vst [vmem:[#allocation52_spill] sm:$0xff] %v7665_v35  ;;  %v1660_v25 = vmul.f32 %v7547_v12, %v11281_v43  ;;  %v11286_v35 = vld [vmem:[#allocation94_spill] sm:$0xff]  ;;  %v7702_v37 = vadd.f32 %v1644_v13, %v7352_v50  ;;  %v7705_v22 = vadd.f32 %v1657_v30, %v7432_v57  ;;  %v11294_v57 = vld [vmem:[#allocation96_spill] sm:$0xff]  ;;  %v7730_v30 = vpop.permute.xlu1 %3934 }
 0x58e   :  { %11283 = vst [vmem:[#allocation55_spill] sm:$0xff] %v7673_v53  ;;  %v1652_v9 = vmul.f32 %v7547_v12, %v11286_v35  ;;  %v11287_v43 = vld [vmem:[#allocation22_spill] sm:$0xff]  ;;  %v7693_v53 = vadd.f32 %v1192_v48, %v7337_v62  ;;  %v7711_v62 = vadd.f32 %v1647_v19, %v7364_v63  ;;  %v11293_v48 = vld [vmem:[#allocation95_spill] sm:$0xff]  ;;  %v1663_v13 = vmul.f32 %v7547_v12, %v11294_v57  ;;  %v11299_v19 = vld [vmem:[#allocation101_spill] sm:$0xff] }
 0x58f   :  { %v7687_v14 = vadd.f32 %v1189_v11, %v11287_v43  ;;  %11289 = vst [vmem:[#allocation56_spill] sm:$0xff] %v7699_v56  ;;  %v11291_v11 = vld [vmem:[#allocation23_spill] sm:$0xff]  ;;  %v7714_v28 = vadd.f32 %v1660_v25, %v7441_v59  ;;  %v1650_v50 = vmul.f32 %v7547_v12, %v11293_v48  ;;  %v1653_v63 = vmul.f32 %v7547_v12, %v11295_v54  ;;  %v11300_v25 = vld [vmem:[#allocation102_spill] sm:$0xff]  ;;  %v11303_v43 = vld [vmem:[#allocation104_spill] sm:$0xff] }
 0x590   :  { %11290 = vst [vmem:[#allocation57_spill] sm:$0xff] %v7705_v22  ;;  %v7708_v35 = vadd.f32 %v1646_v2, %v11291_v11  ;;  %v7724_v15 = vadd.f32 %v1652_v9, %v7346_v38  ;;  %v1655_v59 = vmul.f32 %v7547_v12, %v11296_v55  ;;  %v1666_v2 = vmul.f32 %v7547_v12, %v11298_v45  ;;  %v7740_v9 = vpop.permute.xlu2 %3999  ;;  %v11304_v11 = vld [vmem:[#allocation105_spill] sm:$0xff]  ;;  %v11305_v57 = vld [vmem:[#allocation103_spill] sm:$0xff]  ;;  %v11306_v55 = vld [vmem:[#allocation106_spill] sm:$0xff] }
 0x591   :  { %11292 = vst [vmem:[#allocation59_spill] sm:$0xff] %v7714_v28  ;;  %v1656_v46 = vmul.f32 %v7547_v12, %v11299_v19  ;;  %v1669_v3 = vmul.f32 %v7547_v12, %v11300_v25  ;;  %v1658_v38 = vmul.f32 %v7547_v12, %v11301_v6  ;;  %v1659_v1 = vmul.f32 %v7547_v12, %v11303_v43  ;;  %v11307_v25 = vld [vmem:[#allocation107_spill] sm:$0xff]  ;;  %v11312_v22 = vld [vmem:[#allocation110_spill] sm:$0xff] }
 0x592   :  { %11297 = vst [vmem:[#allocation58_spill] sm:$0xff] %v7730_v30  ;;  %v1672_v48 = vmul.f32 %v7547_v12, %v11304_v11  ;;  %v1661_v54 = vmul.f32 %v7547_v12, %v11305_v57  ;;  %v1664_v45 = vmul.f32 %v7547_v12, %v11306_v55  ;;  %v7751_v19 = vadd.f32 %v1650_v50, %v7370_v26  ;;  %v11309_v30 = vld [vmem:[#allocation109_spill] sm:$0xff]  ;;  %v3877_v28 = vld [vmem:[#allocation2 + $0x2e9] sm:$0xff]  ;;  %v11311_v26 = vld [vmem:[#allocation26_spill] sm:$0xff] }
 0x593   :  { %11302 = vst [vmem:[#allocation60_spill] sm:$0xff] %v7740_v9  ;;  %v1662_v6 = vmul.f32 %v7547_v12, %v11307_v25  ;;  %v11308_v9 = vld [vmem:[#allocation108_spill] sm:$0xff]  ;;  %v1667_v43 = vmul.f32 %v7547_v12, %v11309_v30  ;;  %v7759_v11 = vpop.permute.xlu0 %3959  ;;  %v7762_v57 = vadd.f32 %v1663_v13, %v7453_v36  ;;  %v7765_v55 = vadd.f32 %v1653_v63, %v7409_v61  ;;  %v3881_v56 = vld [vmem:[#allocation2 + $0x319] sm:$0xff]  ;;  %v11313_v36 = vld [vmem:[#allocation27_spill] sm:$0xff] }
 0x594   :  { %v1675_v18 = vmul.f32 %v7547_v12, %v11308_v9  ;;  %11310 = vst [vmem:[#allocation61_spill] sm:$0xff] %v7759_v11  ;;  %v7768_v50 = vadd.f32 %v1655_v59, %v11311_v26  ;;  %v1665_v25 = vmul.f32 %v7547_v12, %v11312_v22  ;;  %v7773_v9 = vadd.f32 %v1666_v2, %v7492_v29  ;;  %v11314_v22 = vld [vmem:[#allocation25_spill] sm:$0xff] }
 0x595   :  { %v7776_v30 = vadd.f32 %v1656_v46, %v7424_v49  ;;  %v7779_v11 = vadd.f32 %v1669_v3, %v7504_v31  ;;  %v7782_v13 = vadd.f32 %v1658_v38, %v11313_v36  ;;  %v7785_v61 = vadd.f32 %v1659_v1, %v7438_v16  ;;  %4159 = vperm.xlu1 %5677, %v3877_v28   ;;  %v3882_v49 = vld [vmem:[#allocation2 + $0x321] sm:$0xff]  ;;  %v11319_v1 = vld [vmem:[#allocation112_spill] sm:$0xff] }
 0x596   :  { %v7788_v63 = vadd.f32 %v1672_v48, %v7515_v52  ;;  %v7791_v59 = vadd.f32 %v1661_v54, %v11314_v22  ;;  %v7794_v29 = vadd.f32 %v1664_v45, %v7418_v24  ;;  %v7797_v31 = vadd.f32 %v1662_v6, %v7447_v10  ;;  %v11316_v46 = vld [vmem:[#allocation111_spill] sm:$0xff]  ;;  %4179 = vperm.xlu2 %5678, %v3881_v56   ;;  %v11317_v24 = vld [vmem:[#allocation113_spill] sm:$0xff]  ;;  %v11318_v38 = vld [vmem:[#allocation114_spill] sm:$0xff]  ;;  %v7816_v48 = vpop.permute.xlu1 %3949 }
 0x597   :  { %v7800_v2 = vadd.f32 %v1675_v18, %v7527_v7  ;;  %v1678_v16 = vmul.f32 %v7547_v12, %v11316_v46  ;;  %v7805_v52 = vadd.f32 %v1667_v43, %v7429_v40  ;;  %v7808_v3 = vadd.f32 %v1665_v25, %v7450_v27  ;;  %11320 = vst [vmem:[#allocation9_spill] sm:$0xff] %v7816_v48  ;;  %v11321_v54 = vld [vmem:[#allocation116_spill] sm:$0xff]  ;;  %v11322_v40 = vld [vmem:[#allocation117_spill] sm:$0xff]  ;;  %v11323_v6 = vld [vmem:[#allocation115_spill] sm:$0xff] }
 0x598   :  { %v1668_v28 = vmul.f32 %v7547_v12, %v11317_v24  ;;  %v1681_v10 = vmul.f32 %v7547_v12, %v11318_v38  ;;  %v1670_v7 = vmul.f32 %v7547_v12, %v11319_v1  ;;  %v1671_v45 = vmul.f32 %v7547_v12, %v11321_v54  ;;  %v11324_v18 = vld [vmem:[#allocation118_spill] sm:$0xff]  ;;  %v7826_v26 = vpop.permute.xlu2 %4014  ;;  %4184 = vperm.xlu0 %5676, %v3882_v49   ;;  %v11326_v25 = vld [vmem:[#allocation119_spill] sm:$0xff]  ;;  %v11327_v22 = vld [vmem:[#allocation120_spill] sm:$0xff] }
 0x599   :  { %11315 = vst [vmem:[#allocation62_spill] sm:$0xff] %v7800_v2  ;;  %v1684_v56 = vmul.f32 %v7547_v12, %v11322_v40  ;;  %v1673_v27 = vmul.f32 %v7547_v12, %v11323_v6  ;;  %v1676_v43 = vmul.f32 %v7547_v12, %v11324_v18  ;;  %v1674_v36 = vmul.f32 %v7547_v12, %v11326_v25  ;;  %v11328_v24 = vld [vmem:[#allocation122_spill] sm:$0xff]  ;;  %v11329_v1 = vld [vmem:[#allocation121_spill] sm:$0xff]  ;;  %v11331_v6 = vld [vmem:[#allocation123_spill] sm:$0xff] }
 0x59a   :  { %11325 = vst [vmem:[#allocation63_spill] sm:$0xff] %v7826_v26  ;;  %v1687_v46 = vmul.f32 %v7547_v12, %v11327_v22  ;;  %v1677_v38 = vmul.f32 %v7547_v12, %v11328_v24  ;;  %v1679_v54 = vmul.f32 %v7547_v12, %v11329_v1  ;;  %v7837_v40 = vadd.f32 %v1678_v16, %v7533_v60  ;;  %v11332_v26 = vld [vmem:[#allocation125_spill] sm:$0xff]  ;;  %v11333_v48 = vld [vmem:[#allocation124_spill] sm:$0xff]  ;;  %v11336_v16 = vld [vmem:[#allocation126_spill] sm:$0xff] }
 0x59b   :  { %v1690_v18 = vmul.f32 %v7547_v12, %v11331_v6  ;;  %v1680_v49 = vmul.f32 %v7547_v12, %v11332_v26  ;;  %v1682_v25 = vmul.f32 %v7547_v12, %v11333_v48  ;;  %v3880_v2 = vld [vmem:[#allocation2 + $0x309] sm:$0xff]  ;;  %v7845_v22 = vpop.permute.xlu0 %3974  ;;  %v7848_v24 = vadd.f32 %v1668_v28, %v7463_v58  ;;  %v11339_v58 = vld [vmem:[#allocation17_spill] sm:$0xff] }
 0x59c   :  { %11330 = vst [vmem:[#allocation400_spill] sm:$0xff] %v7837_v40  ;;  %v7851_v1 = vadd.f32 %v1681_v10, %v7550_v8  ;;  %v7854_v60 = vadd.f32 %v1670_v7, %v7435_v17  ;;  %v1693_v6 = vmul.f32 %v7547_v12, %v11336_v16  ;;  %v3884_v40 = vld [vmem:[#allocation2 + $0x339] sm:$0xff]  ;;  %v7859_v26 = vadd.f32 %v1671_v45, %v7510_v21  ;;  %v11341_v8 = vld [vmem:[#allocation35_spill] sm:$0xff]  ;;  %v11344_v21 = vld [vmem:[#allocation20_spill] sm:$0xff] }
 0x59d   :  { %11334 = vst [vmem:[#allocation404_spill] sm:$0xff] %v7845_v22  ;;  %v7862_v48 = vadd.f32 %v1684_v56, %v7590_v20  ;;  %v7865_v22 = vadd.f32 %v1673_v27, %v7444_v33  ;;  %v7868_v28 = vadd.f32 %v1676_v43, %v11339_v58  ;;  %v7871_v10 = vadd.f32 %v1674_v36, %v11341_v8  ;;  %v11343_v7 = vld [vmem:[#allocation34_spill] sm:$0xff]  ;;  %v3885_v20 = vld [vmem:[#allocation2 + $0x349] sm:$0xff] }
 0x59e   :  { %11335 = vst [vmem:[#allocation65_spill] sm:$0xff] %v7851_v1  ;;  %v7874_v17 = vadd.f32 %v1687_v46, %v7601_v34  ;;  %v7877_v16 = vadd.f32 %v1677_v38, %v11343_v7  ;;  %v7880_v45 = vadd.f32 %v1679_v54, %v11344_v21  ;;  %4174 = vperm.xlu1 %5677, %v3880_v2   ;;  %v11347_v56 = vld [vmem:[#allocation38_spill] sm:$0xff]  ;;  %v11348_v43 = vld [vmem:[#allocation31_spill] sm:$0xff]  ;;  %v11352_v38 = vld [vmem:[#allocation128_spill] sm:$0xff] }
 0x59f   :  { %11337 = vst [vmem:[#allocation66_spill] sm:$0xff] %v7862_v48  ;;  %v7883_v33 = vadd.f32 %v1690_v18, %v7613_v42  ;;  %v7886_v27 = vadd.f32 %v1680_v49, %v11347_v56  ;;  %v7889_v36 = vadd.f32 %v1682_v25, %v11348_v43  ;;  %v11350_v58 = vld [vmem:[#allocation127_spill] sm:$0xff]  ;;  %4194 = vperm.xlu2 %5678, %v3884_v40   ;;  %v11353_v54 = vld [vmem:[#allocation129_spill] sm:$0xff]  ;;  %v7903_v49 = vpop.permute.xlu1 %3964  ;;  %v11357_v21 = vld [vmem:[#allocation132_spill] sm:$0xff] }
 0x5a0   :  { %11338 = vst [vmem:[#allocation64_spill] sm:$0xff] %v7865_v22  ;;  %v1685_v34 = vmul.f32 %v7547_v12, %v11350_v58  ;;  %v7894_v46 = vadd.f32 %v1693_v6, %v7619_v23  ;;  %v1683_v2 = vmul.f32 %v7547_v12, %v11352_v38  ;;  %v1696_v42 = vmul.f32 %v7547_v12, %v11353_v54  ;;  %v11354_v18 = vld [vmem:[#allocation393_spill] sm:$0xff]  ;;  %v11356_v25 = vld [vmem:[#allocation131_spill] sm:$0xff]  ;;  %v11358_v56 = vld [vmem:[#allocation130_spill] sm:$0xff]  ;;  %v7913_v58 = vpop.permute.xlu2 %4029 }
 0x5a1   :  { %11340 = vst [vmem:[#allocation68_spill] sm:$0xff] %v7868_v28  ;;  %v7901_v8 = vperm.slane %v11354_v18, 3  ;;  %v1686_v7 = vmul.f32 %v7547_v12, %v11356_v25  ;;  %v1699_v40 = vmul.f32 %v7547_v12, %v11357_v21  ;;  %v1688_v23 = vmul.f32 %v7547_v12, %v11358_v56  ;;  %v11359_v6 = vld [vmem:[#allocation133_spill] sm:$0xff]  ;;  %4199 = vperm.xlu0 %5676, %v3885_v20   ;;  %v11361_v38 = vld [vmem:[#allocation134_spill] sm:$0xff]  ;;  %v11369_v48 = vld [vmem:[#allocation139_spill] sm:$0xff] }
 0x5a2   :  { %11342 = vst [vmem:[#allocation69_spill] sm:$0xff] %v7874_v17  ;;  %v1691_v43 = vmul.f32 %v7547_v12, %v11359_v6  ;;  %v1689_v54 = vmul.f32 %v7547_v12, %v11361_v38  ;;  %v11364_v17 = vld [vmem:[#allocation136_spill] sm:$0xff]  ;;  %v11367_v18 = vld [vmem:[#allocation138_spill] sm:$0xff]  ;;  %v1697_v38 = vmul.f32 %v7547_v12, %v11369_v48 }
 0x5a3   :  { %11345 = vst [vmem:[#allocation67_spill] sm:$0xff] %v7880_v45  ;;  %v1694_v21 = vmul.f32 %v7547_v12, %v11364_v17  ;;  %v1705_v6 = vmul.f32 %v7547_v12, %v11367_v18  ;;  %v3883_v1 = vld [vmem:[#allocation2 + $0x331] sm:$0xff]  ;;  %v7938_v17 = vadd.f32 %v1696_v42, %v7628_v4  ;;  %v7948_v48 = vadd.f32 %v1699_v40, %v7676_v0  ;;  %v4337_v0 = vld [vmem:[#allocation2 + $0x3a] sm:$0xff] }
 0x5a4   :  { %11346 = vst [vmem:[#allocation70_spill] sm:$0xff] %v7883_v33  ;;  %v11363_v33 = vld [vmem:[#allocation137_spill] sm:$0xff]  ;;  %v7957_v4 = vadd.f32 %v1689_v54, %v7607_v41  ;;  %v11386_v54 = vld [vmem:[#allocation143_spill] sm:$0xff] }
 0x5a5   :  { %11349 = vst [vmem:[#allocation71_spill] sm:$0xff] %v7889_v36  ;;  %v1692_v25 = vmul.f32 %v7547_v12, %v11363_v33  ;;  %v11365_v36 = vld [vmem:[#allocation33_spill] sm:$0xff]  ;;  %v7969_v40 = vadd.f32 %v1705_v6, %v7693_v53 }
 0x5a6   :  { %11351 = vst [vmem:[#allocation72_spill] sm:$0xff] %v7894_v46  ;;  %v11362_v46 = vld [vmem:[#allocation135_spill] sm:$0xff]  ;;  %v7924_v56 = vadd.f32 %v1685_v34, %v11365_v36  ;;  %v11371_v45 = vld [vmem:[#allocation37_spill] sm:$0xff]  ;;  %4189 = vperm.xlu1 %5677, %v3883_v1  }
 0x5a7   :  { %11355 = vst [vmem:[#allocation74_spill] sm:$0xff] %v7903_v49  ;;  %v1702_v49 = vmul.f32 %v7547_v12, %v11362_v46  ;;  %v7932_v46 = vpop.permute.xlu0 %3989  ;;  %v7935_v33 = vadd.f32 %v1683_v2, %v11371_v45  ;;  %v11373_v36 = vld [vmem:[#allocation141_spill] sm:$0xff]  ;;  %v11377_v45 = vld [vmem:[#allocation39_spill] sm:$0xff] }
 0x5a8   :  { %11360 = vst [vmem:[#allocation73_spill] sm:$0xff] %v7913_v58  ;;  %v11368_v58 = vld [vmem:[#allocation140_spill] sm:$0xff]  ;;  %v2157_v34 = vmul.f32 %v7901_v8, %v11373_v36  ;;  %v7954_v2 = vadd.f32 %v1691_v43, %v11377_v45  ;;  %v11391_v53 = vld [vmem:[#allocation145_spill] sm:$0xff] }
 0x5a9   :  { %11366 = vst [vmem:[#allocation15_spill] sm:$0xff] %v7924_v56  ;;  %v1695_v20 = vmul.f32 %v7547_v12, %v11368_v58  ;;  %v11374_v56 = vld [vmem:[#allocation142_spill] sm:$0xff]  ;;  %v4336_v28 = vld [vmem:[#allocation2 + $0x32] sm:$0xff]  ;;  %v7945_v58 = vadd.f32 %v1686_v7, %v7596_v44  ;;  %v7960_v42 = vadd.f32 %v1702_v49, %v7687_v14  ;;  %v1698_v14 = vmul.f32 %v7547_v12, %v11386_v54  ;;  %v7999_v54 = vpop.permute.xlu2 %4044 }
 0x5aa   :  { %11370 = vst [vmem:[#allocation75_spill] sm:$0xff] %v7932_v46  ;;  %v1700_v18 = vmul.f32 %v7547_v12, %v11374_v56  ;;  %v11376_v46 = vld [vmem:[#allocation36_spill] sm:$0xff]  ;;  %v11379_v56 = vld [vmem:[#allocation46_spill] sm:$0xff]  ;;  %4402 = vperm.xlu2 %5678, %v4336_v28   ;;  %v7980_v49 = vadd.f32 %v2157_v34, %v7702_v37  ;;  %v1703_v6 = vmul.f32 %v7547_v12, %v11391_v53 }
 0x5ab   :  { %11372 = vst [vmem:[#allocation77_spill] sm:$0xff] %v7938_v17  ;;  %v7951_v22 = vadd.f32 %v1688_v23, %v11376_v46  ;;  %v7963_v36 = vadd.f32 %v1692_v25, %v11379_v56  ;;  %v11380_v44 = vld [vmem:[#allocation40_spill] sm:$0xff]  ;;  %4407 = vperm.xlu0 %5676, %v4337_v0  }
 0x5ac   :  { %11375 = vst [vmem:[#allocation76_spill] sm:$0xff] %v7948_v48  ;;  %v7966_v7 = vadd.f32 %v1694_v21, %v11380_v44  ;;  %v11383_v23 = vld [vmem:[#allocation48_spill] sm:$0xff]  ;;  %v11389_v21 = vld [vmem:[#allocation45_spill] sm:$0xff]  ;;  %v11394_v44 = vld [vmem:[#allocation147_spill] sm:$0xff] }
 0x5ad   :  { %11378 = vst [vmem:[#allocation407_spill] sm:$0xff] %v7960_v42  ;;  %v7972_v43 = vadd.f32 %v1695_v20, %v11383_v23  ;;  %v11384_v46 = vld [vmem:[#allocation44_spill] sm:$0xff]  ;;  %v7985_v45 = vadd.f32 %v1700_v18, %v11389_v21  ;;  %v7989_v20 = vpop.permute.xlu1 %3979  ;;  %v2163_v28 = vmul.f32 %v7901_v8, %v11394_v44  ;;  %v11395_v23 = vld [vmem:[#allocation149_spill] sm:$0xff]  ;;  %v11398_v18 = vld [vmem:[#allocation150_spill] sm:$0xff] }
 0x5ae   :  { %11381 = vst [vmem:[#allocation14_spill] sm:$0xff] %v7966_v7  ;;  %v7975_v41 = vadd.f32 %v1697_v38, %v11384_v46  ;;  %v11388_v25 = vld [vmem:[#allocation144_spill] sm:$0xff]  ;;  %v11393_v38 = vld [vmem:[#allocation146_spill] sm:$0xff]  ;;  %v1704_v37 = vmul.f32 %v7547_v12, %v11395_v23  ;;  %v11403_v23 = vld [vmem:[#allocation155_spill] sm:$0xff] }
 0x5af   :  { %11382 = vst [vmem:[#allocation402_spill] sm:$0xff] %v7969_v40  ;;  %v2160_v1 = vmul.f32 %v7901_v8, %v11388_v25  ;;  %v1701_v56 = vmul.f32 %v7547_v12, %v11393_v38  ;;  %v11396_v34 = vld [vmem:[#allocation148_spill] sm:$0xff]  ;;  %v2166_v25 = vmul.f32 %v7901_v8, %v11398_v18  ;;  %v11402_v40 = vld [vmem:[#allocation51_spill] sm:$0xff] }
 0x5b0   :  { %11385 = vst [vmem:[#allocation78_spill] sm:$0xff] %v7975_v41  ;;  %v2155_v46 = vmul.f32 %v7901_v8, %v11396_v34  ;;  %v11399_v21 = vld [vmem:[#allocation152_spill] sm:$0xff]  ;;  %v8010_v12 = vadd.f32 %v1698_v14, %v11402_v40  ;;  %v2159_v34 = vmul.f32 %v7901_v8, %v11403_v23  ;;  %v11407_v48 = vld [vmem:[#allocation47_spill] sm:$0xff]  ;;  %v11408_v40 = vld [vmem:[#allocation158_spill] sm:$0xff] }
 0x5b1   :  { %11387 = vst [vmem:[#allocation409_spill] sm:$0xff] %v7980_v49  ;;  %v2156_v53 = vmul.f32 %v7901_v8, %v11399_v21  ;;  %v11401_v49 = vld [vmem:[#allocation151_spill] sm:$0xff]  ;;  %v3886_v42 = vld [vmem:[#allocation2 + $0x351] sm:$0xff]  ;;  %v8018_v21 = vpop.permute.xlu0 %4004  ;;  %v2162_v14 = vmul.f32 %v7901_v8, %v11408_v40 }
 0x5b2   :  { %11390 = vst [vmem:[#allocation403_spill] sm:$0xff] %v7985_v45  ;;  %v2158_v44 = vmul.f32 %v7901_v8, %v11401_v49  ;;  %v11405_v45 = vld [vmem:[#allocation154_spill] sm:$0xff]  ;;  %v8024_v49 = vadd.f32 %v1703_v6, %v11407_v48  ;;  %v11409_v41 = vld [vmem:[#allocation157_spill] sm:$0xff]  ;;  %v8043_v48 = vadd.f32 %v2166_v25, %v7765_v55  ;;  %4204 = vperm.xlu1 %5677, %v3886_v42   ;;  %v11417_v25 = vld [vmem:[#allocation160_spill] sm:$0xff] }
 0x5b3   :  { %11392 = vst [vmem:[#allocation406_spill] sm:$0xff] %v7989_v20  ;;  %v11400_v20 = vld [vmem:[#allocation153_spill] sm:$0xff]  ;;  %v2161_v18 = vmul.f32 %v7901_v8, %v11405_v45  ;;  %v2164_v23 = vmul.f32 %v7901_v8, %v11409_v41  ;;  %v8034_v45 = vadd.f32 %v2163_v28, %v7751_v19  ;;  %v8046_v6 = vadd.f32 %v2156_v53, %v7696_v51  ;;  %v4340_v19 = vld [vmem:[#allocation2 + $0x62] sm:$0xff] }
 0x5b4   :  { %11397 = vst [vmem:[#allocation6_spill] sm:$0xff] %v7999_v54  ;;  %v2169_v38 = vmul.f32 %v7901_v8, %v11400_v20  ;;  %v11404_v54 = vld [vmem:[#allocation156_spill] sm:$0xff]  ;;  %v8021_v20 = vadd.f32 %v2160_v1, %v7711_v62  ;;  %v11411_v62 = vld [vmem:[#allocation50_spill] sm:$0xff]  ;;  %v11416_v42 = vld [vmem:[#allocation161_spill] sm:$0xff]  ;;  %4422 = vperm.xlu0 %5676, %v4340_v19  }
 0x5b5   :  { %v2172_v0 = vmul.f32 %v7901_v8, %v11404_v54  ;;  %11406 = vst [vmem:[#allocation8_spill] sm:$0xff] %v8018_v21  ;;  %v4339_v17 = vld [vmem:[#allocation2 + $0x52] sm:$0xff]  ;;  %v8037_v21 = vadd.f32 %v1704_v37, %v7682_v32  ;;  %v8040_v1 = vadd.f32 %v2155_v46, %v11411_v62  ;;  %v8055_v32 = vadd.f32 %v2159_v34, %v7708_v35  ;;  %v11415_v37 = vld [vmem:[#allocation159_spill] sm:$0xff]  ;;  %v8075_v53 = vpop.permute.xlu1 %3994 }
 0x5b6   :  { %v11410_v54 = vld [vmem:[#allocation52_spill] sm:$0xff]  ;;  %v8049_v41 = vadd.f32 %v2169_v38, %v7776_v30  ;;  %v8061_v55 = vadd.f32 %v2161_v18, %v7679_v47  ;;  %v2175_v51 = vmul.f32 %v7901_v8, %v11415_v37  ;;  %4417 = vperm.xlu2 %5678, %v4339_v17   ;;  %v8066_v30 = vadd.f32 %v2162_v14, %v7717_v5  ;;  %v11419_v47 = vld [vmem:[#allocation162_spill] sm:$0xff]  ;;  %v11421_v34 = vld [vmem:[#allocation165_spill] sm:$0xff]  ;;  %v8085_v18 = vpop.permute.xlu2 %4059 }
 0x5b7   :  { %v8031_v7 = vadd.f32 %v1701_v56, %v11410_v54  ;;  %v11413_v56 = vld [vmem:[#allocation49_spill] sm:$0xff]  ;;  %v8058_v28 = vadd.f32 %v2172_v0, %v7785_v61  ;;  %v8069_v46 = vadd.f32 %v2164_v23, %v7690_v39  ;;  %v2165_v35 = vmul.f32 %v7901_v8, %v11416_v42  ;;  %11418 = vst [vmem:[#allocation410_spill] sm:$0xff] %v8075_v53  ;;  %v11422_v0 = vld [vmem:[#allocation163_spill] sm:$0xff]  ;;  %v11425_v54 = vld [vmem:[#allocation168_spill] sm:$0xff] }
 0x5b8   :  { %11412 = vst [vmem:[#allocation408_spill] sm:$0xff] %v8049_v41  ;;  %v8052_v40 = vadd.f32 %v2158_v44, %v11413_v56  ;;  %v2167_v61 = vmul.f32 %v7901_v8, %v11417_v25  ;;  %v2178_v38 = vmul.f32 %v7901_v8, %v11419_v47  ;;  %v11420_v44 = vld [vmem:[#allocation164_spill] sm:$0xff]  ;;  %v2181_v5 = vmul.f32 %v7901_v8, %v11421_v34  ;;  %v11424_v14 = vld [vmem:[#allocation167_spill] sm:$0xff]  ;;  %v11426_v56 = vld [vmem:[#allocation166_spill] sm:$0xff] }
 0x5b9   :  { %11414 = vst [vmem:[#allocation11_spill] sm:$0xff] %v8058_v28  ;;  %v2168_v17 = vmul.f32 %v7901_v8, %v11420_v44  ;;  %v2170_v39 = vmul.f32 %v7901_v8, %v11422_v0  ;;  %v2171_v23 = vmul.f32 %v7901_v8, %v11424_v14  ;;  %v2184_v62 = vmul.f32 %v7901_v8, %v11425_v54  ;;  %v11427_v42 = vld [vmem:[#allocation169_spill] sm:$0xff]  ;;  %v11429_v44 = vld [vmem:[#allocation170_spill] sm:$0xff]  ;;  %v11430_v0 = vld [vmem:[#allocation171_spill] sm:$0xff]  ;;  %v8104_v54 = vpop.permute.xlu0 %4019 }
 0x5ba   :  { %11423 = vst [vmem:[#allocation79_spill] sm:$0xff] %v8085_v18  ;;  %v2173_v37 = vmul.f32 %v7901_v8, %v11426_v56  ;;  %v2176_v25 = vmul.f32 %v7901_v8, %v11427_v42  ;;  %v8096_v47 = vadd.f32 %v2175_v51, %v7797_v31  ;;  %v2174_v34 = vmul.f32 %v7901_v8, %v11429_v44  ;;  %v11431_v18 = vld [vmem:[#allocation172_spill] sm:$0xff]  ;;  %v11434_v31 = vld [vmem:[#allocation173_spill] sm:$0xff] }
 0x5bb   :  { %v2187_v19 = vmul.f32 %v7901_v8, %v11430_v0  ;;  %v2179_v14 = vmul.f32 %v7901_v8, %v11431_v18  ;;  %v4338_v53 = vld [vmem:[#allocation2 + $0x4a] sm:$0xff]  ;;  %11432 = vst [vmem:[#allocation81_spill] sm:$0xff] %v8104_v54  ;;  %v8107_v56 = vadd.f32 %v2165_v35, %v7724_v15  ;;  %v2177_v51 = vmul.f32 %v7901_v8, %v11434_v31  ;;  %v4342_v41 = vld [vmem:[#allocation2 + $0x7a] sm:$0xff] }
 0x5bc   :  { %11428 = vst [vmem:[#allocation80_spill] sm:$0xff] %v8096_v47  ;;  %v11433_v28 = vld [vmem:[#allocation56_spill] sm:$0xff]  ;;  %v11435_v47 = vld [vmem:[#allocation174_spill] sm:$0xff]  ;;  %v8117_v0 = vadd.f32 %v2178_v38, %v7808_v3  ;;  %v8120_v18 = vadd.f32 %v2168_v17, %v7768_v50  ;;  %v8123_v54 = vadd.f32 %v2181_v5, %v7848_v24  ;;  %v11436_v15 = vld [vmem:[#allocation57_spill] sm:$0xff]  ;;  %v8138_v3 = vadd.f32 %v2176_v25, %v7762_v57 }
 0x5bd   :  { %v8110_v42 = vadd.f32 %v2167_v61, %v11433_v28  ;;  %v2190_v44 = vmul.f32 %v7901_v8, %v11435_v47  ;;  %v8126_v35 = vadd.f32 %v2170_v39, %v11436_v15  ;;  %v8129_v28 = vadd.f32 %v2171_v23, %v7782_v13  ;;  %v11438_v47 = vld [vmem:[#allocation59_spill] sm:$0xff]  ;;  %4412 = vperm.xlu1 %5677, %v4338_v53   ;;  %v11442_v53 = vld [vmem:[#allocation176_spill] sm:$0xff]  ;;  %v11443_v39 = vld [vmem:[#allocation177_spill] sm:$0xff]  ;;  %v8161_v23 = vpop.permute.xlu1 %4009 }
 0x5be   :  { %v8132_v61 = vadd.f32 %v2184_v62, %v7859_v26  ;;  %v8135_v31 = vadd.f32 %v2173_v37, %v11438_v47  ;;  %v4343_v50 = vld [vmem:[#allocation2 + $0x82] sm:$0xff]  ;;  %v8141_v24 = vadd.f32 %v2174_v34, %v7791_v59  ;;  %v8144_v38 = vadd.f32 %v2187_v19, %v7871_v10  ;;  %4432 = vperm.xlu2 %5678, %v4342_v41   ;;  %v11446_v37 = vld [vmem:[#allocation180_spill] sm:$0xff]  ;;  %v11448_v34 = vld [vmem:[#allocation181_spill] sm:$0xff]  ;;  %v8171_v19 = vpop.permute.xlu2 %4074 }
 0x5bf   :  { %v8147_v13 = vadd.f32 %v2179_v14, %v7773_v9  ;;  %v11440_v17 = vld [vmem:[#allocation175_spill] sm:$0xff]  ;;  %v8152_v5 = vadd.f32 %v2177_v51, %v7794_v29  ;;  %v8155_v57 = vadd.f32 %v2190_v44, %v7877_v16  ;;  %v2180_v59 = vmul.f32 %v7901_v8, %v11442_v53  ;;  %11444 = vst [vmem:[#allocation86_spill] sm:$0xff] %v8161_v23  ;;  %v11447_v25 = vld [vmem:[#allocation178_spill] sm:$0xff]  ;;  %v11452_v47 = vld [vmem:[#allocation185_spill] sm:$0xff] }
 0x5c0   :  { %11437 = vst [vmem:[#allocation82_spill] sm:$0xff] %v8132_v61  ;;  %v2182_v26 = vmul.f32 %v7901_v8, %v11440_v17  ;;  %v2193_v10 = vmul.f32 %v7901_v8, %v11443_v39  ;;  %v11445_v9 = vld [vmem:[#allocation179_spill] sm:$0xff]  ;;  %v2196_v41 = vmul.f32 %v7901_v8, %v11446_v37  ;;  %v2185_v29 = vmul.f32 %v7901_v8, %v11447_v25  ;;  %v11450_v14 = vld [vmem:[#allocation182_spill] sm:$0xff]  ;;  %v11453_v53 = vld [vmem:[#allocation184_spill] sm:$0xff] }
 0x5c1   :  { %11439 = vst [vmem:[#allocation83_spill] sm:$0xff] %v8144_v38  ;;  %v2183_v62 = vmul.f32 %v7901_v8, %v11445_v9  ;;  %v2188_v16 = vmul.f32 %v7901_v8, %v11448_v34  ;;  %4437 = vperm.xlu0 %5676, %v4343_v50   ;;  %v2186_v51 = vmul.f32 %v7901_v8, %v11450_v14  ;;  %v11451_v44 = vld [vmem:[#allocation183_spill] sm:$0xff]  ;;  %v11454_v37 = vld [vmem:[#allocation186_spill] sm:$0xff]  ;;  %v11455_v34 = vld [vmem:[#allocation188_spill] sm:$0xff] }
 0x5c2   :  { %11441 = vst [vmem:[#allocation84_spill] sm:$0xff] %v8155_v57  ;;  %v2199_v15 = vmul.f32 %v7901_v8, %v11451_v44  ;;  %v2189_v17 = vmul.f32 %v7901_v8, %v11452_v47  ;;  %v2191_v39 = vmul.f32 %v7901_v8, %v11453_v53  ;;  %v8182_v9 = vadd.f32 %v2182_v26, %v7779_v11  ;;  %v4341_v23 = vld [vmem:[#allocation2 + $0x6a] sm:$0xff]  ;;  %v8190_v44 = vpop.permute.xlu0 %4034  ;;  %v11459_v11 = vld [vmem:[#allocation189_spill] sm:$0xff]  ;;  %v11460_v57 = vld [vmem:[#allocation190_spill] sm:$0xff] }
 0x5c3   :  { %11449 = vst [vmem:[#allocation85_spill] sm:$0xff] %v8171_v19  ;;  %v2202_v25 = vmul.f32 %v7901_v8, %v11454_v37  ;;  %v2192_v50 = vmul.f32 %v7901_v8, %v11455_v34  ;;  %v11456_v19 = vld [vmem:[#allocation187_spill] sm:$0xff]  ;;  %v8193_v47 = vadd.f32 %v2180_v59, %v7805_v52  ;;  %v8196_v53 = vadd.f32 %v2193_v10, %v7886_v27  ;;  %v4345_v38 = vld [vmem:[#allocation2 + $0x9a] sm:$0xff]  ;;  %v11465_v27 = vld [vmem:[#allocation64_spill] sm:$0xff] }
 0x5c4   :  { %v2194_v14 = vmul.f32 %v7901_v8, %v11456_v19  ;;  %11457 = vst [vmem:[#allocation87_spill] sm:$0xff] %v8190_v44  ;;  %v2205_v26 = vmul.f32 %v7901_v8, %v11459_v11  ;;  %v2197_v37 = vmul.f32 %v7901_v8, %v11460_v57  ;;  %v8203_v34 = vadd.f32 %v2183_v62, %v7854_v60  ;;  %v11463_v52 = vld [vmem:[#allocation62_spill] sm:$0xff]  ;;  %v11467_v57 = vld [vmem:[#allocation68_spill] sm:$0xff] }
 0x5c5   :  { %11458 = vst [vmem:[#allocation89_spill] sm:$0xff] %v8196_v53  ;;  %v8206_v19 = vadd.f32 %v2196_v41, %v7935_v33  ;;  %v8209_v44 = vadd.f32 %v2185_v29, %v7788_v63  ;;  %v8212_v59 = vadd.f32 %v2188_v16, %v11463_v52  ;;  %v8215_v10 = vadd.f32 %v2186_v51, %v11465_v27  ;;  %v11468_v60 = vld [vmem:[#allocation400_spill] sm:$0xff]  ;;  %v11471_v41 = vld [vmem:[#allocation67_spill] sm:$0xff]  ;;  %v11472_v16 = vld [vmem:[#allocation65_spill] sm:$0xff] }
 0x5c6   :  { %v8218_v11 = vadd.f32 %v2199_v15, %v7945_v58  ;;  %v8221_v53 = vadd.f32 %v2189_v17, %v11467_v57  ;;  %v8224_v62 = vadd.f32 %v2191_v39, %v11468_v60  ;;  %4427 = vperm.xlu1 %5677, %v4341_v23   ;;  %v4346_v33 = vld [vmem:[#allocation2 + $0xaa] sm:$0xff]  ;;  %v8227_v63 = vadd.f32 %v2202_v25, %v7957_v4  ;;  %v11477_v39 = vld [vmem:[#allocation66_spill] sm:$0xff]  ;;  %v11479_v4 = vld [vmem:[#allocation393_spill] sm:$0xff] }
 0x5c7   :  { %11461 = vst [vmem:[#allocation90_spill] sm:$0xff] %v8206_v19  ;;  %v8230_v29 = vadd.f32 %v2192_v50, %v11471_v41  ;;  %v8233_v51 = vadd.f32 %v2194_v14, %v11472_v16  ;;  %v11474_v52 = vld [vmem:[#allocation191_spill] sm:$0xff]  ;;  %4447 = vperm.xlu2 %5678, %v4345_v38   ;;  %v8238_v15 = vadd.f32 %v2205_v26, %v7963_v36  ;;  %v11476_v17 = vld [vmem:[#allocation192_spill] sm:$0xff]  ;;  %v8246_v25 = vperm.slane %v11479_v4, 4  ;;  %v8248_v50 = vpop.permute.xlu1 %4024  ;;  %v11481_v14 = vld [vmem:[#allocation194_spill] sm:$0xff] }
 0x5c8   :  { %11462 = vst [vmem:[#allocation88_spill] sm:$0xff] %v8209_v44  ;;  %v2195_v58 = vmul.f32 %v7901_v8, %v11474_v52  ;;  %v2208_v23 = vmul.f32 %v7901_v8, %v11476_v17  ;;  %v8243_v27 = vadd.f32 %v2197_v37, %v11477_v39  ;;  %v2198_v57 = vmul.f32 %v7901_v8, %v11481_v14  ;;  %v11482_v60 = vld [vmem:[#allocation195_spill] sm:$0xff]  ;;  %v11483_v41 = vld [vmem:[#allocation193_spill] sm:$0xff]  ;;  %v11484_v26 = vld [vmem:[#allocation196_spill] sm:$0xff]  ;;  %v8258_v52 = vpop.permute.xlu2 %4089 }
 0x5c9   :  { %11464 = vst [vmem:[#allocation7_spill] sm:$0xff] %v8212_v59  ;;  %v2211_v38 = vmul.f32 %v7901_v8, %v11482_v60  ;;  %v2200_v36 = vmul.f32 %v7901_v8, %v11483_v41  ;;  %v2203_v16 = vmul.f32 %v7901_v8, %v11484_v26  ;;  %4452 = vperm.xlu0 %5676, %v4346_v33   ;;  %v11486_v37 = vld [vmem:[#allocation197_spill] sm:$0xff]  ;;  %v11487_v39 = vld [vmem:[#allocation198_spill] sm:$0xff] }
 0x5ca   :  { %11466 = vst [vmem:[#allocation92_spill] sm:$0xff] %v8218_v11  ;;  %v2201_v17 = vmul.f32 %v7901_v8, %v11486_v37  ;;  %v11492_v11 = vld [vmem:[#allocation201_spill] sm:$0xff]  ;;  %v11494_v19 = vld [vmem:[#allocation202_spill] sm:$0xff] }
 0x5cb   :  { %11469 = vst [vmem:[#allocation93_spill] sm:$0xff] %v8224_v62  ;;  %v2217_v26 = vmul.f32 %v7901_v8, %v11492_v11  ;;  %v2209_v37 = vmul.f32 %v7901_v8, %v11494_v19  ;;  %v11497_v62 = vld [vmem:[#allocation204_spill] sm:$0xff]  ;;  %v11499_v59 = vld [vmem:[#allocation205_spill] sm:$0xff]  ;;  %v4348_v44 = vld [vmem:[#allocation2 + $0xc2] sm:$0xff]  ;;  %v8292_v19 = vadd.f32 %v2211_v38, %v8010_v12 }
 0x5cc   :  { %11470 = vst [vmem:[#allocation91_spill] sm:$0xff] %v8227_v63  ;;  %v11490_v63 = vld [vmem:[#allocation71_spill] sm:$0xff]  ;;  %v2212_v11 = vmul.f32 %v7901_v8, %v11499_v59 }
 0x5cd   :  { %11473 = vst [vmem:[#allocation13_spill] sm:$0xff] %v8233_v51  ;;  %v8269_v41 = vadd.f32 %v2195_v58, %v11490_v63  ;;  %v4344_v51 = vld [vmem:[#allocation2 + $0x92] sm:$0xff]  ;;  %v11498_v63 = vld [vmem:[#allocation206_spill] sm:$0xff]  ;;  %v4349_v12 = vld [vmem:[#allocation2 + $0xca] sm:$0xff]  ;;  %v8311_v38 = vadd.f32 %v2217_v26, %v8037_v21 }
 0x5ce   :  { %11475 = vst [vmem:[#allocation10_spill] sm:$0xff] %v8238_v15  ;;  %v11488_v15 = vld [vmem:[#allocation200_spill] sm:$0xff]  ;;  %v2210_v58 = vmul.f32 %v7901_v8, %v11498_v63  ;;  %4442 = vperm.xlu1 %5677, %v4344_v51  }
 0x5cf   :  { %11478 = vst [vmem:[#allocation94_spill] sm:$0xff] %v8243_v27  ;;  %v2204_v14 = vmul.f32 %v7901_v8, %v11488_v15  ;;  %v11489_v27 = vld [vmem:[#allocation199_spill] sm:$0xff]  ;;  %v8280_v15 = vadd.f32 %v2208_v23, %v7972_v43  ;;  %v11503_v43 = vld [vmem:[#allocation70_spill] sm:$0xff]  ;;  %4462 = vperm.xlu2 %5678, %v4348_v44   ;;  %v11513_v51 = vld [vmem:[#allocation76_spill] sm:$0xff]  ;;  %v8332_v26 = vpop.permute.xlu1 %4039 }
 0x5d0   :  { %11480 = vst [vmem:[#allocation22_spill] sm:$0xff] %v8248_v50  ;;  %v2214_v50 = vmul.f32 %v7901_v8, %v11487_v39  ;;  %v2206_v60 = vmul.f32 %v7901_v8, %v11489_v27  ;;  %v8277_v39 = vpop.permute.xlu0 %4049  ;;  %v2669_v27 = vmul.f32 %v8246_v25, %v11497_v62  ;;  %v8298_v23 = vadd.f32 %v2203_v16, %v11503_v43  ;;  %v11508_v16 = vld [vmem:[#allocation77_spill] sm:$0xff]  ;;  %v11515_v21 = vld [vmem:[#allocation208_spill] sm:$0xff] }
 0x5d1   :  { %11485 = vst [vmem:[#allocation12_spill] sm:$0xff] %v8258_v52  ;;  %v11493_v52 = vld [vmem:[#allocation203_spill] sm:$0xff]  ;;  %v2265_v62 = vadd.f32 %v2201_v17, %v7951_v22  ;;  %v8305_v59 = vadd.f32 %v2204_v14, %v7954_v2  ;;  %v8328_v14 = vadd.f32 %v2212_v11, %v11513_v51  ;;  %v11519_v43 = vld [vmem:[#allocation212_spill] sm:$0xff]  ;;  %4467 = vperm.xlu0 %5676, %v4349_v12   ;;  %v11522_v11 = vld [vmem:[#allocation213_spill] sm:$0xff] }
 0x5d2   :  { %11491 = vst [vmem:[#allocation23_spill] sm:$0xff] %v8269_v41  ;;  %v2207_v33 = vmul.f32 %v7901_v8, %v11493_v52  ;;  %v11500_v52 = vld [vmem:[#allocation15_spill] sm:$0xff]  ;;  %v8302_v63 = vadd.f32 %v2214_v50, %v8031_v7  ;;  %v8322_v2 = vadd.f32 %v2669_v27, %v8046_v6  ;;  %v11512_v50 = vld [vmem:[#allocation78_spill] sm:$0xff]  ;;  %v2216_v6 = vmul.f32 %v7901_v8, %v11519_v43  ;;  %v11524_v51 = vld [vmem:[#allocation249_spill] sm:$0xff] }
 0x5d3   :  { %11495 = vst [vmem:[#allocation95_spill] sm:$0xff] %v8277_v39  ;;  %v8289_v61 = vadd.f32 %v2198_v57, %v11500_v52  ;;  %v11502_v39 = vld [vmem:[#allocation69_spill] sm:$0xff]  ;;  %v8317_v52 = vadd.f32 %v2209_v37, %v11508_v16  ;;  %v11510_v22 = vld [vmem:[#allocation207_spill] sm:$0xff]  ;;  %v8325_v17 = vadd.f32 %v2210_v58, %v11512_v50  ;;  %v2678_v16 = vmul.f32 %v8246_v25, %v11522_v11 }
 0x5d4   :  { %11496 = vst [vmem:[#allocation96_spill] sm:$0xff] %v8280_v15  ;;  %v8295_v41 = vadd.f32 %v2200_v36, %v11502_v39  ;;  %v11505_v15 = vld [vmem:[#allocation72_spill] sm:$0xff]  ;;  %v11507_v36 = vld [vmem:[#allocation14_spill] sm:$0xff]  ;;  %v2672_v7 = vmul.f32 %v8246_v25, %v11510_v22  ;;  %v11520_v27 = vld [vmem:[#allocation211_spill] sm:$0xff] }
 0x5d5   :  { %11501 = vst [vmem:[#allocation98_spill] sm:$0xff] %v8292_v19  ;;  %v8308_v57 = vadd.f32 %v2206_v60, %v11505_v15  ;;  %v8314_v39 = vadd.f32 %v2207_v33, %v11507_v36  ;;  %v2215_v60 = vmul.f32 %v7901_v8, %v11515_v21  ;;  %v11517_v33 = vld [vmem:[#allocation209_spill] sm:$0xff]  ;;  %v11518_v15 = vld [vmem:[#allocation210_spill] sm:$0xff]  ;;  %v2218_v58 = vmul.f32 %v7901_v8, %v11520_v27  ;;  %v8342_v36 = vpop.permute.xlu2 %4104  ;;  %v11527_v43 = vld [vmem:[#allocation215_spill] sm:$0xff] }
 0x5d6   :  { %11504 = vst [vmem:[#allocation97_spill] sm:$0xff] %v8302_v63  ;;  %v2213_v37 = vmul.f32 %v7901_v8, %v11517_v33  ;;  %v2675_v44 = vmul.f32 %v8246_v25, %v11518_v15  ;;  %v11523_v22 = vld [vmem:[#allocation214_spill] sm:$0xff]  ;;  %v2714_v21 = vmul.f32 %v8246_v25, %v11524_v51  ;;  %v8351_v33 = vperm.slane %v11479_v4, 5  ;;  %v11528_v27 = vld [vmem:[#allocation216_spill] sm:$0xff] }
 0x5d7   :  { %11506 = vst [vmem:[#allocation99_spill] sm:$0xff] %v8311_v38  ;;  %v2670_v50 = vmul.f32 %v8246_v25, %v11523_v22  ;;  %v8354_v15 = vadd.f32 %v2672_v7, %v8055_v32  ;;  %v2668_v8 = vmul.f32 %v8246_v25, %v11527_v43  ;;  %v2681_v12 = vmul.f32 %v8246_v25, %v11528_v27  ;;  %v11533_v38 = vld [vmem:[#allocation218_spill] sm:$0xff]  ;;  %v11535_v27 = vld [vmem:[#allocation403_spill] sm:$0xff] }
 0x5d8   :  { %11509 = vst [vmem:[#allocation101_spill] sm:$0xff] %v8317_v52  ;;  %v8362_v22 = vpop.permute.xlu0 %4064  ;;  %v2671_v63 = vmul.f32 %v8246_v25, %v11533_v38  ;;  %v11534_v32 = vld [vmem:[#allocation322_spill] sm:$0xff]  ;;  %v8372_v43 = vperm.slane %v11479_v4, 6  ;;  %v8387_v38 = vadd.f32 %v2678_v16, %v8107_v56  ;;  %v2778_v19 = vadd.f32 %v2714_v21, %v2265_v62  ;;  %v11539_v52 = vld [vmem:[#allocation389_spill] sm:$0xff]  ;;  %v8413_v16 = vpop.permute.xlu1 %4054 }
 0x5d9   :  { %11511 = vst [vmem:[#allocation102_spill] sm:$0xff] %v8322_v2  ;;  %v11531_v2 = vld [vmem:[#allocation407_spill] sm:$0xff]  ;;  %v3227_v7 = vmul.f32 %v8351_v33, %v11534_v32  ;;  %v11538_v32 = vld [vmem:[#allocation409_spill] sm:$0xff]  ;;  %v11545_v21 = vld [vmem:[#allocation222_spill] sm:$0xff] }
 0x5da   :  { %11514 = vst [vmem:[#allocation100_spill] sm:$0xff] %v8328_v14  ;;  %v8365_v51 = vadd.f32 %v2215_v60, %v11531_v2  ;;  %v8375_v14 = vadd.f32 %v2213_v37, %v11535_v27  ;;  %v11536_v2 = vld [vmem:[#allocation402_spill] sm:$0xff]  ;;  %v3741_v37 = vmul.f32 %v8372_v43, %v11539_v52  ;;  %v4352_v27 = vld [vmem:[#allocation2 + $0xf2] sm:$0xff]  ;;  %v8406_v62 = vadd.f32 %v2671_v63, %v8052_v40  ;;  %v11547_v40 = vld [vmem:[#allocation223_spill] sm:$0xff] }
 0x5db   :  { %11516 = vst [vmem:[#allocation104_spill] sm:$0xff] %v8332_v26  ;;  %v4347_v26 = vld [vmem:[#allocation2 + $0xb2] sm:$0xff]  ;;  %v8384_v60 = vadd.f32 %v2218_v58, %v11536_v2  ;;  %v2679_v63 = vmul.f32 %v8246_v25, %v11547_v40  ;;  %4482 = vperm.xlu0 %5676, %v4352_v27  }
 0x5dc   :  { %11521 = vst [vmem:[#allocation105_spill] sm:$0xff] %v8342_v36  ;;  %v11529_v36 = vld [vmem:[#allocation217_spill] sm:$0xff]  ;;  %4457 = vperm.xlu1 %5677, %v4347_v26   ;;  %v11542_v58 = vld [vmem:[#allocation220_spill] sm:$0xff]  ;;  %v3291_v26 = vadd.f32 %v3227_v7, %v2778_v19 }
 0x5dd   :  { %11525 = vst [vmem:[#allocation103_spill] sm:$0xff] %v8351_v33  ;;  %v2673_v11 = vmul.f32 %v8246_v25, %v11529_v36  ;;  %v8378_v36 = vadd.f32 %v2675_v44, %v8066_v30  ;;  %v8395_v30 = vadd.f32 %v2668_v8, %v8040_v1  ;;  %v11541_v44 = vld [vmem:[#allocation219_spill] sm:$0xff]  ;;  %v2676_v52 = vmul.f32 %v8246_v25, %v11542_v58  ;;  %v11546_v8 = vld [vmem:[#allocation224_spill] sm:$0xff]  ;;  %v11548_v19 = vld [vmem:[#allocation225_spill] sm:$0xff] }
 0x5de   :  { %11526 = vst [vmem:[#allocation106_spill] sm:$0xff] %v8354_v15  ;;  %v4351_v15 = vld [vmem:[#allocation2 + $0xe2] sm:$0xff]  ;;  %v8411_v1 = vperm.slane %v11479_v4, 7  ;;  %v2690_v4 = vmul.f32 %v8246_v25, %v11548_v19  ;;  %v3805_v2 = vadd.f32 %v3741_v37, %v3291_v26 }
 0x5df   :  { %11530 = vst [vmem:[#allocation107_spill] sm:$0xff] %v8362_v22  ;;  %v8381_v22 = vadd.f32 %v2216_v6, %v8024_v49  ;;  %v8398_v49 = vadd.f32 %v2681_v12, %v8120_v18  ;;  %v2684_v6 = vmul.f32 %v8246_v25, %v11541_v44  ;;  %v8403_v56 = vadd.f32 %v2673_v11, %v8021_v20  ;;  %v11544_v18 = vld [vmem:[#allocation221_spill] sm:$0xff]  ;;  %v4120_v12 = vpop.permute.xlu2 %4119  ;;  %v11549_v11 = vld [vmem:[#allocation252_spill] sm:$0xff]  ;;  %v11550_v44 = vld [vmem:[#allocation227_spill] sm:$0xff] }
 0x5e0   :  { %11532 = vst [vmem:[#allocation108_spill] sm:$0xff] %v8365_v51  ;;  %v8390_v51 = vadd.f32 %v2670_v50, %v11538_v32  ;;  %4477 = vperm.xlu2 %5678, %v4351_v15   ;;  %v2674_v50 = vmul.f32 %v8246_v25, %v11544_v18  ;;  %v2687_v20 = vmul.f32 %v8246_v25, %v11545_v21  ;;  %v11551_v18 = vld [vmem:[#allocation228_spill] sm:$0xff]  ;;  %v8436_v19 = vpop.permute.xlu0 %4079  ;;  %v11555_v37 = vld [vmem:[#allocation230_spill] sm:$0xff] }
 0x5e1   :  { %11537 = vst [vmem:[#allocation109_spill] sm:$0xff] %v8387_v38  ;;  %v2677_v15 = vmul.f32 %v8246_v25, %v11546_v8  ;;  %v2717_v7 = vmul.f32 %v8246_v25, %v11549_v11  ;;  %v4254_v32 = vmul.f32 %v8411_v1, %v4120_v12  ;;  %v2680_v58 = vmul.f32 %v8246_v25, %v11550_v44  ;;  %v11552_v8 = vld [vmem:[#allocation226_spill] sm:$0xff]  ;;  %v11556_v12 = vld [vmem:[#allocation325_spill] sm:$0xff] }
 0x5e2   :  { %11540 = vst [vmem:[#allocation26_spill] sm:$0xff] %v8398_v49  ;;  %v2693_v21 = vmul.f32 %v8246_v25, %v11551_v18  ;;  %v2682_v40 = vmul.f32 %v8246_v25, %v11552_v8  ;;  %v4350_v49 = vld [vmem:[#allocation2 + $0xda] sm:$0xff]  ;;  %v8439_v11 = vadd.f32 %v2684_v6, %v8129_v28  ;;  %v2683_v26 = vmul.f32 %v8246_v25, %v11555_v37  ;;  %v4354_v18 = vld [vmem:[#allocation2 + $0x10a] sm:$0xff] }
 0x5e3   :  { %11543 = vst [vmem:[#allocation110_spill] sm:$0xff] %v8413_v16  ;;  %v11553_v16 = vld [vmem:[#allocation229_spill] sm:$0xff]  ;;  %v3230_v44 = vmul.f32 %v8351_v33, %v11556_v12  ;;  %v8445_v38 = vadd.f32 %v4254_v32, %v3805_v2  ;;  %v8448_v8 = vadd.f32 %v2674_v50, %v8061_v55  ;;  %v8457_v28 = vadd.f32 %v2679_v63, %v8043_v48  ;;  %v11559_v32 = vld [vmem:[#allocation392_spill] sm:$0xff] }
 0x5e4   :  { %v2685_v27 = vmul.f32 %v8246_v25, %v11553_v16  ;;  %11554 = vst [vmem:[#allocation27_spill] sm:$0xff] %v8436_v19  ;;  %v8451_v16 = vadd.f32 %v2687_v20, %v8141_v24  ;;  %v8454_v19 = vadd.f32 %v2676_v52, %v8034_v45  ;;  %v8460_v6 = vadd.f32 %v2677_v15, %v8069_v46  ;;  %v4355_v24 = vld [vmem:[#allocation2 + $0x112] sm:$0xff]  ;;  %v11562_v46 = vld [vmem:[#allocation11_spill] sm:$0xff] }
 0x5e5   :  { %11557 = vst [vmem:[#allocation25_spill] sm:$0xff] %v8445_v38  ;;  %v8463_v37 = vadd.f32 %v2690_v4, %v8152_v5  ;;  %v2781_v2 = vadd.f32 %v2717_v7, %v8305_v59  ;;  %v3744_v55 = vmul.f32 %v8372_v43, %v11559_v32  ;;  %4472 = vperm.xlu1 %5677, %v4350_v49   ;;  %v11561_v48 = vld [vmem:[#allocation408_spill] sm:$0xff]  ;;  %v11564_v59 = vld [vmem:[#allocation231_spill] sm:$0xff]  ;;  %v8487_v4 = vpop.permute.xlu1 %4069  ;;  %v11576_v38 = vld [vmem:[#allocation241_spill] sm:$0xff] }
 0x5e6   :  { %v8469_v50 = vadd.f32 %v2680_v58, %v8110_v42  ;;  %v8472_v45 = vadd.f32 %v2693_v21, %v8193_v47  ;;  %v8475_v52 = vadd.f32 %v2682_v40, %v11561_v48  ;;  %v8478_v20 = vadd.f32 %v2685_v27, %v11562_v46  ;;  %v11565_v15 = vld [vmem:[#allocation232_spill] sm:$0xff]  ;;  %11566 = vst [vmem:[#allocation112_spill] sm:$0xff] %v8487_v4  ;;  %v11567_v47 = vld [vmem:[#allocation233_spill] sm:$0xff]  ;;  %v11568_v58 = vld [vmem:[#allocation234_spill] sm:$0xff] }
 0x5e7   :  { %11558 = vst [vmem:[#allocation111_spill] sm:$0xff] %v8463_v37  ;;  %v8481_v5 = vadd.f32 %v2683_v26, %v8126_v35  ;;  %v2696_v49 = vmul.f32 %v8246_v25, %v11564_v59  ;;  %v2688_v42 = vmul.f32 %v8246_v25, %v11565_v15  ;;  %v3294_v63 = vadd.f32 %v3230_v44, %v2781_v2  ;;  %v11569_v40 = vld [vmem:[#allocation236_spill] sm:$0xff]  ;;  %v11570_v35 = vld [vmem:[#allocation235_spill] sm:$0xff]  ;;  %v4135_v12 = vpop.permute.xlu2 %4134  ;;  %v4353_v4 = vld [vmem:[#allocation2 + $0xfa] sm:$0xff] }
 0x5e8   :  { %11560 = vst [vmem:[#allocation113_spill] sm:$0xff] %v8472_v45  ;;  %4492 = vperm.xlu2 %5678, %v4354_v18   ;;  %v2686_v7 = vmul.f32 %v8246_v25, %v11567_v47  ;;  %v2699_v21 = vmul.f32 %v8246_v25, %v11568_v58  ;;  %v2689_v27 = vmul.f32 %v8246_v25, %v11569_v40  ;;  %v11571_v18 = vld [vmem:[#allocation237_spill] sm:$0xff]  ;;  %v11572_v44 = vld [vmem:[#allocation255_spill] sm:$0xff]  ;;  %v11574_v47 = vld [vmem:[#allocation240_spill] sm:$0xff] }
 0x5e9   :  { %11563 = vst [vmem:[#allocation114_spill] sm:$0xff] %v8478_v20  ;;  %v2691_v26 = vmul.f32 %v8246_v25, %v11570_v35  ;;  %4497 = vperm.xlu0 %5676, %v4355_v24   ;;  %v2702_v32 = vmul.f32 %v8246_v25, %v11571_v18  ;;  %v2720_v2 = vmul.f32 %v8246_v25, %v11572_v44  ;;  %v11573_v59 = vld [vmem:[#allocation239_spill] sm:$0xff]  ;;  %v11575_v40 = vld [vmem:[#allocation238_spill] sm:$0xff]  ;;  %v8510_v18 = vpop.permute.xlu0 %4094  ;;  %v11580_v44 = vld [vmem:[#allocation328_spill] sm:$0xff] }
 0x5ea   :  { %v3808_v48 = vadd.f32 %v3744_v55, %v3294_v63  ;;  %v4257_v46 = vmul.f32 %v8411_v1, %v4135_v12  ;;  %v2692_v15 = vmul.f32 %v8246_v25, %v11573_v59  ;;  %v2705_v58 = vmul.f32 %v8246_v25, %v11574_v47  ;;  %11577 = vst [vmem:[#allocation116_spill] sm:$0xff] %v8510_v18  ;;  %v11578_v45 = vld [vmem:[#allocation242_spill] sm:$0xff]  ;;  %v11579_v63 = vld [vmem:[#allocation243_spill] sm:$0xff]  ;;  %v11584_v20 = vld [vmem:[#allocation80_spill] sm:$0xff] }
 0x5eb   :  { %v2694_v35 = vmul.f32 %v8246_v25, %v11575_v40  ;;  %v2697_v24 = vmul.f32 %v8246_v25, %v11576_v38  ;;  %v2695_v55 = vmul.f32 %v8246_v25, %v11578_v45  ;;  %v2708_v12 = vmul.f32 %v8246_v25, %v11579_v63  ;;  %v4357_v47 = vld [vmem:[#allocation2 + $0x12a] sm:$0xff] }
 0x5ec   :  { %v3233_v59 = vmul.f32 %v8351_v33, %v11580_v44  ;;  %v8518_v37 = vadd.f32 %v4257_v46, %v3808_v48  ;;  %v8521_v40 = vadd.f32 %v2696_v49, %v8203_v34  ;;  %v8524_v38 = vadd.f32 %v2686_v7, %v8135_v31  ;;  %v11585_v46 = vld [vmem:[#allocation396_spill] sm:$0xff]  ;;  %v4358_v31 = vld [vmem:[#allocation2 + $0x13a] sm:$0xff] }
 0x5ed   :  { %v8527_v18 = vadd.f32 %v2699_v21, %v8215_v10  ;;  %v8530_v45 = vadd.f32 %v2688_v42, %v11584_v20  ;;  %v8533_v63 = vadd.f32 %v2689_v27, %v8138_v3  ;;  %v8536_v44 = vadd.f32 %v2691_v26, %v8117_v0  ;;  %4487 = vperm.xlu1 %5677, %v4353_v4   ;;  %v11590_v4 = vld [vmem:[#allocation82_spill] sm:$0xff]  ;;  %v8562_v21 = vpop.permute.xlu1 %4084  ;;  %v11595_v26 = vld [vmem:[#allocation244_spill] sm:$0xff] }
 0x5ee   :  { %11581 = vst [vmem:[#allocation117_spill] sm:$0xff] %v8518_v37  ;;  %v2784_v48 = vadd.f32 %v2720_v2, %v8314_v39  ;;  %v3747_v34 = vmul.f32 %v8372_v43, %v11585_v46  ;;  %v8542_v49 = vadd.f32 %v2702_v32, %v8221_v53  ;;  %v8545_v10 = vadd.f32 %v2692_v15, %v8147_v13  ;;  %v11588_v39 = vld [vmem:[#allocation23_spill] sm:$0xff]  ;;  %v11593_v13 = vld [vmem:[#allocation245_spill] sm:$0xff]  ;;  %v11594_v27 = vld [vmem:[#allocation246_spill] sm:$0xff] }
 0x5ef   :  { %11582 = vst [vmem:[#allocation115_spill] sm:$0xff] %v8521_v40  ;;  %v8548_v20 = vadd.f32 %v2705_v58, %v8230_v29  ;;  %v8551_v3 = vadd.f32 %v2694_v35, %v8123_v54  ;;  %v8554_v0 = vadd.f32 %v2695_v55, %v8182_v9  ;;  %v8557_v42 = vadd.f32 %v2708_v12, %v11588_v39  ;;  %v11596_v9 = vld [vmem:[#allocation247_spill] sm:$0xff]  ;;  %v4150_v15 = vpop.permute.xlu2 %4149  ;;  %v11597_v58 = vld [vmem:[#allocation248_spill] sm:$0xff]  ;;  %v11600_v46 = vld [vmem:[#allocation250_spill] sm:$0xff] }
 0x5f0   :  { %11583 = vst [vmem:[#allocation118_spill] sm:$0xff] %v8527_v18  ;;  %4507 = vperm.xlu2 %5678, %v4357_v47   ;;  %v8560_v7 = vadd.f32 %v2697_v24, %v11590_v4  ;;  %v3297_v53 = vadd.f32 %v3233_v59, %v2784_v48  ;;  %v2698_v29 = vmul.f32 %v8246_v25, %v11593_v13  ;;  %v11598_v24 = vld [vmem:[#allocation258_spill] sm:$0xff]  ;;  %v11599_v47 = vld [vmem:[#allocation251_spill] sm:$0xff]  ;;  %v11641_v18 = vld [vmem:[#allocation385_spill] sm:$0xff] }
 0x5f1   :  { %11586 = vst [vmem:[#allocation119_spill] sm:$0xff] %v8542_v49  ;;  %v2711_v54 = vmul.f32 %v8246_v25, %v11594_v27  ;;  %v2700_v32 = vmul.f32 %v8246_v25, %v11595_v26  ;;  %v2703_v2 = vmul.f32 %v8246_v25, %v11596_v9  ;;  %4512 = vperm.xlu0 %5676, %v4358_v31   ;;  %v11601_v4 = vld [vmem:[#allocation254_spill] sm:$0xff]  ;;  %v11602_v27 = vld [vmem:[#allocation253_spill] sm:$0xff]  ;;  %v8585_v9 = vpop.permute.xlu0 %4109  ;;  %v11614_v49 = vld [vmem:[#allocation7_spill] sm:$0xff] }
 0x5f2   :  { %11587 = vst [vmem:[#allocation120_spill] sm:$0xff] %v8548_v20  ;;  %v2701_v35 = vmul.f32 %v8246_v25, %v11597_v58  ;;  %v2723_v55 = vmul.f32 %v8246_v25, %v11598_v24  ;;  %v3811_v12 = vadd.f32 %v3747_v34, %v3297_v53  ;;  %v4260_v59 = vmul.f32 %v8411_v1, %v4150_v15  ;;  %v4356_v26 = vld [vmem:[#allocation2 + $0x122] sm:$0xff]  ;;  %v11604_v58 = vld [vmem:[#allocation256_spill] sm:$0xff]  ;;  %v11643_v40 = vld [vmem:[#allocation329_spill] sm:$0xff] }
 0x5f3   :  { %11589 = vst [vmem:[#allocation122_spill] sm:$0xff] %v8557_v42  ;;  %v2704_v48 = vmul.f32 %v8246_v25, %v11599_v47  ;;  %v2706_v39 = vmul.f32 %v8246_v25, %v11600_v46  ;;  %v2707_v13 = vmul.f32 %v8246_v25, %v11601_v4  ;;  %v2709_v31 = vmul.f32 %v8246_v25, %v11602_v27  ;;  %v11605_v53 = vld [vmem:[#allocation259_spill] sm:$0xff]  ;;  %v4360_v46 = vld [vmem:[#allocation2 + $0x152] sm:$0xff] }
 0x5f4   :  { %11591 = vst [vmem:[#allocation121_spill] sm:$0xff] %v8560_v7  ;;  %v2712_v34 = vmul.f32 %v8246_v25, %v11604_v58  ;;  %v2715_v15 = vmul.f32 %v8246_v25, %v11605_v53  ;;  %v11606_v24 = vld [vmem:[#allocation331_spill] sm:$0xff]  ;;  %v8593_v37 = vadd.f32 %v4260_v59, %v3811_v12  ;;  %v8599_v27 = vadd.f32 %v2711_v54, %v8289_v61  ;;  %v11612_v20 = vld [vmem:[#allocation84_spill] sm:$0xff]  ;;  %v11615_v12 = vld [vmem:[#allocation326_spill] sm:$0xff] }
 0x5f5   :  { %11592 = vst [vmem:[#allocation123_spill] sm:$0xff] %v8562_v21  ;;  %v3236_v47 = vmul.f32 %v8351_v33, %v11606_v24  ;;  %v11608_v21 = vld [vmem:[#allocation88_spill] sm:$0xff]  ;;  %v11610_v42 = vld [vmem:[#allocation83_spill] sm:$0xff]  ;;  %v8605_v58 = vadd.f32 %v2703_v2, %v11612_v20  ;;  %v8608_v53 = vadd.f32 %v2701_v35, %v11614_v49  ;;  %v2787_v24 = vadd.f32 %v2723_v55, %v8325_v17  ;;  %v4361_v61 = vld [vmem:[#allocation2 + $0x15a] sm:$0xff] }
 0x5f6   :  { %11603 = vst [vmem:[#allocation125_spill] sm:$0xff] %v8585_v9  ;;  %v8596_v4 = vadd.f32 %v2698_v29, %v11608_v21  ;;  %v8602_v9 = vadd.f32 %v2700_v32, %v11610_v42  ;;  %v3228_v59 = vmul.f32 %v8351_v33, %v11615_v12  ;;  %4502 = vperm.xlu1 %5677, %v4356_v26   ;;  %v11617_v29 = vld [vmem:[#allocation93_spill] sm:$0xff]  ;;  %v11622_v49 = vld [vmem:[#allocation90_spill] sm:$0xff]  ;;  %v11624_v17 = vld [vmem:[#allocation92_spill] sm:$0xff] }
 0x5f7   :  { %11607 = vst [vmem:[#allocation124_spill] sm:$0xff] %v8593_v37  ;;  %v11616_v37 = vld [vmem:[#allocation399_spill] sm:$0xff]  ;;  %v8616_v54 = vadd.f32 %v2704_v48, %v11617_v29  ;;  %v11618_v42 = vld [vmem:[#allocation89_spill] sm:$0xff]  ;;  %v8625_v35 = vadd.f32 %v2709_v31, %v11622_v49  ;;  %v8628_v55 = vadd.f32 %v2712_v34, %v11624_v17  ;;  %v3300_v26 = vadd.f32 %v3236_v47, %v2787_v24  ;;  %v8633_v29 = vpop.permute.xlu1 %4099  ;;  %v11632_v49 = vld [vmem:[#allocation262_spill] sm:$0xff]  ;;  %v4165_v17 = vpop.permute.xlu2 %4164 }
 0x5f8   :  { %11609 = vst [vmem:[#allocation126_spill] sm:$0xff] %v8599_v27  ;;  %v3750_v21 = vmul.f32 %v8372_v43, %v11616_v37  ;;  %v8619_v32 = vadd.f32 %v2706_v39, %v11618_v42  ;;  %v11620_v20 = vld [vmem:[#allocation13_spill] sm:$0xff]  ;;  %4522 = vperm.xlu2 %5678, %v4360_v46   ;;  %v11626_v12 = vld [vmem:[#allocation91_spill] sm:$0xff]  ;;  %v11627_v27 = vld [vmem:[#allocation378_spill] sm:$0xff]  ;;  %v2718_v34 = vmul.f32 %v8246_v25, %v11632_v49 }
 0x5f9   :  { %11611 = vst [vmem:[#allocation17_spill] sm:$0xff] %v8602_v9  ;;  %v8622_v2 = vadd.f32 %v2707_v13, %v11620_v20  ;;  %v2779_v37 = vadd.f32 %v2715_v15, %v11626_v12  ;;  %v3742_v48 = vmul.f32 %v8372_v43, %v11627_v27  ;;  %v11629_v39 = vld [vmem:[#allocation257_spill] sm:$0xff]  ;;  %v11630_v13 = vld [vmem:[#allocation260_spill] sm:$0xff]  ;;  %4527 = vperm.xlu0 %5676, %v4361_v61   ;;  %v11633_v15 = vld [vmem:[#allocation263_spill] sm:$0xff] }
 0x5fa   :  { %11613 = vst [vmem:[#allocation35_spill] sm:$0xff] %v8605_v58  ;;  %v2710_v42 = vmul.f32 %v8246_v25, %v11629_v39  ;;  %v2713_v20 = vmul.f32 %v8246_v25, %v11630_v13  ;;  %v11631_v31 = vld [vmem:[#allocation261_spill] sm:$0xff]  ;;  %v2716_v47 = vmul.f32 %v8246_v25, %v11633_v15  ;;  %v3814_v24 = vadd.f32 %v3750_v21, %v3300_v26  ;;  %v4359_v61 = vld [vmem:[#allocation2 + $0x142] sm:$0xff]  ;;  %v4125_v58 = vpop.permute.xlu0 %4124 }
 0x5fb   :  { %11619 = vst [vmem:[#allocation34_spill] sm:$0xff] %v8619_v32  ;;  %v2726_v46 = vmul.f32 %v8246_v25, %v11631_v31  ;;  %v3292_v27 = vadd.f32 %v3228_v59, %v2779_v37  ;;  %v4263_v12 = vmul.f32 %v8411_v1, %v4165_v17  ;;  %v11637_v32 = vld [vmem:[#allocation312_spill] sm:$0xff]  ;;  %v11638_v9 = vld [vmem:[#allocation334_spill] sm:$0xff] }
 0x5fc   :  { %11621 = vst [vmem:[#allocation20_spill] sm:$0xff] %v8622_v2  ;;  %v3226_v49 = vmul.f32 %v8351_v33, %v11637_v32  ;;  %v3239_v59 = vmul.f32 %v8351_v33, %v11638_v9  ;;  %v4363_v26 = vld [vmem:[#allocation2 + $0x172] sm:$0xff]  ;;  %v11640_v17 = vld [vmem:[#allocation94_spill] sm:$0xff]  ;;  %v3740_v32 = vmul.f32 %v8372_v43, %v11641_v18  ;;  %v3231_v9 = vmul.f32 %v8351_v33, %v11643_v40 }
 0x5fd   :  { %11623 = vst [vmem:[#allocation38_spill] sm:$0xff] %v8625_v35  ;;  %v11636_v35 = vld [vmem:[#allocation265_spill] sm:$0xff]  ;;  %v3806_v21 = vadd.f32 %v3742_v48, %v3292_v27  ;;  %v8656_v37 = vadd.f32 %v4263_v12, %v3814_v24  ;;  %v8660_v15 = vadd.f32 %v2710_v42, %v11640_v17  ;;  %v11642_v7 = vld [vmem:[#allocation10_spill] sm:$0xff]  ;;  %v2780_v24 = vadd.f32 %v2716_v47, %v8298_v23  ;;  %v11650_v47 = vld [vmem:[#allocation268_spill] sm:$0xff] }
 0x5fe   :  { %11625 = vst [vmem:[#allocation31_spill] sm:$0xff] %v8628_v55  ;;  %v11634_v55 = vld [vmem:[#allocation264_spill] sm:$0xff]  ;;  %v2721_v31 = vmul.f32 %v8246_v25, %v11636_v35  ;;  %v2790_v35 = vadd.f32 %v2726_v46, %v8375_v14  ;;  %v2782_v2 = vadd.f32 %v2718_v34, %v11642_v7  ;;  %v11644_v48 = vld [vmem:[#allocation18_spill] sm:$0xff]  ;;  %4517 = vperm.xlu1 %5677, %v4359_v61   ;;  %v11647_v7 = vld [vmem:[#allocation267_spill] sm:$0xff] }
 0x5ff   :  { %11628 = vst [vmem:[#allocation127_spill] sm:$0xff] %v8633_v29  ;;  %v2729_v39 = vmul.f32 %v8246_v25, %v11634_v55  ;;  %v11635_v29 = vld [vmem:[#allocation266_spill] sm:$0xff]  ;;  %v4255_v55 = vmul.f32 %v8411_v1, %v4125_v58  ;;  %v3753_v27 = vmul.f32 %v8372_v43, %v11644_v48  ;;  %v11646_v14 = vld [vmem:[#allocation96_spill] sm:$0xff]  ;;  %v3181_v40 = vmul.f32 %v8351_v33, %v11647_v7  ;;  %v11648_v12 = vld [vmem:[#allocation381_spill] sm:$0xff] }
 0x600   :  { %v2719_v13 = vmul.f32 %v8246_v25, %v11635_v29  ;;  %11639 = vst [vmem:[#allocation128_spill] sm:$0xff] %v8656_v37  ;;  %v2777_v29 = vadd.f32 %v2713_v20, %v8295_v41  ;;  %v4364_v42 = vld [vmem:[#allocation2 + $0x182] sm:$0xff]  ;;  %v2785_v20 = vadd.f32 %v2721_v31, %v11646_v14  ;;  %4537 = vperm.xlu2 %5678, %v4363_v26  }
 0x601   :  { %v8671_v58 = vadd.f32 %v4255_v55, %v3806_v21  ;;  %v2793_v41 = vadd.f32 %v2729_v39, %v8381_v22  ;;  %v3303_v34 = vadd.f32 %v3239_v59, %v2790_v35  ;;  %v3745_v61 = vmul.f32 %v8372_v43, %v11648_v12  ;;  %v4115_v21 = vpop.permute.xlu1 %4114  ;;  %v11649_v55 = vld [vmem:[#allocation269_spill] sm:$0xff]  ;;  %4542 = vperm.xlu0 %5676, %v4364_v42   ;;  %v11653_v48 = vld [vmem:[#allocation271_spill] sm:$0xff] }
 0x602   :  { %v3290_v46 = vadd.f32 %v3226_v49, %v2777_v29  ;;  %v8677_v18 = vadd.f32 %v2719_v13, %v8308_v57  ;;  %v2722_v23 = vmul.f32 %v8246_v25, %v11649_v55  ;;  %v2724_v22 = vmul.f32 %v8246_v25, %v11650_v47  ;;  %v4180_v49 = vpop.permute.xlu2 %4179  ;;  %v11651_v57 = vld [vmem:[#allocation270_spill] sm:$0xff]  ;;  %v11652_v29 = vld [vmem:[#allocation272_spill] sm:$0xff]  ;;  %v11654_v7 = vld [vmem:[#allocation315_spill] sm:$0xff]  ;;  %v4140_v42 = vpop.permute.xlu0 %4139 }
 0x603   :  { %11645 = vst [vmem:[#allocation129_spill] sm:$0xff] %v8671_v58  ;;  %v4253_v31 = vmul.f32 %v8411_v1, %v4115_v21  ;;  %v3184_v13 = vmul.f32 %v8351_v33, %v11651_v57  ;;  %v3295_v26 = vadd.f32 %v3231_v9, %v2782_v2  ;;  %v3817_v59 = vadd.f32 %v3753_v27, %v3303_v34  ;;  %v4362_v12 = vld [vmem:[#allocation2 + $0x16a] sm:$0xff]  ;;  %v11656_v21 = vld [vmem:[#allocation337_spill] sm:$0xff]  ;;  %v11675_v58 = vld [vmem:[#allocation318_spill] sm:$0xff] }
 0x604   :  { %v3804_v39 = vadd.f32 %v3740_v32, %v3290_v46  ;;  %v4266_v17 = vmul.f32 %v8411_v1, %v4180_v49  ;;  %v2725_v35 = vmul.f32 %v8246_v25, %v11652_v29  ;;  %v2727_v14 = vmul.f32 %v8246_v25, %v11653_v48  ;;  %v4366_v27 = vld [vmem:[#allocation2 + $0x19a] sm:$0xff] }
 0x605   :  { %v3229_v32 = vmul.f32 %v8351_v33, %v11654_v7  ;;  %v3242_v55 = vmul.f32 %v8351_v33, %v11656_v21  ;;  %v3809_v2 = vadd.f32 %v3745_v61, %v3295_v26  ;;  %v4258_v34 = vmul.f32 %v8411_v1, %v4140_v42  ;;  %v11658_v49 = vld [vmem:[#allocation101_spill] sm:$0xff]  ;;  %v11659_v29 = vld [vmem:[#allocation98_spill] sm:$0xff]  ;;  %v11661_v61 = vld [vmem:[#allocation332_spill] sm:$0xff] }
 0x606   :  { %v8697_v46 = vadd.f32 %v4253_v31, %v3804_v39  ;;  %v8701_v9 = vadd.f32 %v4266_v17, %v3817_v59  ;;  %v8705_v47 = vadd.f32 %v3181_v40, %v8395_v30  ;;  %v8708_v57 = vadd.f32 %v2722_v23, %v11658_v49  ;;  %v11660_v31 = vld [vmem:[#allocation388_spill] sm:$0xff]  ;;  %4532 = vperm.xlu1 %5677, %v4362_v12   ;;  %v4367_v40 = vld [vmem:[#allocation2 + $0x1a2] sm:$0xff]  ;;  %v11666_v49 = vld [vmem:[#allocation97_spill] sm:$0xff] }
 0x607   :  { %v8711_v39 = vadd.f32 %v2724_v22, %v11659_v29  ;;  %v3743_v48 = vmul.f32 %v8372_v43, %v11660_v31  ;;  %v8716_v7 = vadd.f32 %v3184_v13, %v8406_v62  ;;  %v3234_v26 = vmul.f32 %v8351_v33, %v11661_v61  ;;  %v11662_v59 = vld [vmem:[#allocation16_spill] sm:$0xff]  ;;  %v11665_v22 = vld [vmem:[#allocation273_spill] sm:$0xff]  ;;  %v11667_v13 = vld [vmem:[#allocation275_spill] sm:$0xff] }
 0x608   :  { %11655 = vst [vmem:[#allocation131_spill] sm:$0xff] %v8697_v46  ;;  %v3756_v17 = vmul.f32 %v8372_v43, %v11662_v59  ;;  %v8722_v30 = vadd.f32 %v4258_v34, %v3809_v2  ;;  %v11664_v23 = vld [vmem:[#allocation100_spill] sm:$0xff]  ;;  %v3187_v21 = vmul.f32 %v8351_v33, %v11665_v22  ;;  %v8730_v29 = vadd.f32 %v2727_v14, %v11666_v49  ;;  %v11668_v61 = vld [vmem:[#allocation274_spill] sm:$0xff]  ;;  %v11671_v22 = vld [vmem:[#allocation277_spill] sm:$0xff] }
 0x609   :  { %11657 = vst [vmem:[#allocation132_spill] sm:$0xff] %v8701_v9  ;;  %v8725_v42 = vadd.f32 %v2725_v35, %v11664_v23  ;;  %v3293_v62 = vadd.f32 %v3229_v32, %v2780_v24  ;;  %4552 = vperm.xlu2 %5678, %v4366_v27   ;;  %v2728_v31 = vmul.f32 %v8246_v25, %v11667_v13  ;;  %v11669_v34 = vld [vmem:[#allocation384_spill] sm:$0xff]  ;;  %v4130_v35 = vpop.permute.xlu1 %4129  ;;  %v11672_v27 = vld [vmem:[#allocation278_spill] sm:$0xff] }
 0x60a   :  { %11663 = vst [vmem:[#allocation130_spill] sm:$0xff] %v8722_v30  ;;  %v2730_v12 = vmul.f32 %v8246_v25, %v11668_v61  ;;  %v3306_v2 = vadd.f32 %v3242_v55, %v2793_v41  ;;  %v3748_v59 = vmul.f32 %v8372_v43, %v11669_v34  ;;  %v11670_v23 = vld [vmem:[#allocation276_spill] sm:$0xff]  ;;  %v3182_v14 = vmul.f32 %v8351_v33, %v11671_v22  ;;  %v4195_v32 = vpop.permute.xlu2 %4194  ;;  %v11673_v34 = vld [vmem:[#allocation279_spill] sm:$0xff]  ;;  %v11677_v22 = vld [vmem:[#allocation281_spill] sm:$0xff] }
 0x60b   :  { %v3190_v9 = vmul.f32 %v8351_v33, %v11670_v23  ;;  %v3807_v49 = vadd.f32 %v3743_v48, %v3293_v62  ;;  %v4256_v24 = vmul.f32 %v8411_v1, %v4130_v35  ;;  %4557 = vperm.xlu0 %5676, %v4367_v40   ;;  %v2731_v13 = vmul.f32 %v8246_v25, %v11672_v27  ;;  %v11674_v30 = vld [vmem:[#allocation280_spill] sm:$0xff]  ;;  %v4155_v40 = vpop.permute.xlu0 %4154  ;;  %v11743_v46 = vld [vmem:[#allocation314_spill] sm:$0xff] }
 0x60c   :  { %v3298_v61 = vadd.f32 %v3234_v26, %v2785_v20  ;;  %v3820_v41 = vadd.f32 %v3756_v17, %v3306_v2  ;;  %v4269_v55 = vmul.f32 %v8411_v1, %v4195_v32  ;;  %v3193_v37 = vmul.f32 %v8351_v33, %v11673_v34  ;;  %v4365_v35 = vld [vmem:[#allocation2 + $0x18a] sm:$0xff] }
 0x60d   :  { %v3185_v23 = vmul.f32 %v8351_v33, %v11674_v30  ;;  %v3232_v48 = vmul.f32 %v8351_v33, %v11675_v58  ;;  %v8752_v62 = vadd.f32 %v4256_v24, %v3807_v49  ;;  %v3183_v25 = vmul.f32 %v8351_v33, %v11677_v22  ;;  %v4369_v17 = vld [vmem:[#allocation2 + $0x1ea] sm:$0xff] }
 0x60e   :  { %v3812_v20 = vadd.f32 %v3748_v59, %v3298_v61  ;;  %v8756_v26 = vadd.f32 %v4269_v55, %v3820_v41  ;;  %v4261_v2 = vmul.f32 %v8411_v1, %v4155_v40  ;;  %v8760_v32 = vadd.f32 %v3187_v21, %v8448_v8  ;;  %v11679_v30 = vld [vmem:[#allocation108_spill] sm:$0xff]  ;;  %v11680_v58 = vld [vmem:[#allocation99_spill] sm:$0xff]  ;;  %v11682_v59 = vld [vmem:[#allocation282_spill] sm:$0xff]  ;;  %4547 = vperm.xlu1 %5677, %v4365_v35  }
 0x60f   :  { %11676 = vst [vmem:[#allocation133_spill] sm:$0xff] %v8752_v62  ;;  %v8763_v27 = vadd.f32 %v2728_v31, %v11679_v30  ;;  %v8766_v49 = vadd.f32 %v2730_v12, %v11680_v58  ;;  %v11681_v24 = vld [vmem:[#allocation391_spill] sm:$0xff]  ;;  %v8771_v22 = vadd.f32 %v3190_v9, %v8460_v6  ;;  %v3196_v61 = vmul.f32 %v8351_v33, %v11682_v59  ;;  %v4370_v21 = vld [vmem:[#allocation2 + $0x1fa] sm:$0xff] }
 0x610   :  { %11678 = vst [vmem:[#allocation134_spill] sm:$0xff] %v8756_v26  ;;  %v3746_v34 = vmul.f32 %v8372_v43, %v11681_v24  ;;  %v11683_v41 = vld [vmem:[#allocation335_spill] sm:$0xff]  ;;  %v8777_v8 = vadd.f32 %v4261_v2, %v3812_v20  ;;  %v8780_v31 = vadd.f32 %v2731_v13, %v8384_v60  ;;  %v8783_v12 = vadd.f32 %v3193_v37, %v8469_v50  ;;  %v11685_v40 = vld [vmem:[#allocation102_spill] sm:$0xff]  ;;  %v11689_v37 = vld [vmem:[#allocation284_spill] sm:$0xff] }
 0x611   :  { %v3237_v55 = vmul.f32 %v8351_v33, %v11683_v41  ;;  %v8786_v30 = vadd.f32 %v3182_v14, %v11685_v40  ;;  %v3296_v6 = vadd.f32 %v3232_v48, %v8677_v18  ;;  %4567 = vperm.xlu2 %5678, %v4369_v17   ;;  %v8790_v9 = vadd.f32 %v3183_v25, %v8390_v51  ;;  %v11686_v58 = vld [vmem:[#allocation106_spill] sm:$0xff]  ;;  %v11687_v20 = vld [vmem:[#allocation283_spill] sm:$0xff]  ;;  %v4145_v50 = vpop.permute.xlu1 %4144  ;;  %v11690_v24 = vld [vmem:[#allocation285_spill] sm:$0xff] }
 0x612   :  { %11684 = vst [vmem:[#allocation135_spill] sm:$0xff] %v8777_v8  ;;  %v8793_v35 = vadd.f32 %v3185_v23, %v11686_v58  ;;  %v3188_v2 = vmul.f32 %v8351_v33, %v11687_v20  ;;  %v11688_v60 = vld [vmem:[#allocation387_spill] sm:$0xff]  ;;  %v3186_v14 = vmul.f32 %v8351_v33, %v11689_v37  ;;  %v3199_v18 = vmul.f32 %v8351_v33, %v11690_v24  ;;  %v8804_v25 = vpop.permute.xlu2 %4402  ;;  %v11692_v41 = vld [vmem:[#allocation286_spill] sm:$0xff]  ;;  %v11693_v20 = vld [vmem:[#allocation288_spill] sm:$0xff] }
 0x613   :  { %v3751_v13 = vmul.f32 %v8372_v43, %v11688_v60  ;;  %v3810_v48 = vadd.f32 %v3746_v34, %v3296_v6  ;;  %v4259_v51 = vmul.f32 %v8411_v1, %v4145_v50  ;;  %4572 = vperm.xlu0 %5676, %v4370_v21   ;;  %v8807_v23 = vadd.f32 %v3196_v61, %v8481_v5  ;;  %v11691_v17 = vld [vmem:[#allocation287_spill] sm:$0xff]  ;;  %v11694_v34 = vld [vmem:[#allocation289_spill] sm:$0xff]  ;;  %v4170_v61 = vpop.permute.xlu0 %4169  ;;  %v11697_v24 = vld [vmem:[#allocation290_spill] sm:$0xff] }
 0x614   :  { %v3189_v59 = vmul.f32 %v8351_v33, %v11691_v17  ;;  %v3191_v40 = vmul.f32 %v8351_v33, %v11692_v41  ;;  %v3301_v58 = vadd.f32 %v3237_v55, %v8711_v39  ;;  %v3202_v60 = vmul.f32 %v8351_v33, %v11693_v20  ;;  %v11695_v50 = vld [vmem:[#allocation321_spill] sm:$0xff]  ;;  %v4368_v5 = vld [vmem:[#allocation2 + $0x1e2] sm:$0xff] }
 0x615   :  { %v3194_v6 = vmul.f32 %v8351_v33, %v11694_v34  ;;  %v3235_v21 = vmul.f32 %v8351_v33, %v11695_v50  ;;  %v8820_v37 = vadd.f32 %v4259_v51, %v3810_v48  ;;  %v3192_v17 = vmul.f32 %v8351_v33, %v11697_v24  ;;  %v11698_v26 = vld [vmem:[#allocation291_spill] sm:$0xff]  ;;  %v4372_v55 = vld [vmem:[#allocation2 + $0x212] sm:$0xff] }
 0x616   :  { %v3205_v41 = vmul.f32 %v8351_v33, %v11698_v26  ;;  %v3815_v39 = vadd.f32 %v3751_v13, %v3301_v58  ;;  %v4264_v20 = vmul.f32 %v8411_v1, %v4170_v61  ;;  %v8828_v8 = vadd.f32 %v3186_v14, %v8403_v56  ;;  %v11699_v51 = vld [vmem:[#allocation395_spill] sm:$0xff]  ;;  %v11700_v24 = vld [vmem:[#allocation109_spill] sm:$0xff]  ;;  %v11701_v26 = vld [vmem:[#allocation292_spill] sm:$0xff]  ;;  %4562 = vperm.xlu1 %5677, %v4368_v5  }
 0x617   :  { %11696 = vst [vmem:[#allocation137_spill] sm:$0xff] %v8820_v37  ;;  %v8831_v34 = vadd.f32 %v3199_v18, %v8524_v38  ;;  %v8834_v48 = vadd.f32 %v3188_v2, %v8378_v36  ;;  %v3749_v50 = vmul.f32 %v8372_v43, %v11699_v51  ;;  %v8839_v37 = vadd.f32 %v3191_v40, %v11700_v24  ;;  %v11702_v58 = vld [vmem:[#allocation338_spill] sm:$0xff]  ;;  %v11708_v24 = vld [vmem:[#allocation295_spill] sm:$0xff] }
 0x618   :  { %v3197_v13 = vmul.f32 %v8351_v33, %v11701_v26  ;;  %v3240_v61 = vmul.f32 %v8351_v33, %v11702_v58  ;;  %v8845_v56 = vadd.f32 %v4264_v20, %v3815_v39  ;;  %v4373_v38 = vld [vmem:[#allocation2 + $0x21a] sm:$0xff]  ;;  %v8848_v14 = vadd.f32 %v3189_v59, %v8454_v19 }
 0x619   :  { %v8851_v36 = vadd.f32 %v3202_v60, %v8533_v63  ;;  %v11704_v2 = vld [vmem:[#allocation26_spill] sm:$0xff]  ;;  %v3299_v40 = vadd.f32 %v3235_v21, %v8708_v57  ;;  %4582 = vperm.xlu2 %5678, %v4372_v55   ;;  %v8858_v51 = vadd.f32 %v3192_v17, %v8457_v28  ;;  %v8861_v5 = vadd.f32 %v3205_v41, %v8545_v10  ;;  %v11705_v39 = vld [vmem:[#allocation293_spill] sm:$0xff]  ;;  %v4160_v63 = vpop.permute.xlu1 %4159  ;;  %v11709_v41 = vld [vmem:[#allocation296_spill] sm:$0xff] }
 0x61a   :  { %11703 = vst [vmem:[#allocation136_spill] sm:$0xff] %v8845_v56  ;;  %v8854_v18 = vadd.f32 %v3194_v6, %v11704_v2  ;;  %v3195_v20 = vmul.f32 %v8351_v33, %v11705_v39  ;;  %v11706_v19 = vld [vmem:[#allocation390_spill] sm:$0xff]  ;;  %v3200_v57 = vmul.f32 %v8351_v33, %v11708_v24  ;;  %v4262_v28 = vmul.f32 %v8411_v1, %v4160_v63  ;;  %v8872_v17 = vpop.permute.xlu2 %4417  ;;  %v11710_v26 = vld [vmem:[#allocation297_spill] sm:$0xff]  ;;  %v11711_v39 = vld [vmem:[#allocation299_spill] sm:$0xff] }
 0x61b   :  { %v3754_v59 = vmul.f32 %v8372_v43, %v11706_v19  ;;  %v11707_v60 = vld [vmem:[#allocation294_spill] sm:$0xff]  ;;  %v3813_v21 = vadd.f32 %v3749_v50, %v3299_v40  ;;  %4587 = vperm.xlu0 %5676, %v4373_v38   ;;  %v8875_v10 = vadd.f32 %v3197_v13, %v8439_v11  ;;  %v3198_v55 = vmul.f32 %v8351_v33, %v11709_v41  ;;  %v11713_v63 = vld [vmem:[#allocation324_spill] sm:$0xff]  ;;  %v4185_v13 = vpop.permute.xlu0 %4184  ;;  %v11716_v56 = vld [vmem:[#allocation301_spill] sm:$0xff] }
 0x61c   :  { %v3208_v6 = vmul.f32 %v8351_v33, %v11707_v60  ;;  %v3211_v58 = vmul.f32 %v8351_v33, %v11710_v26  ;;  %v3304_v2 = vadd.f32 %v3240_v61, %v8730_v29  ;;  %v3201_v19 = vmul.f32 %v8351_v33, %v11711_v39  ;;  %v11712_v50 = vld [vmem:[#allocation298_spill] sm:$0xff]  ;;  %v11715_v24 = vld [vmem:[#allocation300_spill] sm:$0xff] }
 0x61d   :  { %v3203_v40 = vmul.f32 %v8351_v33, %v11712_v50  ;;  %v3238_v38 = vmul.f32 %v8351_v33, %v11713_v63  ;;  %v8888_v60 = vadd.f32 %v4262_v28, %v3813_v21  ;;  %v4371_v11 = vld [vmem:[#allocation2 + $0x202] sm:$0xff]  ;;  %v3214_v41 = vmul.f32 %v8351_v33, %v11715_v24  ;;  %v4375_v61 = vld [vmem:[#allocation2 + $0x232] sm:$0xff] }
 0x61e   :  { %v3206_v26 = vmul.f32 %v8351_v33, %v11716_v56  ;;  %v3818_v29 = vadd.f32 %v3754_v59, %v3304_v2  ;;  %v4267_v39 = vmul.f32 %v8411_v1, %v4185_v13  ;;  %v8896_v62 = vadd.f32 %v3195_v20, %v8475_v52  ;;  %v11717_v28 = vld [vmem:[#allocation398_spill] sm:$0xff]  ;;  %v11719_v56 = vld [vmem:[#allocation303_spill] sm:$0xff]  ;;  %v11720_v2 = vld [vmem:[#allocation341_spill] sm:$0xff]  ;;  %4577 = vperm.xlu1 %5677, %v4371_v11  }
 0x61f   :  { %11714 = vst [vmem:[#allocation33_spill] sm:$0xff] %v8888_v60  ;;  %v8899_v50 = vadd.f32 %v3208_v6, %v8554_v0  ;;  %v8902_v21 = vadd.f32 %v3200_v57, %v8451_v16  ;;  %v3752_v63 = vmul.f32 %v8372_v43, %v11717_v28  ;;  %v11718_v24 = vld [vmem:[#allocation302_spill] sm:$0xff]  ;;  %v3217_v59 = vmul.f32 %v8351_v33, %v11719_v56  ;;  %v11724_v57 = vld [vmem:[#allocation111_spill] sm:$0xff] }
 0x620   :  { %v3204_v60 = vmul.f32 %v8351_v33, %v11718_v24  ;;  %v3243_v13 = vmul.f32 %v8351_v33, %v11720_v2  ;;  %v8912_v52 = vadd.f32 %v4267_v39, %v3818_v29  ;;  %v4376_v0 = vld [vmem:[#allocation2 + $0x242] sm:$0xff]  ;;  %v8918_v16 = vadd.f32 %v3211_v58, %v8596_v4  ;;  %v11726_v29 = vld [vmem:[#allocation113_spill] sm:$0xff] }
 0x621   :  { %v11722_v20 = vld [vmem:[#allocation114_spill] sm:$0xff]  ;;  %v8921_v28 = vadd.f32 %v3203_v40, %v11724_v57  ;;  %v3302_v24 = vadd.f32 %v3238_v38, %v8725_v42  ;;  %4597 = vperm.xlu2 %5678, %v4375_v61   ;;  %v8925_v56 = vadd.f32 %v3201_v19, %v8530_v45  ;;  %v8928_v11 = vadd.f32 %v3214_v41, %v8608_v53  ;;  %v4175_v4 = vpop.permute.xlu1 %4174  ;;  %v11728_v58 = vld [vmem:[#allocation305_spill] sm:$0xff] }
 0x622   :  { %11721 = vst [vmem:[#allocation138_spill] sm:$0xff] %v8912_v52  ;;  %v8915_v6 = vadd.f32 %v3198_v55, %v11722_v20  ;;  %v8931_v39 = vadd.f32 %v3206_v26, %v11726_v29  ;;  %v11727_v55 = vld [vmem:[#allocation394_spill] sm:$0xff]  ;;  %v3207_v40 = vmul.f32 %v8351_v33, %v11728_v58  ;;  %v11729_v20 = vld [vmem:[#allocation304_spill] sm:$0xff]  ;;  %v4265_v45 = vmul.f32 %v8411_v1, %v4175_v4  ;;  %v8940_v19 = vpop.permute.xlu2 %4432  ;;  %v11734_v4 = vld [vmem:[#allocation327_spill] sm:$0xff] }
 0x623   :  { %11723 = vst [vmem:[#allocation140_spill] sm:$0xff] %v8918_v16  ;;  %v3757_v2 = vmul.f32 %v8372_v43, %v11727_v55  ;;  %v3209_v42 = vmul.f32 %v8351_v33, %v11729_v20  ;;  %v3816_v38 = vadd.f32 %v3752_v63, %v3302_v24  ;;  %4602 = vperm.xlu0 %5676, %v4376_v0   ;;  %v11731_v26 = vld [vmem:[#allocation306_spill] sm:$0xff]  ;;  %v11732_v29 = vld [vmem:[#allocation308_spill] sm:$0xff]  ;;  %v11733_v63 = vld [vmem:[#allocation307_spill] sm:$0xff] }
 0x624   :  { %11725 = vst [vmem:[#allocation139_spill] sm:$0xff] %v8928_v11  ;;  %v8943_v53 = vadd.f32 %v3204_v60, %v8536_v44  ;;  %v8946_v41 = vadd.f32 %v3217_v59, %v8616_v54  ;;  %v3220_v61 = vmul.f32 %v8351_v33, %v11731_v26  ;;  %v3307_v57 = vadd.f32 %v3243_v13, %v8766_v49  ;;  %v4374_v44 = vld [vmem:[#allocation2 + $0x22a] sm:$0xff]  ;;  %v4200_v60 = vpop.permute.xlu0 %4199  ;;  %v11736_v54 = vld [vmem:[#allocation309_spill] sm:$0xff]  ;;  %v11737_v20 = vld [vmem:[#allocation310_spill] sm:$0xff] }
 0x625   :  { %v3210_v55 = vmul.f32 %v8351_v33, %v11732_v29  ;;  %v3212_v24 = vmul.f32 %v8351_v33, %v11733_v63  ;;  %v3241_v0 = vmul.f32 %v8351_v33, %v11734_v4  ;;  %v8957_v58 = vadd.f32 %v4265_v45, %v3816_v38  ;;  %v228_v13 = vld [vmem:[%s10660_s1 + $0x4] sm:$0x1]  ;;  %v4378_v29 = vld [vmem:[#allocation2 + $0x25a] sm:$0xff]  ;;  %v11738_v38 = vld [vmem:[#allocation115_spill] sm:$0xff] }
 0x626   :  { %11730 = vst [vmem:[#allocation37_spill] sm:$0xff] %v8946_v41  ;;  %v3223_v59 = vmul.f32 %v8351_v33, %v11736_v54  ;;  %v3215_v26 = vmul.f32 %v8351_v33, %v11737_v20  ;;  %v3821_v49 = vadd.f32 %v3757_v2, %v3307_v57  ;;  %v4270_v63 = vmul.f32 %v8411_v1, %v4200_v60  ;;  %v11739_v52 = vld [vmem:[#allocation311_spill] sm:$0xff]  ;;  %v11741_v2 = vld [vmem:[#allocation20_spill] sm:$0xff]  ;;  %v11744_v11 = vld [vmem:[#allocation313_spill] sm:$0xff] }
 0x627   :  { %11735 = vst [vmem:[#allocation141_spill] sm:$0xff] %v8957_v58  ;;  %v8968_v4 = vadd.f32 %v3207_v40, %v8551_v3  ;;  %v8971_v45 = vadd.f32 %v3209_v42, %v11738_v38  ;;  %v3213_v54 = vmul.f32 %v8351_v33, %v11739_v52  ;;  %v11740_v58 = vld [vmem:[#allocation405_spill] sm:$0xff]  ;;  %v8978_v57 = vadd.f32 %v3220_v61, %v11741_v2  ;;  %v4379_v40 = vld [vmem:[#allocation2 + $0x262] sm:$0xff] }
 0x628   :  { %v3755_v20 = vmul.f32 %v8372_v43, %v11740_v58  ;;  %v3216_v41 = vmul.f32 %v8351_v33, %v11743_v46  ;;  %v3218_v60 = vmul.f32 %v8351_v33, %v11744_v11  ;;  %4592 = vperm.xlu1 %5677, %v4374_v44   ;;  %v8984_v3 = vadd.f32 %v4270_v63, %v3821_v49  ;;  %v11746_v42 = vld [vmem:[#allocation121_spill] sm:$0xff]  ;;  %v11747_v52 = vld [vmem:[#allocation118_spill] sm:$0xff]  ;;  %v11749_v46 = vld [vmem:[#allocation119_spill] sm:$0xff] }
 0x629   :  { %11742 = vst [vmem:[#allocation142_spill] sm:$0xff] %v8978_v57  ;;  %v8987_v38 = vadd.f32 %v3210_v55, %v11746_v42  ;;  %v8990_v16 = vadd.f32 %v3212_v24, %v11747_v52  ;;  %v3305_v58 = vadd.f32 %v3241_v0, %v8763_v27  ;;  %v230_v61 = vunpack.c.l.bf16 %v228_v13  ;;  %4612 = vperm.xlu2 %5678, %v4378_v29   ;;  %v11751_v11 = vld [vmem:[#allocation317_spill] sm:$0xff]  ;;  %v11752_v49 = vld [vmem:[#allocation316_spill] sm:$0xff]  ;;  %v4190_v63 = vpop.permute.xlu1 %4189 }
 0x62a   :  { %11745 = vst [vmem:[#allocation36_spill] sm:$0xff] %v8984_v3  ;;  %v8994_v2 = vadd.f32 %v3223_v59, %v8660_v15  ;;  %v8997_v57 = vadd.f32 %v3215_v26, %v11749_v46  ;;  %v3219_v44 = vmul.f32 %v8351_v33, %v11751_v11  ;;  %v3221_v55 = vmul.f32 %v8351_v33, %v11752_v49  ;;  %v11753_v42 = vld [vmem:[#allocation17_spill] sm:$0xff]  ;;  %v11754_v52 = vld [vmem:[#allocation344_spill] sm:$0xff]  ;;  %v9009_v59 = vpop.permute.xlu2 %4447  ;;  %v11755_v26 = vld [vmem:[#allocation35_spill] sm:$0xff] }
 0x62b   :  { %v9004_v24 = vadd.f32 %v3213_v54, %v11753_v42  ;;  %v3696_v27 = vmul.f32 %v8372_v43, %v11754_v52  ;;  %v3819_v0 = vadd.f32 %v3755_v20, %v3305_v58  ;;  %v4268_v15 = vmul.f32 %v8411_v1, %v4190_v63  ;;  %4617 = vperm.xlu0 %5676, %v4379_v40   ;;  %v11757_v29 = vld [vmem:[#allocation120_spill] sm:$0xff]  ;;  %v11759_v11 = vld [vmem:[#allocation319_spill] sm:$0xff]  ;;  %v11760_v54 = vld [vmem:[#allocation330_spill] sm:$0xff] }
 0x62c   :  { %11748 = vst [vmem:[#allocation39_spill] sm:$0xff] %v8994_v2  ;;  %v9012_v13 = vadd.f32 %v3216_v41, %v11755_v26  ;;  %v9015_v46 = vadd.f32 %v3218_v60, %v11757_v29  ;;  %v3224_v49 = vmul.f32 %v8351_v33, %v11759_v11  ;;  %v3244_v42 = vmul.f32 %v8351_v33, %v11760_v54  ;;  %v11761_v3 = vld [vmem:[#allocation340_spill] sm:$0xff]  ;;  %v11762_v58 = vld [vmem:[#allocation397_spill] sm:$0xff]  ;;  %v4408_v26 = vpop.permute.xlu0 %4407  ;;  %v11764_v60 = vld [vmem:[#allocation34_spill] sm:$0xff] }
 0x62d   :  { %11750 = vst [vmem:[#allocation46_spill] sm:$0xff] %v8997_v57  ;;  %v3695_v20 = vmul.f32 %v8372_v43, %v11761_v3  ;;  %v4209_v63 = vmul.f32 %v8411_v1, %v11762_v58  ;;  %v9025_v52 = vperm.slane %v230_v61, 0  ;;  %v9027_v40 = vadd.f32 %v4268_v15, %v3819_v0  ;;  %v4377_v41 = vld [vmem:[#allocation2 + $0x24a] sm:$0xff]  ;;  %v11766_v2 = vld [vmem:[#allocation122_spill] sm:$0xff]  ;;  %v11769_v57 = vld [vmem:[#allocation333_spill] sm:$0xff] }
 0x62e   :  { %11756 = vst [vmem:[#allocation40_spill] sm:$0xff] %v9012_v13  ;;  %v9030_v29 = vadd.f32 %v3219_v44, %v11764_v60  ;;  %v9033_v11 = vadd.f32 %v3221_v55, %v11766_v2  ;;  %v3697_v3 = vmul.f32 %v8372_v43, %v11769_v57  ;;  %v4381_v13 = vld [vmem:[#allocation2 + $0x27a] sm:$0xff]  ;;  %v3760_v61 = vadd.f32 %v3696_v27, %v8786_v30  ;;  %v11770_v58 = vld [vmem:[#allocation24_spill] sm:$0xff]  ;;  %v11771_v15 = vld [vmem:[#allocation19_spill] sm:$0xff] }
 0x62f   :  { %11758 = vst [vmem:[#allocation48_spill] sm:$0xff] %v9015_v46  ;;  %v11768_v46 = vld [vmem:[#allocation320_spill] sm:$0xff]  ;;  %v3758_v0 = vmul.f32 %v8372_v43, %v11770_v58  ;;  %v4722_v44 = vmul.f32 %v9025_v52, %v4408_v26  ;;  %v11772_v60 = vld [vmem:[#allocation126_spill] sm:$0xff]  ;;  %v3308_v55 = vadd.f32 %v3244_v42, %v8780_v31  ;;  %v11775_v57 = vld [vmem:[#allocation339_spill] sm:$0xff]  ;;  %v3759_v27 = vadd.f32 %v3695_v20, %v8705_v47 }
 0x630   :  { %11763 = vst [vmem:[#allocation44_spill] sm:$0xff] %v9027_v40  ;;  %v3222_v54 = vmul.f32 %v8351_v33, %v11768_v46  ;;  %v4208_v40 = vmul.f32 %v8411_v1, %v11771_v15  ;;  %v9046_v2 = vadd.f32 %v3224_v49, %v11772_v60  ;;  %v11774_v46 = vld [vmem:[#allocation336_spill] sm:$0xff]  ;;  %4607 = vperm.xlu1 %5677, %v4377_v41   ;;  %v11776_v58 = vld [vmem:[#allocation343_spill] sm:$0xff]  ;;  %v11777_v26 = vld [vmem:[#allocation38_spill] sm:$0xff] }
 0x631   :  { %11765 = vst [vmem:[#allocation143_spill] sm:$0xff] %v9030_v29  ;;  %v3700_v33 = vmul.f32 %v8372_v43, %v11774_v46  ;;  %v4382_v30 = vld [vmem:[#allocation2 + $0x28a] sm:$0xff]  ;;  %v3698_v15 = vmul.f32 %v8372_v43, %v11776_v58  ;;  %v4273_v29 = vadd.f32 %v4209_v63, %v3760_v61  ;;  %v4721_v49 = vmul.f32 %v9025_v52, %v8804_v25  ;;  %v11778_v60 = vld [vmem:[#allocation342_spill] sm:$0xff]  ;;  %v4205_v47 = vpop.permute.xlu1 %4204  ;;  %v11782_v58 = vld [vmem:[#allocation41_spill] sm:$0xff] }
 0x632   :  { %11767 = vst [vmem:[#allocation144_spill] sm:$0xff] %v9033_v11  ;;  %v3703_v11 = vmul.f32 %v8372_v43, %v11775_v57  ;;  %4627 = vperm.xlu2 %5678, %v4381_v13   ;;  %v9059_v31 = vadd.f32 %v3222_v54, %v11777_v26  ;;  %v3761_v42 = vadd.f32 %v3697_v3, %v8790_v9  ;;  %v11779_v41 = vld [vmem:[#allocation347_spill] sm:$0xff]  ;;  %v9067_v61 = vpop.permute.xlu2 %4462  ;;  %v11781_v54 = vld [vmem:[#allocation345_spill] sm:$0xff] }
 0x633   :  { %11773 = vst [vmem:[#allocation45_spill] sm:$0xff] %v9046_v2  ;;  %v3706_v46 = vmul.f32 %v8372_v43, %v11778_v60  ;;  %v3699_v57 = vmul.f32 %v8372_v43, %v11779_v41  ;;  %v3822_v20 = vadd.f32 %v3758_v0, %v3308_v55  ;;  %v4272_v2 = vadd.f32 %v4208_v40, %v3759_v27  ;;  %v11783_v55 = vld [vmem:[#allocation401_spill] sm:$0xff]  ;;  %v11787_v60 = vld [vmem:[#allocation28_spill] sm:$0xff] }
 0x634   :  { %v4271_v63 = vmul.f32 %v8411_v1, %v4205_v47  ;;  %v9069_v25 = vadd.f32 %v4722_v44, %v4273_v29  ;;  %4632 = vperm.xlu0 %5676, %v4382_v30   ;;  %v9072_v13 = vadd.f32 %v3700_v33, %v8828_v8  ;;  %v9075_v9 = vadd.f32 %v3703_v11, %v8848_v14  ;;  %v4380_v33 = vld [vmem:[#allocation2 + $0x272] sm:$0xff]  ;;  %v4423_v8 = vpop.permute.xlu0 %4422  ;;  %v11786_v11 = vld [vmem:[#allocation346_spill] sm:$0xff] }
 0x635   :  { %v3709_v3 = vmul.f32 %v8372_v43, %v11781_v54  ;;  %v4211_v0 = vmul.f32 %v8411_v1, %v11782_v58  ;;  %v3762_v40 = vadd.f32 %v3698_v15, %v8716_v7  ;;  %v4212_v27 = vmul.f32 %v8411_v1, %v11783_v55  ;;  %v11785_v30 = vld [vmem:[#allocation348_spill] sm:$0xff]  ;;  %v4384_v15 = vld [vmem:[#allocation2 + $0x2a2] sm:$0xff]  ;;  %v11788_v54 = vld [vmem:[#allocation349_spill] sm:$0xff] }
 0x636   :  { %11780 = vst [vmem:[#allocation145_spill] sm:$0xff] %v9069_v25  ;;  %v9084_v29 = vadd.f32 %v4721_v49, %v4272_v2  ;;  %v9086_v44 = vadd.f32 %v4271_v63, %v3822_v20  ;;  %v3712_v14 = vmul.f32 %v8372_v43, %v11785_v30  ;;  %v3701_v26 = vmul.f32 %v8372_v43, %v11786_v11  ;;  %v11789_v30 = vld [vmem:[#allocation350_spill] sm:$0xff] }
 0x637   :  { %v4210_v41 = vmul.f32 %v8411_v1, %v11787_v60  ;;  %v4724_v7 = vmul.f32 %v9025_v52, %v8872_v17  ;;  %v9097_v2 = vadd.f32 %v3706_v46, %v8858_v51  ;;  %v3763_v49 = vadd.f32 %v3699_v57, %v8793_v35  ;;  %v4385_v17 = vld [vmem:[#allocation2 + $0x2aa] sm:$0xff] }
 0x638   :  { %11784 = vst [vmem:[#allocation146_spill] sm:$0xff] %v9084_v29  ;;  %v4986_v47 = vmul.f32 %v9069_v25, %v9069_v25  ;;  %v4725_v20 = vmul.f32 %v9025_v52, %v4423_v8  ;;  %v9104_v63 = vadd.f32 %v3709_v3, %v8896_v62  ;;  %v3704_v58 = vmul.f32 %v8372_v43, %v11788_v54 }
 0x639   :  { %v4275_v55 = vadd.f32 %v4211_v0, %v3762_v40  ;;  %4622 = vperm.xlu1 %5677, %v4380_v33   ;;  %v3702_v51 = vmul.f32 %v8372_v43, %v11789_v30  ;;  %v4276_v46 = vadd.f32 %v4212_v27, %v3763_v49  ;;  %v4985_v35 = vmul.f32 %v9084_v29, %v9084_v29  ;;  %v4413_v33 = vpop.permute.xlu1 %4412  ;;  %v11794_v30 = vld [vmem:[#allocation32_spill] sm:$0xff] }
 0x63a   :  { %v4853_v57 = vsel %vm4851_vm3, %v9069_v25, 0.0  ;;  %4642 = vperm.xlu2 %5678, %v4384_v15   ;;  %v9115_v62 = vadd.f32 %v3712_v14, %v8915_v6  ;;  %v3765_v3 = vadd.f32 %v3701_v26, %v8760_v32  ;;  %v4274_v0 = vadd.f32 %v4210_v41, %v3761_v42  ;;  %v9124_v60 = vpop.permute.xlu2 %4477  ;;  %v11790_v6 = vld [vmem:[#allocation351_spill] sm:$0xff]  ;;  %v11791_v42 = vld [vmem:[#allocation53_spill] sm:$0xff] }
 0x63b   :  { %v9118_v40 = vadd.f32 %v4724_v7, %v4275_v55  ;;  %v4852_v8 = vsel %vm4851_vm3, %v9084_v29, 0.0  ;;  %v5050_v27 = vsel %vm4851_vm3, %v4986_v47, 0.0  ;;  %v4723_v11 = vmul.f32 %v9025_v52, %v4413_v33  ;;  %v11792_v15 = vld [vmem:[#allocation21_spill] sm:$0xff] }
 0x63c   :  { %v9126_v49 = vadd.f32 %v4725_v20, %v4276_v46  ;;  %4647 = vperm.xlu0 %5676, %v4385_v17   ;;  %v3715_v14 = vmul.f32 %v8372_v43, %v11790_v6  ;;  %v3768_v32 = vadd.f32 %v3704_v58, %v8771_v22  ;;  %v4214_v26 = vmul.f32 %v8411_v1, %v11791_v42  ;;  %v4383_v20 = vld [vmem:[#allocation2 + $0x292] sm:$0xff]  ;;  %v4438_v17 = vpop.permute.xlu0 %4437 }
 0x63d   :  { %v4854_v41 = vadd.f32 %v4853_v57, %v4852_v8  ;;  %v3766_v7 = vadd.f32 %v3702_v51, %v8834_v48  ;;  %v4215_v47 = vmul.f32 %v8411_v1, %v11792_v15  ;;  %v5049_v54 = vsel %vm4851_vm3, %v4985_v35, 0.0  ;;  %v4387_v48 = vld [vmem:[#allocation2 + $0x2c2] sm:$0xff]  ;;  %v11795_v8 = vld [vmem:[#allocation353_spill] sm:$0xff]  ;;  %v11796_v6 = vld [vmem:[#allocation352_spill] sm:$0xff] }
 0x63e   :  { %v9137_v55 = vadd.f32 %v4723_v11, %v4274_v0  ;;  %v4213_v46 = vmul.f32 %v8411_v1, %v11794_v30  ;;  %v4988_v22 = vmul.f32 %v9118_v40, %v9118_v40  ;;  %v4727_v58 = vmul.f32 %v9025_v52, %v8940_v19  ;;  %v4388_v15 = vld [vmem:[#allocation2 + $0x2d2] sm:$0xff] }
 0x63f   :  { %v5051_v57 = vadd.f32 %v5050_v27, %v5049_v54  ;;  %v4989_v0 = vmul.f32 %v9126_v49, %v9126_v49  ;;  %v4728_v33 = vmul.f32 %v9025_v52, %v4438_v17  ;;  %v3705_v11 = vmul.f32 %v8372_v43, %v11795_v8 }
 0x640   :  { %11793 = vst [vmem:[#allocation147_spill] sm:$0xff] %v9137_v55  ;;  %v4855_v51 = vsel %vm4851_vm3, %v9137_v55, 0.0  ;;  %v4987_v35 = vmul.f32 %v9137_v55, %v9137_v55  ;;  %v3707_v42 = vmul.f32 %v8372_v43, %v11796_v6  ;;  %v4278_v19 = vadd.f32 %v4214_v26, %v3765_v3 }
 0x641   :  { %v4856_v27 = vadd.f32 %v4855_v51, %v4854_v41  ;;  %4637 = vperm.xlu1 %5677, %v4383_v20   ;;  %v4279_v54 = vadd.f32 %v4215_v47, %v3766_v7  ;;  %v4857_v30 = vsel %vm4851_vm3, %v9118_v40, 0.0  ;;  %v4859_v25 = vsel %vm4851_vm3, %v9126_v49, 0.0  ;;  %v4428_v3 = vpop.permute.xlu1 %4427  ;;  %v11798_v51 = vld [vmem:[#allocation29_spill] sm:$0xff] }
 0x642   :  { %v5052_v55 = vsel %vm4851_vm3, %v4987_v35, 0.0  ;;  %4657 = vperm.xlu2 %5678, %v4387_v48   ;;  %v4277_v17 = vadd.f32 %v4213_v46, %v9072_v13  ;;  %v9162_v8 = vadd.f32 %v4727_v58, %v4278_v19  ;;  %v5054_v26 = vsel %vm4851_vm3, %v4988_v22, 0.0  ;;  %v9167_v47 = vpop.permute.xlu2 %4492  ;;  %v11797_v13 = vld [vmem:[#allocation58_spill] sm:$0xff] }
 0x643   :  { %v4858_v29 = vadd.f32 %v4857_v30, %v4856_v27  ;;  %v5053_v6 = vadd.f32 %v5052_v55, %v5051_v57  ;;  %v5056_v41 = vsel %vm4851_vm3, %v4989_v0, 0.0  ;;  %v4726_v7 = vmul.f32 %v9025_v52, %v4428_v3  ;;  %v11799_v27 = vld [vmem:[#allocation43_spill] sm:$0xff] }
 0x644   :  { %v9169_v20 = vadd.f32 %v4728_v33, %v4279_v54  ;;  %4662 = vperm.xlu0 %5676, %v4388_v15   ;;  %v9172_v48 = vadd.f32 %v3715_v14, %v8925_v56  ;;  %v4217_v46 = vmul.f32 %v8411_v1, %v11797_v13  ;;  %v3769_v57 = vadd.f32 %v3705_v11, %v8839_v37  ;;  %v4386_v33 = vld [vmem:[#allocation2 + $0x2ba] sm:$0xff]  ;;  %v4453_v19 = vpop.permute.xlu0 %4452  ;;  %v4390_v37 = vld [vmem:[#allocation2 + $0x2ea] sm:$0xff] }
 0x645   :  { %v5055_v58 = vadd.f32 %v5054_v26, %v5053_v6  ;;  %v4860_v55 = vadd.f32 %v4859_v25, %v4858_v29  ;;  %v3771_v22 = vadd.f32 %v3707_v42, %v8783_v12  ;;  %v4218_v35 = vmul.f32 %v8411_v1, %v11798_v51  ;;  %v11800_v54 = vld [vmem:[#allocation354_spill] sm:$0xff]  ;;  %v4391_v26 = vld [vmem:[#allocation2 + $0x2f2] sm:$0xff] }
 0x646   :  { %v9180_v0 = vadd.f32 %v4726_v7, %v4277_v17  ;;  %v4216_v56 = vmul.f32 %v8411_v1, %v11799_v27  ;;  %v4991_v14 = vmul.f32 %v9162_v8, %v9162_v8  ;;  %v4730_v25 = vmul.f32 %v9025_v52, %v9009_v59  ;;  %v11801_v17 = vld [vmem:[#allocation356_spill] sm:$0xff] }
 0x647   :  { %v5057_v29 = vadd.f32 %v5056_v41, %v5055_v58  ;;  %v4992_v42 = vmul.f32 %v9169_v20, %v9169_v20  ;;  %v4731_v15 = vmul.f32 %v9025_v52, %v4453_v19  ;;  %v3718_v30 = vmul.f32 %v8372_v43, %v11800_v54 }
 0x648   :  { %v4861_v12 = vsel %vm4851_vm3, %v9180_v0, 0.0  ;;  %v4990_v11 = vmul.f32 %v9180_v0, %v9180_v0  ;;  %v3708_v6 = vmul.f32 %v8372_v43, %v11801_v17  ;;  %v4281_v59 = vadd.f32 %v4217_v46, %v3768_v32 }
 0x649   :  { %v4862_v3 = vadd.f32 %v4861_v12, %v4860_v55  ;;  %4652 = vperm.xlu1 %5677, %v4386_v33   ;;  %v4282_v41 = vadd.f32 %v4218_v35, %v3769_v57  ;;  %v4863_v7 = vsel %vm4851_vm3, %v9162_v8, 0.0  ;;  %v4865_v58 = vsel %vm4851_vm3, %v9169_v20, 0.0  ;;  %v4443_v32 = vpop.permute.xlu1 %4442 }
 0x64a   :  { %v5058_v13 = vsel %vm4851_vm3, %v4990_v11, 0.0  ;;  %4672 = vperm.xlu2 %5678, %v4390_v37   ;;  %v4280_v51 = vadd.f32 %v4216_v56, %v9075_v9  ;;  %v9205_v19 = vadd.f32 %v4730_v25, %v4281_v59  ;;  %v5060_v46 = vsel %vm4851_vm3, %v4991_v14, 0.0  ;;  %v9210_v35 = vpop.permute.xlu2 %4507  ;;  %v11802_v9 = vld [vmem:[#allocation9_spill] sm:$0xff]  ;;  %v11803_v14 = vld [vmem:[#allocation355_spill] sm:$0xff] }
 0x64b   :  { %v4864_v27 = vadd.f32 %v4863_v7, %v4862_v3  ;;  %v5059_v54 = vadd.f32 %v5058_v13, %v5057_v29  ;;  %v5062_v55 = vsel %vm4851_vm3, %v4992_v42, 0.0  ;;  %v4729_v57 = vmul.f32 %v9025_v52, %v4443_v32  ;;  %v11804_v42 = vld [vmem:[#allocation30_spill] sm:$0xff]  ;;  %v11807_v32 = vld [vmem:[#allocation359_spill] sm:$0xff] }
 0x64c   :  { %v9212_v33 = vadd.f32 %v4731_v15, %v4282_v41  ;;  %4677 = vperm.xlu0 %5676, %v4391_v26   ;;  %v9215_v37 = vadd.f32 %v3718_v30, %v8943_v53  ;;  %v4220_v56 = vmul.f32 %v8411_v1, %v11802_v9  ;;  %v3772_v12 = vadd.f32 %v3708_v6, %v8854_v18  ;;  %v4389_v15 = vld [vmem:[#allocation2 + $0x2da] sm:$0xff]  ;;  %v4468_v3 = vpop.permute.xlu0 %4467  ;;  %v11805_v26 = vld [vmem:[#allocation55_spill] sm:$0xff] }
 0x64d   :  { %v5061_v25 = vadd.f32 %v5060_v46, %v5059_v54  ;;  %v4866_v29 = vadd.f32 %v4865_v58, %v4864_v27  ;;  %v3710_v11 = vmul.f32 %v8372_v43, %v11803_v14  ;;  %v4221_v17 = vmul.f32 %v8411_v1, %v11804_v42  ;;  %v4393_v6 = vld [vmem:[#allocation2 + $0x30a] sm:$0xff]  ;;  %v11806_v27 = vld [vmem:[#allocation357_spill] sm:$0xff] }
 0x64e   :  { %v9224_v59 = vadd.f32 %v4729_v57, %v4280_v51  ;;  %v4219_v53 = vmul.f32 %v8411_v1, %v11805_v26  ;;  %v4994_v30 = vmul.f32 %v9205_v19, %v9205_v19  ;;  %v4733_v41 = vmul.f32 %v9025_v52, %v9067_v61  ;;  %v4394_v57 = vld [vmem:[#allocation2 + $0x31a] sm:$0xff] }
 0x64f   :  { %v5063_v18 = vadd.f32 %v5062_v55, %v5061_v25  ;;  %v4995_v58 = vmul.f32 %v9212_v33, %v9212_v33  ;;  %v4734_v51 = vmul.f32 %v9025_v52, %v4468_v3  ;;  %v3721_v54 = vmul.f32 %v8372_v43, %v11806_v27 }
 0x650   :  { %v4867_v7 = vsel %vm4851_vm3, %v9224_v59, 0.0  ;;  %v4993_v13 = vmul.f32 %v9224_v59, %v9224_v59  ;;  %v3711_v46 = vmul.f32 %v8372_v43, %v11807_v32  ;;  %v4284_v61 = vadd.f32 %v4220_v56, %v3771_v22 }
 0x651   :  { %v4868_v55 = vadd.f32 %v4867_v7, %v4866_v29  ;;  %4667 = vperm.xlu1 %5677, %v4389_v15   ;;  %v4285_v9 = vadd.f32 %v4221_v17, %v3772_v12  ;;  %v4869_v25 = vsel %vm4851_vm3, %v9205_v19, 0.0  ;;  %v4871_v42 = vsel %vm4851_vm3, %v9212_v33, 0.0  ;;  %v4458_v22 = vpop.permute.xlu1 %4457  ;;  %v11808_v7 = vld [vmem:[#allocation74_spill] sm:$0xff] }
 0x652   :  { %v5064_v14 = vsel %vm4851_vm3, %v4993_v13, 0.0  ;;  %4687 = vperm.xlu2 %5678, %v4393_v6   ;;  %v4283_v3 = vadd.f32 %v4219_v53, %v9097_v2  ;;  %v9249_v26 = vadd.f32 %v4733_v41, %v4284_v61  ;;  %v5066_v56 = vsel %vm4851_vm3, %v4994_v30, 0.0  ;;  %v9254_v17 = vpop.permute.xlu2 %4522  ;;  %v11809_v13 = vld [vmem:[#allocation42_spill] sm:$0xff] }
 0x653   :  { %v4870_v27 = vadd.f32 %v4869_v25, %v4868_v55  ;;  %v5065_v32 = vadd.f32 %v5064_v14, %v5063_v18  ;;  %v5068_v29 = vsel %vm4851_vm3, %v4995_v58, 0.0  ;;  %v4732_v12 = vmul.f32 %v9025_v52, %v4458_v22 }
 0x654   :  { %v9256_v15 = vadd.f32 %v4734_v51, %v4285_v9  ;;  %4692 = vperm.xlu0 %5676, %v4394_v57   ;;  %v3774_v6 = vadd.f32 %v3710_v11, %v8807_v23  ;;  %v4223_v2 = vmul.f32 %v8411_v1, %v11808_v7  ;;  %v9262_v18 = vadd.f32 %v3721_v54, %v8968_v4  ;;  %v4392_v51 = vld [vmem:[#allocation2 + $0x302] sm:$0xff]  ;;  %v4483_v55 = vpop.permute.xlu0 %4482  ;;  %v11810_v57 = vld [vmem:[#allocation61_spill] sm:$0xff] }
 0x655   :  { %v5067_v53 = vadd.f32 %v5066_v56, %v5065_v32  ;;  %v4872_v41 = vadd.f32 %v4871_v42, %v4870_v27  ;;  %v3775_v30 = vadd.f32 %v3711_v46, %v8875_v10  ;;  %v4224_v58 = vmul.f32 %v8411_v1, %v11809_v13  ;;  %v4396_v54 = vld [vmem:[#allocation2 + $0x332] sm:$0xff]  ;;  %v11811_v42 = vld [vmem:[#allocation358_spill] sm:$0xff] }
 0x656   :  { %v9267_v61 = vadd.f32 %v4732_v12, %v4283_v3  ;;  %v4222_v23 = vmul.f32 %v8411_v1, %v11810_v57  ;;  %v4997_v11 = vmul.f32 %v9249_v26, %v9249_v26  ;;  %v4736_v9 = vmul.f32 %v9025_v52, %v9124_v60  ;;  %v11812_v27 = vld [vmem:[#allocation362_spill] sm:$0xff] }
 0x657   :  { %v5069_v4 = vadd.f32 %v5068_v29, %v5067_v53  ;;  %v4998_v25 = vmul.f32 %v9256_v15, %v9256_v15  ;;  %v4737_v14 = vmul.f32 %v9025_v52, %v4483_v55  ;;  %v3713_v3 = vmul.f32 %v8372_v43, %v11811_v42  ;;  %v4397_v56 = vld [vmem:[#allocation2 + $0x33a] sm:$0xff] }
 0x658   :  { %v4873_v10 = vsel %vm4851_vm3, %v9267_v61, 0.0  ;;  %v4996_v46 = vmul.f32 %v9267_v61, %v9267_v61  ;;  %v3714_v32 = vmul.f32 %v8372_v43, %v11812_v27  ;;  %v4287_v60 = vadd.f32 %v4223_v2, %v3774_v6 }
 0x659   :  { %v4874_v22 = vadd.f32 %v4873_v10, %v4872_v41  ;;  %4682 = vperm.xlu1 %5677, %v4392_v51   ;;  %v4288_v29 = vadd.f32 %v4224_v58, %v3775_v30  ;;  %v4875_v12 = vsel %vm4851_vm3, %v9249_v26, 0.0  ;;  %v4877_v53 = vsel %vm4851_vm3, %v9256_v15, 0.0  ;;  %v4473_v6 = vpop.permute.xlu1 %4472  ;;  %v11813_v10 = vld [vmem:[#allocation406_spill] sm:$0xff] }
 0x65a   :  { %v5070_v7 = vsel %vm4851_vm3, %v4996_v46, 0.0  ;;  %4702 = vperm.xlu2 %5678, %v4396_v54   ;;  %v4286_v13 = vadd.f32 %v4222_v23, %v9104_v63  ;;  %v9292_v55 = vadd.f32 %v4736_v9, %v4287_v60  ;;  %v5072_v2 = vsel %vm4851_vm3, %v4997_v11, 0.0  ;;  %v9302_v9 = vpop.permute.xlu2 %4537  ;;  %v4395_v60 = vld [vmem:[#allocation2 + $0x322] sm:$0xff] }
 0x65b   :  { %v4876_v57 = vadd.f32 %v4875_v12, %v4874_v22  ;;  %v5071_v42 = vadd.f32 %v5070_v7, %v5069_v4  ;;  %v5074_v41 = vsel %vm4851_vm3, %v4998_v25, 0.0  ;;  %v4735_v30 = vmul.f32 %v9025_v52, %v4473_v6  ;;  %v11814_v4 = vld [vmem:[#allocation360_spill] sm:$0xff]  ;;  %v11815_v25 = vld [vmem:[#allocation54_spill] sm:$0xff]  ;;  %v11818_v6 = vld [vmem:[#allocation365_spill] sm:$0xff] }
 0x65c   :  { %v9297_v58 = vadd.f32 %v4737_v14, %v4288_v29  ;;  %4707 = vperm.xlu0 %5676, %v4397_v56   ;;  %v3777_v51 = vadd.f32 %v3713_v3, %v8831_v34  ;;  %v4226_v54 = vmul.f32 %v8411_v1, %v11813_v10  ;;  %v3724_v46 = vmul.f32 %v8372_v43, %v11814_v4  ;;  %v4498_v22 = vpop.permute.xlu0 %4497  ;;  %v11816_v34 = vld [vmem:[#allocation404_spill] sm:$0xff] }
 0x65d   :  { %v5073_v63 = vadd.f32 %v5072_v2, %v5071_v42  ;;  %v4878_v23 = vadd.f32 %v4877_v53, %v4876_v57  ;;  %v3778_v11 = vadd.f32 %v3714_v32, %v8902_v21  ;;  %v4227_v27 = vmul.f32 %v8411_v1, %v11815_v25  ;;  %v4399_v7 = vld [vmem:[#allocation2 + $0x352] sm:$0xff] }
 0x65e   :  { %v9309_v14 = vadd.f32 %v4735_v30, %v4286_v13  ;;  %v4225_v3 = vmul.f32 %v8411_v1, %v11816_v34  ;;  %v5000_v56 = vmul.f32 %v9292_v55, %v9292_v55  ;;  %v4739_v29 = vmul.f32 %v9025_v52, %v9167_v47  ;;  %v11817_v57 = vld [vmem:[#allocation361_spill] sm:$0xff] }
 0x65f   :  { %v5075_v12 = vadd.f32 %v5074_v41, %v5073_v63  ;;  %v5001_v53 = vmul.f32 %v9297_v58, %v9297_v58  ;;  %v4740_v13 = vmul.f32 %v9025_v52, %v4498_v22  ;;  %v3716_v42 = vmul.f32 %v8372_v43, %v11817_v57 }
 0x660   :  { %v4879_v21 = vsel %vm4851_vm3, %v9309_v14, 0.0  ;;  %v4999_v32 = vmul.f32 %v9309_v14, %v9309_v14  ;;  %v3717_v2 = vmul.f32 %v8372_v43, %v11818_v6  ;;  %v4290_v47 = vadd.f32 %v4226_v54, %v3777_v51 }
 0x661   :  { %v4880_v41 = vadd.f32 %v4879_v21, %v4878_v23  ;;  %4697 = vperm.xlu1 %5677, %v4395_v60   ;;  %v4291_v30 = vadd.f32 %v4227_v27, %v3778_v11  ;;  %v4881_v10 = vsel %vm4851_vm3, %v9292_v55, 0.0  ;;  %v4883_v4 = vsel %vm4851_vm3, %v9297_v58, 0.0  ;;  %v4488_v6 = vpop.permute.xlu1 %4487  ;;  %v11819_v60 = vld [vmem:[#allocation410_spill] sm:$0xff]  ;;  %v11820_v21 = vld [vmem:[#allocation60_spill] sm:$0xff] }
 0x662   :  { %v5076_v63 = vsel %vm4851_vm3, %v4999_v32, 0.0  ;;  %4717 = vperm.xlu2 %5678, %v4399_v7   ;;  %v4289_v25 = vadd.f32 %v4225_v3, %v9115_v62  ;;  %v9334_v22 = vadd.f32 %v4739_v29, %v4290_v47  ;;  %v5078_v51 = vsel %vm4851_vm3, %v5000_v56, 0.0  ;;  %v11821_v47 = vld [vmem:[#allocation75_spill] sm:$0xff] }
 0x663   :  { %v4882_v34 = vadd.f32 %v4881_v10, %v4880_v41  ;;  %v5077_v57 = vadd.f32 %v5076_v63, %v5075_v12  ;;  %v5080_v54 = vsel %vm4851_vm3, %v5001_v53, 0.0  ;;  %v4738_v23 = vmul.f32 %v9025_v52, %v4488_v6  ;;  %v4398_v53 = vld [vmem:[#allocation2 + $0x34a] sm:$0xff] }
 0x664   :  { %v9339_v11 = vadd.f32 %v4740_v13, %v4291_v30  ;;  %v9342_v27 = vadd.f32 %v3724_v46, %v8987_v38  ;;  %v4229_v7 = vmul.f32 %v8411_v1, %v11819_v60  ;;  %v3780_v29 = vadd.f32 %v3716_v42, %v8851_v36  ;;  %v4513_v13 = vpop.permute.xlu0 %4512  ;;  %v9358_v36 = vpop.permute.xlu2 %4552  ;;  %v11822_v63 = vld [vmem:[#allocation364_spill] sm:$0xff] }
 0x665   :  { %v5079_v62 = vadd.f32 %v5078_v51, %v5077_v57  ;;  %v4884_v3 = vadd.f32 %v4883_v4, %v4882_v34  ;;  %v3781_v12 = vadd.f32 %v3717_v2, %v8921_v28  ;;  %v4230_v56 = vmul.f32 %v8411_v1, %v11820_v21 }
 0x666   :  { %v9350_v32 = vadd.f32 %v4738_v23, %v4289_v25  ;;  %v4228_v38 = vmul.f32 %v8411_v1, %v11821_v47  ;;  %v5003_v46 = vmul.f32 %v9334_v22, %v9334_v22  ;;  %v4742_v41 = vmul.f32 %v9025_v52, %v9210_v35  ;;  %v11823_v25 = vld [vmem:[#allocation368_spill] sm:$0xff] }
 0x667   :  { %v5081_v30 = vadd.f32 %v5080_v54, %v5079_v62  ;;  %v5004_v2 = vmul.f32 %v9339_v11, %v9339_v11  ;;  %v4743_v10 = vmul.f32 %v9025_v52, %v4513_v13  ;;  %v3719_v4 = vmul.f32 %v8372_v43, %v11822_v63  ;;  %v11826_v63 = vld [vmem:[#allocation63_spill] sm:$0xff] }
 0x668   :  { %v4885_v28 = vsel %vm4851_vm3, %v9350_v32, 0.0  ;;  %v5002_v42 = vmul.f32 %v9350_v32, %v9350_v32  ;;  %v3720_v35 = vmul.f32 %v8372_v43, %v11823_v25  ;;  %v4293_v34 = vadd.f32 %v4229_v7, %v3780_v29 }
 0x669   :  { %v4886_v57 = vadd.f32 %v4885_v28, %v4884_v3  ;;  %4712 = vperm.xlu1 %5677, %v4398_v53   ;;  %v4294_v6 = vadd.f32 %v4230_v56, %v3781_v12  ;;  %v4887_v51 = vsel %vm4851_vm3, %v9334_v22, 0.0  ;;  %v4889_v23 = vsel %vm4851_vm3, %v9339_v11, 0.0  ;;  %v4503_v47 = vpop.permute.xlu1 %4502  ;;  %v11824_v56 = vld [vmem:[#allocation363_spill] sm:$0xff]  ;;  %v11825_v28 = vld [vmem:[#allocation86_spill] sm:$0xff] }
 0x66a   :  { %v5082_v54 = vsel %vm4851_vm3, %v5002_v42, 0.0  ;;  %v4292_v60 = vadd.f32 %v4228_v38, %v9172_v48  ;;  %v9377_v62 = vadd.f32 %v4742_v41, %v4293_v34  ;;  %v5084_v7 = vsel %vm4851_vm3, %v5003_v46, 0.0 }
 0x66b   :  { %v4888_v21 = vadd.f32 %v4887_v51, %v4886_v57  ;;  %v5083_v13 = vadd.f32 %v5082_v54, %v5081_v30  ;;  %v5086_v3 = vsel %vm4851_vm3, %v5004_v2, 0.0  ;;  %v4741_v29 = vmul.f32 %v9025_v52, %v4503_v47  ;;  %v11828_v54 = vld [vmem:[#allocation367_spill] sm:$0xff] }
 0x66c   :  { %v9382_v12 = vadd.f32 %v4743_v10, %v4294_v6  ;;  %v3727_v53 = vmul.f32 %v8372_v43, %v11824_v56  ;;  %v4232_v42 = vmul.f32 %v8411_v1, %v11825_v28  ;;  %v3783_v41 = vadd.f32 %v3719_v4, %v8861_v5  ;;  %v4528_v25 = vpop.permute.xlu0 %4527  ;;  %v11827_v10 = vld [vmem:[#allocation8_spill] sm:$0xff]  ;;  %v9411_v47 = vpop.permute.xlu2 %4567 }
 0x66d   :  { %v5085_v48 = vadd.f32 %v5084_v7, %v5083_v13  ;;  %v4890_v38 = vadd.f32 %v4889_v23, %v4888_v21  ;;  %v3784_v30 = vadd.f32 %v3720_v35, %v8931_v39  ;;  %v4233_v46 = vmul.f32 %v8411_v1, %v11826_v63 }
 0x66e   :  { %v9392_v2 = vadd.f32 %v4741_v29, %v4292_v60  ;;  %v4231_v34 = vmul.f32 %v8411_v1, %v11827_v10  ;;  %v5006_v57 = vmul.f32 %v9377_v62, %v9377_v62  ;;  %v4745_v6 = vmul.f32 %v9025_v52, %v9254_v17  ;;  %v11829_v60 = vld [vmem:[#allocation371_spill] sm:$0xff] }
 0x66f   :  { %v5087_v51 = vadd.f32 %v5086_v3, %v5085_v48  ;;  %v5007_v4 = vmul.f32 %v9382_v12, %v9382_v12  ;;  %v4746_v35 = vmul.f32 %v9025_v52, %v4528_v25  ;;  %v3722_v23 = vmul.f32 %v8372_v43, %v11828_v54  ;;  %v11831_v54 = vld [vmem:[#allocation73_spill] sm:$0xff] }
 0x670   :  { %v4891_v5 = vsel %vm4851_vm3, %v9392_v2, 0.0  ;;  %v5005_v39 = vmul.f32 %v9392_v2, %v9392_v2  ;;  %v3723_v21 = vmul.f32 %v8372_v43, %v11829_v60  ;;  %v4296_v13 = vadd.f32 %v4232_v42, %v3783_v41 }
 0x671   :  { %v4892_v17 = vadd.f32 %v4891_v5, %v4890_v38  ;;  %v4297_v7 = vadd.f32 %v4233_v46, %v3784_v30  ;;  %v4893_v3 = vsel %vm4851_vm3, %v9377_v62, 0.0  ;;  %v4895_v56 = vsel %vm4851_vm3, %v9382_v12, 0.0  ;;  %v4518_v10 = vpop.permute.xlu1 %4517  ;;  %v11830_v5 = vld [vmem:[#allocation22_spill] sm:$0xff] }
 0x672   :  { %v5088_v29 = vsel %vm4851_vm3, %v5005_v39, 0.0  ;;  %v4295_v28 = vadd.f32 %v4231_v34, %v9215_v37  ;;  %v9419_v48 = vadd.f32 %v4745_v6, %v4296_v13  ;;  %v5090_v42 = vsel %vm4851_vm3, %v5006_v57, 0.0 }
 0x673   :  { %v5089_v63 = vadd.f32 %v5088_v29, %v5087_v51  ;;  %v4894_v25 = vadd.f32 %v4893_v3, %v4892_v17  ;;  %v5092_v38 = vsel %vm4851_vm3, %v5007_v4, 0.0  ;;  %v4744_v41 = vmul.f32 %v9025_v52, %v4518_v10  ;;  %v11834_v29 = vld [vmem:[#allocation374_spill] sm:$0xff] }
 0x674   :  { %v9424_v30 = vadd.f32 %v4746_v35, %v4297_v7  ;;  %v9427_v46 = vadd.f32 %v3727_v53, %v9004_v24  ;;  %v4235_v39 = vmul.f32 %v8411_v1, %v11830_v5  ;;  %v3786_v6 = vadd.f32 %v3722_v23, %v8899_v50  ;;  %v4543_v60 = vpop.permute.xlu0 %4542  ;;  %v11832_v35 = vld [vmem:[#allocation81_spill] sm:$0xff]  ;;  %v11833_v7 = vld [vmem:[#allocation370_spill] sm:$0xff] }
 0x675   :  { %v4896_v37 = vadd.f32 %v4895_v56, %v4894_v25  ;;  %v5091_v34 = vadd.f32 %v5090_v42, %v5089_v63  ;;  %v3787_v51 = vadd.f32 %v3723_v21, %v8971_v45  ;;  %v4236_v57 = vmul.f32 %v8411_v1, %v11831_v54 }
 0x676   :  { %v9435_v4 = vadd.f32 %v4744_v41, %v4295_v28  ;;  %v4234_v13 = vmul.f32 %v8411_v1, %v11832_v35  ;;  %v5009_v24 = vmul.f32 %v9419_v48, %v9419_v48  ;;  %v4748_v53 = vmul.f32 %v9025_v52, %v9302_v9 }
 0x677   :  { %v5093_v17 = vadd.f32 %v5092_v38, %v5091_v34  ;;  %v5010_v23 = vmul.f32 %v9424_v30, %v9424_v30  ;;  %v4749_v21 = vmul.f32 %v9025_v52, %v4543_v60  ;;  %v3725_v3 = vmul.f32 %v8372_v43, %v11833_v7  ;;  %v9462_v34 = vpop.permute.xlu2 %4582 }
 0x678   :  { %v4897_v50 = vsel %vm4851_vm3, %v9435_v4, 0.0  ;;  %v5008_v45 = vmul.f32 %v9435_v4, %v9435_v4  ;;  %v3726_v56 = vmul.f32 %v8372_v43, %v11834_v29  ;;  %v4299_v28 = vadd.f32 %v4235_v39, %v3786_v6  ;;  %v11839_v29 = vld [vmem:[#allocation6_spill] sm:$0xff] }
 0x679   :  { %v4898_v9 = vadd.f32 %v4897_v50, %v4896_v37  ;;  %v4300_v63 = vadd.f32 %v4236_v57, %v3787_v51  ;;  %v4899_v25 = vsel %vm4851_vm3, %v9419_v48, 0.0  ;;  %v4901_v42 = vsel %vm4851_vm3, %v9424_v30, 0.0  ;;  %v4533_v60 = vpop.permute.xlu1 %4532  ;;  %v11836_v57 = vld [vmem:[#allocation366_spill] sm:$0xff]  ;;  %v11837_v50 = vld [vmem:[#allocation104_spill] sm:$0xff] }
 0x67a   :  { %v5094_v10 = vsel %vm4851_vm3, %v5008_v45, 0.0  ;;  %v4298_v38 = vadd.f32 %v4234_v13, %v9262_v18  ;;  %v9460_v41 = vadd.f32 %v4748_v53, %v4299_v28  ;;  %v5096_v39 = vsel %vm4851_vm3, %v5009_v24, 0.0 }
 0x67b   :  { %v5095_v5 = vadd.f32 %v5094_v10, %v5093_v17  ;;  %v4900_v54 = vadd.f32 %v4899_v25, %v4898_v9  ;;  %v5098_v37 = vsel %vm4851_vm3, %v5010_v23, 0.0  ;;  %v4747_v6 = vmul.f32 %v9025_v52, %v4533_v60  ;;  %v11838_v17 = vld [vmem:[#allocation140_spill] sm:$0xff] }
 0x67c   :  { %v9467_v51 = vadd.f32 %v4749_v21, %v4300_v63  ;;  %v3730_v35 = vmul.f32 %v8372_v43, %v11836_v57  ;;  %v4238_v18 = vmul.f32 %v8411_v1, %v11837_v50  ;;  %v3789_v45 = vadd.f32 %v3725_v3, %v11838_v17  ;;  %v11840_v21 = vld [vmem:[#allocation87_spill] sm:$0xff] }
 0x67d   :  { %v4902_v13 = vadd.f32 %v4901_v42, %v4900_v54  ;;  %v5097_v53 = vadd.f32 %v5096_v39, %v5095_v5  ;;  %v3790_v7 = vadd.f32 %v3726_v56, %v8990_v16  ;;  %v4239_v24 = vmul.f32 %v8411_v1, %v11839_v29  ;;  %v4558_v28 = vpop.permute.xlu0 %4557  ;;  %v11842_v54 = vld [vmem:[#allocation377_spill] sm:$0xff] }
 0x67e   :  { %11835 = vst [vmem:[#allocation149_spill] sm:$0xff] %v9467_v51  ;;  %v9477_v23 = vadd.f32 %v4747_v6, %v4298_v38  ;;  %v4237_v9 = vmul.f32 %v8411_v1, %v11840_v21  ;;  %v5012_v63 = vmul.f32 %v9460_v41, %v9460_v41  ;;  %v4751_v25 = vmul.f32 %v9025_v52, %v9358_v36  ;;  %v11841_v38 = vld [vmem:[#allocation373_spill] sm:$0xff] }
 0x67f   :  { %v5099_v10 = vadd.f32 %v5098_v37, %v5097_v53  ;;  %v5013_v56 = vmul.f32 %v9467_v51, %v9467_v51  ;;  %v4752_v42 = vmul.f32 %v9025_v52, %v4558_v28  ;;  %v3728_v5 = vmul.f32 %v8372_v43, %v11841_v38 }
 0x680   :  { %v4903_v3 = vsel %vm4851_vm3, %v9477_v23, 0.0  ;;  %v5011_v16 = vmul.f32 %v9477_v23, %v9477_v23  ;;  %v3729_v60 = vmul.f32 %v8372_v43, %v11842_v54  ;;  %v4302_v39 = vadd.f32 %v4238_v18, %v3789_v45  ;;  %v9512_v54 = vpop.permute.xlu2 %4597 }
 0x681   :  { %v4904_v36 = vadd.f32 %v4903_v3, %v4902_v13  ;;  %v4303_v37 = vadd.f32 %v4239_v24, %v3790_v7  ;;  %v4905_v6 = vsel %vm4851_vm3, %v9460_v41, 0.0  ;;  %v4907_v50 = vsel %vm4851_vm3, %v9467_v51, 0.0  ;;  %v4548_v21 = vpop.permute.xlu1 %4547  ;;  %v11845_v7 = vld [vmem:[#allocation40_spill] sm:$0xff]  ;;  %v11846_v3 = vld [vmem:[#allocation110_spill] sm:$0xff] }
 0x682   :  { %v5100_v57 = vsel %vm4851_vm3, %v5011_v16, 0.0  ;;  %v4301_v53 = vadd.f32 %v4237_v9, %v9342_v27  ;;  %v9502_v17 = vadd.f32 %v4751_v25, %v4302_v39  ;;  %v5102_v38 = vsel %vm4851_vm3, %v5012_v63, 0.0  ;;  %v11847_v25 = vld [vmem:[#allocation139_spill] sm:$0xff]  ;;  %v11848_v39 = vld [vmem:[#allocation46_spill] sm:$0xff] }
 0x683   :  { %v5101_v29 = vadd.f32 %v5100_v57, %v5099_v10  ;;  %v4906_v28 = vadd.f32 %v4905_v6, %v4904_v36  ;;  %v5104_v18 = vsel %vm4851_vm3, %v5013_v56, 0.0  ;;  %v4750_v13 = vmul.f32 %v9025_v52, %v4548_v21  ;;  %v11849_v63 = vld [vmem:[#allocation79_spill] sm:$0xff]  ;;  %v11852_v21 = vld [vmem:[#allocation376_spill] sm:$0xff] }
 0x684   :  { %11843 = vst [vmem:[#allocation148_spill] sm:$0xff] %v9502_v17  ;;  %v9507_v45 = vadd.f32 %v4752_v42, %v4303_v37  ;;  %v3794_v24 = vadd.f32 %v3730_v35, %v11845_v7  ;;  %v4241_v16 = vmul.f32 %v8411_v1, %v11846_v3  ;;  %v3792_v10 = vadd.f32 %v3728_v5, %v11847_v25  ;;  %v11851_v37 = vld [vmem:[#allocation95_spill] sm:$0xff] }
 0x685   :  { %v4908_v27 = vadd.f32 %v4907_v50, %v4906_v28  ;;  %v5103_v9 = vadd.f32 %v5102_v38, %v5101_v29  ;;  %v3793_v36 = vadd.f32 %v3729_v60, %v11848_v39  ;;  %v4242_v56 = vmul.f32 %v8411_v1, %v11849_v63  ;;  %v4573_v42 = vpop.permute.xlu0 %4572 }
 0x686   :  { %11844 = vst [vmem:[#allocation150_spill] sm:$0xff] %v9507_v45  ;;  %v9518_v6 = vadd.f32 %v4750_v13, %v4301_v53  ;;  %v4240_v35 = vmul.f32 %v8411_v1, %v11851_v37  ;;  %v5015_v57 = vmul.f32 %v9502_v17, %v9502_v17  ;;  %v4754_v50 = vmul.f32 %v9025_v52, %v9411_v47  ;;  %v11853_v13 = vld [vmem:[#allocation380_spill] sm:$0xff] }
 0x687   :  { %v5105_v29 = vadd.f32 %v5104_v18, %v5103_v9  ;;  %v5016_v53 = vmul.f32 %v9507_v45, %v9507_v45  ;;  %v4755_v28 = vmul.f32 %v9025_v52, %v4573_v42  ;;  %v3731_v38 = vmul.f32 %v8372_v43, %v11852_v21 }
 0x688   :  { %11850 = vst [vmem:[#allocation152_spill] sm:$0xff] %v9518_v6  ;;  %v4909_v5 = vsel %vm4851_vm3, %v9518_v6, 0.0  ;;  %v5014_v60 = vmul.f32 %v9518_v6, %v9518_v6  ;;  %v3732_v7 = vmul.f32 %v8372_v43, %v11853_v13  ;;  %v4305_v3 = vadd.f32 %v4241_v16, %v3792_v10 }
 0x689   :  { %v4910_v47 = vadd.f32 %v4909_v5, %v4908_v27  ;;  %v4306_v18 = vadd.f32 %v4242_v56, %v3793_v36  ;;  %v4911_v9 = vsel %vm4851_vm3, %v9502_v17, 0.0  ;;  %v4913_v39 = vsel %vm4851_vm3, %v9507_v45, 0.0  ;;  %v4563_v6 = vpop.permute.xlu1 %4562  ;;  %v11854_v36 = vld [vmem:[#allocation369_spill] sm:$0xff]  ;;  %v11855_v5 = vld [vmem:[#allocation112_spill] sm:$0xff] }
 0x68a   :  { %v5106_v25 = vsel %vm4851_vm3, %v5014_v60, 0.0  ;;  %v4304_v63 = vadd.f32 %v4240_v35, %v9427_v46  ;;  %v9543_v42 = vadd.f32 %v4754_v50, %v4305_v3  ;;  %v5108_v13 = vsel %vm4851_vm3, %v5015_v57, 0.0  ;;  %v11856_v50 = vld [vmem:[#allocation37_spill] sm:$0xff]  ;;  %v11857_v3 = vld [vmem:[#allocation48_spill] sm:$0xff] }
 0x68b   :  { %v5107_v37 = vadd.f32 %v5106_v25, %v5105_v29  ;;  %v4912_v21 = vadd.f32 %v4911_v9, %v4910_v47  ;;  %v5110_v16 = vsel %vm4851_vm3, %v5016_v53, 0.0  ;;  %v4753_v27 = vmul.f32 %v9025_v52, %v4563_v6  ;;  %v11858_v9 = vld [vmem:[#allocation85_spill] sm:$0xff] }
 0x68c   :  { %v9548_v10 = vadd.f32 %v4755_v28, %v4306_v18  ;;  %v3733_v56 = vmul.f32 %v8372_v43, %v11854_v36  ;;  %v4244_v60 = vmul.f32 %v8411_v1, %v11855_v5  ;;  %v3795_v29 = vadd.f32 %v3731_v38, %v11856_v50  ;;  %v11860_v28 = vld [vmem:[#allocation107_spill] sm:$0xff] }
 0x68d   :  { %v4914_v46 = vadd.f32 %v4913_v39, %v4912_v21  ;;  %v5109_v35 = vadd.f32 %v5108_v13, %v5107_v37  ;;  %v3796_v47 = vadd.f32 %v3732_v7, %v11857_v3  ;;  %v4245_v57 = vmul.f32 %v8411_v1, %v11858_v9  ;;  %v4588_v6 = vpop.permute.xlu0 %4587  ;;  %v9566_v37 = vpop.permute.xlu2 %4612  ;;  %v11862_v5 = vld [vmem:[#allocation383_spill] sm:$0xff] }
 0x68e   :  { %v9558_v53 = vadd.f32 %v4753_v27, %v4304_v63  ;;  %v4243_v18 = vmul.f32 %v8411_v1, %v11860_v28  ;;  %v5018_v25 = vmul.f32 %v9543_v42, %v9543_v42  ;;  %v4757_v39 = vmul.f32 %v9025_v52, %v9462_v34  ;;  %v11861_v27 = vld [vmem:[#allocation379_spill] sm:$0xff] }
 0x68f   :  { %v5111_v38 = vadd.f32 %v5110_v16, %v5109_v35  ;;  %v5019_v21 = vmul.f32 %v9548_v10, %v9548_v10  ;;  %v4758_v13 = vmul.f32 %v9025_v52, %v4588_v6  ;;  %v3734_v36 = vmul.f32 %v8372_v43, %v11861_v27 }
 0x690   :  { %11859 = vst [vmem:[#allocation153_spill] sm:$0xff] %v9558_v53  ;;  %v4915_v7 = vsel %vm4851_vm3, %v9558_v53, 0.0  ;;  %v5017_v63 = vmul.f32 %v9558_v53, %v9558_v53  ;;  %v3735_v34 = vmul.f32 %v8372_v43, %v11862_v5  ;;  %v4308_v50 = vadd.f32 %v4244_v60, %v3795_v29 }
 0x691   :  { %v4916_v3 = vadd.f32 %v4915_v7, %v4914_v46  ;;  %v4309_v16 = vadd.f32 %v4245_v57, %v3796_v47  ;;  %v4917_v35 = vsel %vm4851_vm3, %v9543_v42, 0.0  ;;  %v4919_v28 = vsel %vm4851_vm3, %v9548_v10, 0.0  ;;  %v4578_v27 = vpop.permute.xlu1 %4577  ;;  %v11865_v47 = vld [vmem:[#allocation143_spill] sm:$0xff] }
 0x692   :  { %v5112_v9 = vsel %vm4851_vm3, %v5017_v63, 0.0  ;;  %v4307_v53 = vadd.f32 %v4243_v18, %v3794_v24  ;;  %v9584_v45 = vadd.f32 %v4757_v39, %v4308_v50  ;;  %v5114_v51 = vsel %vm4851_vm3, %v5018_v25, 0.0  ;;  %v11866_v7 = vld [vmem:[#allocation123_spill] sm:$0xff]  ;;  %v11867_v18 = vld [vmem:[#allocation142_spill] sm:$0xff] }
 0x693   :  { %v5113_v6 = vadd.f32 %v5112_v9, %v5111_v38  ;;  %v4918_v17 = vadd.f32 %v4917_v35, %v4916_v3  ;;  %v5116_v60 = vsel %vm4851_vm3, %v5019_v21, 0.0  ;;  %v4756_v46 = vmul.f32 %v9025_v52, %v4578_v27  ;;  %v11868_v38 = vld [vmem:[#allocation144_spill] sm:$0xff]  ;;  %v11871_v9 = vld [vmem:[#allocation27_spill] sm:$0xff]  ;;  %v11873_v27 = vld [vmem:[#allocation386_spill] sm:$0xff] }
 0x694   :  { %11863 = vst [vmem:[#allocation151_spill] sm:$0xff] %v9584_v45  ;;  %v9589_v29 = vadd.f32 %v4758_v13, %v4309_v16  ;;  %v3797_v57 = vadd.f32 %v3733_v56, %v11865_v47  ;;  %v4247_v63 = vmul.f32 %v8411_v1, %v11866_v7  ;;  %v3798_v39 = vadd.f32 %v3734_v36, %v11867_v18  ;;  %v11869_v3 = vld [vmem:[#allocation12_spill] sm:$0xff] }
 0x695   :  { %v4920_v5 = vadd.f32 %v4919_v28, %v4918_v17  ;;  %v5115_v24 = vadd.f32 %v5114_v51, %v5113_v6  ;;  %v3799_v50 = vadd.f32 %v3735_v34, %v11868_v38  ;;  %v4248_v25 = vmul.f32 %v8411_v1, %v11869_v3  ;;  %v4603_v21 = vpop.permute.xlu0 %4602  ;;  %v11872_v28 = vld [vmem:[#allocation382_spill] sm:$0xff] }
 0x696   :  { %11864 = vst [vmem:[#allocation51_spill] sm:$0xff] %v9589_v29  ;;  %v9598_v35 = vadd.f32 %v4756_v46, %v4307_v53  ;;  %v4246_v13 = vmul.f32 %v8411_v1, %v11871_v9  ;;  %v5021_v56 = vmul.f32 %v9584_v45, %v9584_v45  ;;  %v4760_v17 = vmul.f32 %v9025_v52, %v9512_v54  ;;  %v4628_v54 = vpop.permute.xlu2 %4627 }
 0x697   :  { %v5117_v51 = vadd.f32 %v5116_v60, %v5115_v24  ;;  %v5022_v53 = vmul.f32 %v9589_v29, %v9589_v29  ;;  %v4761_v16 = vmul.f32 %v9025_v52, %v4603_v21  ;;  %v3737_v6 = vmul.f32 %v8372_v43, %v11872_v28 }
 0x698   :  { %11870 = vst [vmem:[#allocation155_spill] sm:$0xff] %v9598_v35  ;;  %v4921_v36 = vsel %vm4851_vm3, %v9598_v35, 0.0  ;;  %v5020_v34 = vmul.f32 %v9598_v35, %v9598_v35  ;;  %v3738_v46 = vmul.f32 %v8372_v43, %v11873_v27  ;;  %v4311_v47 = vadd.f32 %v4247_v63, %v3798_v39 }
 0x699   :  { %v4922_v60 = vadd.f32 %v4921_v36, %v4920_v5  ;;  %v4312_v7 = vadd.f32 %v4248_v25, %v3799_v50  ;;  %v4923_v24 = vsel %vm4851_vm3, %v9584_v45, 0.0  ;;  %v4925_v38 = vsel %vm4851_vm3, %v9589_v29, 0.0  ;;  %v11874_v50 = vld [vmem:[#allocation372_spill] sm:$0xff]  ;;  %v11875_v36 = vld [vmem:[#allocation127_spill] sm:$0xff] }
 0x69a   :  { %v5118_v18 = vsel %vm4851_vm3, %v5020_v34, 0.0  ;;  %v4310_v3 = vadd.f32 %v4246_v13, %v3797_v57  ;;  %v9622_v21 = vadd.f32 %v4760_v17, %v4311_v47  ;;  %v4593_v35 = vpop.permute.xlu1 %4592  ;;  %v5120_v27 = vsel %vm4851_vm3, %v5021_v56, 0.0  ;;  %v11876_v17 = vld [vmem:[#allocation39_spill] sm:$0xff]  ;;  %v11877_v47 = vld [vmem:[#allocation45_spill] sm:$0xff] }
 0x69b   :  { %v5119_v9 = vadd.f32 %v5118_v18, %v5117_v51  ;;  %v4924_v28 = vadd.f32 %v4923_v24, %v4922_v60  ;;  %v5122_v63 = vsel %vm4851_vm3, %v5022_v53, 0.0  ;;  %v4759_v5 = vmul.f32 %v9025_v52, %v4593_v35  ;;  %v11878_v24 = vld [vmem:[#allocation105_spill] sm:$0xff] }
 0x69c   :  { %v9627_v39 = vadd.f32 %v4761_v16, %v4312_v7  ;;  %v3736_v25 = vmul.f32 %v8372_v43, %v11874_v50  ;;  %v4250_v34 = vmul.f32 %v8411_v1, %v11875_v36  ;;  %v3801_v51 = vadd.f32 %v3737_v6, %v11876_v17  ;;  %v11880_v16 = vld [vmem:[#allocation116_spill] sm:$0xff] }
 0x69d   :  { %v4926_v57 = vadd.f32 %v4925_v38, %v4924_v28  ;;  %v5121_v13 = vadd.f32 %v5120_v27, %v5119_v9  ;;  %v3802_v60 = vadd.f32 %v3738_v46, %v11877_v47  ;;  %v4251_v56 = vmul.f32 %v8411_v1, %v11878_v24  ;;  %v4618_v35 = vpop.permute.xlu0 %4617  ;;  %v11881_v27 = vld [vmem:[#allocation323_spill] sm:$0xff] }
 0x69e   :  { %v9637_v53 = vadd.f32 %v4759_v5, %v4310_v3  ;;  %v4249_v7 = vmul.f32 %v8411_v1, %v11880_v16  ;;  %v5024_v18 = vmul.f32 %v9622_v21, %v9622_v21  ;;  %v4763_v38 = vmul.f32 %v9025_v52, %v9566_v37  ;;  %v11882_v5 = vld [vmem:[#allocation103_spill] sm:$0xff] }
 0x69f   :  { %v5123_v9 = vadd.f32 %v5122_v63, %v5121_v13  ;;  %v5025_v3 = vmul.f32 %v9627_v39, %v9627_v39  ;;  %v4764_v28 = vmul.f32 %v9025_v52, %v4618_v35  ;;  %v3225_v50 = vmul.f32 %v11882_v5, %v11881_v27  ;;  %v4643_v35 = vpop.permute.xlu2 %4642  ;;  %v11885_v5 = vld [vmem:[#allocation125_spill] sm:$0xff] }
 0x6a0   :  { %11879 = vst [vmem:[#allocation156_spill] sm:$0xff] %v9637_v53  ;;  %v4927_v6 = vsel %vm4851_vm3, %v9637_v53, 0.0  ;;  %v5023_v46 = vmul.f32 %v9637_v53, %v9637_v53  ;;  %v3800_v36 = vadd.f32 %v3736_v25, %v9059_v31  ;;  %v4314_v17 = vadd.f32 %v4250_v34, %v3801_v51  ;;  %v11883_v51 = vld [vmem:[#allocation375_spill] sm:$0xff] }
 0x6a1   :  { %v4928_v47 = vadd.f32 %v4927_v6, %v4926_v57  ;;  %v4315_v37 = vadd.f32 %v4251_v56, %v3802_v60  ;;  %v4929_v63 = vsel %vm4851_vm3, %v9622_v21, 0.0  ;;  %v4931_v24 = vsel %vm4851_vm3, %v9627_v39, 0.0 }
 0x6a2   :  { %v5124_v13 = vsel %vm4851_vm3, %v5023_v46, 0.0  ;;  %v4313_v16 = vadd.f32 %v4249_v7, %v3800_v36  ;;  %v9660_v53 = vadd.f32 %v4763_v38, %v4314_v17  ;;  %v4608_v27 = vpop.permute.xlu1 %4607  ;;  %v5126_v31 = vsel %vm4851_vm3, %v5024_v18, 0.0  ;;  %v11884_v7 = vld [vmem:[#allocation31_spill] sm:$0xff] }
 0x6a3   :  { %v5125_v29 = vadd.f32 %v5124_v13, %v5123_v9  ;;  %v4930_v45 = vadd.f32 %v4929_v63, %v4928_v47  ;;  %v5128_v25 = vsel %vm4851_vm3, %v5025_v3, 0.0  ;;  %v4762_v34 = vmul.f32 %v9025_v52, %v4608_v27  ;;  %v11886_v13 = vld [vmem:[#allocation131_spill] sm:$0xff] }
 0x6a4   :  { %v9665_v57 = vadd.f32 %v4764_v28, %v4315_v37  ;;  %v3739_v60 = vmul.f32 %v8372_v43, %v11883_v51  ;;  %v3289_v38 = vadd.f32 %v3225_v50, %v11884_v7  ;;  %v4252_v36 = vmul.f32 %v8411_v1, %v11885_v5 }
 0x6a5   :  { %v4932_v56 = vadd.f32 %v4931_v24, %v4930_v45  ;;  %v5127_v6 = vadd.f32 %v5126_v31, %v5125_v29  ;;  %v9670_v46 = vadd.f32 %v4762_v34, %v4313_v16  ;;  %v5027_v18 = vmul.f32 %v9660_v53, %v9660_v53 }
 0x6a6   :  { %v4633_v9 = vpop.permute.xlu0 %4632  ;;  %v4766_v3 = vmul.f32 %v9025_v52, %v4628_v54  ;;  %v5028_v45 = vmul.f32 %v9665_v57, %v9665_v57  ;;  %v3803_v50 = vadd.f32 %v3739_v60, %v3289_v38  ;;  %v4935_v1 = vsel %vm4851_vm3, %v9660_v53, 0.0  ;;  %v11887_v60 = vld [vmem:[#allocation25_spill] sm:$0xff] }
 0x6a7   :  { %v5129_v28 = vadd.f32 %v5128_v25, %v5127_v6  ;;  %v4933_v17 = vsel %vm4851_vm3, %v9670_v46, 0.0  ;;  %v5026_v43 = vmul.f32 %v9670_v46, %v9670_v46  ;;  %v4767_v29 = vmul.f32 %v9025_v52, %v4633_v9  ;;  %v4658_v6 = vpop.permute.xlu2 %4657 }
 0x6a8   :  { %v4934_v47 = vadd.f32 %v4933_v17, %v4932_v56  ;;  %v4937_v54 = vsel %vm4851_vm3, %v9665_v57, 0.0  ;;  %v4316_v63 = vadd.f32 %v4252_v36, %v3803_v50  ;;  %v9690_v24 = vadd.f32 %v4766_v3, %v11886_v13 }
 0x6a9   :  { %v5130_v37 = vsel %vm4851_vm3, %v5026_v43, 0.0  ;;  %v5132_v25 = vsel %vm4851_vm3, %v5027_v18, 0.0  ;;  %v5134_v34 = vsel %vm4851_vm3, %v5028_v45, 0.0  ;;  %v9696_v56 = vadd.f32 %v4767_v29, %v11887_v60 }
 0x6aa   :  { %v5131_v16 = vadd.f32 %v5130_v37, %v5129_v28  ;;  %v4936_v27 = vadd.f32 %v4935_v1, %v4934_v47  ;;  %v5030_v36 = vmul.f32 %v9690_v24, %v9690_v24  ;;  %v4769_v3 = vmul.f32 %v9025_v52, %v4643_v35  ;;  %v11889_v1 = vld [vmem:[#allocation133_spill] sm:$0xff] }
 0x6ab   :  { %v4623_v31 = vpop.permute.xlu1 %4622  ;;  %11888 = vst [vmem:[#allocation154_spill] sm:$0xff] %v9696_v56  ;;  %v5031_v43 = vmul.f32 %v9696_v56, %v9696_v56  ;;  %v4941_v50 = vsel %vm4851_vm3, %v9690_v24, 0.0  ;;  %v4943_v35 = vsel %vm4851_vm3, %v9696_v56, 0.0 }
 0x6ac   :  { %v4765_v51 = vmul.f32 %v9025_v52, %v4623_v31  ;;  %v4938_v7 = vadd.f32 %v4937_v54, %v4936_v27  ;;  %v5133_v38 = vadd.f32 %v5132_v25, %v5131_v16  ;;  %v9716_v37 = vadd.f32 %v4769_v3, %v11889_v1  ;;  %v11891_v25 = vld [vmem:[#allocation117_spill] sm:$0xff] }
 0x6ad   :  { %v5138_v16 = vsel %vm4851_vm3, %v5030_v36, 0.0  ;;  %v5140_v27 = vsel %vm4851_vm3, %v5031_v43, 0.0  ;;  %v11895_v1 = vld [vmem:[#allocation137_spill] sm:$0xff] }
 0x6ae   :  { %v9698_v9 = vadd.f32 %v4765_v51, %v4316_v63  ;;  %v4648_v5 = vpop.permute.xlu0 %4647  ;;  %v5135_v28 = vadd.f32 %v5134_v34, %v5133_v38  ;;  %11890 = vst [vmem:[#allocation47_spill] sm:$0xff] %v9716_v37  ;;  %v5033_v3 = vmul.f32 %v9716_v37, %v9716_v37 }
 0x6af   :  { %v4770_v45 = vmul.f32 %v9025_v52, %v4648_v5 }
 0x6b0   :  { %v4939_v18 = vsel %vm4851_vm3, %v9698_v9, 0.0  ;;  %v5029_v17 = vmul.f32 %v9698_v9, %v9698_v9 }
 0x6b1   :  { %v4940_v29 = vadd.f32 %v4939_v18, %v4938_v7  ;;  %v9722_v34 = vadd.f32 %v4770_v45, %v11891_v25  ;;  %v11893_v7 = vld [vmem:[#allocation129_spill] sm:$0xff]  ;;  %v4673_v18 = vpop.permute.xlu2 %4672 }
 0x6b2   :  { %v5136_v47 = vsel %vm4851_vm3, %v5029_v17, 0.0 }
 0x6b3   :  { %v5137_v54 = vadd.f32 %v5136_v47, %v5135_v28  ;;  %v4942_v63 = vadd.f32 %v4941_v50, %v4940_v29  ;;  %v4638_v13 = vpop.permute.xlu1 %4637  ;;  %11892 = vst [vmem:[#allocation158_spill] sm:$0xff] %v9722_v34  ;;  %v4772_v28 = vmul.f32 %v9025_v52, %v4658_v6  ;;  %v5034_v45 = vmul.f32 %v9722_v34, %v9722_v34 }
 0x6b4   :  { %v4768_v31 = vmul.f32 %v9025_v52, %v4638_v13  ;;  %v4947_v47 = vsel %vm4851_vm3, %v9716_v37, 0.0  ;;  %v4949_v6 = vsel %vm4851_vm3, %v9722_v34, 0.0 }
 0x6b5   :  { %v4944_v51 = vadd.f32 %v4943_v35, %v4942_v63  ;;  %v5139_v60 = vadd.f32 %v5138_v16, %v5137_v54  ;;  %v9743_v54 = vadd.f32 %v4772_v28, %v11895_v1 }
 0x6b6   :  { %v9725_v38 = vadd.f32 %v4768_v31, %v11893_v7  ;;  %v4663_v5 = vpop.permute.xlu0 %4662  ;;  %v5146_v31 = vsel %vm4851_vm3, %v5034_v45, 0.0 }
 0x6b7   :  { %v5141_v36 = vadd.f32 %v5140_v27, %v5139_v60  ;;  %v4773_v29 = vmul.f32 %v9025_v52, %v4663_v5  ;;  %11896 = vst [vmem:[#allocation52_spill] sm:$0xff] %v9743_v54  ;;  %v5144_v27 = vsel %vm4851_vm3, %v5033_v3, 0.0  ;;  %v5036_v28 = vmul.f32 %v9743_v54, %v9743_v54 }
 0x6b8   :  { %11894 = vst [vmem:[#allocation157_spill] sm:$0xff] %v9725_v38  ;;  %v4945_v17 = vsel %vm4851_vm3, %v9725_v38, 0.0  ;;  %v5032_v43 = vmul.f32 %v9725_v38, %v9725_v38  ;;  %v4953_v1 = vsel %vm4851_vm3, %v9743_v54, 0.0  ;;  %v11905_v54 = vld [vmem:[#allocation135_spill] sm:$0xff]  ;;  %v11917_v38 = vld [vmem:[#allocation138_spill] sm:$0xff] }
 0x6b9   :  { %v4946_v50 = vadd.f32 %v4945_v17, %v4944_v51  ;;  %v11897_v51 = vld [vmem:[#allocation124_spill] sm:$0xff]  ;;  %v11899_v17 = vld [vmem:[#allocation130_spill] sm:$0xff] }
 0x6ba   :  { %v5142_v35 = vsel %vm4851_vm3, %v5032_v43, 0.0  ;;  %v9749_v60 = vadd.f32 %v4773_v29, %v11897_v51  ;;  %v5150_v51 = vsel %vm4851_vm3, %v5036_v28, 0.0 }
 0x6bb   :  { %v5143_v63 = vadd.f32 %v5142_v35, %v5141_v36  ;;  %v4948_v13 = vadd.f32 %v4947_v47, %v4946_v50  ;;  %v4653_v16 = vpop.permute.xlu1 %4652  ;;  %v4775_v36 = vmul.f32 %v9025_v52, %v4673_v18  ;;  %v4688_v35 = vpop.permute.xlu2 %4687 }
 0x6bc   :  { %v4771_v25 = vmul.f32 %v9025_v52, %v4653_v16  ;;  %11898 = vst [vmem:[#allocation50_spill] sm:$0xff] %v9749_v60  ;;  %v5037_v29 = vmul.f32 %v9749_v60, %v9749_v60  ;;  %v4955_v18 = vsel %vm4851_vm3, %v9749_v60, 0.0 }
 0x6bd   :  { %v4950_v7 = vadd.f32 %v4949_v6, %v4948_v13  ;;  %v5145_v5 = vadd.f32 %v5144_v27, %v5143_v63  ;;  %v11901_v13 = vld [vmem:[#allocation33_spill] sm:$0xff] }
 0x6be   :  { %v9752_v43 = vadd.f32 %v4771_v25, %v11899_v17  ;;  %v4678_v34 = vpop.permute.xlu0 %4677  ;;  %v9770_v16 = vadd.f32 %v4775_v36, %v11901_v13  ;;  %v11907_v13 = vld [vmem:[#allocation141_spill] sm:$0xff] }
 0x6bf   :  { %v5147_v50 = vadd.f32 %v5146_v31, %v5145_v5  ;;  %v4776_v47 = vmul.f32 %v9025_v52, %v4678_v34  ;;  %v5152_v34 = vsel %vm4851_vm3, %v5037_v29, 0.0  ;;  %v11903_v5 = vld [vmem:[#allocation128_spill] sm:$0xff] }
 0x6c0   :  { %11900 = vst [vmem:[#allocation49_spill] sm:$0xff] %v9752_v43  ;;  %v4951_v3 = vsel %vm4851_vm3, %v9752_v43, 0.0  ;;  %v5035_v45 = vmul.f32 %v9752_v43, %v9752_v43  ;;  %v5039_v36 = vmul.f32 %v9770_v16, %v9770_v16 }
 0x6c1   :  { %v4952_v6 = vadd.f32 %v4951_v3, %v4950_v7  ;;  %11902 = vst [vmem:[#allocation159_spill] sm:$0xff] %v9770_v16  ;;  %v9776_v17 = vadd.f32 %v4776_v47, %v11903_v5 }
 0x6c2   :  { %v5148_v63 = vsel %vm4851_vm3, %v5035_v45, 0.0 }
 0x6c3   :  { %v5149_v27 = vadd.f32 %v5148_v63, %v5147_v50  ;;  %v4954_v31 = vadd.f32 %v4953_v1, %v4952_v6  ;;  %v4668_v25 = vpop.permute.xlu1 %4667  ;;  %11904 = vst [vmem:[#allocation161_spill] sm:$0xff] %v9776_v17  ;;  %v4778_v50 = vmul.f32 %v9025_v52, %v4688_v35  ;;  %v5040_v47 = vmul.f32 %v9776_v17, %v9776_v17 }
 0x6c4   :  { %v4774_v7 = vmul.f32 %v9025_v52, %v4668_v25  ;;  %v4959_v63 = vsel %vm4851_vm3, %v9770_v16, 0.0  ;;  %v4961_v35 = vsel %vm4851_vm3, %v9776_v17, 0.0  ;;  %v11911_v16 = vld [vmem:[#allocation136_spill] sm:$0xff] }
 0x6c5   :  { %v4956_v3 = vadd.f32 %v4955_v18, %v4954_v31  ;;  %v5151_v45 = vadd.f32 %v5150_v51, %v5149_v27  ;;  %v9797_v27 = vadd.f32 %v4778_v50, %v11907_v13  ;;  %v4703_v31 = vpop.permute.xlu2 %4702 }
 0x6c6   :  { %v9779_v43 = vadd.f32 %v4774_v7, %v11905_v54  ;;  %v4693_v60 = vpop.permute.xlu0 %4692  ;;  %v5156_v7 = vsel %vm4851_vm3, %v5039_v36, 0.0 }
 0x6c7   :  { %v5153_v6 = vadd.f32 %v5152_v34, %v5151_v45  ;;  %v4779_v1 = vmul.f32 %v9025_v52, %v4693_v60  ;;  %11908 = vst [vmem:[#allocation162_spill] sm:$0xff] %v9797_v27  ;;  %v5158_v60 = vsel %vm4851_vm3, %v5040_v47, 0.0 }
 0x6c8   :  { %11906 = vst [vmem:[#allocation160_spill] sm:$0xff] %v9779_v43  ;;  %v4957_v28 = vsel %vm4851_vm3, %v9779_v43, 0.0  ;;  %v5038_v29 = vmul.f32 %v9779_v43, %v9779_v43  ;;  %v11941_v43 = vld [vmem:[#allocation159_spill] sm:$0xff] }
 0x6c9   :  { %v4958_v54 = vadd.f32 %v4957_v28, %v4956_v3  ;;  %v11909_v3 = vld [vmem:[#allocation132_spill] sm:$0xff] }
 0x6ca   :  { %v5154_v18 = vsel %vm4851_vm3, %v5038_v29, 0.0  ;;  %v9803_v45 = vadd.f32 %v4779_v1, %v11909_v3 }
 0x6cb   :  { %v5155_v25 = vadd.f32 %v5154_v18, %v5153_v6  ;;  %v4960_v51 = vadd.f32 %v4959_v63, %v4958_v54  ;;  %v4683_v34 = vpop.permute.xlu1 %4682  ;;  %v5042_v6 = vmul.f32 %v9797_v27, %v9797_v27  ;;  %v4781_v54 = vmul.f32 %v9025_v52, %v4703_v31 }
 0x6cc   :  { %v4777_v5 = vmul.f32 %v9025_v52, %v4683_v34  ;;  %11910 = vst [vmem:[#allocation164_spill] sm:$0xff] %v9803_v45  ;;  %v5043_v1 = vmul.f32 %v9803_v45, %v9803_v45  ;;  %v4967_v31 = vsel %vm4851_vm3, %v9803_v45, 0.0  ;;  %v10017_v45 = vld [vmem:[%s10662_s3] ss:$0 sm:$0xff]  ;;  %s5711_s3 = smov [#allocation3]  }
 0x6cd   :  { %v4962_v28 = vadd.f32 %v4961_v35, %v4960_v51  ;;  %v5157_v29 = vadd.f32 %v5156_v7, %v5155_v25  ;;  %v4965_v35 = vsel %vm4851_vm3, %v9797_v27, 0.0  ;;  %v11913_v25 = vld [vmem:[#allocation44_spill] sm:$0xff]  ;;  %11945 = vst [vmem:[#allocation170_spill] sm:$0xff] %v10017_v45  ;;  %s5657_s18 = sshll.u32 %s5711_s3, 4  ;;  %s5658_s18 = int_to_ptr.vmem [resolvable:$true] %s5657_s18 }
 0x6ce   :  { %v9806_v37 = vadd.f32 %v4777_v5, %v11911_v16  ;;  %v4708_v50 = vpop.permute.xlu0 %4707  ;;  %v9824_v51 = vadd.f32 %v4781_v54, %v11913_v25  ;;  %v5162_v5 = vsel %vm4851_vm3, %v5042_v6, 0.0  ;;  %v5164_v3 = vsel %vm4851_vm3, %v5043_v1, 0.0 }
 0x6cf   :  { %v5159_v63 = vadd.f32 %v5158_v60, %v5157_v29  ;;  %v4782_v18 = vmul.f32 %v9025_v52, %v4708_v50  ;;  %v11915_v29 = vld [vmem:[#allocation134_spill] sm:$0xff] }
 0x6d0   :  { %11912 = vst [vmem:[#allocation165_spill] sm:$0xff] %v9806_v37  ;;  %v4963_v36 = vsel %vm4851_vm3, %v9806_v37, 0.0  ;;  %v5041_v47 = vmul.f32 %v9806_v37, %v9806_v37  ;;  %v5045_v54 = vmul.f32 %v9824_v51, %v9824_v51 }
 0x6d1   :  { %v4964_v16 = vadd.f32 %v4963_v36, %v4962_v28  ;;  %11914 = vst [vmem:[#allocation163_spill] sm:$0xff] %v9824_v51  ;;  %v9830_v50 = vadd.f32 %v4782_v18, %v11915_v29  ;;  %v4718_v36 = vpop.permute.xlu2 %4717 }
 0x6d2   :  { %v5160_v13 = vsel %vm4851_vm3, %v5041_v47, 0.0 }
 0x6d3   :  { %v5161_v34 = vadd.f32 %v5160_v13, %v5159_v63  ;;  %v4966_v7 = vadd.f32 %v4965_v35, %v4964_v16  ;;  %v4698_v60 = vpop.permute.xlu1 %4697  ;;  %11916 = vst [vmem:[#allocation167_spill] sm:$0xff] %v9830_v50  ;;  %v4784_v16 = vmul.f32 %v9025_v52, %v4718_v36  ;;  %v5046_v18 = vmul.f32 %v9830_v50, %v9830_v50  ;;  %v11920_v36 = vld [vmem:[#allocation36_spill] sm:$0xff] }
 0x6d4   :  { %v4780_v28 = vmul.f32 %v9025_v52, %v4698_v60 }
 0x6d5   :  { %v4968_v47 = vadd.f32 %v4967_v31, %v4966_v7  ;;  %v5163_v27 = vadd.f32 %v5162_v5, %v5161_v34  ;;  %v5168_v7 = vsel %vm4851_vm3, %v5045_v54, 0.0  ;;  %v9851_v60 = vadd.f32 %v4784_v16, %v9086_v44 }
 0x6d6   :  { %v9833_v56 = vadd.f32 %v4780_v28, %v11917_v38  ;;  %v4971_v38 = vsel %vm4851_vm3, %v9824_v51, 0.0  ;;  %v5170_v5 = vsel %vm4851_vm3, %v5046_v18, 0.0 }
 0x6d7   :  { %v5165_v63 = vadd.f32 %v5164_v3, %v5163_v27  ;;  %v4973_v27 = vsel %vm4851_vm3, %v9830_v50, 0.0  ;;  %11919 = vst [vmem:[#allocation166_spill] sm:$0xff] %v9851_v60  ;;  %v4977_v16 = vsel %vm4851_vm3, %v9851_v60, 0.0 }
 0x6d8   :  { %11918 = vst [vmem:[#allocation168_spill] sm:$0xff] %v9833_v56  ;;  %v4969_v6 = vsel %vm4851_vm3, %v9833_v56, 0.0  ;;  %v5044_v1 = vmul.f32 %v9833_v56, %v9833_v56  ;;  %v9994_v56 = vld [vmem:[%s10661_s2] ss:$0 sm:$0xff] }
 0x6d9   :  { %v4970_v35 = vadd.f32 %v4969_v6, %v4968_v47  ;;  %11937 = vst [vmem:[#allocation169_spill] sm:$0xff] %v9994_v56 }
 0x6da   :  { %v5166_v13 = vsel %vm4851_vm3, %v5044_v1, 0.0 }
 0x6db   :  { %v5167_v31 = vadd.f32 %v5166_v13, %v5165_v63  ;;  %v4972_v25 = vadd.f32 %v4971_v38, %v4970_v35  ;;  %v4713_v34 = vpop.permute.xlu1 %4712  ;;  %v5048_v63 = vmul.f32 %v9851_v60, %v9851_v60 }
 0x6dc   :  { %v4783_v3 = vmul.f32 %v9025_v52, %v4713_v34 }
 0x6dd   :  { %v4974_v28 = vadd.f32 %v4973_v27, %v4972_v25  ;;  %v5169_v29 = vadd.f32 %v5168_v7, %v5167_v31  ;;  %v5174_v38 = vsel %vm4851_vm3, %v5048_v63, 0.0  ;;  %v11940_v63 = vld [vmem:[#allocation50_spill] sm:$0xff] }
 0x6de   :  { %v9856_v47 = vadd.f32 %v4783_v3, %v11920_v36 }
 0x6df   :  { %v5171_v6 = vadd.f32 %v5170_v5, %v5169_v29 }
 0x6e0   :  { %v4975_v1 = vsel %vm4851_vm3, %v9856_v47, 0.0  ;;  %v5047_v44 = vmul.f32 %v9856_v47, %v9856_v47 }
 0x6e1   :  { %v4976_v54 = vadd.f32 %v4975_v1, %v4974_v28 }
 0x6e2   :  { %v5172_v52 = vsel %vm4851_vm3, %v5047_v44, 0.0 }
 0x6e3   :  { %v4978_v18 = vadd.f32 %v4977_v16, %v4976_v54  ;;  %v5173_v35 = vadd.f32 %v5172_v52, %v5171_v6 }
 0x6e5   :  { %v4979_v13 = vrot.slane %v4978_v18, 4  ;;  %v5175_v27 = vadd.f32 %v5174_v38, %v5173_v35  ;;  %v11922_v38 = vld [vmem:[#allocation145_spill] sm:$0xff] }
 0x6e7   :  { %v4980_v31 = vadd.f32 %v4979_v13, %v4978_v18  ;;  %v5176_v25 = vrot.slane %v5175_v27, 4  ;;  %v11921_v18 = vld [vmem:[#allocation146_spill] sm:$0xff] }
 0x6e8   :  { %v11942_v13 = vld [vmem:[#allocation162_spill] sm:$0xff] }
 0x6e9   :  { %v4981_v34 = vrot.slane %v4980_v31, 2  ;;  %v5177_v7 = vadd.f32 %v5176_v25, %v5175_v27  ;;  %v11932_v27 = vld [vmem:[#allocation156_spill] sm:$0xff] }
 0x6eb   :  { %v4982_v5 = vadd.f32 %v4981_v34, %v4980_v31  ;;  %v5178_v3 = vrot.slane %v5177_v7, 2  ;;  %v11931_v31 = vld [vmem:[#allocation51_spill] sm:$0xff] }
 0x6ed   :  { %v4983_v29 = vrot.slane %v4982_v5, 1  ;;  %v5179_v36 = vadd.f32 %v5178_v3, %v5177_v7  ;;  %v11927_v3 = vld [vmem:[#allocation150_spill] sm:$0xff] }
 0x6ef   :  { %v4984_v28 = vadd.f32 %v4983_v29, %v4982_v5  ;;  %v5180_v1 = vrot.slane %v5179_v36, 1  ;;  %v11928_v5 = vld [vmem:[#allocation153_spill] sm:$0xff] }
 0x6f1   :  { %v5181_v51 = vadd.f32 %v5180_v1, %v5179_v36  ;;  %v9868_v60 = vmul.f32 0.001953125, %v4984_v28  ;;  %v11925_v36 = vld [vmem:[#allocation152_spill] sm:$0xff] }
 0x6f2   :  { %v11939_v28 = vld [vmem:[#allocation52_spill] sm:$0xff] }
 0x6f3   :  { %v5183_v44 = vmul.f32 0.001953125, %v5181_v51  ;;  %v5184_v6 = vmul.f32 %v9868_v60, %v9868_v60  ;;  %v11923_v51 = vld [vmem:[#allocation147_spill] sm:$0xff]  ;;  %v11946_v17 = vsub.f32 %v9856_v47, %v9868_v60  ;;  %v11949_v25 = vsub.f32 %v11922_v38, %v9868_v60 }
 0x6f4   :  { %v11951_v37 = vsub.f32 %v11923_v51, %v9868_v60 }
 0x6f5   :  { %v5185_v54 = vsub.f32 %v5183_v44, %v5184_v6  ;;  %v11926_v6 = vld [vmem:[#allocation148_spill] sm:$0xff]  ;;  %v11929_v44 = vld [vmem:[#allocation155_spill] sm:$0xff] }
 0x6f7   :  { %v5186_v16 = vmax.f32 %v5185_v54, 0.0  ;;  %v11930_v54 = vld [vmem:[#allocation151_spill] sm:$0xff] }
 0x6f9   :  { %v9874_v52 = vadd.f32 1e-05, %v5186_v16  ;;  %v11924_v16 = vld [vmem:[#allocation149_spill] sm:$0xff] }
 0x6fb   :  { %5681 = vrsqrt.f32 %v9874_v52  ;;  %vm5258_vm4 = vweird.f32 %v9874_v52 }
 0x701   :  { %v5682_v29 = vpop.eup %5681 }
 0x702   :  { %v5253_v1 = vmul.f32 %v5682_v29, %v9874_v52  ;;  %vm5259_vm5 = vweird.f32 %v5682_v29  ;;  %v11943_v52 = vld [vmem:[#allocation163_spill] sm:$0xff] }
 0x703   :  { %vm5260_vm6 = vmor %vm5258_vm4, %vm5259_vm5 }
 0x704   :  { %v5254_v34 = vmul.f32 %v5682_v29, %v5253_v1 }
 0x706   :  { %v5255_v7 = vmul.f32 0.5, %v5254_v34 }
 0x708   :  { %v5256_v1 = vsub.f32 1.5, %v5255_v7 }
 0x70a   :  { %v5257_v7 = vmul.f32 %v5682_v29, %v5256_v1 }
 0x70c   :  { %v10006_v35 = vsel %vm5260_vm6, %v5682_v29, %v5257_v7  ;;  %v11947_v7 = vsub.f32 %v11921_v18, %v9868_v60  ;;  %v11955_v18 = vsub.f32 %v9126_v49, %v9868_v60  ;;  %v11961_v49 = vsub.f32 %v9169_v20, %v9868_v60 }
 0x70d   :  { %v5324_v29 = vmul.f32 %v10006_v35, %v11946_v17  ;;  %v10033_v34 = vmul.f32 %v10006_v35, %v11949_v25  ;;  %v10039_v1 = vmul.f32 %v10006_v35, %v11951_v37  ;;  %v11953_v17 = vsub.f32 %v9118_v40, %v9868_v60 }
 0x70e   :  { %v10027_v50 = vmul.f32 %v10006_v35, %v11947_v7  ;;  %v10051_v38 = vmul.f32 %v10006_v35, %v11955_v18  ;;  %v11957_v25 = vsub.f32 %v9180_v0, %v9868_v60  ;;  %v11959_v37 = vsub.f32 %v9162_v8, %v9868_v60 }
 0x70f   :  { %11950 = vst [vmem:[#allocation172_spill] sm:$0xff] %v10033_v34  ;;  %v10045_v47 = vmul.f32 %v10006_v35, %v11953_v17  ;;  %v5391_v7 = vmul.f32 %v9994_v56, %v5324_v29  ;;  %v5269_v17 = vmul.f32 %v10006_v35, %v11961_v49  ;;  %v11962_v18 = vsub.f32 %v9224_v59, %v9868_v60  ;;  %v12015_v34 = vld [vmem:[#allocation161_spill] sm:$0xff]  ;;  %v12022_v56 = vld [vmem:[#allocation168_spill] sm:$0xff] }
 0x710   :  { %11948 = vst [vmem:[#allocation171_spill] sm:$0xff] %v10027_v50  ;;  %v10057_v51 = vmul.f32 %v10006_v35, %v11957_v25  ;;  %v10063_v40 = vmul.f32 %v10006_v35, %v11959_v37  ;;  %v11963_v25 = vsub.f32 %v9205_v19, %v9868_v60  ;;  %v11964_v37 = vsub.f32 %v9212_v33, %v9868_v60  ;;  %v12017_v50 = vld [vmem:[#allocation165_spill] sm:$0xff] }
 0x711   :  { %11952 = vst [vmem:[#allocation56_spill] sm:$0xff] %v10039_v1  ;;  %v5270_v0 = vmul.f32 %v10006_v35, %v11962_v18  ;;  %v11965_v20 = vsub.f32 %v9267_v61, %v9868_v60  ;;  %v11966_v59 = vsub.f32 %v9249_v26, %v9868_v60  ;;  %v11967_v19 = vsub.f32 %v9256_v15, %v9868_v60  ;;  %v12012_v1 = vld [vmem:[#allocation160_spill] sm:$0xff] }
 0x712   :  { %11954 = vst [vmem:[#allocation173_spill] sm:$0xff] %v10045_v47  ;;  %v5271_v8 = vmul.f32 %v10006_v35, %v11963_v25  ;;  %v5272_v29 = vmul.f32 %v10006_v35, %v11964_v37  ;;  %v11968_v33 = vsub.f32 %v9309_v14, %v9868_v60  ;;  %v11969_v61 = vsub.f32 %v9292_v55, %v9868_v60  ;;  %v12008_v47 = vld [vmem:[#allocation49_spill] sm:$0xff] }
 0x713   :  { %11956 = vst [vmem:[#allocation174_spill] sm:$0xff] %v10051_v38  ;;  %v5273_v49 = vmul.f32 %v10006_v35, %v11965_v20  ;;  %v5274_v18 = vmul.f32 %v10006_v35, %v11966_v59  ;;  %v5275_v25 = vmul.f32 %v10006_v35, %v11967_v19  ;;  %v11970_v26 = vsub.f32 %v9297_v58, %v9868_v60  ;;  %v12006_v38 = vld [vmem:[#allocation158_spill] sm:$0xff] }
 0x714   :  { %11958 = vst [vmem:[#allocation57_spill] sm:$0xff] %v10057_v51  ;;  %v5276_v37 = vmul.f32 %v10006_v35, %v11968_v33  ;;  %v5277_v20 = vmul.f32 %v10006_v35, %v11969_v61  ;;  %v11971_v15 = vsub.f32 %v9350_v32, %v9868_v60  ;;  %v11972_v14 = vsub.f32 %v9334_v22, %v9868_v60  ;;  %v12004_v51 = vld [vmem:[#allocation47_spill] sm:$0xff] }
 0x715   :  { %11960 = vst [vmem:[#allocation59_spill] sm:$0xff] %v10063_v40  ;;  %v5458_v40 = vadd.f32 %v10017_v45, %v5391_v7  ;;  %v5278_v59 = vmul.f32 %v10006_v35, %v11970_v26  ;;  %v11973_v55 = vsub.f32 %v9339_v11, %v9868_v60  ;;  %v11974_v58 = vsub.f32 %v9392_v2, %v9868_v60  ;;  %v12020_v45 = vld [vmem:[#allocation164_spill] sm:$0xff] }
 0x716   :  { %v5279_v7 = vmul.f32 %v10006_v35, %v11971_v15  ;;  %v5280_v19 = vmul.f32 %v10006_v35, %v11972_v14  ;;  %v11975_v32 = vsub.f32 %v9377_v62, %v9868_v60  ;;  %v11976_v22 = vsub.f32 %v9382_v12, %v9868_v60 }
 0x717   :  { %v5281_v33 = vmul.f32 %v10006_v35, %v11973_v55  ;;  %v5282_v61 = vmul.f32 %v10006_v35, %v11974_v58  ;;  %v5522_v26 = vmax.f32 %v5458_v40, 0.0  ;;  %v11977_v11 = vsub.f32 %v9435_v4, %v9868_v60 }
 0x718   :  { %v5283_v15 = vmul.f32 %v10006_v35, %v11975_v32  ;;  %v5284_v14 = vmul.f32 %v10006_v35, %v11976_v22  ;;  %v11978_v2 = vsub.f32 %v9419_v48, %v9868_v60  ;;  %v11979_v62 = vsub.f32 %v9424_v30, %v9868_v60 }
 0x719   :  { %v5285_v55 = vmul.f32 %v10006_v35, %v11977_v11  ;;  %v11980_v12 = vsub.f32 %v9477_v23, %v9868_v60  ;;  %v11981_v4 = vsub.f32 %v9460_v41, %v9868_v60  ;;  %v5586_v11 = vpack.c.bf16 %v5522_v26, %v5522_v26 }
 0x71a   :  { %v5286_v40 = vmul.f32 %v10006_v35, %v11978_v2  ;;  %v5287_v58 = vmul.f32 %v10006_v35, %v11979_v62  ;;  %v11982_v48 = vsub.f32 %v11924_v16, %v9868_v60  ;;  %v11983_v30 = vsub.f32 %v11925_v36, %v9868_v60 }
 0x71b   :  { %v5288_v32 = vmul.f32 %v10006_v35, %v11980_v12  ;;  %v5289_v22 = vmul.f32 %v10006_v35, %v11981_v4  ;;  %v11984_v23 = vsub.f32 %v11926_v6, %v9868_v60  ;;  %v11985_v41 = vsub.f32 %v11927_v3, %v9868_v60  ;;  %5651 = vst.msk [vmem:[#allocation3 + $0xf8] sm:$0xf] %vm5588_vm7, %v5586_v11 }
 0x71c   :  { %v5290_v2 = vmul.f32 %v10006_v35, %v11982_v48  ;;  %v5291_v62 = vmul.f32 %v10006_v35, %v11983_v30  ;;  %v11986_v16 = vsub.f32 %v11928_v5, %v9868_v60  ;;  %v11987_v36 = vsub.f32 %v9543_v42, %v9868_v60 }
 0x71d   :  { %v5292_v12 = vmul.f32 %v10006_v35, %v11984_v23  ;;  %v5293_v26 = vmul.f32 %v10006_v35, %v11985_v41  ;;  %v11988_v6 = vsub.f32 %v9548_v10, %v9868_v60  ;;  %v11989_v3 = vsub.f32 %v11929_v44, %v9868_v60 }
 0x71e   :  { %v5294_v4 = vmul.f32 %v10006_v35, %v11986_v16  ;;  %v5295_v48 = vmul.f32 %v10006_v35, %v11987_v36  ;;  %v11990_v5 = vsub.f32 %v11930_v54, %v9868_v60  ;;  %v11991_v42 = vsub.f32 %v11931_v31, %v9868_v60 }
 0x71f   :  { %v5296_v30 = vmul.f32 %v10006_v35, %v11988_v6  ;;  %v5297_v23 = vmul.f32 %v10006_v35, %v11989_v3  ;;  %v11992_v10 = vsub.f32 %v11932_v27, %v9868_v60  ;;  %v11993_v44 = vsub.f32 %v9622_v21, %v9868_v60 }
 0x720   :  { %v5298_v41 = vmul.f32 %v10006_v35, %v11990_v5  ;;  %v5299_v16 = vmul.f32 %v10006_v35, %v11991_v42  ;;  %v11994_v54 = vsub.f32 %v9627_v39, %v9868_v60  ;;  %v11995_v31 = vsub.f32 %v9670_v46, %v9868_v60 }
 0x721   :  { %v5300_v11 = vmul.f32 %v10006_v35, %v11992_v10  ;;  %v5301_v36 = vmul.f32 %v10006_v35, %v11993_v44  ;;  %v11996_v27 = vsub.f32 %v9660_v53, %v9868_v60  ;;  %v11997_v21 = vsub.f32 %v9665_v57, %v9868_v60 }
 0x722   :  { %v5302_v6 = vmul.f32 %v10006_v35, %v11994_v54  ;;  %v5303_v3 = vmul.f32 %v10006_v35, %v11995_v31  ;;  %v11998_v39 = vsub.f32 %v9698_v9, %v9868_v60  ;;  %v11999_v46 = vsub.f32 %v9690_v24, %v9868_v60  ;;  %v12000_v54 = vld [vmem:[#allocation154_spill] sm:$0xff] }
 0x723   :  { %v5304_v5 = vmul.f32 %v10006_v35, %v11996_v27  ;;  %v5305_v42 = vmul.f32 %v10006_v35, %v11997_v21  ;;  %v12001_v53 = vsub.f32 %v12000_v54, %v9868_v60  ;;  %v12002_v27 = vld [vmem:[#allocation157_spill] sm:$0xff]  ;;  %v12005_v9 = vsub.f32 %v12004_v51, %v9868_v60 }
 0x724   :  { %v5306_v10 = vmul.f32 %v10006_v35, %v11998_v39  ;;  %v5307_v44 = vmul.f32 %v10006_v35, %v11999_v46  ;;  %v12003_v57 = vsub.f32 %v12002_v27, %v9868_v60  ;;  %v12007_v24 = vsub.f32 %v12006_v38, %v9868_v60 }
 0x725   :  { %v5308_v31 = vmul.f32 %v10006_v35, %v12001_v53  ;;  %v5310_v39 = vmul.f32 %v10006_v35, %v12005_v9  ;;  %v12009_v54 = vsub.f32 %v12008_v47, %v9868_v60  ;;  %v12010_v27 = vsub.f32 %v11939_v28, %v9868_v60 }
 0x726   :  { %v5309_v21 = vmul.f32 %v10006_v35, %v12003_v57  ;;  %v5311_v46 = vmul.f32 %v10006_v35, %v12007_v24  ;;  %v12011_v51 = vsub.f32 %v11940_v63, %v9868_v60  ;;  %v12013_v38 = vsub.f32 %v12012_v1, %v9868_v60 }
 0x727   :  { %v5312_v53 = vmul.f32 %v10006_v35, %v12009_v54  ;;  %v5313_v57 = vmul.f32 %v10006_v35, %v12010_v27  ;;  %v12014_v47 = vsub.f32 %v11941_v43, %v9868_v60  ;;  %v12016_v28 = vsub.f32 %v12015_v34, %v9868_v60 }
 0x728   :  { %v5314_v9 = vmul.f32 %v10006_v35, %v12011_v51  ;;  %v5315_v24 = vmul.f32 %v10006_v35, %v12013_v38  ;;  %v12018_v63 = vsub.f32 %v12017_v50, %v9868_v60  ;;  %v12019_v1 = vsub.f32 %v11942_v13, %v9868_v60  ;;  %v12025_v13 = vld [vmem:[#allocation167_spill] sm:$0xff] }
 0x729   :  { %v5316_v54 = vmul.f32 %v10006_v35, %v12014_v47  ;;  %v5317_v27 = vmul.f32 %v10006_v35, %v12016_v28  ;;  %v12021_v43 = vsub.f32 %v12020_v45, %v9868_v60  ;;  %v12023_v34 = vsub.f32 %v12022_v56, %v9868_v60 }
 0x72a   :  { %v5318_v51 = vmul.f32 %v10006_v35, %v12018_v63  ;;  %v5319_v38 = vmul.f32 %v10006_v35, %v12019_v1  ;;  %v12024_v50 = vsub.f32 %v11943_v52, %v9868_v60  ;;  %v12026_v1 = vsub.f32 %v12025_v13, %v9868_v60  ;;  %v12029_v52 = vld [vmem:[#allocation169_spill] sm:$0xff] }
 0x72b   :  { %v5320_v47 = vmul.f32 %v10006_v35, %v12021_v43  ;;  %v5321_v28 = vmul.f32 %v10006_v35, %v12023_v34  ;;  %v12027_v43 = vld [vmem:[#allocation166_spill] sm:$0xff]  ;;  %v5337_v13 = vmul.f32 %v12029_v52, %v5270_v0  ;;  %v5344_v0 = vmul.f32 %v12029_v52, %v5277_v20 }
 0x72c   :  { %v5322_v63 = vmul.f32 %v10006_v35, %v12024_v50  ;;  %v5323_v45 = vmul.f32 %v10006_v35, %v12026_v1  ;;  %v12028_v56 = vsub.f32 %v12027_v43, %v9868_v60  ;;  %v5336_v50 = vmul.f32 %v12029_v52, %v5269_v17 }
 0x72d   :  { %v5338_v1 = vmul.f32 %v12029_v52, %v5271_v8  ;;  %v5339_v43 = vmul.f32 %v12029_v52, %v5272_v29  ;;  %v5340_v60 = vmul.f32 %v12029_v52, %v5273_v49  ;;  %v5343_v17 = vmul.f32 %v12029_v52, %v5276_v37 }
 0x72e   :  { %v5325_v34 = vmul.f32 %v10006_v35, %v12028_v56  ;;  %v5341_v35 = vmul.f32 %v12029_v52, %v5274_v18  ;;  %v5342_v56 = vmul.f32 %v12029_v52, %v5275_v25  ;;  %v5345_v8 = vmul.f32 %v12029_v52, %v5278_v59 }
 0x72f   :  { %v5346_v29 = vmul.f32 %v12029_v52, %v5279_v7  ;;  %v5347_v49 = vmul.f32 %v12029_v52, %v5280_v19  ;;  %v5348_v18 = vmul.f32 %v12029_v52, %v5281_v33  ;;  %v5349_v25 = vmul.f32 %v12029_v52, %v5282_v61 }
 0x730   :  { %v5350_v37 = vmul.f32 %v12029_v52, %v5283_v15  ;;  %v5351_v20 = vmul.f32 %v12029_v52, %v5284_v14  ;;  %v5352_v59 = vmul.f32 %v12029_v52, %v5285_v55  ;;  %v5353_v7 = vmul.f32 %v12029_v52, %v5286_v40 }
 0x731   :  { %v5354_v19 = vmul.f32 %v12029_v52, %v5287_v58  ;;  %v5355_v33 = vmul.f32 %v12029_v52, %v5288_v32  ;;  %v5356_v61 = vmul.f32 %v12029_v52, %v5289_v22  ;;  %v5357_v15 = vmul.f32 %v12029_v52, %v5290_v2 }
 0x732   :  { %v5358_v14 = vmul.f32 %v12029_v52, %v5291_v62  ;;  %v5359_v55 = vmul.f32 %v12029_v52, %v5292_v12  ;;  %v5360_v40 = vmul.f32 %v12029_v52, %v5293_v26  ;;  %v5361_v58 = vmul.f32 %v12029_v52, %v5294_v4 }
 0x733   :  { %v5362_v32 = vmul.f32 %v12029_v52, %v5295_v48  ;;  %v5363_v22 = vmul.f32 %v12029_v52, %v5296_v30  ;;  %v5364_v2 = vmul.f32 %v12029_v52, %v5297_v23  ;;  %v5365_v62 = vmul.f32 %v12029_v52, %v5298_v41 }
 0x734   :  { %v5366_v12 = vmul.f32 %v12029_v52, %v5299_v16  ;;  %v5367_v26 = vmul.f32 %v12029_v52, %v5300_v11  ;;  %v5368_v4 = vmul.f32 %v12029_v52, %v5301_v36  ;;  %v5369_v48 = vmul.f32 %v12029_v52, %v5302_v6 }
 0x735   :  { %v5370_v30 = vmul.f32 %v12029_v52, %v5303_v3  ;;  %v5371_v23 = vmul.f32 %v12029_v52, %v5304_v5  ;;  %v5372_v41 = vmul.f32 %v12029_v52, %v5305_v42  ;;  %v5373_v16 = vmul.f32 %v12029_v52, %v5306_v10 }
 0x736   :  { %v5374_v11 = vmul.f32 %v12029_v52, %v5307_v44  ;;  %v5375_v36 = vmul.f32 %v12029_v52, %v5308_v31  ;;  %v5376_v6 = vmul.f32 %v12029_v52, %v5309_v21  ;;  %v5377_v3 = vmul.f32 %v12029_v52, %v5310_v39 }
 0x737   :  { %v5378_v5 = vmul.f32 %v12029_v52, %v5311_v46  ;;  %v5379_v42 = vmul.f32 %v12029_v52, %v5312_v53  ;;  %v5380_v10 = vmul.f32 %v12029_v52, %v5313_v57  ;;  %v5381_v44 = vmul.f32 %v12029_v52, %v5314_v9 }
 0x738   :  { %v5382_v31 = vmul.f32 %v12029_v52, %v5315_v24  ;;  %v5383_v21 = vmul.f32 %v12029_v52, %v5316_v54  ;;  %v5384_v39 = vmul.f32 %v12029_v52, %v5317_v27  ;;  %v5385_v46 = vmul.f32 %v12029_v52, %v5318_v51  ;;  %v12030_v51 = vld [vmem:[#allocation170_spill] sm:$0xff] }
 0x739   :  { %v5386_v53 = vmul.f32 %v12029_v52, %v5319_v38  ;;  %v5387_v57 = vmul.f32 %v12029_v52, %v5320_v47  ;;  %v5388_v9 = vmul.f32 %v12029_v52, %v5321_v28  ;;  %v5389_v24 = vmul.f32 %v12029_v52, %v5322_v63 }
 0x73a   :  { %v5390_v54 = vmul.f32 %v12029_v52, %v5323_v45  ;;  %v5392_v27 = vmul.f32 %v12029_v52, %v5325_v34  ;;  %v10349_v38 = vadd.f32 %v12030_v51, %v5336_v50  ;;  %v10352_v47 = vadd.f32 %v12030_v51, %v5337_v13 }
 0x73b   :  { %v10355_v28 = vadd.f32 %v12030_v51, %v5338_v1  ;;  %v10358_v63 = vadd.f32 %v12030_v51, %v5339_v43  ;;  %v10361_v45 = vadd.f32 %v12030_v51, %v5340_v60  ;;  %v10364_v34 = vadd.f32 %v12030_v51, %v5341_v35 }
 0x73c   :  { %v10367_v52 = vadd.f32 %v12030_v51, %v5342_v56  ;;  %v10370_v50 = vadd.f32 %v12030_v51, %v5343_v17  ;;  %v10373_v13 = vadd.f32 %v12030_v51, %v5344_v0  ;;  %v10376_v1 = vadd.f32 %v12030_v51, %v5345_v8 }
 0x73d   :  { %v10379_v43 = vadd.f32 %v12030_v51, %v5346_v29  ;;  %v10382_v60 = vadd.f32 %v12030_v51, %v5347_v49  ;;  %v10385_v35 = vadd.f32 %v12030_v51, %v5348_v18  ;;  %v10388_v56 = vadd.f32 %v12030_v51, %v5349_v25 }
 0x73e   :  { %v10391_v17 = vadd.f32 %v12030_v51, %v5350_v37  ;;  %v10394_v0 = vadd.f32 %v12030_v51, %v5351_v20  ;;  %v10397_v8 = vadd.f32 %v12030_v51, %v5352_v59  ;;  %v10400_v29 = vadd.f32 %v12030_v51, %v5353_v7 }
 0x73f   :  { %v10403_v49 = vadd.f32 %v12030_v51, %v5354_v19  ;;  %v10406_v18 = vadd.f32 %v12030_v51, %v5355_v33  ;;  %v10409_v25 = vadd.f32 %v12030_v51, %v5356_v61  ;;  %v10412_v37 = vadd.f32 %v12030_v51, %v5357_v15 }
 0x740   :  { %v10415_v20 = vadd.f32 %v12030_v51, %v5358_v14  ;;  %v10418_v59 = vadd.f32 %v12030_v51, %v5359_v55  ;;  %v10421_v7 = vadd.f32 %v12030_v51, %v5360_v40  ;;  %v10424_v19 = vadd.f32 %v12030_v51, %v5361_v58 }
 0x741   :  { %v10427_v33 = vadd.f32 %v12030_v51, %v5362_v32  ;;  %v10430_v61 = vadd.f32 %v12030_v51, %v5363_v22  ;;  %v10433_v15 = vadd.f32 %v12030_v51, %v5364_v2  ;;  %v10436_v14 = vadd.f32 %v12030_v51, %v5365_v62 }
 0x742   :  { %v10439_v55 = vadd.f32 %v12030_v51, %v5366_v12  ;;  %v10442_v40 = vadd.f32 %v12030_v51, %v5367_v26  ;;  %v10445_v58 = vadd.f32 %v12030_v51, %v5368_v4  ;;  %v10448_v32 = vadd.f32 %v12030_v51, %v5369_v48 }
 0x743   :  { %v10451_v22 = vadd.f32 %v12030_v51, %v5370_v30  ;;  %v10454_v2 = vadd.f32 %v12030_v51, %v5371_v23  ;;  %v10457_v62 = vadd.f32 %v12030_v51, %v5372_v41  ;;  %v10460_v12 = vadd.f32 %v12030_v51, %v5373_v16 }
 0x744   :  { %v10463_v26 = vadd.f32 %v12030_v51, %v5374_v11  ;;  %v10466_v4 = vadd.f32 %v12030_v51, %v5375_v36  ;;  %v10469_v48 = vadd.f32 %v12030_v51, %v5376_v6  ;;  %v10472_v30 = vadd.f32 %v12030_v51, %v5377_v3 }
 0x745   :  { %v10475_v23 = vadd.f32 %v12030_v51, %v5378_v5  ;;  %v10478_v41 = vadd.f32 %v12030_v51, %v5379_v42  ;;  %v10481_v16 = vadd.f32 %v12030_v51, %v5380_v10  ;;  %v10484_v11 = vadd.f32 %v12030_v51, %v5381_v44 }
 0x746   :  { %12031 = vst [vmem:[#allocation175_spill] sm:$0xff] %v10469_v48  ;;  %v10487_v36 = vadd.f32 %v12030_v51, %v5382_v31  ;;  %v10490_v6 = vadd.f32 %v12030_v51, %v5383_v21  ;;  %v10493_v3 = vadd.f32 %v12030_v51, %v5384_v39  ;;  %v10496_v5 = vadd.f32 %v12030_v51, %v5385_v46  ;;  %v12047_v46 = vld [vmem:[#allocation171_spill] sm:$0xff] }
 0x747   :  { %12032 = vst [vmem:[#allocation176_spill] sm:$0xff] %v10472_v30  ;;  %v10499_v42 = vadd.f32 %v12030_v51, %v5386_v53  ;;  %v10502_v10 = vadd.f32 %v12030_v51, %v5387_v57  ;;  %v10505_v44 = vadd.f32 %v12030_v51, %v5388_v9  ;;  %v10508_v31 = vadd.f32 %v12030_v51, %v5389_v24  ;;  %v12049_v53 = vld [vmem:[#allocation172_spill] sm:$0xff]  ;;  %v12051_v9 = vld [vmem:[#allocation173_spill] sm:$0xff]  ;;  %v12052_v24 = vld [vmem:[#allocation174_spill] sm:$0xff] }
 0x748   :  { %12033 = vst [vmem:[#allocation177_spill] sm:$0xff] %v10475_v23  ;;  %v10511_v21 = vadd.f32 %v12030_v51, %v5390_v54  ;;  %v10514_v39 = vadd.f32 %v12030_v51, %v5392_v27  ;;  %v12050_v57 = vld [vmem:[#allocation56_spill] sm:$0xff]  ;;  %v12053_v54 = vld [vmem:[#allocation57_spill] sm:$0xff]  ;;  %v12054_v27 = vld [vmem:[#allocation59_spill] sm:$0xff] }
 0x749   :  { %12034 = vst [vmem:[#allocation179_spill] sm:$0xff] %v10478_v41 }
 0x74a   :  { %12035 = vst [vmem:[#allocation180_spill] sm:$0xff] %v10481_v16 }
 0x74b   :  { %12036 = vst [vmem:[#allocation178_spill] sm:$0xff] %v10484_v11 }
 0x74c   :  { %12037 = vst [vmem:[#allocation181_spill] sm:$0xff] %v10487_v36 }
 0x74d   :  { %12038 = vst [vmem:[#allocation182_spill] sm:$0xff] %v10490_v6 }
 0x74e   :  { %12039 = vst [vmem:[#allocation183_spill] sm:$0xff] %v10493_v3 }
 0x74f   :  { %12040 = vst [vmem:[#allocation185_spill] sm:$0xff] %v10496_v5  ;;  %v12048_v5 = vld [vmem:[#allocation169_spill] sm:$0xff] }
 0x750   :  { %12041 = vst [vmem:[#allocation184_spill] sm:$0xff] %v10499_v42  ;;  %v5329_v3 = vmul.f32 %v12048_v5, %v12047_v46  ;;  %v5330_v42 = vmul.f32 %v12048_v5, %v12049_v53 }
 0x751   :  { %12042 = vst [vmem:[#allocation186_spill] sm:$0xff] %v10502_v10  ;;  %v5331_v10 = vmul.f32 %v12048_v5, %v12050_v57 }
 0x752   :  { %12043 = vst [vmem:[#allocation188_spill] sm:$0xff] %v10505_v44  ;;  %v5332_v44 = vmul.f32 %v12048_v5, %v12051_v9  ;;  %v5396_v46 = vadd.f32 %v12030_v51, %v5329_v3  ;;  %v5397_v6 = vadd.f32 %v12030_v51, %v5330_v42 }
 0x753   :  { %12044 = vst [vmem:[#allocation187_spill] sm:$0xff] %v10508_v31  ;;  %v5333_v31 = vmul.f32 %v12048_v5, %v12052_v24  ;;  %v5398_v53 = vadd.f32 %v12030_v51, %v5331_v10  ;;  %v5467_v10 = vmax.f32 %v10349_v38, 0.0  ;;  %v5472_v38 = vmax.f32 %v10364_v34, 0.0 }
 0x754   :  { %12045 = vst [vmem:[#allocation189_spill] sm:$0xff] %v10511_v21  ;;  %v5334_v21 = vmul.f32 %v12048_v5, %v12053_v54  ;;  %v5399_v57 = vadd.f32 %v12030_v51, %v5332_v44  ;;  %v5460_v11 = vmax.f32 %v5396_v46, 0.0  ;;  %v5461_v16 = vmax.f32 %v5397_v6, 0.0 }
 0x755   :  { %12046 = vst [vmem:[#allocation190_spill] sm:$0xff] %v10514_v39  ;;  %v5335_v39 = vmul.f32 %v12048_v5, %v12054_v27  ;;  %v5400_v36 = vadd.f32 %v12030_v51, %v5333_v31  ;;  %v5462_v54 = vmax.f32 %v5398_v53, 0.0  ;;  %v5468_v44 = vmax.f32 %v10352_v47, 0.0 }
 0x756   :  { %v5401_v9 = vadd.f32 %v12030_v51, %v5334_v21  ;;  %v5463_v41 = vmax.f32 %v5399_v57, 0.0  ;;  %v5524_v3 = vpack.c.bf16 %v5460_v11, %v5460_v11  ;;  %v5525_v30 = vpack.c.bf16 %v5461_v16, %v5461_v16 }
 0x757   :  { %v5402_v24 = vadd.f32 %v12030_v51, %v5335_v39  ;;  %v5464_v23 = vmax.f32 %v5400_v36, 0.0  ;;  %v5526_v42 = vpack.c.bf16 %v5462_v54, %v5462_v54  ;;  %v5469_v51 = vmax.f32 %v10355_v28, 0.0 }
 0x758   :  { %v5465_v5 = vmax.f32 %v5401_v9, 0.0  ;;  %v5527_v48 = vpack.c.bf16 %v5463_v41, %v5463_v41  ;;  %5589 = vst.msk [vmem:[#allocation3] sm:$0xf] %vm5588_vm7, %v5524_v3  ;;  %v5470_v36 = vmax.f32 %v10358_v63, 0.0  ;;  %v5471_v16 = vmax.f32 %v10361_v45, 0.0 }
 0x759   :  { %v5466_v27 = vmax.f32 %v5402_v24, 0.0  ;;  %v5528_v31 = vpack.c.bf16 %v5464_v23, %v5464_v23  ;;  %5590 = vst.msk [vmem:[#allocation3 + $0x4] sm:$0xf] %vm5588_vm7, %v5525_v30  ;;  %v5531_v11 = vpack.c.bf16 %v5467_v10, %v5467_v10  ;;  %v5532_v47 = vpack.c.bf16 %v5468_v44, %v5468_v44 }
 0x75a   :  { %v5529_v21 = vpack.c.bf16 %v5465_v5, %v5465_v5  ;;  %5591 = vst.msk [vmem:[#allocation3 + $0x8] sm:$0xf] %vm5588_vm7, %v5526_v42  ;;  %v5473_v28 = vmax.f32 %v10367_v52, 0.0  ;;  %v5533_v23 = vpack.c.bf16 %v5469_v51, %v5469_v51  ;;  %v5474_v63 = vmax.f32 %v10370_v50, 0.0 }
 0x75b   :  { %v5530_v6 = vpack.c.bf16 %v5466_v27, %v5466_v27  ;;  %5592 = vst.msk [vmem:[#allocation3 + $0xc] sm:$0xf] %vm5588_vm7, %v5527_v48  ;;  %v5534_v30 = vpack.c.bf16 %v5470_v36, %v5470_v36  ;;  %v5475_v45 = vmax.f32 %v10373_v13, 0.0  ;;  %v5535_v41 = vpack.c.bf16 %v5471_v16, %v5471_v16 }
 0x75c   :  { %5593 = vst.msk [vmem:[#allocation3 + $0x10] sm:$0xf] %vm5588_vm7, %v5528_v31  ;;  %v5476_v34 = vmax.f32 %v10376_v1, 0.0  ;;  %v5536_v48 = vpack.c.bf16 %v5472_v38, %v5472_v38  ;;  %v5477_v52 = vmax.f32 %v10379_v43, 0.0  ;;  %v5537_v39 = vpack.c.bf16 %v5473_v28, %v5473_v28 }
 0x75d   :  { %5594 = vst.msk [vmem:[#allocation3 + $0x14] sm:$0xf] %vm5588_vm7, %v5529_v21  ;;  %v5478_v50 = vmax.f32 %v10382_v60, 0.0  ;;  %v5538_v46 = vpack.c.bf16 %v5474_v63, %v5474_v63  ;;  %v5479_v13 = vmax.f32 %v10385_v35, 0.0  ;;  %v5539_v53 = vpack.c.bf16 %v5475_v45, %v5475_v45 }
 0x75e   :  { %5595 = vst.msk [vmem:[#allocation3 + $0x18] sm:$0xf] %vm5588_vm7, %v5530_v6  ;;  %v5480_v1 = vmax.f32 %v10388_v56, 0.0  ;;  %v5540_v57 = vpack.c.bf16 %v5476_v34, %v5476_v34  ;;  %v5481_v43 = vmax.f32 %v10391_v17, 0.0  ;;  %v5541_v9 = vpack.c.bf16 %v5477_v52, %v5477_v52  ;;  %v12055_v52 = vld [vmem:[#allocation175_spill] sm:$0xff] }
 0x75f   :  { %5596 = vst.msk [vmem:[#allocation3 + $0x1c] sm:$0xf] %vm5588_vm7, %v5531_v11  ;;  %v5482_v60 = vmax.f32 %v10394_v0, 0.0  ;;  %v5542_v24 = vpack.c.bf16 %v5478_v50, %v5478_v50  ;;  %v5483_v35 = vmax.f32 %v10397_v8, 0.0  ;;  %v5543_v54 = vpack.c.bf16 %v5479_v13, %v5479_v13  ;;  %v12056_v50 = vld [vmem:[#allocation176_spill] sm:$0xff]  ;;  %v12057_v13 = vld [vmem:[#allocation177_spill] sm:$0xff] }
 0x760   :  { %5597 = vst.msk [vmem:[#allocation3 + $0x20] sm:$0xf] %vm5588_vm7, %v5532_v47  ;;  %v5484_v56 = vmax.f32 %v10400_v29, 0.0  ;;  %v5544_v5 = vpack.c.bf16 %v5480_v1, %v5480_v1  ;;  %v5485_v17 = vmax.f32 %v10403_v49, 0.0  ;;  %v5545_v27 = vpack.c.bf16 %v5481_v43, %v5481_v43  ;;  %v12058_v1 = vld [vmem:[#allocation179_spill] sm:$0xff]  ;;  %v12059_v43 = vld [vmem:[#allocation180_spill] sm:$0xff] }
 0x761   :  { %5598 = vst.msk [vmem:[#allocation3 + $0x24] sm:$0xf] %vm5588_vm7, %v5533_v23  ;;  %v5486_v0 = vmax.f32 %v10406_v18, 0.0  ;;  %v5546_v3 = vpack.c.bf16 %v5482_v60, %v5482_v60  ;;  %v5487_v8 = vmax.f32 %v10409_v25, 0.0  ;;  %v5547_v42 = vpack.c.bf16 %v5483_v35, %v5483_v35 }
 0x762   :  { %5599 = vst.msk [vmem:[#allocation3 + $0x28] sm:$0xf] %vm5588_vm7, %v5534_v30  ;;  %v5488_v29 = vmax.f32 %v10412_v37, 0.0  ;;  %v5548_v10 = vpack.c.bf16 %v5484_v56, %v5484_v56  ;;  %v5489_v49 = vmax.f32 %v10415_v20, 0.0  ;;  %v5549_v44 = vpack.c.bf16 %v5485_v17, %v5485_v17  ;;  %v12061_v56 = vld [vmem:[#allocation181_spill] sm:$0xff] }
 0x763   :  { %5600 = vst.msk [vmem:[#allocation3 + $0x2c] sm:$0xf] %vm5588_vm7, %v5535_v41  ;;  %v5490_v18 = vmax.f32 %v10418_v59, 0.0  ;;  %v5550_v31 = vpack.c.bf16 %v5486_v0, %v5486_v0  ;;  %v5491_v25 = vmax.f32 %v10421_v7, 0.0  ;;  %v5551_v51 = vpack.c.bf16 %v5487_v8, %v5487_v8  ;;  %v12063_v8 = vld [vmem:[#allocation183_spill] sm:$0xff] }
 0x764   :  { %5601 = vst.msk [vmem:[#allocation3 + $0x30] sm:$0xf] %vm5588_vm7, %v5536_v48  ;;  %v5492_v37 = vmax.f32 %v10424_v19, 0.0  ;;  %v5552_v21 = vpack.c.bf16 %v5488_v29, %v5488_v29  ;;  %v5493_v20 = vmax.f32 %v10427_v33, 0.0  ;;  %v5553_v36 = vpack.c.bf16 %v5489_v49, %v5489_v49 }
 0x765   :  { %5602 = vst.msk [vmem:[#allocation3 + $0x34] sm:$0xf] %vm5588_vm7, %v5537_v39  ;;  %v5494_v59 = vmax.f32 %v10430_v61, 0.0  ;;  %v5554_v6 = vpack.c.bf16 %v5490_v18, %v5490_v18  ;;  %v5495_v7 = vmax.f32 %v10433_v15, 0.0  ;;  %v5555_v16 = vpack.c.bf16 %v5491_v25, %v5491_v25  ;;  %v12065_v18 = vld [vmem:[#allocation184_spill] sm:$0xff] }
 0x766   :  { %5603 = vst.msk [vmem:[#allocation3 + $0x38] sm:$0xf] %vm5588_vm7, %v5538_v46  ;;  %v5496_v19 = vmax.f32 %v10436_v14, 0.0  ;;  %v5556_v11 = vpack.c.bf16 %v5492_v37, %v5492_v37  ;;  %v5497_v33 = vmax.f32 %v10439_v55, 0.0  ;;  %v5557_v38 = vpack.c.bf16 %v5493_v20, %v5493_v20  ;;  %v12067_v20 = vld [vmem:[#allocation188_spill] sm:$0xff] }
 0x767   :  { %5604 = vst.msk [vmem:[#allocation3 + $0x3c] sm:$0xf] %vm5588_vm7, %v5539_v53  ;;  %v5498_v61 = vmax.f32 %v10442_v40, 0.0  ;;  %v5558_v47 = vpack.c.bf16 %v5494_v59, %v5494_v59  ;;  %v5499_v15 = vmax.f32 %v10445_v58, 0.0  ;;  %v5559_v28 = vpack.c.bf16 %v5495_v7, %v5495_v7 }
 0x768   :  { %5605 = vst.msk [vmem:[#allocation3 + $0x40] sm:$0xf] %vm5588_vm7, %v5540_v57  ;;  %v5500_v14 = vmax.f32 %v10448_v32, 0.0  ;;  %v5560_v23 = vpack.c.bf16 %v5496_v19, %v5496_v19  ;;  %v5501_v55 = vmax.f32 %v10451_v22, 0.0  ;;  %v5561_v63 = vpack.c.bf16 %v5497_v33, %v5497_v33  ;;  %v12069_v19 = vld [vmem:[#allocation189_spill] sm:$0xff] }
 0x769   :  { %5606 = vst.msk [vmem:[#allocation3 + $0x44] sm:$0xf] %vm5588_vm7, %v5541_v9  ;;  %v5502_v40 = vmax.f32 %v10454_v2, 0.0  ;;  %v5562_v30 = vpack.c.bf16 %v5498_v61, %v5498_v61  ;;  %v5503_v58 = vmax.f32 %v10457_v62, 0.0  ;;  %v5563_v45 = vpack.c.bf16 %v5499_v15, %v5499_v15 }
 0x76a   :  { %5607 = vst.msk [vmem:[#allocation3 + $0x48] sm:$0xf] %vm5588_vm7, %v5542_v24  ;;  %v5504_v32 = vmax.f32 %v10460_v12, 0.0  ;;  %v5564_v41 = vpack.c.bf16 %v5500_v14, %v5500_v14  ;;  %v5505_v22 = vmax.f32 %v10463_v26, 0.0  ;;  %v5565_v34 = vpack.c.bf16 %v5501_v55, %v5501_v55  ;;  %v12060_v24 = vld [vmem:[#allocation178_spill] sm:$0xff] }
 0x76b   :  { %5608 = vst.msk [vmem:[#allocation3 + $0x4c] sm:$0xf] %vm5588_vm7, %v5543_v54  ;;  %v5506_v2 = vmax.f32 %v10466_v4, 0.0  ;;  %v5566_v48 = vpack.c.bf16 %v5502_v40, %v5502_v40  ;;  %v5507_v62 = vmax.f32 %v12055_v52, 0.0  ;;  %v5567_v39 = vpack.c.bf16 %v5503_v58, %v5503_v58 }
 0x76c   :  { %5609 = vst.msk [vmem:[#allocation3 + $0x50] sm:$0xf] %vm5588_vm7, %v5544_v5  ;;  %v5508_v12 = vmax.f32 %v12056_v50, 0.0  ;;  %v5568_v46 = vpack.c.bf16 %v5504_v32, %v5504_v32  ;;  %v5509_v26 = vmax.f32 %v12057_v13, 0.0  ;;  %v5569_v53 = vpack.c.bf16 %v5505_v22, %v5505_v22 }
 0x76d   :  { %5610 = vst.msk [vmem:[#allocation3 + $0x54] sm:$0xf] %vm5588_vm7, %v5545_v27  ;;  %v5510_v4 = vmax.f32 %v12058_v1, 0.0  ;;  %v5570_v57 = vpack.c.bf16 %v5506_v2, %v5506_v2  ;;  %v5511_v9 = vmax.f32 %v12059_v43, 0.0  ;;  %v5571_v60 = vpack.c.bf16 %v5507_v62, %v5507_v62  ;;  %v12062_v27 = vld [vmem:[#allocation182_spill] sm:$0xff] }
 0x76e   :  { %5611 = vst.msk [vmem:[#allocation3 + $0x58] sm:$0xf] %vm5588_vm7, %v5546_v3  ;;  %v5512_v35 = vmax.f32 %v12060_v24, 0.0  ;;  %v5572_v54 = vpack.c.bf16 %v5508_v12, %v5508_v12  ;;  %v5513_v5 = vmax.f32 %v12061_v56, 0.0  ;;  %v5573_v17 = vpack.c.bf16 %v5509_v26, %v5509_v26 }
 0x76f   :  { %5612 = vst.msk [vmem:[#allocation3 + $0x5c] sm:$0xf] %vm5588_vm7, %v5547_v42  ;;  %v5514_v0 = vmax.f32 %v12062_v27, 0.0  ;;  %v5574_v3 = vpack.c.bf16 %v5510_v4, %v5510_v4  ;;  %v5515_v42 = vmax.f32 %v12063_v8, 0.0  ;;  %v5575_v29 = vpack.c.bf16 %v5511_v9, %v5511_v9 }
 0x770   :  { %5613 = vst.msk [vmem:[#allocation3 + $0x60] sm:$0xf] %vm5588_vm7, %v5548_v10  ;;  %v12064_v10 = vld [vmem:[#allocation185_spill] sm:$0xff]  ;;  %v5577_v25 = vpack.c.bf16 %v5513_v5, %v5513_v5 }
 0x771   :  { %5614 = vst.msk [vmem:[#allocation3 + $0x64] sm:$0xf] %vm5588_vm7, %v5549_v44  ;;  %v5516_v49 = vmax.f32 %v12064_v10, 0.0  ;;  %v5576_v44 = vpack.c.bf16 %v5512_v35, %v5512_v35  ;;  %v5579_v59 = vpack.c.bf16 %v5515_v42, %v5515_v42 }
 0x772   :  { %5615 = vst.msk [vmem:[#allocation3 + $0x68] sm:$0xf] %vm5588_vm7, %v5550_v31  ;;  %v5517_v31 = vmax.f32 %v12065_v18, 0.0 }
 0x773   :  { %5616 = vst.msk [vmem:[#allocation3 + $0x6c] sm:$0xf] %vm5588_vm7, %v5551_v51  ;;  %v12066_v51 = vld [vmem:[#allocation186_spill] sm:$0xff] }
 0x774   :  { %5617 = vst.msk [vmem:[#allocation3 + $0x70] sm:$0xf] %vm5588_vm7, %v5552_v21  ;;  %v5518_v37 = vmax.f32 %v12066_v51, 0.0  ;;  %v5578_v21 = vpack.c.bf16 %v5514_v0, %v5514_v0  ;;  %v5581_v33 = vpack.c.bf16 %v5517_v31, %v5517_v31 }
 0x775   :  { %5618 = vst.msk [vmem:[#allocation3 + $0x74] sm:$0xf] %vm5588_vm7, %v5553_v36  ;;  %v5519_v36 = vmax.f32 %v12067_v20, 0.0 }
 0x776   :  { %5619 = vst.msk [vmem:[#allocation3 + $0x78] sm:$0xf] %vm5588_vm7, %v5554_v6  ;;  %v12068_v6 = vld [vmem:[#allocation187_spill] sm:$0xff] }
 0x777   :  { %5620 = vst.msk [vmem:[#allocation3 + $0x7c] sm:$0xf] %vm5588_vm7, %v5555_v16  ;;  %v5520_v7 = vmax.f32 %v12068_v6, 0.0  ;;  %v5580_v16 = vpack.c.bf16 %v5516_v49, %v5516_v49  ;;  %v5583_v15 = vpack.c.bf16 %v5519_v36, %v5519_v36 }
 0x778   :  { %5621 = vst.msk [vmem:[#allocation3 + $0x80] sm:$0xf] %vm5588_vm7, %v5556_v11  ;;  %v5521_v11 = vmax.f32 %v12069_v19, 0.0 }
 0x779   :  { %5622 = vst.msk [vmem:[#allocation3 + $0x84] sm:$0xf] %vm5588_vm7, %v5557_v38  ;;  %v12070_v38 = vld [vmem:[#allocation190_spill] sm:$0xff] }
 0x77a   :  { %5623 = vst.msk [vmem:[#allocation3 + $0x88] sm:$0xf] %vm5588_vm7, %v5558_v47  ;;  %v5523_v61 = vmax.f32 %v12070_v38, 0.0  ;;  %v5582_v47 = vpack.c.bf16 %v5518_v37, %v5518_v37  ;;  %v5585_v14 = vpack.c.bf16 %v5521_v11, %v5521_v11 }
 0x77b   :  { %5624 = vst.msk [vmem:[#allocation3 + $0x8c] sm:$0xf] %vm5588_vm7, %v5559_v28  ;;  %v5584_v28 = vpack.c.bf16 %v5520_v7, %v5520_v7 }
 0x77c   :  { %5625 = vst.msk [vmem:[#allocation3 + $0x90] sm:$0xf] %vm5588_vm7, %v5560_v23  ;;  %v5587_v23 = vpack.c.bf16 %v5523_v61, %v5523_v61 }
 0x77d   :  { %5626 = vst.msk [vmem:[#allocation3 + $0x94] sm:$0xf] %vm5588_vm7, %v5561_v63 }
 0x77e   :  { %5627 = vst.msk [vmem:[#allocation3 + $0x98] sm:$0xf] %vm5588_vm7, %v5562_v30 }
 0x77f   :  { %5628 = vst.msk [vmem:[#allocation3 + $0x9c] sm:$0xf] %vm5588_vm7, %v5563_v45 }
 0x780   :  { %5629 = vst.msk [vmem:[#allocation3 + $0xa0] sm:$0xf] %vm5588_vm7, %v5564_v41 }
 0x781   :  { %5630 = vst.msk [vmem:[#allocation3 + $0xa4] sm:$0xf] %vm5588_vm7, %v5565_v34 }
 0x782   :  { %5631 = vst.msk [vmem:[#allocation3 + $0xa8] sm:$0xf] %vm5588_vm7, %v5566_v48 }
 0x783   :  { %5632 = vst.msk [vmem:[#allocation3 + $0xac] sm:$0xf] %vm5588_vm7, %v5567_v39 }
 0x784   :  { %5633 = vst.msk [vmem:[#allocation3 + $0xb0] sm:$0xf] %vm5588_vm7, %v5568_v46 }
 0x785   :  { %5634 = vst.msk [vmem:[#allocation3 + $0xb4] sm:$0xf] %vm5588_vm7, %v5569_v53 }
 0x786   :  { %5635 = vst.msk [vmem:[#allocation3 + $0xb8] sm:$0xf] %vm5588_vm7, %v5570_v57 }
 0x787   :  { %5636 = vst.msk [vmem:[#allocation3 + $0xbc] sm:$0xf] %vm5588_vm7, %v5571_v60 }
 0x788   :  { %5637 = vst.msk [vmem:[#allocation3 + $0xc0] sm:$0xf] %vm5588_vm7, %v5572_v54 }
 0x789   :  { %5638 = vst.msk [vmem:[#allocation3 + $0xc4] sm:$0xf] %vm5588_vm7, %v5573_v17 }
 0x78a   :  { %5639 = vst.msk [vmem:[#allocation3 + $0xc8] sm:$0xf] %vm5588_vm7, %v5574_v3 }
 0x78b   :  { %5640 = vst.msk [vmem:[#allocation3 + $0xcc] sm:$0xf] %vm5588_vm7, %v5575_v29 }
 0x78c   :  { %5641 = vst.msk [vmem:[#allocation3 + $0xd0] sm:$0xf] %vm5588_vm7, %v5576_v44 }
 0x78d   :  { %5642 = vst.msk [vmem:[#allocation3 + $0xd4] sm:$0xf] %vm5588_vm7, %v5577_v25 }
 0x78e   :  { %5643 = vst.msk [vmem:[#allocation3 + $0xd8] sm:$0xf] %vm5588_vm7, %v5578_v21 }
 0x78f   :  { %5644 = vst.msk [vmem:[#allocation3 + $0xdc] sm:$0xf] %vm5588_vm7, %v5579_v59 }
 0x790   :  { %5645 = vst.msk [vmem:[#allocation3 + $0xe0] sm:$0xf] %vm5588_vm7, %v5580_v16 }
 0x791   :  { %5646 = vst.msk [vmem:[#allocation3 + $0xe4] sm:$0xf] %vm5588_vm7, %v5581_v33 }
 0x792   :  { %5647 = vst.msk [vmem:[#allocation3 + $0xe8] sm:$0xf] %vm5588_vm7, %v5582_v47 }
 0x793   :  { %5648 = vst.msk [vmem:[#allocation3 + $0xec] sm:$0xf] %vm5588_vm7, %v5583_v15 }
 0x794   :  { %5649 = vst.msk [vmem:[#allocation3 + $0xf0] sm:$0xf] %vm5588_vm7, %v5584_v28 }
 0x795   :  { %5650 = vst.msk [vmem:[#allocation3 + $0xf4] sm:$0xf] %vm5588_vm7, %v5585_v14 }
 0x796   :  { %5652 = vst.msk [vmem:[#allocation3 + $0xfc] sm:$0xf] %vm5588_vm7, %v5587_v23 }
 0x797   :  { %5665 = dma.vmem_to_hbm [thread:$0]  %s5658_s18, 4096, %s5660_s21, [#allocation4], %s5712_s22, %s5712_s22, %s5713_s23  }
 0x798   :  { %5707 = dma.done.wait [#allocation4], 4096  }
 0x799   :  { %5708 = vsyncadd [#allocation4], 4294963200 }
 0x79a   :  { %5670 = vsyncpa [#allocation4], 1 }

</bundles_post_ra>
